<compile_context>
chip_gen: v5e
topology: v5e:2x2
jax: 0.10.0
libtpu: 0.0.40
codegen_flags: <defaults>
</compile_context>

<pallas_src>
import jax
import jax.numpy as jnp
from jax import lax
from jax.experimental import pallas as pl
from jax.experimental.pallas import tpu as pltpu

COMPRESS_C = 8


def asff2_kernel(x1_ref, x2_ref, x1h_ref, x2h_ref,
                 w12_ref, b12_ref, wd_ref, bd_ref, w3_ref, b3_ref, out_ref):
    TH, W, C = x1_ref.shape
    RM = TH * W                       # main rows (flattened H*W of this tile)
    RE = (TH + 2) * W                 # rows incl. the 1-row halo top & bottom

    def fuse(a1, a2):
        """1x1 compressors (BN folded, bf16, block-diagonal) -> softmax weight
        -> fused feature map, for an arbitrary batch of flattened rows."""
        xc = jnp.concatenate([a1.astype(jnp.bfloat16),
                              a2.astype(jnp.bfloat16)], axis=-1)      # (r, 2C)
        l12 = jnp.maximum(
            jnp.dot(xc, w12_ref[...], preferred_element_type=jnp.float32)
            + b12_ref[...], 0.0)                                      # (r, 16)
        # 2-way softmax == sigmoid of the logit difference; the tiny contraction
        # runs on VPU/XLU (multiply + lane reduce), keeping the MXU for the conv.
        d = (jnp.sum(l12 * wd_ref[...], axis=-1, keepdims=True)
             + bd_ref[...])                                           # (r, 1)
        w0 = 1.0 / (1.0 + jnp.exp(-d))                                # weight of x1
        return a2 + w0 * (a1 - a2)                                    # (r, C) f32

    # Main tile and the 2 halo rows are fused separately (no full-tile input
    # concatenates); only the small fused halo rows are stitched on.  The fused
    # value of zero halo inputs is exactly 0 -> the conv's vertical zero padding.
    fm = fuse(x1_ref[...].reshape(RM, C), x2_ref[...].reshape(RM, C))
    fh = fuse(x1h_ref[...].reshape(2 * W, C), x2h_ref[...].reshape(2 * W, C))
    fused = jnp.concatenate([fh[:W], fm, fh[W:]], axis=0)             # (RE, C)

    # Horizontal (dw) taps: roll along the flattened row axis + zero the wrapped
    # column (this IS the 3x3 conv's zero padding along W).  K-pack the three
    # dw-shifted maps on the lane axis so each dh is ONE (RM,3C)x(3C,C) matmul.
    col = lax.broadcasted_iota(jnp.int32, (RE, 1), 0) % W
    f_l = jnp.where(col == 0, 0.0, pltpu.roll(fused, 1, 0))           # col w-1
    f_r = jnp.where(col == W - 1, 0.0, pltpu.roll(fused, RE - 1, 0))  # col w+1
    f3 = jnp.concatenate([f_l.astype(jnp.bfloat16),
                          fused.astype(jnp.bfloat16),
                          f_r.astype(jnp.bfloat16)], axis=-1)         # (RE, 3C)

    # 3x3 conv = 3 K-packed, sublane-aligned shifted matmuls (bf16 in, f32 acc).
    acc = jnp.dot(f3[0 * W:0 * W + RM], w3_ref[0],
                  preferred_element_type=jnp.float32)
    acc += jnp.dot(f3[1 * W:1 * W + RM], w3_ref[1],
                   preferred_element_type=jnp.float32)
    acc += jnp.dot(f3[2 * W:2 * W + RM], w3_ref[2],
                   preferred_element_type=jnp.float32)

    out = jnp.maximum(acc + b3_ref[...], 0.0)
    out_ref[...] = out.reshape(TH, W, C).astype(out_ref.dtype)


def fold_params(params):
    """Fold BN scales into conv weights and build the packed kernel operands."""
    (w1, s1, b1, w2, s2, b2, wl, bl, w3, s3, b3) = params
    C = w1.shape[0]
    cc = w1.shape[1]
    # Block-diagonal compressor: one (2C, 2*cc) bf16 matmul replaces two (C, cc).
    w12 = jnp.zeros((2 * C, 2 * cc), jnp.float32)
    w12 = w12.at[:C, :cc].set(w1 * s1)
    w12 = w12.at[C:, cc:].set(w2 * s2)
    w12 = w12.astype(jnp.bfloat16)
    b12 = jnp.concatenate([b1, b2], axis=-1)                    # (1, 2*cc)
    # 2-way softmax -> sigmoid of the logit difference.
    wd = (wl[:, 0] - wl[:, 1]).reshape(1, 2 * cc)               # (1, 2*cc)
    bd = (bl[:, 0] - bl[:, 1]).reshape(1, 1)                    # (1, 1)
    # 3x3 conv: BN scale folded, per-dh lane-packed [dw=-1 | dw=0 | dw=+1] taps.
    w3p = (w3 * s3.reshape(1, 1, C)).reshape(3, 3 * C, C).astype(jnp.bfloat16)
    return (w12, b12, wd, bd, w3p, b3)


def _pick_block_h(N, H, W, C, budget_bytes=16 << 20):
    """Largest row-tile (divisor of H) whose per-step live set fits the budget,
    preferring >= 2 total grid steps so both v7x TensorCores get work."""
    io_row = 3 * 2 * W * C * 4                           # x1/x2/out, double-buffered
    mid_row = W * (2 * C * 2 + 16 * 4 + C * 4            # x_cat bf16, l12, fused
                   + 2 * C * 4 + 3 * C * 2 + C * 4)      # f_l/f_r, f3 bf16, acc
    per_row = max(io_row + mid_row, 1)
    cap = max(1, budget_bytes // per_row)
    divisors = [d for d in range(1, H + 1) if H % d == 0]
    fitting = [d for d in divisors if d <= cap] or [divisors[0]]
    multi_step = [d for d in fitting if N * (H // d) >= 2]
    return max(multi_step) if multi_step else max(fitting)


def asff2_forward(x1, x2, params, *, block_h=None,
                  vmem_limit_bytes=32 * 1024 * 1024):
    N, H, W, C = x1.shape
    assert x2.shape == x1.shape
    # Sublane alignment of the shifted row-slices (W % 16 additionally avoids
    # bf16 relayouts).
    assert W % 8 == 0, "W must be a multiple of 8"

    (w12, b12, wd, bd, w3p, b3) = fold_params(params)

    TH = _pick_block_h(N, H, W, C) if block_h is None else min(block_h, H)
    assert H % TH == 0, "H must be divisible by the row-tile size"
    nT = H // TH

    def make_halo(x):
        # halo[:, i, 0] = row i*TH - 1 (zeros for i == 0)
        # halo[:, i, 1] = row (i+1)*TH (zeros for i == nT-1)
        z = jnp.zeros((N, 1, W, C), x.dtype)
        top = jnp.concatenate([z, x[:, TH - 1::TH][:, :nT - 1]], axis=1)
        bot = jnp.concatenate([x[:, TH::TH], z], axis=1)
        return jnp.stack([top, bot], axis=2)                 # (N, nT, 2, W, C)

    x1h = make_halo(x1)
    x2h = make_halo(x2)
    args = (x1, x2, x1h, x2h, w12, b12, wd, bd, w3p, b3)

    def build_call(single_buffer_weights):
        def const_spec(a):
            nd = a.ndim
            idx = lambda b, i, _nd=nd: (0,) * _nd
            if single_buffer_weights:
                # Constant block index: single-buffer to halve the weights'
                # VMEM footprint (matters for v7x / large C).
                return pl.BlockSpec(a.shape, idx, pipeline_mode=pl.Buffered(1))
            return pl.BlockSpec(a.shape, idx)

        grid_spec = pltpu.PrefetchScalarGridSpec(
            num_scalar_prefetch=0,
            grid=(N, nT),
            in_specs=[
                pl.BlockSpec((None, TH, W, C), lambda b, i: (b, i, 0, 0)),
                pl.BlockSpec((None, TH, W, C), lambda b, i: (b, i, 0, 0)),
                pl.BlockSpec((None, None, 2, W, C), lambda b, i: (b, i, 0, 0, 0)),
                pl.BlockSpec((None, None, 2, W, C), lambda b, i: (b, i, 0, 0, 0)),
                const_spec(w12), const_spec(b12), const_spec(wd), const_spec(bd),
                const_spec(w3p), const_spec(b3),
            ],
            out_specs=pl.BlockSpec((None, TH, W, C), lambda b, i: (b, i, 0, 0)),
        )
        return pl.pallas_call(
            asff2_kernel,
            out_shape=jax.ShapeDtypeStruct((N, H, W, C), x1.dtype),
            grid_spec=grid_spec,
            compiler_params=pltpu.CompilerParams(
                dimension_semantics=("parallel", "parallel"),
                vmem_limit_bytes=vmem_limit_bytes),
        )

    try:
        return build_call(True)(*args)
    except Exception:
        # pipeline_mode / Buffered(1) unsupported on this jax version: fall back
        # to the default double-buffered weight blocks (identical semantics).
        return build_call(False)(*args)


def asff2_reference(x1, x2, params, *, match_kernel_precision=False):
    """Pure-JAX NHWC reference. With match_kernel_precision=True the compressor
    and 3x3 conv use the kernel's folded bf16 operands (f32 accumulation) so the
    comparison is precision-matched; otherwise exact f32 module semantics."""
    (w1, s1, b1, w2, s2, b2, wl, bl, w3, s3, b3) = params
    C = x1.shape[-1]
    dn = ('NHWC', 'HWIO', 'NHWC')
    w3_hwio = w3.reshape(3, 3, C, C)

    if match_kernel_precision:
        def conv1x1_bf16(x, w):
            return jnp.einsum('nhwc,cd->nhwd', x.astype(jnp.bfloat16),
                              w.astype(jnp.bfloat16),
                              preferred_element_type=jnp.float32)
        l1 = jax.nn.relu(conv1x1_bf16(x1, w1 * s1) + b1)
        l2 = jax.nn.relu(conv1x1_bf16(x2, w2 * s2) + b2)
        wdv = wl[:, 0] - wl[:, 1]
        bdv = bl[:, 0] - bl[:, 1]
        d = jnp.einsum('nhwk,k->nhw',
                       jnp.concatenate([l1, l2], axis=-1), wdv)[..., None] + bdv
        w0 = 1.0 / (1.0 + jnp.exp(-d))
        fused = x2 + w0 * (x1 - x2)
        w3_b = (w3_hwio * s3.reshape(1, 1, 1, C)).astype(jnp.bfloat16)
        conv = lax.conv_general_dilated(
            fused.astype(jnp.bfloat16), w3_b, window_strides=(1, 1),
            padding='SAME', dimension_numbers=dn,
            preferred_element_type=jnp.float32)
        return jax.nn.relu(conv + b3)

    def conv1x1(x, w):
        return jnp.einsum('nhwc,cd->nhwd', x, w)

    l1 = jax.nn.relu(conv1x1(x1, w1) * s1 + b1)
    l2 = jax.nn.relu(conv1x1(x2, w2) * s2 + b2)
    logits = conv1x1(jnp.concatenate([l1, l2], axis=-1), wl) + bl
    wsm = jax.nn.softmax(logits, axis=-1)
    fused = x1 * wsm[..., 0:1] + x2 * wsm[..., 1:2]
    conv = lax.conv_general_dilated(
        fused, w3_hwio, window_strides=(1, 1), padding='SAME',
        dimension_numbers=dn)
    return jax.nn.relu(conv * s3 + b3)


def make_params(key, C):
    """Deterministic synthetic parameters (eval-mode BN as scale/bias)."""
    eps = 1e-5
    ks = jax.random.split(key, 16)

    def bn_fold(kg, kb, km, kv, ch):
        gamma = jax.random.uniform(kg, (ch,), minval=0.5, maxval=1.5)
        beta = 0.1 * jax.random.normal(kb, (ch,))
        mean = 0.1 * jax.random.normal(km, (ch,))
        var = jax.random.uniform(kv, (ch,), minval=0.5, maxval=1.5)
        scale = gamma / jnp.sqrt(var + eps)
        bias = beta - mean * scale
        return scale.reshape(1, ch), bias.reshape(1, ch)

    w1 = 0.1 * jax.random.normal(ks[0], (C, COMPRESS_C))
    s1, b1 = bn_fold(ks[1], ks[2], ks[3], ks[4], COMPRESS_C)
    w2 = 0.1 * jax.random.normal(ks[5], (C, COMPRESS_C))
    s2, b2 = bn_fold(ks[6], ks[7], ks[8], ks[9], COMPRESS_C)
    wl = 0.1 * jax.random.normal(ks[10], (2 * COMPRESS_C, 2))
    bl = (0.1 * jax.random.normal(ks[11], (2,))).reshape(1, 2)
    w3 = 0.05 * jax.random.normal(ks[12], (9, C, C))
    s3, b3 = bn_fold(ks[13], ks[14], ks[15], ks[0], C)
    return tuple(p.astype(jnp.float32)
                 for p in (w1, s1, b1, w2, s2, b2, wl, bl, w3, s3, b3))


if __name__ == "__main__":
    # TODO(synk): training-mode BatchNorm (batch-stat updates) is not modeled;
    # BN is folded as eval-mode per-channel affine, matching inference semantics.
    key = jax.random.PRNGKey(0)
    N, H, W, C = 2, 16, 16, 64          # inter_dim = 64 (small), compress_c = 8
    k1, k2, k3 = jax.random.split(key, 3)
    x1 = jax.random.normal(k1, (N, H, W, C), dtype=jnp.float32)
    x2 = jax.random.normal(k2, (N, H, W, C), dtype=jnp.float32)
    params = make_params(k3, C)

    # Default (auto-sized) row tile.
    out = jax.block_until_ready(asff2_forward(x1, x2, params))
    assert out.shape == (N, H, W, C)

    # Tight check against a precision-matched (bf16 operand) reference.
    ref_m = jax.block_until_ready(
        asff2_reference(x1, x2, params, match_kernel_precision=True))
    err_m = float(jnp.max(jnp.abs(out - ref_m)))
    assert jnp.allclose(out, ref_m, rtol=3e-3, atol=3e-3), err_m

    # Loose check against the exact f32 module semantics.
    ref_f = jax.block_until_ready(asff2_reference(x1, x2, params))
    err_f = float(jnp.max(jnp.abs(out - ref_f)))
    assert jnp.allclose(out, ref_f, rtol=5e-2, atol=5e-2), err_f

    # Also exercise an explicit multi-row-tile configuration (real halo path).
    out8 = jax.block_until_ready(asff2_forward(x1, x2, params, block_h=8))
    assert jnp.allclose(out8, ref_m, rtol=3e-3, atol=3e-3), (
        float(jnp.max(jnp.abs(out8 - ref_m))))

    print("KERNEL_OK")
</pallas_src>

<mosaic_0001>
module attributes {stable_mosaic.version = 11 : i64} {
  func.func @asff2_kernel(%arg0: i32, %arg1: i32, %arg2: memref<1x16x16x64xf32, #tpu.memory_space<vmem>>, %arg3: memref<1x16x16x64xf32, #tpu.memory_space<vmem>>, %arg4: memref<1x1x2x16x64xf32, #tpu.memory_space<vmem>>, %arg5: memref<1x1x2x16x64xf32, #tpu.memory_space<vmem>>, %arg6: memref<128x16xbf16, #tpu.memory_space<vmem>>, %arg7: memref<1x16xf32, #tpu.memory_space<vmem>>, %arg8: memref<1x16xf32, #tpu.memory_space<vmem>>, %arg9: memref<1x1xf32, #tpu.memory_space<vmem>>, %arg10: memref<3x192x64xbf16, #tpu.memory_space<vmem>>, %arg11: memref<1x64xf32, #tpu.memory_space<vmem>>, %arg12: memref<1x16x16x64xf32, #tpu.memory_space<vmem>>) attributes {dimension_semantics = [#tpu.dimension_semantics<parallel>, #tpu.dimension_semantics<parallel>], iteration_bounds = array<i64: 2, 1>, scalar_prefetch = 0 : i64, scratch_operands = 0 : i64, tpu.core_type = #tpu.core_type<tc>, window_params = [{transform_indices = @transform_0, window_bounds = array<i64: 1, 16, 16, 64>}, {transform_indices = @transform_1, window_bounds = array<i64: 1, 16, 16, 64>}, {transform_indices = @transform_2, window_bounds = array<i64: 1, 1, 2, 16, 64>}, {transform_indices = @transform_3, window_bounds = array<i64: 1, 1, 2, 16, 64>}, {pipeline_mode = #tpu.pipeline_mode<synchronous>, transform_indices = @transform_4, window_bounds = array<i64: 128, 16>}, {pipeline_mode = #tpu.pipeline_mode<synchronous>, transform_indices = @transform_5, window_bounds = array<i64: 1, 16>}, {pipeline_mode = #tpu.pipeline_mode<synchronous>, transform_indices = @transform_6, window_bounds = array<i64: 1, 16>}, {pipeline_mode = #tpu.pipeline_mode<synchronous>, transform_indices = @transform_7, window_bounds = array<i64: 1, 1>}, {pipeline_mode = #tpu.pipeline_mode<synchronous>, transform_indices = @transform_8, window_bounds = array<i64: 3, 192, 64>}, {pipeline_mode = #tpu.pipeline_mode<synchronous>, transform_indices = @transform_9, window_bounds = array<i64: 1, 64>}, {transform_indices = @transform_10, window_bounds = array<i64: 1, 16, 16, 64>}]} {
    %c0 = arith.constant 0 : index
    %c0_0 = arith.constant 0 : index
    %c0_1 = arith.constant 0 : index
    %c0_2 = arith.constant 0 : index
    %0 = vector.load %arg2[%c0, %c0_0, %c0_1, %c0_2] : memref<1x16x16x64xf32, #tpu.memory_space<vmem>>, vector<1x16x16x64xf32>
    %1 = vector.shape_cast %0 : vector<1x16x16x64xf32> to vector<16x16x64xf32>
    %2 = vector.shape_cast %1 : vector<16x16x64xf32> to vector<256x64xf32>
    %c0_3 = arith.constant 0 : index
    %c0_4 = arith.constant 0 : index
    %c0_5 = arith.constant 0 : index
    %c0_6 = arith.constant 0 : index
    %3 = vector.load %arg3[%c0_3, %c0_4, %c0_5, %c0_6] : memref<1x16x16x64xf32, #tpu.memory_space<vmem>>, vector<1x16x16x64xf32>
    %4 = vector.shape_cast %3 : vector<1x16x16x64xf32> to vector<16x16x64xf32>
    %5 = vector.shape_cast %4 : vector<16x16x64xf32> to vector<256x64xf32>
    %6 = arith.truncf %2 : vector<256x64xf32> to vector<256x64xbf16>
    %7 = arith.truncf %5 : vector<256x64xf32> to vector<256x64xbf16>
    %8 = tpu.concatenate %6, %7 in 1 : vector<256x64xbf16>, vector<256x64xbf16> -> vector<256x128xbf16>
    %c0_7 = arith.constant 0 : index
    %c0_8 = arith.constant 0 : index
    %9 = vector.load %arg6[%c0_7, %c0_8] : memref<128x16xbf16, #tpu.memory_space<vmem>>, vector<128x16xbf16>
    %cst = arith.constant dense<0.000000e+00> : vector<256x16xf32>
    %10 = tpu.matmul %8, %9, %cst {dimension_numbers = #tpu.dot_dimension_numbers<[1], [0], [0], [1], [0, 0, 1, 1], [], []>} : vector<256x128xbf16>, vector<128x16xbf16>, vector<256x16xf32> -> vector<256x16xf32>
    %c0_9 = arith.constant 0 : index
    %c0_10 = arith.constant 0 : index
    %11 = vector.load %arg7[%c0_9, %c0_10] : memref<1x16xf32, #tpu.memory_space<vmem>>, vector<1x16xf32>
    %12 = vector.broadcast %11 : vector<1x16xf32> to vector<256x16xf32>
    %13 = arith.addf %10, %12 : vector<256x16xf32>
    %cst_11 = arith.constant 0.000000e+00 : f32
    %14 = vector.broadcast %cst_11 : f32 to vector<256x16xf32>
    %15 = arith.maximumf %13, %14 : vector<256x16xf32>
    %c0_12 = arith.constant 0 : index
    %c0_13 = arith.constant 0 : index
    %16 = vector.load %arg8[%c0_12, %c0_13] : memref<1x16xf32, #tpu.memory_space<vmem>>, vector<1x16xf32>
    %17 = vector.broadcast %16 : vector<1x16xf32> to vector<256x16xf32>
    %18 = arith.mulf %15, %17 : vector<256x16xf32>
    %cst_14 = arith.constant dense<0.000000e+00> : vector<256xf32>
    %19 = vector.multi_reduction <add>, %18, %cst_14 [1] : vector<256x16xf32> to vector<256xf32>
    %20 = vector.shape_cast %19 : vector<256xf32> to vector<256x1xf32>
    %c0_15 = arith.constant 0 : index
    %c0_16 = arith.constant 0 : index
    %21 = vector.load %arg9[%c0_15, %c0_16] : memref<1x1xf32, #tpu.memory_space<vmem>>, vector<1x1xf32>
    %22 = vector.broadcast %21 : vector<1x1xf32> to vector<256x1xf32>
    %23 = arith.addf %20, %22 : vector<256x1xf32>
    %cst_17 = arith.constant 0.000000e+00 : f32
    %24 = vector.broadcast %cst_17 : f32 to vector<256x1xf32>
    %25 = arith.subf %24, %23 : vector<256x1xf32>
    %26 = math.exp %25 : vector<256x1xf32>
    %cst_18 = arith.constant 1.000000e+00 : f32
    %27 = vector.broadcast %cst_18 : f32 to vector<256x1xf32>
    %28 = arith.addf %27, %26 : vector<256x1xf32>
    %cst_19 = arith.constant 1.000000e+00 : f32
    %29 = vector.broadcast %cst_19 : f32 to vector<256x1xf32>
    %30 = arith.divf %29, %28 : vector<256x1xf32>
    %31 = arith.subf %2, %5 : vector<256x64xf32>
    %32 = vector.broadcast %30 : vector<256x1xf32> to vector<256x64xf32>
    %33 = arith.mulf %32, %31 : vector<256x64xf32>
    %34 = arith.addf %5, %33 : vector<256x64xf32>
    %c0_20 = arith.constant 0 : index
    %c0_21 = arith.constant 0 : index
    %c0_22 = arith.constant 0 : index
    %c0_23 = arith.constant 0 : index
    %c0_24 = arith.constant 0 : index
    %35 = vector.load %arg4[%c0_20, %c0_21, %c0_22, %c0_23, %c0_24] : memref<1x1x2x16x64xf32, #tpu.memory_space<vmem>>, vector<1x1x2x16x64xf32>
    %36 = vector.shape_cast %35 : vector<1x1x2x16x64xf32> to vector<2x16x64xf32>
    %37 = vector.shape_cast %36 : vector<2x16x64xf32> to vector<32x64xf32>
    %c0_25 = arith.constant 0 : index
    %c0_26 = arith.constant 0 : index
    %c0_27 = arith.constant 0 : index
    %c0_28 = arith.constant 0 : index
    %c0_29 = arith.constant 0 : index
    %38 = vector.load %arg5[%c0_25, %c0_26, %c0_27, %c0_28, %c0_29] : memref<1x1x2x16x64xf32, #tpu.memory_space<vmem>>, vector<1x1x2x16x64xf32>
    %39 = vector.shape_cast %38 : vector<1x1x2x16x64xf32> to vector<2x16x64xf32>
    %40 = vector.shape_cast %39 : vector<2x16x64xf32> to vector<32x64xf32>
    %41 = arith.truncf %37 : vector<32x64xf32> to vector<32x64xbf16>
    %42 = arith.truncf %40 : vector<32x64xf32> to vector<32x64xbf16>
    %43 = tpu.concatenate %41, %42 in 1 : vector<32x64xbf16>, vector<32x64xbf16> -> vector<32x128xbf16>
    %c0_30 = arith.constant 0 : index
    %c0_31 = arith.constant 0 : index
    %44 = vector.load %arg6[%c0_30, %c0_31] : memref<128x16xbf16, #tpu.memory_space<vmem>>, vector<128x16xbf16>
    %cst_32 = arith.constant dense<0.000000e+00> : vector<32x16xf32>
    %45 = tpu.matmul %43, %44, %cst_32 {dimension_numbers = #tpu.dot_dimension_numbers<[1], [0], [0], [1], [0, 0, 1, 1], [], []>} : vector<32x128xbf16>, vector<128x16xbf16>, vector<32x16xf32> -> vector<32x16xf32>
    %c0_33 = arith.constant 0 : index
    %c0_34 = arith.constant 0 : index
    %46 = vector.load %arg7[%c0_33, %c0_34] : memref<1x16xf32, #tpu.memory_space<vmem>>, vector<1x16xf32>
    %47 = vector.broadcast %46 : vector<1x16xf32> to vector<32x16xf32>
    %48 = arith.addf %45, %47 : vector<32x16xf32>
    %cst_35 = arith.constant 0.000000e+00 : f32
    %49 = vector.broadcast %cst_35 : f32 to vector<32x16xf32>
    %50 = arith.maximumf %48, %49 : vector<32x16xf32>
    %c0_36 = arith.constant 0 : index
    %c0_37 = arith.constant 0 : index
    %51 = vector.load %arg8[%c0_36, %c0_37] : memref<1x16xf32, #tpu.memory_space<vmem>>, vector<1x16xf32>
    %52 = vector.broadcast %51 : vector<1x16xf32> to vector<32x16xf32>
    %53 = arith.mulf %50, %52 : vector<32x16xf32>
    %cst_38 = arith.constant dense<0.000000e+00> : vector<32xf32>
    %54 = vector.multi_reduction <add>, %53, %cst_38 [1] : vector<32x16xf32> to vector<32xf32>
    %55 = vector.shape_cast %54 : vector<32xf32> to vector<32x1xf32>
    %c0_39 = arith.constant 0 : index
    %c0_40 = arith.constant 0 : index
    %56 = vector.load %arg9[%c0_39, %c0_40] : memref<1x1xf32, #tpu.memory_space<vmem>>, vector<1x1xf32>
    %57 = vector.broadcast %56 : vector<1x1xf32> to vector<32x1xf32>
    %58 = arith.addf %55, %57 : vector<32x1xf32>
    %cst_41 = arith.constant 0.000000e+00 : f32
    %59 = vector.broadcast %cst_41 : f32 to vector<32x1xf32>
    %60 = arith.subf %59, %58 : vector<32x1xf32>
    %61 = math.exp %60 : vector<32x1xf32>
    %cst_42 = arith.constant 1.000000e+00 : f32
    %62 = vector.broadcast %cst_42 : f32 to vector<32x1xf32>
    %63 = arith.addf %62, %61 : vector<32x1xf32>
    %cst_43 = arith.constant 1.000000e+00 : f32
    %64 = vector.broadcast %cst_43 : f32 to vector<32x1xf32>
    %65 = arith.divf %64, %63 : vector<32x1xf32>
    %66 = arith.subf %37, %40 : vector<32x64xf32>
    %67 = vector.broadcast %65 : vector<32x1xf32> to vector<32x64xf32>
    %68 = arith.mulf %67, %66 : vector<32x64xf32>
    %69 = arith.addf %40, %68 : vector<32x64xf32>
    %70 = vector.extract_strided_slice %69 {offsets = [0, 0], sizes = [16, 64], strides = [1, 1]} : vector<32x64xf32> to vector<16x64xf32>
    %71 = vector.extract_strided_slice %69 {offsets = [16, 0], sizes = [16, 64], strides = [1, 1]} : vector<32x64xf32> to vector<16x64xf32>
    %72 = tpu.concatenate %70, %34, %71 in 0 : vector<16x64xf32>, vector<256x64xf32>, vector<16x64xf32> -> vector<288x64xf32>
    %73 = tpu.iota {dimensions = array<i32: 0>} : vector<288x1xi32>
    %c16_i32 = arith.constant 16 : i32
    %c0_i32 = arith.constant 0 : i32
    %74 = arith.cmpi eq, %c16_i32, %c0_i32 : i32
    %c1_i32 = arith.constant 1 : i32
    %75 = arith.select %74, %c1_i32, %c16_i32 : i32
    %76 = vector.broadcast %75 : i32 to vector<288x1xi32>
    %77 = arith.remsi %73, %76 : vector<288x1xi32>
    %c0_i32_44 = arith.constant 0 : i32
    %78 = vector.broadcast %c0_i32_44 : i32 to vector<288x1xi32>
    %79 = arith.cmpi ne, %77, %78 : vector<288x1xi32>
    %c0_i32_45 = arith.constant 0 : i32
    %80 = vector.broadcast %c0_i32_45 : i32 to vector<288x1xi32>
    %81 = arith.cmpi slt, %77, %80 : vector<288x1xi32>
    %c0_i32_46 = arith.constant 0 : i32
    %82 = arith.cmpi slt, %75, %c0_i32_46 : i32
    %83 = vector.broadcast %82 : i1 to vector<288x1xi1>
    %84 = vector.broadcast %83 : vector<288x1xi1> to vector<288x1xi1>
    %85 = arith.xori %81, %84 : vector<288x1xi1>
    %86 = arith.andi %85, %79 : vector<288x1xi1>
    %87 = vector.broadcast %75 : i32 to vector<288x1xi32>
    %88 = arith.addi %77, %87 : vector<288x1xi32>
    %89 = arith.select %86, %88, %77 : vector<288x1xi1>, vector<288x1xi32>
    %c0_i32_47 = arith.constant 0 : i32
    %90 = vector.broadcast %c0_i32_47 : i32 to vector<288x1xi32>
    %91 = arith.cmpi eq, %89, %90 : vector<288x1xi32>
    %c1_i32_48 = arith.constant 1 : i32
    %92 = tpu.dynamic_rotate %72 by %c1_i32_48 dim 0 : vector<288x64xf32>, i32 -> vector<288x64xf32>
    %cst_49 = arith.constant 0.000000e+00 : f32
    %93 = vector.shape_cast %91 : vector<288x1xi1> to vector<288x1xi1>
    %94 = vector.broadcast %93 : vector<288x1xi1> to vector<288x64xi1>
    %95 = vector.broadcast %cst_49 : f32 to vector<288x64xf32>
    %96 = arith.select %94, %95, %92 : vector<288x64xi1>, vector<288x64xf32>
    %c15_i32 = arith.constant 15 : i32
    %97 = vector.broadcast %c15_i32 : i32 to vector<288x1xi32>
    %98 = arith.cmpi eq, %89, %97 : vector<288x1xi32>
    %c287_i32 = arith.constant 287 : i32
    %99 = tpu.dynamic_rotate %72 by %c287_i32 dim 0 : vector<288x64xf32>, i32 -> vector<288x64xf32>
    %cst_50 = arith.constant 0.000000e+00 : f32
    %100 = vector.shape_cast %98 : vector<288x1xi1> to vector<288x1xi1>
    %101 = vector.broadcast %100 : vector<288x1xi1> to vector<288x64xi1>
    %102 = vector.broadcast %cst_50 : f32 to vector<288x64xf32>
    %103 = arith.select %101, %102, %99 : vector<288x64xi1>, vector<288x64xf32>
    %104 = arith.truncf %96 : vector<288x64xf32> to vector<288x64xbf16>
    %105 = arith.truncf %72 : vector<288x64xf32> to vector<288x64xbf16>
    %106 = arith.truncf %103 : vector<288x64xf32> to vector<288x64xbf16>
    %107 = tpu.concatenate %104, %105, %106 in 1 : vector<288x64xbf16>, vector<288x64xbf16>, vector<288x64xbf16> -> vector<288x192xbf16>
    %108 = vector.extract_strided_slice %107 {offsets = [0, 0], sizes = [256, 192], strides = [1, 1]} : vector<288x192xbf16> to vector<256x192xbf16>
    %c0_51 = arith.constant 0 : index
    %c0_52 = arith.constant 0 : index
    %c0_53 = arith.constant 0 : index
    %109 = vector.load %arg10[%c0_51, %c0_52, %c0_53] : memref<3x192x64xbf16, #tpu.memory_space<vmem>>, vector<1x192x64xbf16>
    %110 = vector.shape_cast %109 : vector<1x192x64xbf16> to vector<192x64xbf16>
    %cst_54 = arith.constant dense<0.000000e+00> : vector<256x64xf32>
    %111 = tpu.matmul %108, %110, %cst_54 {dimension_numbers = #tpu.dot_dimension_numbers<[1], [0], [0], [1], [0, 0, 1, 1], [], []>} : vector<256x192xbf16>, vector<192x64xbf16>, vector<256x64xf32> -> vector<256x64xf32>
    %112 = vector.extract_strided_slice %107 {offsets = [16, 0], sizes = [256, 192], strides = [1, 1]} : vector<288x192xbf16> to vector<256x192xbf16>
    %c1 = arith.constant 1 : index
    %c0_55 = arith.constant 0 : index
    %c0_56 = arith.constant 0 : index
    %113 = vector.load %arg10[%c1, %c0_55, %c0_56] : memref<3x192x64xbf16, #tpu.memory_space<vmem>>, vector<1x192x64xbf16>
    %114 = vector.shape_cast %113 : vector<1x192x64xbf16> to vector<192x64xbf16>
    %cst_57 = arith.constant dense<0.000000e+00> : vector<256x64xf32>
    %115 = tpu.matmul %112, %114, %cst_57 {dimension_numbers = #tpu.dot_dimension_numbers<[1], [0], [0], [1], [0, 0, 1, 1], [], []>} : vector<256x192xbf16>, vector<192x64xbf16>, vector<256x64xf32> -> vector<256x64xf32>
    %116 = arith.addf %111, %115 : vector<256x64xf32>
    %117 = vector.extract_strided_slice %107 {offsets = [32, 0], sizes = [256, 192], strides = [1, 1]} : vector<288x192xbf16> to vector<256x192xbf16>
    %c2 = arith.constant 2 : index
    %c0_58 = arith.constant 0 : index
    %c0_59 = arith.constant 0 : index
    %118 = vector.load %arg10[%c2, %c0_58, %c0_59] : memref<3x192x64xbf16, #tpu.memory_space<vmem>>, vector<1x192x64xbf16>
    %119 = vector.shape_cast %118 : vector<1x192x64xbf16> to vector<192x64xbf16>
    %cst_60 = arith.constant dense<0.000000e+00> : vector<256x64xf32>
    %120 = tpu.matmul %117, %119, %cst_60 {dimension_numbers = #tpu.dot_dimension_numbers<[1], [0], [0], [1], [0, 0, 1, 1], [], []>} : vector<256x192xbf16>, vector<192x64xbf16>, vector<256x64xf32> -> vector<256x64xf32>
    %121 = arith.addf %116, %120 : vector<256x64xf32>
    %c0_61 = arith.constant 0 : index
    %c0_62 = arith.constant 0 : index
    %122 = vector.load %arg11[%c0_61, %c0_62] : memref<1x64xf32, #tpu.memory_space<vmem>>, vector<1x64xf32>
    %123 = vector.broadcast %122 : vector<1x64xf32> to vector<256x64xf32>
    %124 = arith.addf %121, %123 : vector<256x64xf32>
    %cst_63 = arith.constant 0.000000e+00 : f32
    %125 = vector.broadcast %cst_63 : f32 to vector<256x64xf32>
    %126 = arith.maximumf %124, %125 : vector<256x64xf32>
    %127 = vector.shape_cast %126 : vector<256x64xf32> to vector<16x16x64xf32>
    %c0_64 = arith.constant 0 : index
    %c0_65 = arith.constant 0 : index
    %c0_66 = arith.constant 0 : index
    %c0_67 = arith.constant 0 : index
    %128 = vector.load %arg12[%c0_64, %c0_65, %c0_66, %c0_67] : memref<1x16x16x64xf32, #tpu.memory_space<vmem>>, vector<1x16x16x64xf32>
    %129 = vector.shape_cast %128 : vector<1x16x16x64xf32> to vector<16x16x64xf32>
    %130 = vector.shape_cast %127 : vector<16x16x64xf32> to vector<1x16x16x64xf32>
    tpu.vector_store %arg12[%c0_64, %c0_65, %c0_66, %c0_67], %130 {strides = array<i32>} : memref<1x16x16x64xf32, #tpu.memory_space<vmem>>, vector<1x16x16x64xf32>,
    return
  }
  func.func @transform_0(%arg0: i32, %arg1: i32) -> (i32, i32, i32, i32) {
    %c0_i32 = arith.constant 0 : i32
    %c0_i32_0 = arith.constant 0 : i32
    %c0_i32_1 = arith.constant 0 : i32
    return %arg0, %arg1, %c0_i32, %c0_i32_0 : i32, i32, i32, i32
  }
  func.func @transform_1(%arg0: i32, %arg1: i32) -> (i32, i32, i32, i32) {
    %c0_i32 = arith.constant 0 : i32
    %c0_i32_0 = arith.constant 0 : i32
    %c0_i32_1 = arith.constant 0 : i32
    return %arg0, %arg1, %c0_i32, %c0_i32_0 : i32, i32, i32, i32
  }
  func.func @transform_2(%arg0: i32, %arg1: i32) -> (i32, i32, i32, i32, i32) {
    %c0_i32 = arith.constant 0 : i32
    %c0_i32_0 = arith.constant 0 : i32
    %c0_i32_1 = arith.constant 0 : i32
    %c0_i32_2 = arith.constant 0 : i32
    return %arg0, %arg1, %c0_i32, %c0_i32_0, %c0_i32_1 : i32, i32, i32, i32, i32
  }
  func.func @transform_3(%arg0: i32, %arg1: i32) -> (i32, i32, i32, i32, i32) {
    %c0_i32 = arith.constant 0 : i32
    %c0_i32_0 = arith.constant 0 : i32
    %c0_i32_1 = arith.constant 0 : i32
    %c0_i32_2 = arith.constant 0 : i32
    return %arg0, %arg1, %c0_i32, %c0_i32_0, %c0_i32_1 : i32, i32, i32, i32, i32
  }
  func.func @transform_4(%arg0: i32, %arg1: i32) -> (i32, i32) {
    %c0_i32 = arith.constant 0 : i32
    %c0_i32_0 = arith.constant 0 : i32
    %c0_i32_1 = arith.constant 0 : i32
    return %c0_i32, %c0_i32_0 : i32, i32
  }
  func.func @transform_5(%arg0: i32, %arg1: i32) -> (i32, i32) {
    %c0_i32 = arith.constant 0 : i32
    %c0_i32_0 = arith.constant 0 : i32
    %c0_i32_1 = arith.constant 0 : i32
    return %c0_i32, %c0_i32_0 : i32, i32
  }
  func.func @transform_6(%arg0: i32, %arg1: i32) -> (i32, i32) {
    %c0_i32 = arith.constant 0 : i32
    %c0_i32_0 = arith.constant 0 : i32
    %c0_i32_1 = arith.constant 0 : i32
    return %c0_i32, %c0_i32_0 : i32, i32
  }
  func.func @transform_7(%arg0: i32, %arg1: i32) -> (i32, i32) {
    %c0_i32 = arith.constant 0 : i32
    %c0_i32_0 = arith.constant 0 : i32
    %c0_i32_1 = arith.constant 0 : i32
    return %c0_i32, %c0_i32_0 : i32, i32
  }
  func.func @transform_8(%arg0: i32, %arg1: i32) -> (i32, i32, i32) {
    %c0_i32 = arith.constant 0 : i32
    %c0_i32_0 = arith.constant 0 : i32
    %c0_i32_1 = arith.constant 0 : i32
    %c0_i32_2 = arith.constant 0 : i32
    return %c0_i32, %c0_i32_0, %c0_i32_1 : i32, i32, i32
  }
  func.func @transform_9(%arg0: i32, %arg1: i32) -> (i32, i32) {
    %c0_i32 = arith.constant 0 : i32
    %c0_i32_0 = arith.constant 0 : i32
    %c0_i32_1 = arith.constant 0 : i32
    return %c0_i32, %c0_i32_0 : i32, i32
  }
  func.func @transform_10(%arg0: i32, %arg1: i32) -> (i32, i32, i32, i32) {
    %c0_i32 = arith.constant 0 : i32
    %c0_i32_0 = arith.constant 0 : i32
    %c0_i32_1 = arith.constant 0 : i32
    return %arg0, %arg1, %c0_i32, %c0_i32_0 : i32, i32, i32, i32
  }
}

module attributes {stable_mosaic.version = 11 : i64} {
  func.func @asff2_kernel(%arg0: i32, %arg1: i32, %arg2: memref<1x16x16x64xf32, #tpu.memory_space<vmem>>, %arg3: memref<1x16x16x64xf32, #tpu.memory_space<vmem>>, %arg4: memref<1x1x2x16x64xf32, #tpu.memory_space<vmem>>, %arg5: memref<1x1x2x16x64xf32, #tpu.memory_space<vmem>>, %arg6: memref<128x16xbf16, #tpu.memory_space<vmem>>, %arg7: memref<1x16xf32, #tpu.memory_space<vmem>>, %arg8: memref<1x16xf32, #tpu.memory_space<vmem>>, %arg9: memref<1x1xf32, #tpu.memory_space<vmem>>, %arg10: memref<3x192x64xbf16, #tpu.memory_space<vmem>>, %arg11: memref<1x64xf32, #tpu.memory_space<vmem>>, %arg12: memref<1x16x16x64xf32, #tpu.memory_space<vmem>>) attributes {dimension_semantics = [#tpu.dimension_semantics<parallel>, #tpu.dimension_semantics<parallel>], iteration_bounds = array<i64: 2, 1>, scalar_prefetch = 0 : i64, scratch_operands = 0 : i64, tpu.core_type = #tpu.core_type<tc>, window_params = [{transform_indices = @transform_0, window_bounds = array<i64: 1, 16, 16, 64>}, {transform_indices = @transform_1, window_bounds = array<i64: 1, 16, 16, 64>}, {transform_indices = @transform_2, window_bounds = array<i64: 1, 1, 2, 16, 64>}, {transform_indices = @transform_3, window_bounds = array<i64: 1, 1, 2, 16, 64>}, {pipeline_mode = #tpu.pipeline_mode<synchronous>, transform_indices = @transform_4, window_bounds = array<i64: 128, 16>}, {pipeline_mode = #tpu.pipeline_mode<synchronous>, transform_indices = @transform_5, window_bounds = array<i64: 1, 16>}, {pipeline_mode = #tpu.pipeline_mode<synchronous>, transform_indices = @transform_6, window_bounds = array<i64: 1, 16>}, {pipeline_mode = #tpu.pipeline_mode<synchronous>, transform_indices = @transform_7, window_bounds = array<i64: 1, 1>}, {pipeline_mode = #tpu.pipeline_mode<synchronous>, transform_indices = @transform_8, window_bounds = array<i64: 3, 192, 64>}, {pipeline_mode = #tpu.pipeline_mode<synchronous>, transform_indices = @transform_9, window_bounds = array<i64: 1, 64>}, {transform_indices = @transform_10, window_bounds = array<i64: 1, 16, 16, 64>}]} {
    %c0 = arith.constant 0 : index
    %c0_0 = arith.constant 0 : index
    %c0_1 = arith.constant 0 : index
    %c0_2 = arith.constant 0 : index
    %0 = vector.load %arg2[%c0, %c0_0, %c0_1, %c0_2] : memref<1x16x16x64xf32, #tpu.memory_space<vmem>>, vector<1x16x16x64xf32>
    %1 = vector.shape_cast %0 : vector<1x16x16x64xf32> to vector<16x16x64xf32>
    %2 = vector.shape_cast %1 : vector<16x16x64xf32> to vector<256x64xf32>
    %c0_3 = arith.constant 0 : index
    %c0_4 = arith.constant 0 : index
    %c0_5 = arith.constant 0 : index
    %c0_6 = arith.constant 0 : index
    %3 = vector.load %arg3[%c0_3, %c0_4, %c0_5, %c0_6] : memref<1x16x16x64xf32, #tpu.memory_space<vmem>>, vector<1x16x16x64xf32>
    %4 = vector.shape_cast %3 : vector<1x16x16x64xf32> to vector<16x16x64xf32>
    %5 = vector.shape_cast %4 : vector<16x16x64xf32> to vector<256x64xf32>
    %6 = arith.truncf %2 : vector<256x64xf32> to vector<256x64xbf16>
    %7 = arith.truncf %5 : vector<256x64xf32> to vector<256x64xbf16>
    %8 = tpu.concatenate %6, %7 in 1 : vector<256x64xbf16>, vector<256x64xbf16> -> vector<256x128xbf16>
    %c0_7 = arith.constant 0 : index
    %c0_8 = arith.constant 0 : index
    %9 = vector.load %arg6[%c0_7, %c0_8] : memref<128x16xbf16, #tpu.memory_space<vmem>>, vector<128x16xbf16>
    %cst = arith.constant dense<0.000000e+00> : vector<256x16xf32>
    %10 = tpu.matmul %8, %9, %cst {dimension_numbers = #tpu.dot_dimension_numbers<[1], [0], [0], [1], [0, 0, 1, 1], [], []>} : vector<256x128xbf16>, vector<128x16xbf16>, vector<256x16xf32> -> vector<256x16xf32>
    %c0_9 = arith.constant 0 : index
    %c0_10 = arith.constant 0 : index
    %11 = vector.load %arg7[%c0_9, %c0_10] : memref<1x16xf32, #tpu.memory_space<vmem>>, vector<1x16xf32>
    %12 = vector.broadcast %11 : vector<1x16xf32> to vector<256x16xf32>
    %13 = arith.addf %10, %12 : vector<256x16xf32>
    %cst_11 = arith.constant 0.000000e+00 : f32
    %14 = vector.broadcast %cst_11 : f32 to vector<256x16xf32>
    %15 = arith.maximumf %13, %14 : vector<256x16xf32>
    %c0_12 = arith.constant 0 : index
    %c0_13 = arith.constant 0 : index
    %16 = vector.load %arg8[%c0_12, %c0_13] : memref<1x16xf32, #tpu.memory_space<vmem>>, vector<1x16xf32>
    %17 = vector.broadcast %16 : vector<1x16xf32> to vector<256x16xf32>
    %18 = arith.mulf %15, %17 : vector<256x16xf32>
    %cst_14 = arith.constant dense<0.000000e+00> : vector<256xf32>
    %19 = vector.multi_reduction <add>, %18, %cst_14 [1] : vector<256x16xf32> to vector<256xf32>
    %20 = vector.shape_cast %19 : vector<256xf32> to vector<256x1xf32>
    %c0_15 = arith.constant 0 : index
    %c0_16 = arith.constant 0 : index
    %21 = vector.load %arg9[%c0_15, %c0_16] : memref<1x1xf32, #tpu.memory_space<vmem>>, vector<1x1xf32>
    %22 = vector.broadcast %21 : vector<1x1xf32> to vector<256x1xf32>
    %23 = arith.addf %20, %22 : vector<256x1xf32>
    %cst_17 = arith.constant 0.000000e+00 : f32
    %24 = vector.broadcast %cst_17 : f32 to vector<256x1xf32>
    %25 = arith.subf %24, %23 : vector<256x1xf32>
    %26 = math.exp %25 : vector<256x1xf32>
    %cst_18 = arith.constant 1.000000e+00 : f32
    %27 = vector.broadcast %cst_18 : f32 to vector<256x1xf32>
    %28 = arith.addf %27, %26 : vector<256x1xf32>
    %cst_19 = arith.constant 1.000000e+00 : f32
    %29 = vector.broadcast %cst_19 : f32 to vector<256x1xf32>
    %30 = arith.divf %29, %28 : vector<256x1xf32>
    %31 = arith.subf %2, %5 : vector<256x64xf32>
    %32 = vector.broadcast %30 : vector<256x1xf32> to vector<256x64xf32>
    %33 = arith.mulf %32, %31 : vector<256x64xf32>
    %34 = arith.addf %5, %33 : vector<256x64xf32>
    %c0_20 = arith.constant 0 : index
    %c0_21 = arith.constant 0 : index
    %c0_22 = arith.constant 0 : index
    %c0_23 = arith.constant 0 : index
    %c0_24 = arith.constant 0 : index
    %35 = vector.load %arg4[%c0_20, %c0_21, %c0_22, %c0_23, %c0_24] : memref<1x1x2x16x64xf32, #tpu.memory_space<vmem>>, vector<1x1x2x16x64xf32>
    %36 = vector.shape_cast %35 : vector<1x1x2x16x64xf32> to vector<2x16x64xf32>
    %37 = vector.shape_cast %36 : vector<2x16x64xf32> to vector<32x64xf32>
    %c0_25 = arith.constant 0 : index
    %c0_26 = arith.constant 0 : index
    %c0_27 = arith.constant 0 : index
    %c0_28 = arith.constant 0 : index
    %c0_29 = arith.constant 0 : index
    %38 = vector.load %arg5[%c0_25, %c0_26, %c0_27, %c0_28, %c0_29] : memref<1x1x2x16x64xf32, #tpu.memory_space<vmem>>, vector<1x1x2x16x64xf32>
    %39 = vector.shape_cast %38 : vector<1x1x2x16x64xf32> to vector<2x16x64xf32>
    %40 = vector.shape_cast %39 : vector<2x16x64xf32> to vector<32x64xf32>
    %41 = arith.truncf %37 : vector<32x64xf32> to vector<32x64xbf16>
    %42 = arith.truncf %40 : vector<32x64xf32> to vector<32x64xbf16>
    %43 = tpu.concatenate %41, %42 in 1 : vector<32x64xbf16>, vector<32x64xbf16> -> vector<32x128xbf16>
    %c0_30 = arith.constant 0 : index
    %c0_31 = arith.constant 0 : index
    %44 = vector.load %arg6[%c0_30, %c0_31] : memref<128x16xbf16, #tpu.memory_space<vmem>>, vector<128x16xbf16>
    %cst_32 = arith.constant dense<0.000000e+00> : vector<32x16xf32>
    %45 = tpu.matmul %43, %44, %cst_32 {dimension_numbers = #tpu.dot_dimension_numbers<[1], [0], [0], [1], [0, 0, 1, 1], [], []>} : vector<32x128xbf16>, vector<128x16xbf16>, vector<32x16xf32> -> vector<32x16xf32>
    %c0_33 = arith.constant 0 : index
    %c0_34 = arith.constant 0 : index
    %46 = vector.load %arg7[%c0_33, %c0_34] : memref<1x16xf32, #tpu.memory_space<vmem>>, vector<1x16xf32>
    %47 = vector.broadcast %46 : vector<1x16xf32> to vector<32x16xf32>
    %48 = arith.addf %45, %47 : vector<32x16xf32>
    %cst_35 = arith.constant 0.000000e+00 : f32
    %49 = vector.broadcast %cst_35 : f32 to vector<32x16xf32>
    %50 = arith.maximumf %48, %49 : vector<32x16xf32>
    %c0_36 = arith.constant 0 : index
    %c0_37 = arith.constant 0 : index
    %51 = vector.load %arg8[%c0_36, %c0_37] : memref<1x16xf32, #tpu.memory_space<vmem>>, vector<1x16xf32>
    %52 = vector.broadcast %51 : vector<1x16xf32> to vector<32x16xf32>
    %53 = arith.mulf %50, %52 : vector<32x16xf32>
    %cst_38 = arith.constant dense<0.000000e+00> : vector<32xf32>
    %54 = vector.multi_reduction <add>, %53, %cst_38 [1] : vector<32x16xf32> to vector<32xf32>
    %55 = vector.shape_cast %54 : vector<32xf32> to vector<32x1xf32>
    %c0_39 = arith.constant 0 : index
    %c0_40 = arith.constant 0 : index
    %56 = vector.load %arg9[%c0_39, %c0_40] : memref<1x1xf32, #tpu.memory_space<vmem>>, vector<1x1xf32>
    %57 = vector.broadcast %56 : vector<1x1xf32> to vector<32x1xf32>
    %58 = arith.addf %55, %57 : vector<32x1xf32>
    %cst_41 = arith.constant 0.000000e+00 : f32
    %59 = vector.broadcast %cst_41 : f32 to vector<32x1xf32>
    %60 = arith.subf %59, %58 : vector<32x1xf32>
    %61 = math.exp %60 : vector<32x1xf32>
    %cst_42 = arith.constant 1.000000e+00 : f32
    %62 = vector.broadcast %cst_42 : f32 to vector<32x1xf32>
    %63 = arith.addf %62, %61 : vector<32x1xf32>
    %cst_43 = arith.constant 1.000000e+00 : f32
    %64 = vector.broadcast %cst_43 : f32 to vector<32x1xf32>
    %65 = arith.divf %64, %63 : vector<32x1xf32>
    %66 = arith.subf %37, %40 : vector<32x64xf32>
    %67 = vector.broadcast %65 : vector<32x1xf32> to vector<32x64xf32>
    %68 = arith.mulf %67, %66 : vector<32x64xf32>
    %69 = arith.addf %40, %68 : vector<32x64xf32>
    %70 = vector.extract_strided_slice %69 {offsets = [0, 0], sizes = [16, 64], strides = [1, 1]} : vector<32x64xf32> to vector<16x64xf32>
    %71 = vector.extract_strided_slice %69 {offsets = [16, 0], sizes = [16, 64], strides = [1, 1]} : vector<32x64xf32> to vector<16x64xf32>
    %72 = tpu.concatenate %70, %34, %71 in 0 : vector<16x64xf32>, vector<256x64xf32>, vector<16x64xf32> -> vector<288x64xf32>
    %73 = tpu.iota {dimensions = array<i32: 0>} : vector<288x1xi32>
    %c16_i32 = arith.constant 16 : i32
    %c0_i32 = arith.constant 0 : i32
    %74 = arith.cmpi eq, %c16_i32, %c0_i32 : i32
    %c1_i32 = arith.constant 1 : i32
    %75 = arith.select %74, %c1_i32, %c16_i32 : i32
    %76 = vector.broadcast %75 : i32 to vector<288x1xi32>
    %77 = arith.remsi %73, %76 : vector<288x1xi32>
    %c0_i32_44 = arith.constant 0 : i32
    %78 = vector.broadcast %c0_i32_44 : i32 to vector<288x1xi32>
    %79 = arith.cmpi ne, %77, %78 : vector<288x1xi32>
    %c0_i32_45 = arith.constant 0 : i32
    %80 = vector.broadcast %c0_i32_45 : i32 to vector<288x1xi32>
    %81 = arith.cmpi slt, %77, %80 : vector<288x1xi32>
    %c0_i32_46 = arith.constant 0 : i32
    %82 = arith.cmpi slt, %75, %c0_i32_46 : i32
    %83 = vector.broadcast %82 : i1 to vector<288x1xi1>
    %84 = vector.broadcast %83 : vector<288x1xi1> to vector<288x1xi1>
    %85 = arith.xori %81, %84 : vector<288x1xi1>
    %86 = arith.andi %85, %79 : vector<288x1xi1>
    %87 = vector.broadcast %75 : i32 to vector<288x1xi32>
    %88 = arith.addi %77, %87 : vector<288x1xi32>
    %89 = arith.select %86, %88, %77 : vector<288x1xi1>, vector<288x1xi32>
    %c0_i32_47 = arith.constant 0 : i32
    %90 = vector.broadcast %c0_i32_47 : i32 to vector<288x1xi32>
    %91 = arith.cmpi eq, %89, %90 : vector<288x1xi32>
    %c1_i32_48 = arith.constant 1 : i32
    %92 = tpu.dynamic_rotate %72 by %c1_i32_48 dim 0 : vector<288x64xf32>, i32 -> vector<288x64xf32>
    %cst_49 = arith.constant 0.000000e+00 : f32
    %93 = vector.shape_cast %91 : vector<288x1xi1> to vector<288x1xi1>
    %94 = vector.broadcast %93 : vector<288x1xi1> to vector<288x64xi1>
    %95 = vector.broadcast %cst_49 : f32 to vector<288x64xf32>
    %96 = arith.select %94, %95, %92 : vector<288x64xi1>, vector<288x64xf32>
    %c15_i32 = arith.constant 15 : i32
    %97 = vector.broadcast %c15_i32 : i32 to vector<288x1xi32>
    %98 = arith.cmpi eq, %89, %97 : vector<288x1xi32>
    %c287_i32 = arith.constant 287 : i32
    %99 = tpu.dynamic_rotate %72 by %c287_i32 dim 0 : vector<288x64xf32>, i32 -> vector<288x64xf32>
    %cst_50 = arith.constant 0.000000e+00 : f32
    %100 = vector.shape_cast %98 : vector<288x1xi1> to vector<288x1xi1>
    %101 = vector.broadcast %100 : vector<288x1xi1> to vector<288x64xi1>
    %102 = vector.broadcast %cst_50 : f32 to vector<288x64xf32>
    %103 = arith.select %101, %102, %99 : vector<288x64xi1>, vector<288x64xf32>
    %104 = arith.truncf %96 : vector<288x64xf32> to vector<288x64xbf16>
    %105 = arith.truncf %72 : vector<288x64xf32> to vector<288x64xbf16>
    %106 = arith.truncf %103 : vector<288x64xf32> to vector<288x64xbf16>
    %107 = tpu.concatenate %104, %105, %106 in 1 : vector<288x64xbf16>, vector<288x64xbf16>, vector<288x64xbf16> -> vector<288x192xbf16>
    %108 = vector.extract_strided_slice %107 {offsets = [0, 0], sizes = [256, 192], strides = [1, 1]} : vector<288x192xbf16> to vector<256x192xbf16>
    %c0_51 = arith.constant 0 : index
    %c0_52 = arith.constant 0 : index
    %c0_53 = arith.constant 0 : index
    %109 = vector.load %arg10[%c0_51, %c0_52, %c0_53] : memref<3x192x64xbf16, #tpu.memory_space<vmem>>, vector<1x192x64xbf16>
    %110 = vector.shape_cast %109 : vector<1x192x64xbf16> to vector<192x64xbf16>
    %cst_54 = arith.constant dense<0.000000e+00> : vector<256x64xf32>
    %111 = tpu.matmul %108, %110, %cst_54 {dimension_numbers = #tpu.dot_dimension_numbers<[1], [0], [0], [1], [0, 0, 1, 1], [], []>} : vector<256x192xbf16>, vector<192x64xbf16>, vector<256x64xf32> -> vector<256x64xf32>
    %112 = vector.extract_strided_slice %107 {offsets = [16, 0], sizes = [256, 192], strides = [1, 1]} : vector<288x192xbf16> to vector<256x192xbf16>
    %c1 = arith.constant 1 : index
    %c0_55 = arith.constant 0 : index
    %c0_56 = arith.constant 0 : index
    %113 = vector.load %arg10[%c1, %c0_55, %c0_56] : memref<3x192x64xbf16, #tpu.memory_space<vmem>>, vector<1x192x64xbf16>
    %114 = vector.shape_cast %113 : vector<1x192x64xbf16> to vector<192x64xbf16>
    %cst_57 = arith.constant dense<0.000000e+00> : vector<256x64xf32>
    %115 = tpu.matmul %112, %114, %cst_57 {dimension_numbers = #tpu.dot_dimension_numbers<[1], [0], [0], [1], [0, 0, 1, 1], [], []>} : vector<256x192xbf16>, vector<192x64xbf16>, vector<256x64xf32> -> vector<256x64xf32>
    %116 = arith.addf %111, %115 : vector<256x64xf32>
    %117 = vector.extract_strided_slice %107 {offsets = [32, 0], sizes = [256, 192], strides = [1, 1]} : vector<288x192xbf16> to vector<256x192xbf16>
    %c2 = arith.constant 2 : index
    %c0_58 = arith.constant 0 : index
    %c0_59 = arith.constant 0 : index
    %118 = vector.load %arg10[%c2, %c0_58, %c0_59] : memref<3x192x64xbf16, #tpu.memory_space<vmem>>, vector<1x192x64xbf16>
    %119 = vector.shape_cast %118 : vector<1x192x64xbf16> to vector<192x64xbf16>
    %cst_60 = arith.constant dense<0.000000e+00> : vector<256x64xf32>
    %120 = tpu.matmul %117, %119, %cst_60 {dimension_numbers = #tpu.dot_dimension_numbers<[1], [0], [0], [1], [0, 0, 1, 1], [], []>} : vector<256x192xbf16>, vector<192x64xbf16>, vector<256x64xf32> -> vector<256x64xf32>
    %121 = arith.addf %116, %120 : vector<256x64xf32>
    %c0_61 = arith.constant 0 : index
    %c0_62 = arith.constant 0 : index
    %122 = vector.load %arg11[%c0_61, %c0_62] : memref<1x64xf32, #tpu.memory_space<vmem>>, vector<1x64xf32>
    %123 = vector.broadcast %122 : vector<1x64xf32> to vector<256x64xf32>
    %124 = arith.addf %121, %123 : vector<256x64xf32>
    %cst_63 = arith.constant 0.000000e+00 : f32
    %125 = vector.broadcast %cst_63 : f32 to vector<256x64xf32>
    %126 = arith.maximumf %124, %125 : vector<256x64xf32>
    %127 = vector.shape_cast %126 : vector<256x64xf32> to vector<16x16x64xf32>
    %c0_64 = arith.constant 0 : index
    %c0_65 = arith.constant 0 : index
    %c0_66 = arith.constant 0 : index
    %c0_67 = arith.constant 0 : index
    %128 = vector.load %arg12[%c0_64, %c0_65, %c0_66, %c0_67] : memref<1x16x16x64xf32, #tpu.memory_space<vmem>>, vector<1x16x16x64xf32>
    %129 = vector.shape_cast %128 : vector<1x16x16x64xf32> to vector<16x16x64xf32>
    %130 = vector.shape_cast %127 : vector<16x16x64xf32> to vector<1x16x16x64xf32>
    tpu.vector_store %arg12[%c0_64, %c0_65, %c0_66, %c0_67], %130 {strides = array<i32>} : memref<1x16x16x64xf32, #tpu.memory_space<vmem>>, vector<1x16x16x64xf32>,
    return
  }
  func.func @transform_0(%arg0: i32, %arg1: i32) -> (i32, i32, i32, i32) {
    %c0_i32 = arith.constant 0 : i32
    %c0_i32_0 = arith.constant 0 : i32
    %c0_i32_1 = arith.constant 0 : i32
    return %arg0, %arg1, %c0_i32, %c0_i32_0 : i32, i32, i32, i32
  }
  func.func @transform_1(%arg0: i32, %arg1: i32) -> (i32, i32, i32, i32) {
    %c0_i32 = arith.constant 0 : i32
    %c0_i32_0 = arith.constant 0 : i32
    %c0_i32_1 = arith.constant 0 : i32
    return %arg0, %arg1, %c0_i32, %c0_i32_0 : i32, i32, i32, i32
  }
  func.func @transform_2(%arg0: i32, %arg1: i32) -> (i32, i32, i32, i32, i32) {
    %c0_i32 = arith.constant 0 : i32
    %c0_i32_0 = arith.constant 0 : i32
    %c0_i32_1 = arith.constant 0 : i32
    %c0_i32_2 = arith.constant 0 : i32
    return %arg0, %arg1, %c0_i32, %c0_i32_0, %c0_i32_1 : i32, i32, i32, i32, i32
  }
  func.func @transform_3(%arg0: i32, %arg1: i32) -> (i32, i32, i32, i32, i32) {
    %c0_i32 = arith.constant 0 : i32
    %c0_i32_0 = arith.constant 0 : i32
    %c0_i32_1 = arith.constant 0 : i32
    %c0_i32_2 = arith.constant 0 : i32
    return %arg0, %arg1, %c0_i32, %c0_i32_0, %c0_i32_1 : i32, i32, i32, i32, i32
  }
  func.func @transform_4(%arg0: i32, %arg1: i32) -> (i32, i32) {
    %c0_i32 = arith.constant 0 : i32
    %c0_i32_0 = arith.constant 0 : i32
    %c0_i32_1 = arith.constant 0 : i32
    return %c0_i32, %c0_i32_0 : i32, i32
  }
  func.func @transform_5(%arg0: i32, %arg1: i32) -> (i32, i32) {
    %c0_i32 = arith.constant 0 : i32
    %c0_i32_0 = arith.constant 0 : i32
    %c0_i32_1 = arith.constant 0 : i32
    return %c0_i32, %c0_i32_0 : i32, i32
  }
  func.func @transform_6(%arg0: i32, %arg1: i32) -> (i32, i32) {
    %c0_i32 = arith.constant 0 : i32
    %c0_i32_0 = arith.constant 0 : i32
    %c0_i32_1 = arith.constant 0 : i32
    return %c0_i32, %c0_i32_0 : i32, i32
  }
  func.func @transform_7(%arg0: i32, %arg1: i32) -> (i32, i32) {
    %c0_i32 = arith.constant 0 : i32
    %c0_i32_0 = arith.constant 0 : i32
    %c0_i32_1 = arith.constant 0 : i32
    return %c0_i32, %c0_i32_0 : i32, i32
  }
  func.func @transform_8(%arg0: i32, %arg1: i32) -> (i32, i32, i32) {
    %c0_i32 = arith.constant 0 : i32
    %c0_i32_0 = arith.constant 0 : i32
    %c0_i32_1 = arith.constant 0 : i32
    %c0_i32_2 = arith.constant 0 : i32
    return %c0_i32, %c0_i32_0, %c0_i32_1 : i32, i32, i32
  }
  func.func @transform_9(%arg0: i32, %arg1: i32) -> (i32, i32) {
    %c0_i32 = arith.constant 0 : i32
    %c0_i32_0 = arith.constant 0 : i32
    %c0_i32_1 = arith.constant 0 : i32
    return %c0_i32, %c0_i32_0 : i32, i32
  }
  func.func @transform_10(%arg0: i32, %arg1: i32) -> (i32, i32, i32, i32) {
    %c0_i32 = arith.constant 0 : i32
    %c0_i32_0 = arith.constant 0 : i32
    %c0_i32_1 = arith.constant 0 : i32
    return %arg0, %arg1, %c0_i32, %c0_i32_0 : i32, i32, i32, i32
  }
}

</mosaic_0001>

<bundles_post_ra>
// kernel: tpu_custom_call.1
= control target key start
LH: loop header
LB: loop body
LE: loop exit
PB: predicated region body
PF: predicated region fallthrough
CT: control target
= control target key end

     0   :  { %s8557_s0 = inlined_call_operand.vmem [shape: f32[2,16,16,64], index: 0, kind: input, shape index: {}]   ;;  %s8558_s1 = inlined_call_operand.hbm [shape: f32[2,16,16,64], index: 1, kind: input, shape index: {}]   ;;  %s8559_s2 = inlined_call_operand.hbm [shape: f32[2,1,2,16,64], index: 2, kind: input, shape index: {}]   ;;  %s8560_s3 = inlined_call_operand.hbm [shape: f32[2,1,2,16,64], index: 3, kind: input, shape index: {}]   ;;  %s8561_s4 = inlined_call_operand.vmem [shape: bf16[128,16], index: 4, kind: input, shape index: {}]   ;;  %s8562_s5 = inlined_call_operand.vmem [shape: f32[1,16], index: 5, kind: input, shape index: {}]   ;;  %s8563_s6 = inlined_call_operand.vmem [shape: f32[1,16], index: 6, kind: input, shape index: {}]   ;;  %s8564_s7 = inlined_call_operand.<no memory space> [shape: f32[1,1], index: 7, kind: input, shape index: {}]   ;;  %s8565_s8 = inlined_call_operand.vmem [shape: bf16[3,192,64], index: 8, kind: input, shape index: {}]   ;;  %s8566_s9 = inlined_call_operand.vmem [shape: f32[1,64], index: 9, kind: input, shape index: {}]   ;;  %s8567_s10 = inlined_call_operand.hbm [shape: f32[2,16,16,64], index: 10, kind: output, shape index: {}]  }
   0x1   :  { %8613 = sst [smem:[#allocation54_spill]] %s8559_s2  ;;  %v15_v0 = vstv %s8564_s7 }
   0x2   :  { %8614 = sst [smem:[#allocation55_spill]] %s8565_s8  ;;  %16 = vst [vmem:[#allocation2] sm:$0x1] %v15_v0 }
   0x3   :  { %8615 = sst [smem:[#allocation56_spill]] %s8566_s9 }
   0x4   :  { %8616 = sst [smem:[#allocation57_spill]] %s8567_s10 }
   0x5   :  { %17 = vsyncpa [#allocation4], 0 }
   0x6   :  { %19 = vsyncpa [#allocation4 + $0x1], 0 }
   0x7   :  { %20 = vsyncpa [#allocation7], 0 }
   0x8   :  { %22 = vsyncpa [#allocation7 + $0x1], 0 }
   0x9   :  { %23 = vsyncpa [#allocation5], 0 }
   0xa   :  { %25 = vsyncpa [#allocation5 + $0x1], 0  ;;  %s5832_s15 = smov 0   ;;  %s5834_s16 = smov 0  }
   0xb   :  { %s5836_s17 = smov 0   ;;  %s5838_s18 = smov 0  }
   0xc   :  { %s5840_s19 = smov 0   ;;  %s5842_s20 = smov 0  }
   0xd LB: > { %8617 = sst [smem:[#allocation13_spill]] %s5746_s15  ;;  %s5863_s7 = sadd.s32 4294967295, %s5766_s20   ;;  %s5766_s20 = sphi %s5842_s20, %s31_s20   ;;  %s5762_s19 = sphi %s5840_s19, %s8848_s19   ;;  %s5758_s18 = sphi %s5838_s18, %s8847_s18   ;;  %s5754_s17 = sphi %s5836_s17, %s8843_s17   ;;  %s5750_s16 = sphi %s5834_s16, %s8846_s16   ;;  %s5746_s15 = sphi %s5832_s15, %s8845_s15  }
   0xe   : > { %8618 = sst [smem:[#allocation14_spill]] %s5754_s17  ;;  %s4914_s21 = sadd.s32 4294967294, %s5766_s20  }
   0xf   : > { %s43_s22 = sadd.s32 1, %s5762_s19  ;;  %s80_s23 = sadd.s32 1, %s5754_s17 }
  0x10   : > { %p45_p0 = scmp.ge.s32.totalorder %s43_s22, 2  ;;  %p87_p1 = scmp.ne.s32.totalorder %s5754_s17, %s5750_s16 }
  0x11   : > { %p88_p2 = scmp.eq.s32.totalorder %s5766_s20, 0  ;;  %p93_p3 = scmp.ne.s32.totalorder %s5750_s16, %s5746_s15 }
  0x12   : > { %s8850_s22 = smov (%p45_p0, %s43_s22), 0  ;;  %p94_p5 = scmp.eq.s32.totalorder %s5863_s7, 0 }
  0x13   : > { %8619 = sst [smem:[#allocation15_spill]] %s8850_s22  ;;  %p5875_p4 = por %p88_p2, %p87_p1 }
  0x14   : > { %s75_s25 = ssub.s32 %s5762_s19, %s8850_s22  ;;  %p301_p6 = scmp.eq.s32.totalorder %s5863_s7, 1 }
  0x15   : > { %p78_p7 = scmp.eq.s32.totalorder %s75_s25, 0  ;;  %p5883_p8 = por %p94_p5, %p93_p3 }
  0x16   : > { %p5887_p9 = por %p301_p6, %p87_p1  ;;  %p307_p10 = scmp.eq.s32.totalorder %s4914_s21, 1 }
  0x17   : > { %s5892_s28 = scalar_select %p78_p7, %s5754_s17, %s80_s23  }
  0x18   : > { %s8622_s27 = scalar_select %p5887_p9, 1, 0 }
  0x19   : > { %8624 = sst [smem:[#allocation17_spill]] %s5892_s28  ;;  %p5894_p11 = por %p307_p10, %p93_p3 }
  0x1a   : > { %8623 = sst [smem:[#allocation16_spill]] %s8622_s27  ;;  %p4916_p12 = scmp.ge.s32.totalorder %s5766_s20, 2 }
  0x1b   : > { %s8625_s29 = scalar_select %p5894_p11, 1, 0 }
  0x1c   : > { %p5301_p13 = scmp.lt.s32.totalorder %s5766_s20, 2  ;;  %s5901_s30 = sand.u32 1, %s5754_s17  }
  0x1d   : > { %8626 = sst [smem:[#allocation18_spill]] %s8625_s29  ;;  %s384_s12 = sand.u32 1, %s5766_s20  }
  0x1e   : > { %p5905_p0 = pnand %p5301_p13, %p5875_p4  ;;  %s4920_s13 = sshll.u32 %s5901_s30, 5 }
  0x1f   : > { %s5211_s14 = sshll.u32 %s5762_s19, 5  ;;  %s388_s21 = scalar_lea.vmem [#allocation6], %s4920_s13 }
  0x20   : > { %s398_s23 = sshll.u32 %s388_s21, 4  ;;  %s8628_s2 = sld [smem:[#allocation54_spill]]  ;;  %s399_s23 = int_to_ptr.vmem [resolvable:$true] %s398_s23 }
  0x21   : > { %s419_s15 = scalar_lea.hbm %s8560_s3, %s5211_s14  ;;  %s385_s27 = scalar_lea.sflag [#allocation7], %s384_s12 }
  0x22   : > { %s5768_s10 = smov 128   ;;  %s5769_s9 = smov 8  }
  0x23   : > { %s420_s21 = sshll.u32 %s419_s15, 4  ;;  %s412_s8 = scalar_lea.vmem [#allocation8], %s4920_s13  ;;  %s421_s21 = int_to_ptr.hbm [resolvable:$true] %s420_s21 }
  0x24   : > { %s422_s22 = sshll.u32 %s412_s8, 4  ;;  %p4926_p1 = scmp.ge.s32.totalorder %s5766_s20, 1  ;;  %s423_s22 = int_to_ptr.vmem [resolvable:$true] %s422_s22 }
  0x25   : > { %p430_p2 = scmp.lt.s32.totalorder %s5766_s20, 3  ;;  %s5210_s25 = sshll.u32 %s5762_s19, 8 }
  0x26   : > { %s395_s28 = scalar_lea.hbm %s8628_s2, %s5211_s14  ;;  %s371_s12 = scalar_lea.hbm %s8558_s1, %s5210_s25 }
  0x27   : > { %s396_s24 = sshll.u32 %s395_s28, 4  ;;  %p431_p3 = pnand %p4926_p1, %p430_p2  ;;  %s397_s24 = int_to_ptr.hbm [resolvable:$true] %s396_s24 }
  0x28   : > { %5293 = dma.hbm_to_vmem [thread:$0]  (!%p5905_p0), %s397_s24, 512, %s399_s23, %s385_s27, %s5768_s10, %s5768_s10, %s5769_s9  }
  0x29   : > { %s4917_s28 = sshll.u32 %s5901_s30, 8  ;;  %s372_s14 = sshll.u32 %s371_s12, 4  ;;  %s373_s14 = int_to_ptr.hbm [resolvable:$true] %s372_s14 }
  0x2a   : > { %s363_s2 = scalar_lea.vmem [#allocation3], %s4917_s28  ;;  %s360_s15 = scalar_lea.sflag [#allocation4], %s5901_s30 }
  0x2b   : > { %s374_s23 = sshll.u32 %s363_s2, 4  ;;  %434 = sbr.rel (%p431_p3) target bundleno = 1523 (0x5f3), region = 60  ;;  %s375_s23 = int_to_ptr.vmem [resolvable:$true] %s374_s23 }
  0x2c   : > { %5290 = dma.hbm_to_vmem [thread:$0]  (!%p5905_p0), %s373_s14, 4096, %s375_s23, %s360_s15, %s5768_s10, %s5768_s10, %s5769_s9  }
  0x2d   : > { %5296 = dma.hbm_to_vmem [thread:$0]  (!%p5905_p0), %s421_s21, 512, %s423_s22, %s385_s27, %s5768_s10, %s5768_s10, %s5769_s9  }
  0x30   : > { %s5933_s8 = sand.u32 1, %s5750_s16  }
  0x31   : > { %s4927_s13 = sshll.u32 %s5933_s8, 8  ;;  %s437_s24 = scalar_lea.sflag [#allocation4], %s5933_s8 }
  0x32   : > { %s5939_s28 = scalar_lea.vmem [#allocation3], %s4927_s13 }
  0x33   : > { %5733 = dma.done.wait (%p5883_p8), %s437_s24, 4096  }
  0x34   : > { %5735 = vsyncadd (%p5883_p8), %s437_s24, 4294963200  ;;  %s446_s2 = sand.u32 1, %s5863_s7   ;;  %s4928_s9 = sshll.u32 %s5933_s8, 5 }
  0x35   : > { %s447_s10 = scalar_lea.sflag [#allocation7], %s446_s2  ;;  %s5949_s27 = scalar_lea.vmem [#allocation6], %s4928_s9 }
  0x36   : > { %5737 = dma.done.wait (%p5883_p8), %s447_s10, 1024  }
  0x37   : > { %5739 = vsyncadd (%p5883_p8), %s447_s10, 4294966272  ;;  %v568_v1 = vld [vmem:[%s5939_s28 + $0x20] sm:$0xff]  ;;  %v569_v2 = vld [vmem:[%s5939_s28 + $0x28] sm:$0xff]  ;;  %s5770_s7 = smov 64   ;;  %s6021_s12 = scalar_lea.vmem [#allocation8], %s4928_s9  ;;  %vm852_vm0 = vcmask 523264  }
  0x38   : > { %v564_v3 = vld [vmem:[%s5939_s28] sm:$0xff]  ;;  %v632_v4 = vpack.c.bf16 %v568_v1, %v568_v1  ;;  %v633_v5 = vpack.c.bf16 %v569_v2, %v569_v2  ;;  %v565_v6 = vld [vmem:[%s5939_s28 + $0x8] sm:$0xff]  ;;  %v570_v13 = vld [vmem:[%s5939_s28 + $0x30] sm:$0xff]  ;;  %p519_p4 = scmp.lt.s32.totalorder %s5758_s18, 1  ;;  %vm1142_vm1 = vcmask 130048   ;;  %s8837_s17 = sld [smem:[#allocation57_spill]] }
  0x39   : > { %v628_v7 = vpack.c.bf16 %v564_v3, %v564_v3  ;;  %v572_v8 = vld [vmem:[%s5939_s28 + $0x40] sm:$0xff]  ;;  %v573_v9 = vld [vmem:[%s5939_s28 + $0x48] sm:$0xff]  ;;  %v629_v10 = vpack.c.bf16 %v565_v6, %v565_v6  ;;  %v571_v14 = vld [vmem:[%s5939_s28 + $0x38] sm:$0xff]  ;;  %v634_v19 = vpack.c.bf16 %v570_v13, %v570_v13  ;;  %s4738_s23 = scalar_lea.sflag [#allocation5], %s5933_s8 }
  0x3a   : > { %v636_v11 = vpack.c.bf16 %v572_v8, %v572_v8  ;;  %v637_v12 = vpack.c.bf16 %v573_v9, %v573_v9  ;;  %v574_v15 = vld [vmem:[%s5939_s28 + $0x50] sm:$0xff]  ;;  %v776_v16 = vunpack.c.l.b16 %v632_v4  ;;  %v777_v17 = vunpack.c.l.b16 %v633_v5  ;;  %v575_v20 = vld [vmem:[%s5939_s28 + $0x58] sm:$0xff]  ;;  %v580_v41 = vld [vmem:[%s5939_s28 + $0x80] sm:$0xff]  ;;  %s520_s30 = scalar_select %p519_p4, %s5758_s18, 1 }
  0x3b   : > { %v772_v18 = vunpack.c.l.b16 %v628_v7  ;;  %v773_v21 = vunpack.c.l.b16 %v629_v10  ;;  %v635_v24 = vpack.c.bf16 %v571_v14, %v571_v14  ;;  %v566_v25 = vld [vmem:[%s5939_s28 + $0x10] sm:$0xff]  ;;  %v638_v27 = vpack.c.bf16 %v574_v15, %v574_v15  ;;  %v567_v29 = vld [vmem:[%s5939_s28 + $0x18] sm:$0xff]  ;;  %v581_v42 = vld [vmem:[%s5939_s28 + $0x88] sm:$0xff] }
  0x3c   : > { %v780_v22 = vunpack.c.l.b16 %v636_v11  ;;  %v781_v23 = vunpack.c.l.b16 %v637_v12  ;;  %v806_v26 = vpack.c.b16 %v777_v17, %v776_v16  ;;  %v639_v28 = vpack.c.bf16 %v575_v20, %v575_v20  ;;  %v578_v37 = vld [vmem:[%s5939_s28 + $0x70] sm:$0xff]  ;;  %v579_v38 = vld [vmem:[%s5939_s28 + $0x78] sm:$0xff]  ;;  %v576_v47 = vld [vmem:[%s5939_s28 + $0x60] sm:$0xff]  ;;  %s5213_s11 = sshll.u32 %s520_s30, 8  ;;  %s8631_s30 = sld [smem:[#allocation55_spill]] }
  0x3d   : > { %v804_v30 = vpack.c.b16 %v773_v21, %v772_v18  ;;  %v778_v32 = vunpack.c.l.b16 %v634_v19  ;;  %v779_v33 = vunpack.c.l.b16 %v635_v24  ;;  %v630_v34 = vpack.c.bf16 %v566_v25, %v566_v25  ;;  %v577_v48 = vld [vmem:[%s5939_s28 + $0x68] sm:$0xff]  ;;  %v584_v57 = vld [vmem:[%s5939_s28 + $0xa0] sm:$0xff]  ;;  %v590_v61 = vld [vmem:[%s5939_s28 + $0xd0] sm:$0xff]  ;;  %s6053_s25 = scalar_lea.vmem %s8557_s0, %s5213_s11  ;;  %s8307_s11 = scalar_lea.vmem [#allocation9], %s4927_s13 }
  0x3e   : > { %v808_v31 = vpack.c.b16 %v781_v23, %v780_v22  ;;  %824 = vrot.lane.b32.xlu1 %v806_v26, %s5770_s7  ;;  %v782_v35 = vunpack.c.l.b16 %v638_v27  ;;  %v783_v36 = vunpack.c.l.b16 %v639_v28  ;;  %v631_v39 = vpack.c.bf16 %v567_v29, %v567_v29  ;;  %v585_v58 = vld [vmem:[%s5939_s28 + $0xa8] sm:$0xff]  ;;  %v591_v62 = vld [vmem:[%s5939_s28 + $0xd8] sm:$0xff]  ;;  %v582_v1 = vld [vmem:[%s5939_s28 + $0x90] sm:$0xff]  ;;  %s5258_s13 = sshll.u32 %s5758_s18, 8  ;;  %s8838_s29 = smov %s8837_s17 }
  0x3f   : > { %820 = vrot.lane.b32.xlu0 %v804_v30, %s5770_s7  ;;  %v774_v40 = vunpack.c.l.b16 %v630_v34  ;;  %v807_v44 = vpack.c.b16 %v779_v33, %v778_v32  ;;  %v642_v45 = vpack.c.bf16 %v578_v37, %v578_v37  ;;  %v643_v46 = vpack.c.bf16 %v579_v38, %v579_v38  ;;  %v583_v2 = vld [vmem:[%s5939_s28 + $0x98] sm:$0xff]  ;;  %v5994_v9 = vld [vmem:[%s8561_s4 + $0x30] sm:$0xff]  ;;  %v6002_v16 = vld [vmem:[%s8561_s4 + $0x28] sm:$0xff]  ;;  %s4752_s14 = scalar_lea.hbm %s8837_s17, %s5258_s13  ;;  %s5700_s10 = scalar_lea.hbm %s8838_s29, 512 }
  0x40   : > { %828 = vrot.lane.b32.xlu2 %v808_v31, %s5770_s7  ;;  %v775_v43 = vunpack.c.l.b16 %v631_v39  ;;  %v809_v49 = vpack.c.b16 %v783_v36, %v782_v35  ;;  %v644_v51 = vpack.c.bf16 %v580_v41, %v580_v41  ;;  %v645_v52 = vpack.c.bf16 %v581_v42, %v581_v42  ;;  %v5988_v3 = vld [vmem:[%s8561_s4 + $0x38] sm:$0xff]  ;;  %v592_v19 = vld [vmem:[%s5939_s28 + $0xe0] sm:$0xff]  ;;  %v593_v20 = vld [vmem:[%s5939_s28 + $0xe8] sm:$0xff]  ;;  %s4755_s18 = sshll.u32 %s4752_s14, 4  ;;  %s4756_s18 = int_to_ptr.hbm [resolvable:$true] %s4755_s18 }
  0x41   : > { %v640_v53 = vpack.c.bf16 %v576_v47, %v576_v47  ;;  %v641_v54 = vpack.c.bf16 %v577_v48, %v577_v48  ;;  %v786_v55 = vunpack.c.l.b16 %v642_v45  ;;  %v787_v56 = vunpack.c.l.b16 %v643_v46  ;;  %985 = vmatpush.bf16.msra.mxu0 %v5988_v3  ;;  %5259 = vmatpush.bf16.msra.mxu1 %v5988_v3  ;;  %v586_v23 = vld [vmem:[%s5939_s28 + $0xb0] sm:$0xff]  ;;  %v587_v24 = vld [vmem:[%s5939_s28 + $0xb8] sm:$0xff]  ;;  %v2143_v37 = vld [vmem:[%s6021_s12] sm:$0xff]  ;;  %s5694_s15 = sshra.s32 %s4756_s18, 4  ;;  %s5695_s15 = int_to_ptr.hbm [resolvable:$true] %s5694_s15 }
  0x42   : > { %v805_v50 = vpack.c.b16 %v775_v43, %v774_v40  ;;  %v788_v59 = vunpack.c.l.b16 %v644_v51  ;;  %v789_v60 = vunpack.c.l.b16 %v645_v52  ;;  %v648_v4 = vpack.c.bf16 %v584_v57, %v584_v57  ;;  %v5218_v28 = vld [vmem:[%s8561_s4 + $0x20] sm:$0xff]  ;;  %v2144_v38 = vld [vmem:[%s6021_s12 + $0x8] sm:$0xff]  ;;  %v594_v39 = vld [vmem:[%s5939_s28 + $0xf0] sm:$0xff]  ;;  %s5696_s24 = scalar_lea.hbm %s5695_s15, 256  ;;  %p5701_p8 = scmp.lt.s32.totalorder %s5695_s15, %s8838_s29 }
  0x43   : > { %v784_v63 = vunpack.c.l.b16 %v640_v53  ;;  %v785_v0 = vunpack.c.l.b16 %v641_v54  ;;  %v649_v5 = vpack.c.bf16 %v585_v58, %v585_v58  ;;  %v811_v6 = vpack.c.b16 %v787_v56, %v786_v55  ;;  %v595_v40 = vld [vmem:[%s5939_s28 + $0xf8] sm:$0xff]  ;;  %v5216_v54 = vld [vmem:[%s8561_s4 + $0x10] sm:$0xff]  ;;  %v5215_v55 = vld [vmem:[%s8561_s4 + $0x8] sm:$0xff]  ;;  %p5697_p5 = scmp.ne.s32.totalorder %s5695_s15, %s5696_s24  ;;  %p5702_p10 = scmp.lt.s32.totalorder %s5700_s10, %s5696_s24 }
  0x44   : > { %v654_v7 = vpack.c.bf16 %v590_v61, %v590_v61  ;;  %v655_v8 = vpack.c.bf16 %v591_v62, %v591_v62  ;;  %v812_v10 = vpack.c.b16 %v789_v60, %v788_v59  ;;  %v646_v12 = vpack.c.bf16 %v582_v1, %v582_v1  ;;  %v5217_v53 = vld [vmem:[%s8561_s4 + $0x18] sm:$0xff]  ;;  %v5214_v56 = vld [vmem:[%s8561_s4] sm:$0xff]  ;;  %v533_v60 = vld [vmem:[%s6053_s25 + $0x8] sm:$0xff] }
  0x45   : > { %v810_v11 = vpack.c.b16 %v785_v0, %v784_v63  ;;  %v647_v13 = vpack.c.bf16 %v583_v2, %v583_v2  ;;  %v792_v14 = vunpack.c.l.b16 %v648_v4  ;;  %v793_v15 = vunpack.c.l.b16 %v649_v5  ;;  %986 = vmatpush.bf16.msra.mxu0 %v5994_v9  ;;  %5260 = vmatpush.bf16.msra.mxu1 %v5994_v9  ;;  %v532_v59 = vld [vmem:[%s6053_s25] sm:$0xff]  ;;  %v558_v61 = vld [vmem:[%s6053_s25 + $0xd0] sm:$0xff]  ;;  %v559_v62 = vld [vmem:[%s6053_s25 + $0xd8] sm:$0xff]  ;;  %p5698_p6 = pnand %p5697_p5, %p5887_p9  ;;  %p5703_p13 = por %p5702_p10, %p5701_p8 }
  0x46   : > { %826 = vrot.lane.b32.xlu1 %v807_v44, %s5770_s7  ;;  %v798_v17 = vunpack.c.l.b16 %v654_v7  ;;  %v799_v18 = vunpack.c.l.b16 %v655_v8  ;;  %v790_v21 = vunpack.c.l.b16 %v646_v12  ;;  %v656_v26 = vpack.c.bf16 %v592_v19, %v592_v19 }
  0x47   : > { %822 = vrot.lane.b32.xlu0 %v805_v50, %s5770_s7  ;;  %v791_v22 = vunpack.c.l.b16 %v647_v13  ;;  %v814_v25 = vpack.c.b16 %v793_v15, %v792_v14  ;;  %v657_v27 = vpack.c.bf16 %v593_v20, %v593_v20  ;;  %v650_v31 = vpack.c.bf16 %v586_v23, %v586_v23  ;;  %v534_v13 = vld [vmem:[%s6053_s25 + $0x10] sm:$0xff]  ;;  %v535_v14 = vld [vmem:[%s6053_s25 + $0x18] sm:$0xff]  ;;  %p5699_p7 = pneg %p5698_p6 }
  0x48   : > { %830 = vrot.lane.b32.xlu2 %v809_v49, %s5770_s7  ;;  %v817_v29 = vpack.c.b16 %v799_v18, %v798_v17  ;;  %v651_v32 = vpack.c.bf16 %v587_v24, %v587_v24  ;;  %v800_v33 = vunpack.c.l.b16 %v656_v26  ;;  %v2151_v42 = vpack.c.bf16 %v2143_v37, %v2143_v37 }
  0x49   : > { %987 = vmatpush.bf16.msra.mxu0 %v6002_v16  ;;  %v813_v30 = vpack.c.b16 %v791_v22, %v790_v21  ;;  %5261 = vmatpush.bf16.msra.mxu1 %v6002_v16  ;;  %v801_v34 = vunpack.c.l.b16 %v657_v27  ;;  %v794_v35 = vunpack.c.l.b16 %v650_v31  ;;  %v2152_v43 = vpack.c.bf16 %v2144_v38, %v2144_v38  ;;  %v560_v27 = vld [vmem:[%s6053_s25 + $0xe0] sm:$0xff]  ;;  %p5704_p0 = pnand %p5703_p13, %p5699_p7 }
  0x4a   : > { %v795_v36 = vunpack.c.l.b16 %v651_v32  ;;  %v658_v45 = vpack.c.bf16 %v594_v39, %v594_v39  ;;  %v659_v46 = vpack.c.bf16 %v595_v40, %v595_v40  ;;  %v2169_v47 = vunpack.c.l.b16 %v2151_v42 }
  0x4b   : > { %v818_v41 = vpack.c.b16 %v801_v34, %v800_v33  ;;  %v2170_v48 = vunpack.c.l.b16 %v2152_v43  ;;  %v596_v63 = vpack.c.bf16 %v532_v59, %v532_v59  ;;  %v597_v0 = vpack.c.bf16 %v533_v60, %v533_v60 }
  0x4c   : > { %v815_v44 = vpack.c.b16 %v795_v36, %v794_v35  ;;  %v802_v49 = vunpack.c.l.b16 %v658_v45  ;;  %v803_v50 = vunpack.c.l.b16 %v659_v46  ;;  %v622_v1 = vpack.c.bf16 %v558_v61, %v558_v61  ;;  %v563_v45 = vld [vmem:[%s6053_s25 + $0xf8] sm:$0xff] }
  0x4d   : > { %988 = vmatpush.bf16.msra.mxu0 %v5218_v28  ;;  %5262 = vmatpush.bf16.msra.mxu1 %v5218_v28  ;;  %v2173_v51 = vpack.c.b16 %v2170_v48, %v2169_v47  ;;  %v623_v2 = vpack.c.bf16 %v559_v62, %v559_v62  ;;  %v692_v4 = vunpack.c.l.b16 %v596_v63  ;;  %v693_v5 = vunpack.c.l.b16 %v597_v0 }
  0x4e   : > { %834 = vrot.lane.b32.xlu1 %v811_v6, %s5770_s7  ;;  %v819_v52 = vpack.c.b16 %v803_v50, %v802_v49  ;;  %v718_v6 = vunpack.c.l.b16 %v622_v1  ;;  %v598_v17 = vpack.c.bf16 %v534_v13, %v534_v13  ;;  %v599_v18 = vpack.c.bf16 %v535_v14, %v535_v14  ;;  %v538_v49 = vld [vmem:[%s6053_s25 + $0x30] sm:$0xff]  ;;  %v539_v50 = vld [vmem:[%s6053_s25 + $0x38] sm:$0xff]  ;;  %v2139_v1 = vld [vmem:[%s5949_s27] sm:$0xff] }
  0x4f   : > { %832 = vrot.lane.b32.xlu0 %v810_v11, %s5770_s7  ;;  %v719_v7 = vunpack.c.l.b16 %v623_v2  ;;  %v724_v8 = vpack.c.b16 %v693_v5, %v692_v4  ;;  %v624_v31 = vpack.c.bf16 %v560_v27, %v560_v27  ;;  %v2140_v2 = vld [vmem:[%s5949_s27 + $0x8] sm:$0xff]  ;;  %v540_v5 = vld [vmem:[%s6053_s25 + $0x40] sm:$0xff] }
  0x50   : > { %836 = vrot.lane.b32.xlu2 %v812_v10, %s5770_s7  ;;  %v694_v20 = vunpack.c.l.b16 %v598_v17  ;;  %v695_v21 = vunpack.c.l.b16 %v599_v18  ;;  %v604_v13 = vpack.c.bf16 %v540_v5, %v540_v5  ;;  %v6120_v5 = vld [vmem:[%s8562_s5] ss:$0 sm:$0xff] }
  0x51   : > { %989 = vmatpush.bf16.msra.mxu0 %v5217_v53  ;;  %5263 = vmatpush.bf16.msra.mxu1 %v5217_v53  ;;  %v720_v36 = vunpack.c.l.b16 %v624_v31 }
  0x52   : > { %v725_v23 = vpack.c.b16 %v695_v21, %v694_v20  ;;  %v700_v20 = vunpack.c.l.b16 %v604_v13 }
  0x55   : > { %990 = vmatpush.bf16.msra.mxu0 %v5216_v54  ;;  %5264 = vmatpush.bf16.msra.mxu1 %v5216_v54 }
  0x56   : > { %840 = vrot.lane.b32.xlu1 %v814_v25, %s5770_s7 }
  0x57   : > { %838 = vrot.lane.b32.xlu0 %v813_v30, %s5770_s7  ;;  %v537_v30 = vld [vmem:[%s6053_s25 + $0x28] sm:$0xff] }
  0x58   : > { %846 = vrot.lane.b32.xlu2 %v817_v29, %s5770_s7  ;;  %v536_v29 = vld [vmem:[%s6053_s25 + $0x20] sm:$0xff]  ;;  %v601_v34 = vpack.c.bf16 %v537_v30, %v537_v30 }
  0x59   : > { %991 = vmatpush.bf16.msra.mxu0 %v5215_v55  ;;  %5265 = vmatpush.bf16.msra.mxu1 %v5215_v55  ;;  %v600_v33 = vpack.c.bf16 %v536_v29, %v536_v29  ;;  %v2146_v29 = vld [vmem:[%s6021_s12 + $0x18] sm:$0xff] }
  0x5a   : > { %v697_v40 = vunpack.c.l.b16 %v601_v34  ;;  %v2154_v31 = vpack.c.bf16 %v2146_v29, %v2146_v29  ;;  %v543_v34 = vld [vmem:[%s6053_s25 + $0x58] sm:$0xff] }
  0x5b   : > { %v696_v39 = vunpack.c.l.b16 %v600_v33  ;;  %v542_v33 = vld [vmem:[%s6053_s25 + $0x50] sm:$0xff] }
  0x5d   : > { %992 = vmatpush.bf16.msra.mxu0 %v5214_v56  ;;  %5266 = vmatpush.bf16.msra.mxu1 %v5214_v56  ;;  %v726_v42 = vpack.c.b16 %v697_v40, %v696_v39  ;;  %v606_v40 = vpack.c.bf16 %v542_v33, %v542_v33 }
  0x5e   : > { %848 = vrot.lane.b32.xlu1 %v818_v41, %s5770_s7 }
  0x5f   : > { %842 = vrot.lane.b32.xlu0 %v815_v44, %s5770_s7  ;;  %v562_v44 = vld [vmem:[%s6053_s25 + $0xf0] sm:$0xff] }
  0x61   : > { %2187 = vmatpush.bf16.msrb.mxu1 %v5988_v3 }
  0x65   : > { %2188 = vmatpush.bf16.msrb.mxu1 %v5994_v9  ;;  %v737_v9 = vpack.c.b16 %v719_v7, %v718_v6  ;;  %v541_v6 = vld [vmem:[%s6053_s25 + $0x48] sm:$0xff]  ;;  %v2147_v7 = vpack.c.bf16 %v2139_v1, %v2139_v1 }
  0x66   : > { %2175 = vrot.lane.b32.xlu1 %v2173_v51, %s5770_s7  ;;  %v626_v51 = vpack.c.bf16 %v562_v44, %v562_v44  ;;  %v605_v14 = vpack.c.bf16 %v541_v6, %v541_v6 }
  0x67   : > { %850 = vrot.lane.b32.xlu0 %v819_v52, %s5770_s7  ;;  %v627_v52 = vpack.c.bf16 %v563_v45, %v563_v45  ;;  %v2159_v17 = vunpack.c.l.b16 %v2147_v7  ;;  %v544_v45 = vld [vmem:[%s6053_s25 + $0x60] sm:$0xff] }
  0x68   : > { %v701_v21 = vunpack.c.l.b16 %v605_v14  ;;  %v550_v14 = vld [vmem:[%s6053_s25 + $0x90] sm:$0xff] }
  0x69   : > { %2189 = vmatpush.bf16.msrb.mxu1 %v6002_v16 }
  0x6d   : > { %2190 = vmatpush.bf16.msrb.mxu1 %v5218_v28  ;;  %v561_v28 = vld [vmem:[%s6053_s25 + $0xe8] sm:$0xff] }
  0x6e   : > { %v625_v32 = vpack.c.bf16 %v561_v28, %v561_v28  ;;  %v2145_v28 = vld [vmem:[%s6021_s12 + $0x10] sm:$0xff] }
  0x6f   : > { %v2153_v30 = vpack.c.bf16 %v2145_v28, %v2145_v28 }
  0x70   : > { %v721_v37 = vunpack.c.l.b16 %v625_v32 }
  0x71   : > { %2191 = vmatpush.bf16.msrb.mxu1 %v5217_v53  ;;  %v602_v53 = vpack.c.bf16 %v538_v49, %v538_v49 }
  0x72   : > { %v738_v41 = vpack.c.b16 %v721_v37, %v720_v36  ;;  %v2171_v36 = vunpack.c.l.b16 %v2153_v30  ;;  %v2172_v37 = vunpack.c.l.b16 %v2154_v31 }
  0x73   : > { %v698_v59 = vunpack.c.l.b16 %v602_v53 }
  0x74   : > { %v2174_v39 = vpack.c.b16 %v2172_v37, %v2171_v36 }
  0x75   : > { %2192 = vmatpush.bf16.msrb.mxu1 %v5216_v54  ;;  %v603_v54 = vpack.c.bf16 %v539_v50, %v539_v50 }
  0x77   : > { %v699_v60 = vunpack.c.l.b16 %v603_v54  ;;  %v546_v54 = vld [vmem:[%s6053_s25 + $0x70] sm:$0xff] }
  0x79   : > { %2193 = vmatpush.bf16.msrb.mxu1 %v5215_v55  ;;  %v722_v55 = vunpack.c.l.b16 %v626_v51  ;;  %v727_v63 = vpack.c.b16 %v699_v60, %v698_v59 }
  0x7d   : > { %2194 = vmatpush.bf16.msrb.mxu1 %v5214_v56  ;;  %v723_v56 = vunpack.c.l.b16 %v627_v52 }
  0x7f   : > { %v739_v61 = vpack.c.b16 %v723_v56, %v722_v55  ;;  %v547_v55 = vld [vmem:[%s6053_s25 + $0x78] sm:$0xff]  ;;  %v610_v56 = vpack.c.bf16 %v546_v54, %v546_v54 }
  0x80   : > { %v611_v59 = vpack.c.bf16 %v547_v55, %v547_v55 }
  0x81   : > { %v706_v60 = vunpack.c.l.b16 %v610_v56 }
  0x9a   : > { %v6048_v57 = vpop.permute.xlu2 %828 }
  0xa2   : > { %v6055_v58 = vpop.permute.xlu2 %830 }
  0xaa   : > { %v6061_v3 = vpop.permute.xlu2 %836 }
  0xb0   : > { %v825_v10 = vpop.permute.xlu1 %824 }
  0xb1   : > { %v821_v11 = vpop.permute.xlu0 %820  ;;  %v863_v47 = vsel %vm852_vm0, %v726_v42, %v825_v10  ;;  %v589_v10 = vld [vmem:[%s5939_s28 + $0xc8] sm:$0xff]  ;;  %v702_v42 = vunpack.c.l.b16 %v606_v40 }
  0xb2   : > { %v847_v12 = vpop.permute.xlu2 %846  ;;  %v855_v15 = vsel %vm852_vm0, %v724_v8, %v821_v11  ;;  %v2148_v8 = vpack.c.bf16 %v2140_v2, %v2140_v2 }
  0xb3   : > { %v907_v16 = vsel %vm852_vm0, %v737_v9, %v847_v12  ;;  %993 = vmatmul.bf16.vlgmr.msra.gmra.mxu0 %v855_v15  ;;  %v588_v9 = vld [vmem:[%s5939_s28 + $0xc0] sm:$0xff]  ;;  %v653_v12 = vpack.c.bf16 %v589_v10, %v589_v10  ;;  %v6127_v10 = vld [vmem:[%s8563_s6] ss:$0 sm:$0xff] }
  0xb4   : > { %1058 = vmatmul.bf16.vlgmr.msra.gmra.mxu1 %v907_v16  ;;  %v652_v11 = vpack.c.bf16 %v588_v9, %v588_v9  ;;  %v2160_v18 = vunpack.c.l.b16 %v2148_v8 }
  0xb5   : > { %v797_v16 = vunpack.c.l.b16 %v653_v12 }
  0xb6   : > { %v796_v15 = vunpack.c.l.b16 %v652_v11 }
  0xb8   : > { %v827_v19 = vpop.permute.xlu1 %826 }
  0xb9   : > { %v823_v22 = vpop.permute.xlu0 %822  ;;  %v867_v4 = vsel %vm852_vm0, %v727_v63, %v827_v19  ;;  %v816_v19 = vpack.c.b16 %v797_v16, %v796_v15  ;;  %v548_v63 = vld [vmem:[%s6053_s25 + $0x80] sm:$0xff]  ;;  %v551_v15 = vld [vmem:[%s6053_s25 + $0x98] sm:$0xff] }
  0xba   : > { %v859_v25 = vsel %vm852_vm0, %v725_v23, %v823_v22  ;;  %v2163_v22 = vpack.c.b16 %v2160_v18, %v2159_v17  ;;  %v612_v1 = vpack.c.bf16 %v548_v63, %v548_v63  ;;  %v614_v18 = vpack.c.bf16 %v550_v14, %v550_v14  ;;  %v554_v63 = vld [vmem:[%s6053_s25 + $0xb0] sm:$0xff] }
  0xbb   : > { %844 = vrot.lane.b32.xlu2 %v816_v19, %s5770_s7  ;;  %v615_v19 = vpack.c.bf16 %v551_v15, %v551_v15 }
  0xbd   : > { %v711_v28 = vunpack.c.l.b16 %v615_v19 }
  0xc0   : > { %v6067_v24 = vpop.permute.xlu1 %834 }
  0xc1   : > { %v6070_v26 = vpop.permute.xlu0 %832 }
  0xc3   : > { %998 = vmatmul.bf16.gmra.mxu0 %v859_v25  ;;  %v728_v25 = vpack.c.b16 %v701_v21, %v700_v20  ;;  %2177 = vrot.lane.b32.xlu2 %v2174_v39, %s5770_s7 }
  0xc5   : > { %v871_v32 = vsel %vm852_vm0, %v728_v25, %v6048_v57 }
  0xc8   : > { %v6076_v35 = vpop.permute.xlu1 %840 }
  0xc9   : > { %v6078_v38 = vpop.permute.xlu0 %838 }
  0xd0   : > { %v849_v43 = vpop.permute.xlu1 %848 }
  0xd1   : > { %v911_v46 = vsel %vm852_vm0, %v738_v41, %v849_v43  ;;  %v6084_v48 = vpop.permute.xlu0 %842  ;;  %v607_v41 = vpack.c.bf16 %v543_v34, %v543_v34 }
  0xd2   : > { %1063 = vmatmul.bf16.gmra.mxu1 %v911_v46  ;;  %v545_v46 = vld [vmem:[%s6053_s25 + $0x68] sm:$0xff] }
  0xd3   : > { %1003 = vmatmul.bf16.gmra.mxu0 %v863_v47  ;;  %v703_v43 = vunpack.c.l.b16 %v607_v41  ;;  %v608_v47 = vpack.c.bf16 %v544_v45, %v544_v45  ;;  %v609_v49 = vpack.c.bf16 %v545_v46, %v545_v46  ;;  %v552_v41 = vld [vmem:[%s6053_s25 + $0xa0] sm:$0xff] }
  0xd4   : > { %v616_v45 = vpack.c.bf16 %v552_v41, %v552_v41 }
  0xd5   : > { %v729_v44 = vpack.c.b16 %v703_v43, %v702_v42  ;;  %v704_v50 = vunpack.c.l.b16 %v608_v47  ;;  %v705_v51 = vunpack.c.l.b16 %v609_v49  ;;  %v553_v42 = vld [vmem:[%s6053_s25 + $0xa8] sm:$0xff] }
  0xd6   : > { %v617_v46 = vpack.c.bf16 %v553_v42, %v553_v42 }
  0xd7   : > { %v875_v57 = vsel %vm852_vm0, %v729_v44, %v6055_v58  ;;  %v730_v52 = vpack.c.b16 %v705_v51, %v704_v50 }
  0xd8   : > { %v2176_v23 = vpop.permute.xlu1 %2175  ;;  %v713_v50 = vunpack.c.l.b16 %v617_v46 }
  0xd9   : > { %v851_v62 = vpop.permute.xlu0 %850  ;;  %v2181_v27 = vsel %vm852_vm0, %v2163_v22, %v2176_v23  ;;  %v879_v53 = vsel %vm852_vm0, %v730_v52, %v6070_v26 }
  0xda   : > { %v915_v0 = vsel %vm852_vm0, %v739_v61, %v851_v62  ;;  %v707_v61 = vunpack.c.l.b16 %v611_v59 }
  0xdc   : > { %v731_v62 = vpack.c.b16 %v707_v61, %v706_v60 }
  0xde   : > { %v883_v58 = vsel %vm852_vm0, %v731_v62, %v6067_v24 }
  0xe2   : > { %1068 = vmatmul.bf16.gmra.mxu1 %v915_v0  ;;  %v549_v0 = vld [vmem:[%s6053_s25 + $0x88] sm:$0xff] }
  0xe3   : > { %1008 = vmatmul.bf16.gmra.mxu0 %v867_v4  ;;  %v613_v2 = vpack.c.bf16 %v549_v0, %v549_v0  ;;  %v708_v4 = vunpack.c.l.b16 %v612_v1  ;;  %v555_v0 = vld [vmem:[%s6053_s25 + $0xb8] sm:$0xff] }
  0xe4   : > { %v2141_v1 = vld [vmem:[%s5949_s27 + $0x10] sm:$0xff] }
  0xe5   : > { %v709_v26 = vunpack.c.l.b16 %v613_v2  ;;  %v2142_v2 = vld [vmem:[%s5949_s27 + $0x18] sm:$0xff] }
  0xe7   : > { %v732_v6 = vpack.c.b16 %v709_v26, %v708_v4  ;;  %v2149_v26 = vpack.c.bf16 %v2141_v1, %v2141_v1 }
  0xe9   : > { %v887_v11 = vsel %vm852_vm0, %v732_v6, %v6061_v3  ;;  %v2150_v6 = vpack.c.bf16 %v2142_v2, %v2142_v2 }
  0xf2   : > { %2195 = vmatmul.bf16.vlgmr.msrb.gmra.mxu1 %v2181_v27  ;;  %v710_v27 = vunpack.c.l.b16 %v614_v18 }
  0xf3   : > { %1013 = vmatmul.bf16.gmra.mxu0 %v871_v32 }
  0xf4   : > { %v733_v32 = vpack.c.b16 %v711_v28, %v710_v27 }
  0xf6   : > { %v891_v39 = vsel %vm852_vm0, %v733_v32, %v6078_v38  ;;  %v712_v38 = vunpack.c.l.b16 %v616_v45 }
 0x103   : > { %1018 = vmatmul.bf16.gmra.mxu0 %v875_v57 }
 0x113   : > { %1023 = vmatmul.bf16.gmra.mxu0 %v879_v53  ;;  %v734_v53 = vpack.c.b16 %v713_v50, %v712_v38 }
 0x115   : > { %v6154_v60 = vpop.permute.xlu2 %844 }
 0x11d   : > { %v2178_v18 = vpop.permute.xlu2 %2177 }
 0x123   : > { %1028 = vmatmul.bf16.gmra.mxu0 %v883_v58  ;;  %v895_v58 = vsel %vm852_vm0, %v734_v53, %v6076_v35 }
 0x130   : > { %v994_v7 = vpop.f32.mrf.mxu0 }
 0x131   : > { %v1059_v8 = vpop.f32.mrf.mxu1  ;;  %v995_v9 = vadd.f32 %v6120_v5, %v994_v7  ;;  %v618_v7 = vpack.c.bf16 %v554_v63, %v554_v63 }
 0x132   : > { %v1060_v24 = vadd.f32 %v6120_v5, %v1059_v8  ;;  %v619_v8 = vpack.c.bf16 %v555_v0, %v555_v0 }
 0x133   : > { %v1074_v12 = vmax.f32 %v995_v9, 0.0  ;;  %1033 = vmatmul.bf16.gmra.mxu0 %v887_v11  ;;  %v2161_v11 = vunpack.c.l.b16 %v2149_v26 }
 0x134   : > { %v1100_v13 = vmax.f32 %v1060_v24, 0.0 }
 0x135   : > { %v1110_v16 = vmul.f32 %v6127_v10, %v1074_v12  ;;  %v2162_v12 = vunpack.c.l.b16 %v2150_v6 }
 0x136   : > { %v1136_v17 = vmul.f32 %v6127_v10, %v1100_v13 }
 0x137   : > { %v1143_v20 = vsel %vm1142_vm1, %v1110_v16, 0.0  ;;  %v2164_v15 = vpack.c.b16 %v2162_v12, %v2161_v11 }
 0x138   : > { %v1221_v21 = vsel %vm1142_vm1, %v1136_v17, 0.0  ;;  %v996_v22 = vpop.f32.mrf.mxu0  ;;  %1144 = vadd.xlane.f32.xlu1 %v1143_v20  ;;  %v714_v17 = vunpack.c.l.b16 %v618_v7 }
 0x139   : > { %v1061_v23 = vpop.f32.mrf.mxu1  ;;  %1222 = vadd.xlane.f32.xlu0 %v1221_v21  ;;  %v997_v3 = vadd.f32 %v6120_v5, %v996_v22  ;;  %v715_v21 = vunpack.c.l.b16 %v619_v8  ;;  %v2185_v22 = vsel %vm852_vm0, %v2164_v15, %v2178_v18 }
 0x13a   : > { %v1062_v25 = vadd.f32 %v6120_v5, %v1061_v23  ;;  %2200 = vmatmul.bf16.gmra.mxu1 %v2185_v22 }
 0x13b   : > { %v1075_v29 = vmax.f32 %v997_v3, 0.0 }
 0x13c   : > { %v1101_v30 = vmax.f32 %v1062_v25, 0.0 }
 0x13d   : > { %v1111_v31 = vmul.f32 %v6127_v10, %v1075_v29  ;;  %v735_v29 = vpack.c.b16 %v715_v21, %v714_v17 }
 0x13e   : > { %v1137_v37 = vmul.f32 %v6127_v10, %v1101_v30 }
 0x13f   : > { %v1146_v33 = vsel %vm1142_vm1, %v1111_v31, 0.0 }
 0x140   : > { %v999_v34 = vpop.f32.mrf.mxu0  ;;  %1147 = vadd.xlane.f32.xlu2 %v1146_v33  ;;  %v1224_v44 = vsel %vm1142_vm1, %v1137_v37, 0.0  ;;  %v899_v37 = vsel %vm852_vm0, %v735_v29, %v6084_v48 }
 0x141   : > { %v1000_v36 = vadd.f32 %v6120_v5, %v999_v34  ;;  %v556_v34 = vld [vmem:[%s6053_s25 + $0xc0] sm:$0xff] }
 0x143   : > { %v1076_v40 = vmax.f32 %v1000_v36, 0.0  ;;  %1038 = vmatmul.bf16.gmra.mxu0 %v891_v39  ;;  %v557_v36 = vld [vmem:[%s6053_s25 + $0xc8] sm:$0xff] }
 0x144   : > { %v621_v41 = vpack.c.bf16 %v557_v36, %v557_v36 }
 0x145   : > { %v1112_v43 = vmul.f32 %v6127_v10, %v1076_v40  ;;  %v620_v40 = vpack.c.bf16 %v556_v34, %v556_v34 }
 0x147   : > { %v1149_v57 = vsel %vm1142_vm1, %v1112_v43, 0.0  ;;  %v716_v46 = vunpack.c.l.b16 %v620_v40 }
 0x148   : > { %v1001_v47 = vpop.f32.mrf.mxu0  ;;  %1150 = vadd.xlane.f32.xlu0 %v1149_v57  ;;  %1225 = vadd.xlane.f32.xlu2 %v1224_v44  ;;  %v717_v57 = vunpack.c.l.b16 %v621_v41 }
 0x149   : > { %v1002_v49 = vadd.f32 %v6120_v5, %v1001_v47 }
 0x14a   : > { %v736_v38 = vpack.c.b16 %v717_v57, %v716_v46 }
 0x14b   : > { %v1077_v51 = vmax.f32 %v1002_v49, 0.0 }
 0x14c   : > { %v903_v53 = vsel %vm852_vm0, %v736_v38, %v6154_v60 }
 0x14d   : > { %v1113_v52 = vmul.f32 %v6127_v10, %v1077_v51 }
 0x14f   : > { %v1064_v54 = vpop.f32.mrf.mxu1  ;;  %v1152_v55 = vsel %vm1142_vm1, %v1113_v52, 0.0 }
 0x150   : > { %v1004_v56 = vpop.f32.mrf.mxu0  ;;  %v1065_v59 = vadd.f32 %v6120_v5, %v1064_v54  ;;  %1153 = vadd.xlane.f32.xlu2 %v1152_v55 }
 0x151   : > { %v1005_v61 = vadd.f32 %v6120_v5, %v1004_v56 }
 0x152   : > { %v1102_v62 = vmax.f32 %v1065_v59, 0.0 }
 0x153   : > { %1043 = vmatmul.bf16.gmra.mxu0 %v895_v58  ;;  %v1078_v9 = vmax.f32 %v1005_v61, 0.0 }
 0x154   : > { %v1138_v4 = vmul.f32 %v6127_v10, %v1102_v62 }
 0x155   : > { %v1114_v20 = vmul.f32 %v6127_v10, %v1078_v9 }
 0x156   : > { %v1227_v24 = vsel %vm1142_vm1, %v1138_v4, 0.0 }
 0x157   : > { %v1066_v13 = vpop.f32.mrf.mxu1  ;;  %1228 = vadd.xlane.f32.xlu0 %v1227_v24  ;;  %v1155_v27 = vsel %vm1142_vm1, %v1114_v20, 0.0 }
 0x158   : > { %v1006_v14 = vpop.f32.mrf.mxu0  ;;  %v1067_v35 = vadd.f32 %v6120_v5, %v1066_v13 }
 0x159   : > { %v1007_v16 = vadd.f32 %v6120_v5, %v1006_v14 }
 0x15a   : > { %v1103_v19 = vmax.f32 %v1067_v35, 0.0 }
 0x15b   : > { %v1079_v23 = vmax.f32 %v1007_v16, 0.0 }
 0x15c   : > { %v1139_v3 = vmul.f32 %v6127_v10, %v1103_v19 }
 0x15d   : > { %v1115_v25 = vmul.f32 %v6127_v10, %v1079_v23 }
 0x15e   : > { %v1230_v28 = vsel %vm1142_vm1, %v1139_v3, 0.0 }
 0x15f   : > { %1156 = vadd.xlane.f32.xlu0 %v1155_v27  ;;  %v1158_v30 = vsel %vm1142_vm1, %v1115_v25, 0.0  ;;  %1231 = vadd.xlane.f32.xlu1 %v1230_v28  ;;  %v6174_v31 = vpop.f32.mrf.mxu1 }
 0x160   : > { %v1009_v32 = vpop.f32.mrf.mxu0  ;;  %1159 = vadd.xlane.f32.xlu2 %v1158_v30 }
 0x161   : > { %v1010_v33 = vadd.f32 %v6120_v5, %v1009_v32 }
 0x163   : > { %v1080_v39 = vmax.f32 %v1010_v33, 0.0  ;;  %1048 = vmatmul.bf16.gmra.mxu0 %v899_v37 }
 0x165   : > { %v1116_v42 = vmul.f32 %v6127_v10, %v1080_v39 }
 0x167   : > { %v1161_v43 = vsel %vm1142_vm1, %v1116_v42, 0.0  ;;  %v6183_v44 = vpop.f32.mrf.mxu1 }
 0x168   : > { %v1011_v45 = vpop.f32.mrf.mxu0  ;;  %1162 = vadd.xlane.f32.xlu2 %v1161_v43 }
 0x169   : > { %v1012_v47 = vadd.f32 %v6120_v5, %v1011_v45 }
 0x16b   : > { %v1081_v49 = vmax.f32 %v1012_v47, 0.0 }
 0x16d   : > { %v1117_v48 = vmul.f32 %v6127_v10, %v1081_v49 }
 0x16f   : > { %v1164_v50 = vsel %vm1142_vm1, %v1117_v48, 0.0  ;;  %v6188_v51 = vpop.f32.mrf.mxu1 }
 0x170   : > { %v1014_v52 = vpop.f32.mrf.mxu0  ;;  %1165 = vadd.xlane.f32.xlu0 %v1164_v50 }
 0x171   : > { %v1015_v54 = vadd.f32 %v6120_v5, %v1014_v52 }
 0x173   : > { %v1082_v55 = vmax.f32 %v1015_v54, 0.0  ;;  %1053 = vmatmul.bf16.gmra.mxu0 %v903_v53 }
 0x175   : > { %v1118_v56 = vmul.f32 %v6127_v10, %v1082_v55 }
 0x177   : > { %v1167_v59 = vsel %vm1142_vm1, %v1118_v56, 0.0  ;;  %v2198_v61 = vpop.f32.mrf.mxu1 }
 0x178   : > { %v1016_v62 = vpop.f32.mrf.mxu0  ;;  %1168 = vadd.xlane.f32.xlu1 %v1167_v59  ;;  %v2199_v58 = vadd.f32 %v6120_v5, %v2198_v61 }
 0x179   : > { %v1017_v63 = vadd.f32 %v6120_v5, %v1016_v62 }
 0x17a   : > { %v2207_v0 = vmax.f32 %v2199_v58, 0.0 }
 0x17b   : > { %v1083_v1 = vmax.f32 %v1017_v63, 0.0 }
 0x17c   : > { %v2211_v2 = vmul.f32 %v6127_v10, %v2207_v0 }
 0x17d   : > { %v1119_v60 = vmul.f32 %v6127_v10, %v1083_v1 }
 0x17e   : > { %v2217_v4 = vsel %vm1142_vm1, %v2211_v2, 0.0 }
 0x17f   : > { %v1170_v26 = vsel %vm1142_vm1, %v1119_v60, 0.0  ;;  %2218 = vadd.xlane.f32.xlu0 %v2217_v4  ;;  %v6243_v4 = vld [vmem:[#allocation2] ss:$0 sm:$0xff] }
 0x180   : > { %v1019_v6 = vpop.f32.mrf.mxu0  ;;  %1171 = vadd.xlane.f32.xlu2 %v1170_v26 }
 0x181   : > { %v1020_v7 = vadd.f32 %v6120_v5, %v1019_v6 }
 0x183   : > { %v1084_v8 = vmax.f32 %v1020_v7, 0.0 }
 0x185   : > { %v1120_v9 = vmul.f32 %v6127_v10, %v1084_v8 }
 0x187   : > { %v1173_v24 = vsel %vm1142_vm1, %v1120_v9, 0.0 }
 0x188   : > { %v1021_v11 = vpop.f32.mrf.mxu0  ;;  %1174 = vadd.xlane.f32.xlu1 %v1173_v24 }
 0x189   : > { %v1022_v12 = vadd.f32 %v6120_v5, %v1021_v11 }
 0x18b   : > { %v1085_v13 = vmax.f32 %v1022_v12, 0.0 }
 0x18d   : > { %v1121_v14 = vmul.f32 %v6127_v10, %v1085_v13  ;;  %v5771_v13 = vmov 0  }
 0x18e   : > { %5357 = vset.pattern.permute.xlu2 %v5771_v13  ;;  %5358 = vset.pattern.permute.xlu0 %v5771_v13 }
 0x18f   : > { %v1176_v35 = vsel %vm1142_vm1, %v1121_v14, 0.0  ;;  %5359 = vset.pattern.permute.xlu1 %v5771_v13 }
 0x190   : > { %v1024_v15 = vpop.f32.mrf.mxu0  ;;  %1177 = vadd.xlane.f32.xlu2 %v1176_v35 }
 0x191   : > { %v1025_v16 = vadd.f32 %v6120_v5, %v1024_v15 }
 0x193   : > { %v1086_v17 = vmax.f32 %v1025_v16, 0.0 }
 0x195   : > { %v1122_v18 = vmul.f32 %v6127_v10, %v1086_v17 }
 0x197   : > { %v1179_v19 = vsel %vm1142_vm1, %v1122_v18, 0.0 }
 0x198   : > { %v1026_v20 = vpop.f32.mrf.mxu0  ;;  %1180 = vadd.xlane.f32.xlu0 %v1179_v19 }
 0x199   : > { %v1027_v21 = vadd.f32 %v6120_v5, %v1026_v20 }
 0x19b   : > { %v1087_v22 = vmax.f32 %v1027_v21, 0.0 }
 0x19d   : > { %v1123_v23 = vmul.f32 %v6127_v10, %v1087_v22 }
 0x19f   : > { %v1182_v3 = vsel %vm1142_vm1, %v1123_v23, 0.0 }
 0x1a0   : > { %v1029_v25 = vpop.f32.mrf.mxu0  ;;  %1183 = vadd.xlane.f32.xlu1 %v1182_v3 }
 0x1a1   : > { %v1030_v27 = vadd.f32 %v6120_v5, %v1029_v25 }
 0x1a3   : > { %v1088_v28 = vmax.f32 %v1030_v27, 0.0 }
 0x1a5   : > { %v1124_v29 = vmul.f32 %v6127_v10, %v1088_v28 }
 0x1a7   : > { %v1185_v30 = vsel %vm1142_vm1, %v1124_v29, 0.0 }
 0x1a8   : > { %v1031_v32 = vpop.f32.mrf.mxu0  ;;  %1186 = vadd.xlane.f32.xlu0 %v1185_v30 }
 0x1a9   : > { %v1032_v33 = vadd.f32 %v6120_v5, %v1031_v32 }
 0x1ab   : > { %v1089_v34 = vmax.f32 %v1032_v33, 0.0  ;;  %v6251_v19 = vpop.xlane.xlu1 %1144 }
 0x1ac   : > { %v6224_v46 = vpop.xlane.xlu0 %1222 }
 0x1ad   : > { %v1125_v36 = vmul.f32 %v6127_v10, %v1089_v34 }
 0x1af   : > { %v1188_v37 = vsel %vm1142_vm1, %v1125_v36, 0.0 }
 0x1b0   : > { %v1034_v39 = vpop.f32.mrf.mxu0  ;;  %1189 = vadd.xlane.f32.xlu1 %v1188_v37 }
 0x1b1   : > { %v1035_v40 = vadd.f32 %v6120_v5, %v1034_v39 }
 0x1b3   : > { %v1090_v41 = vmax.f32 %v1035_v40, 0.0  ;;  %v6221_v43 = vpop.xlane.xlu2 %1147 }
 0x1b5   : > { %v1126_v42 = vmul.f32 %v6127_v10, %v1090_v41 }
 0x1b7   : > { %v1191_v45 = vsel %vm1142_vm1, %v1126_v42, 0.0 }
 0x1b8   : > { %v1036_v57 = vpop.f32.mrf.mxu0  ;;  %1192 = vadd.xlane.f32.xlu2 %v1191_v45 }
 0x1b9   : > { %v1037_v47 = vadd.f32 %v6120_v5, %v1036_v57 }
 0x1bb   : > { %v1091_v49 = vmax.f32 %v1037_v47, 0.0  ;;  %v6229_v52 = vpop.xlane.xlu2 %1225  ;;  %v6232_v54 = vpop.xlane.xlu0 %1150 }
 0x1bd   : > { %v1127_v38 = vmul.f32 %v6127_v10, %v1091_v49 }
 0x1bf   : > { %v1194_v48 = vsel %vm1142_vm1, %v1127_v38, 0.0 }
 0x1c0   : > { %v1039_v50 = vpop.f32.mrf.mxu0  ;;  %1195 = vadd.xlane.f32.xlu1 %v1194_v48 }
 0x1c1   : > { %v1040_v53 = vadd.f32 %v6120_v5, %v1039_v50 }
 0x1c3   : > { %v1092_v55 = vmax.f32 %v1040_v53, 0.0  ;;  %v6239_v63 = vpop.xlane.xlu2 %1153 }
 0x1c5   : > { %v1128_v56 = vmul.f32 %v6127_v10, %v1092_v55 }
 0x1c7   : > { %v1197_v59 = vsel %vm1142_vm1, %v1128_v56, 0.0 }
 0x1c8   : > { %v1041_v61 = vpop.f32.mrf.mxu0  ;;  %1198 = vadd.xlane.f32.xlu0 %v1197_v59 }
 0x1c9   : > { %v1042_v62 = vadd.f32 %v6120_v5, %v1041_v61 }
 0x1ca   : > { %v6237_v58 = vpop.xlane.xlu0 %1228 }
 0x1cb   : > { %v1093_v0 = vmax.f32 %v1042_v62, 0.0 }
 0x1cd   : > { %v1129_v1 = vmul.f32 %v6127_v10, %v1093_v0 }
 0x1cf   : > { %v1200_v2 = vsel %vm1142_vm1, %v1129_v1, 0.0 }
 0x1d0   : > { %v1044_v60 = vpop.f32.mrf.mxu0  ;;  %1201 = vadd.xlane.f32.xlu1 %v1200_v2 }
 0x1d1   : > { %v1045_v26 = vadd.f32 %v6120_v5, %v1044_v60 }
 0x1d2   : > { %v1157_v6 = vpop.xlane.xlu0 %1156  ;;  %v6259_v36 = vpop.xlane.xlu1 %1231 }
 0x1d3   : > { %v1094_v7 = vmax.f32 %v1045_v26, 0.0  ;;  %v1247_v8 = vadd.f32 %v6243_v4, %v1157_v6  ;;  %v1160_v9 = vpop.xlane.xlu2 %1159 }
 0x1d4   : > { %v1248_v24 = vadd.f32 %v6243_v4, %v1160_v9 }
 0x1d5   : > { %v1279_v11 = vsub.f32 0.0, %v1247_v8  ;;  %v1130_v12 = vmul.f32 %v6127_v10, %v1094_v7 }
 0x1d6   : > { %v1280_v14 = vsub.f32 0.0, %v1248_v24 }
 0x1d7   : > { %v1315_v35 = vmul.f32 1.442695, %v1279_v11  ;;  %v1203_v15 = vsel %vm1142_vm1, %v1130_v12, 0.0 }
 0x1d8   : > { %v1317_v16 = vmul.f32 1.442695, %v1280_v14  ;;  %v1046_v17 = vpop.f32.mrf.mxu0  ;;  %1204 = vadd.xlane.f32.xlu2 %v1203_v15 }
 0x1d9   : > { %5364 = vpow2.f32 %v1315_v35  ;;  %v1047_v18 = vadd.f32 %v6120_v5, %v1046_v17 }
 0x1da   : > { %5366 = vpow2.f32 %v1317_v16 }
 0x1db   : > { %v1095_v20 = vmax.f32 %v1047_v18, 0.0  ;;  %v1163_v21 = vpop.xlane.xlu2 %1162 }
 0x1dc   : > { %v1249_v22 = vadd.f32 %v6243_v4, %v1163_v21 }
 0x1dd   : > { %v1131_v23 = vmul.f32 %v6127_v10, %v1095_v20 }
 0x1de   : > { %v1281_v3 = vsub.f32 0.0, %v1249_v22 }
 0x1df   : > { %v5365_v25 = vpop.eup %5364  ;;  %v1206_v27 = vsel %vm1142_vm1, %v1131_v23, 0.0 }
 0x1e0   : > { %v1375_v28 = vadd.f32 1.0, %v5365_v25  ;;  %v1319_v29 = vmul.f32 1.442695, %v1281_v3  ;;  %v1049_v30 = vpop.f32.mrf.mxu0  ;;  %1207 = vadd.xlane.f32.xlu1 %v1206_v27  ;;  %v5367_v32 = vpop.eup %5366 }
 0x1e1   : > { %v1050_v33 = vadd.f32 %v6120_v5, %v1049_v30  ;;  %v6257_v34 = vadd.f32 1.0, %v5367_v32 }
 0x1e2   : > { %5368 = vrcp.f32 %v1375_v28  ;;  %v1472_v1 = vand.u32 2147483647, %v1375_v28  ;;  %v1474_v2 = vand.u32 2147483648, %v1375_v28  ;;  %vm1468_vm3 = vweird.f32 %v1375_v28 }
 0x1e3   : > { %5370 = vpow2.f32 %v1319_v29  ;;  %v1096_v37 = vmax.f32 %v1050_v33, 0.0  ;;  %v1166_v39 = vpop.xlane.xlu0 %1165  ;;  %v1489_v27 = vand.u32 2147483648, %v6257_v34  ;;  %vm1483_vm7 = vweird.f32 %v6257_v34 }
 0x1e4   : > { %5372 = vrcp.f32 %v6257_v34  ;;  %v1250_v40 = vadd.f32 %v6243_v4, %v1166_v39  ;;  %v1475_v13 = vor.u32 1.1754944e-38, %v1474_v2  ;;  %vm1473_vm5 = vcmp.eq.f32.partialorder %v1472_v1, 8.507059e+37 }
 0x1e5   : > { %v1132_v41 = vmul.f32 %v6127_v10, %v1096_v37  ;;  %v1487_v29 = vand.u32 2147483647, %v6257_v34 }
 0x1e6   : > { %v1282_v42 = vsub.f32 0.0, %v1250_v40 }
 0x1e7   : > { %v1209_v45 = vsel %vm1142_vm1, %v1132_v41, 0.0  ;;  %vm1488_vm9 = vcmp.eq.f32.partialorder %v1487_v29, 8.507059e+37 }
 0x1e8   : > { %v5369_v57 = vpop.eup %5368  ;;  %v1321_v47 = vmul.f32 1.442695, %v1282_v42  ;;  %v1051_v49 = vpop.f32.mrf.mxu0  ;;  %1210 = vadd.xlane.f32.xlu0 %v1209_v45  ;;  %v1490_v42 = vor.u32 1.1754944e-38, %v1489_v27 }
 0x1e9   : > { %v5371_v38 = vpop.eup %5370  ;;  %v1052_v48 = vadd.f32 %v6120_v5, %v1051_v49  ;;  %v1464_v50 = vmul.f32 %v5369_v57, %v1375_v28  ;;  %vm1469_vm2 = vweird.f32 %v5369_v57 }
 0x1ea   : > { %v6266_v53 = vpop.eup %5372  ;;  %v6268_v55 = vadd.f32 1.0, %v5371_v38  ;;  %5374 = vpow2.f32 %v1321_v47  ;;  %vm1470_vm4 = vmor %vm1468_vm3, %vm1469_vm2 }
 0x1eb   : > { %v1097_v56 = vmax.f32 %v1052_v48, 0.0  ;;  %v1169_v59 = vpop.xlane.xlu1 %1168  ;;  %v1465_v61 = vsub.f32 1.0, %v1464_v50  ;;  %v1479_v62 = vmul.f32 %v6266_v53, %v6257_v34  ;;  %vm1484_vm6 = vweird.f32 %v6266_v53 }
 0x1ec   : > { %5376 = vrcp.f32 %v6268_v55  ;;  %v1251_v0 = vadd.f32 %v6243_v4, %v1169_v59  ;;  %vm1485_vm8 = vmor %vm1483_vm7, %vm1484_vm6  ;;  %v1504_v38 = vand.u32 2147483648, %v6268_v55  ;;  %vm1498_vm11 = vweird.f32 %v6268_v55 }
 0x1ed   : > { %v1133_v60 = vmul.f32 %v6127_v10, %v1097_v56  ;;  %v1466_v26 = vmul.f32 %v5369_v57, %v1465_v61  ;;  %v1480_v6 = vsub.f32 1.0, %v1479_v62 }
 0x1ee   : > { %v1283_v7 = vsub.f32 0.0, %v1251_v0  ;;  %v1505_v2 = vor.u32 1.1754944e-38, %v1504_v38 }
 0x1ef   : > { %v1212_v8 = vsel %vm1142_vm1, %v1133_v60, 0.0  ;;  %v1467_v9 = vadd.f32 %v5369_v57, %v1466_v26  ;;  %v1481_v14 = vmul.f32 %v6266_v53, %v1480_v6 }
 0x1f0   : > { %v5375_v24 = vpop.eup %5374  ;;  %v1323_v11 = vmul.f32 1.442695, %v1283_v7  ;;  %v1054_v12 = vpop.f32.mrf.mxu0  ;;  %1213 = vadd.xlane.f32.xlu1 %v1212_v8 }
 0x1f1   : > { %v6277_v35 = vadd.f32 1.0, %v5375_v24  ;;  %v1055_v15 = vadd.f32 %v6120_v5, %v1054_v12  ;;  %v1471_v16 = vsel %vm1470_vm4, %v5369_v57, %v1467_v9  ;;  %v1482_v23 = vadd.f32 %v6266_v53, %v1481_v14 }
 0x1f2   : > { %v5377_v17 = vpop.eup %5376  ;;  %5378 = vpow2.f32 %v1323_v11  ;;  %v1476_v18 = vsel %vm1473_vm5, %v1475_v13, %v1471_v16  ;;  %v6301_v1 = vpop.xlane.xlu0 %2218 }
 0x1f3   : > { %v1098_v20 = vmax.f32 %v1055_v15, 0.0  ;;  %v1172_v21 = vpop.xlane.xlu2 %1171  ;;  %1937 = vperm.xlu2 %5357, %v1476_v18   ;;  %5380 = vrcp.f32 %v6277_v35  ;;  %v1494_v3 = vmul.f32 %v5377_v17, %v6268_v55  ;;  %v1486_v39 = vsel %vm1485_vm8, %v6266_v53, %v1482_v23 }
 0x1f4   : > { %v1252_v22 = vadd.f32 %v6243_v4, %v1172_v21  ;;  %v1491_v47 = vsel %vm1488_vm9, %v1490_v42, %v1486_v39  ;;  %vm1499_vm10 = vweird.f32 %v5377_v17  ;;  %v1502_v53 = vand.u32 2147483647, %v6268_v55 }
 0x1f5   : > { %v1134_v25 = vmul.f32 %v6127_v10, %v1098_v20  ;;  %v1495_v30 = vsub.f32 1.0, %v1494_v3  ;;  %vm1500_vm12 = vmor %vm1498_vm11, %vm1499_vm10  ;;  %vm1513_vm5 = vweird.f32 %v6277_v35 }
 0x1f6   : > { %v1284_v28 = vsub.f32 0.0, %v1252_v22  ;;  %vm1503_vm13 = vcmp.eq.f32.partialorder %v1502_v53, 8.507059e+37 }
 0x1f7   : > { %v1215_v32 = vsel %vm1142_vm1, %v1134_v25, 0.0  ;;  %v1496_v40 = vmul.f32 %v5377_v17, %v1495_v30 }
 0x1f8   : > { %v5379_v33 = vpop.eup %5378  ;;  %v1325_v37 = vmul.f32 1.442695, %v1284_v28  ;;  %1216 = vadd.xlane.f32.xlu1 %v1215_v32  ;;  %v1517_v28 = vand.u32 2147483647, %v6277_v35  ;;  %v1056_v29 = vpop.f32.mrf.mxu0 }
 0x1f9   : > { %v1379_v41 = vadd.f32 1.0, %v5379_v33  ;;  %v6291_v45 = vpop.eup %5380  ;;  %v1497_v49 = vadd.f32 %v5377_v17, %v1496_v40 }
 0x1fa   : > { %5382 = vpow2.f32 %v1325_v37  ;;  %v1509_v48 = vmul.f32 %v6291_v45, %v6277_v35  ;;  %vm1514_vm3 = vweird.f32 %v6291_v45  ;;  %vm1518_vm8 = vcmp.eq.f32.partialorder %v1517_v28, 8.507059e+37 }
 0x1fb   : > { %5384 = vrcp.f32 %v1379_v41  ;;  %v1175_v57 = vpop.xlane.xlu1 %1174  ;;  %v1501_v61 = vsel %vm1500_vm12, %v5377_v17, %v1497_v49  ;;  %v1534_v9 = vand.u32 2147483648, %v1379_v41  ;;  %v1532_v13 = vand.u32 2147483647, %v1379_v41  ;;  %vm1515_vm6 = vmor %vm1513_vm5, %vm1514_vm3 }
 0x1fc   : > { %v1253_v34 = vadd.f32 %v6243_v4, %v1175_v57  ;;  %1942 = vperm.xlu0 %5358, %v1491_v47   ;;  %v1510_v60 = vsub.f32 1.0, %v1509_v48  ;;  %v1506_v7 = vsel %vm1503_vm13, %v1505_v2, %v1501_v61  ;;  %vm1528_vm15 = vweird.f32 %v1379_v41 }
 0x1fd   : > { %v1519_v17 = vand.u32 2147483648, %v6277_v35  ;;  %v1535_v21 = vor.u32 1.1754944e-38, %v1534_v9  ;;  %vm1533_vm4 = vcmp.eq.f32.partialorder %v1532_v13, 8.507059e+37  ;;  %v1057_v57 = vadd.f32 %v6120_v5, %v1056_v29 }
 0x1fe   : > { %v1285_v50 = vsub.f32 0.0, %v1253_v34  ;;  %v1511_v24 = vmul.f32 %v6291_v45, %v1510_v60 }
 0x1ff   : > { %v1520_v37 = vor.u32 1.1754944e-38, %v1519_v17  ;;  %v1099_v53 = vmax.f32 %v1057_v57, 0.0 }
 0x200   : > { %v5383_v56 = vpop.eup %5382  ;;  %v1327_v59 = vmul.f32 1.442695, %v1285_v50  ;;  %v1512_v22 = vadd.f32 %v6291_v45, %v1511_v24 }
 0x201   : > { %v5385_v62 = vpop.eup %5384  ;;  %v6299_v0 = vadd.f32 1.0, %v5383_v56 }
 0x202   : > { %5386 = vpow2.f32 %v1327_v59  ;;  %v1524_v26 = vmul.f32 %v5385_v62, %v1379_v41  ;;  %vm1529_vm14 = vweird.f32 %v5385_v62  ;;  %v1516_v33 = vsel %vm1515_vm6, %v6291_v45, %v1512_v22 }
 0x203   : > { %5388 = vrcp.f32 %v6299_v0  ;;  %v1178_v6 = vpop.xlane.xlu2 %1177  ;;  %vm1530_vm2 = vmor %vm1528_vm15, %vm1529_vm14  ;;  %v1549_v39 = vand.u32 2147483648, %v6299_v0  ;;  %v1547_v42 = vand.u32 2147483647, %v6299_v0  ;;  %v1521_v34 = vsel %vm1518_vm8, %v1520_v37, %v1516_v33 }
 0x204   : > { %v1254_v55 = vadd.f32 %v6243_v4, %v1178_v6  ;;  %1947 = vperm.xlu0 %5358, %v1506_v7   ;;  %v1525_v8 = vsub.f32 1.0, %v1524_v26  ;;  %vm1543_vm9 = vweird.f32 %v6299_v0  ;;  %v1135_v7 = vmul.f32 %v6127_v10, %v1099_v53 }
 0x205   : > { %v1550_v45 = vor.u32 1.1754944e-38, %v1549_v39  ;;  %vm1548_vm11 = vcmp.eq.f32.partialorder %v1547_v42, 8.507059e+37 }
 0x206   : > { %v1286_v11 = vsub.f32 0.0, %v1254_v55  ;;  %v1526_v12 = vmul.f32 %v5385_v62, %v1525_v8 }
 0x208   : > { %v5387_v14 = vpop.eup %5386  ;;  %v1329_v15 = vmul.f32 1.442695, %v1286_v11  ;;  %v1527_v16 = vadd.f32 %v5385_v62, %v1526_v12 }
 0x209   : > { %v5389_v18 = vpop.eup %5388  ;;  %v6307_v20 = vadd.f32 1.0, %v5387_v14  ;;  %v1218_v14 = vsel %vm1142_vm1, %v1135_v7, 0.0 }
 0x20a   : > { %5390 = vpow2.f32 %v1329_v15  ;;  %v1531_v23 = vsel %vm1530_vm2, %v5385_v62, %v1527_v16  ;;  %v1539_v3 = vmul.f32 %v5389_v18, %v6299_v0  ;;  %vm1544_vm7 = vweird.f32 %v5389_v18 }
 0x20b   : > { %5392 = vrcp.f32 %v6307_v20  ;;  %v1181_v25 = vpop.xlane.xlu0 %1180  ;;  %v1536_v27 = vsel %vm1533_vm4, %v1535_v21, %v1531_v23  ;;  %vm1545_vm10 = vmor %vm1543_vm9, %vm1544_vm7  ;;  %v1564_v0 = vand.u32 2147483648, %v6307_v20  ;;  %v1562_v6 = vand.u32 2147483647, %v6307_v20 }
 0x20c   : > { %v1255_v30 = vadd.f32 %v6243_v4, %v1181_v25  ;;  %1957 = vperm.xlu0 %5358, %v1536_v27   ;;  %v1540_v32 = vsub.f32 1.0, %v1539_v3  ;;  %vm1558_vm13 = vweird.f32 %v6307_v20 }
 0x20d   : > { %v1565_v11 = vor.u32 1.1754944e-38, %v1564_v0  ;;  %vm1563_vm15 = vcmp.eq.f32.partialorder %v1562_v6, 8.507059e+37 }
 0x20e   : > { %v1287_v40 = vsub.f32 0.0, %v1255_v30  ;;  %v1541_v41 = vmul.f32 %v5389_v18, %v1540_v32 }
 0x210   : > { %v5391_v35 = vpop.eup %5390  ;;  %v1331_v47 = vmul.f32 1.442695, %v1287_v40  ;;  %v1542_v49 = vadd.f32 %v5389_v18, %v1541_v41 }
 0x211   : > { %v5393_v38 = vpop.eup %5392  ;;  %1952 = vperm.xlu1 %5359, %v1521_v34   ;;  %v6322_v56 = vadd.f32 1.0, %v5391_v35 }
 0x212   : > { %5394 = vpow2.f32 %v1331_v47  ;;  %v1546_v48 = vsel %vm1545_vm10, %v5389_v18, %v1542_v49  ;;  %v1554_v50 = vmul.f32 %v5393_v38, %v6307_v20  ;;  %vm1559_vm12 = vweird.f32 %v5393_v38 }
 0x213   : > { %v1184_v59 = vpop.xlane.xlu1 %1183  ;;  %v1551_v61 = vsel %vm1548_vm11, %v1550_v45, %v1546_v48  ;;  %5396 = vrcp.f32 %v6322_v56  ;;  %vm1560_vm14 = vmor %vm1558_vm13, %vm1559_vm12  ;;  %vm1573_vm6 = vweird.f32 %v6322_v56  ;;  %v1579_v53 = vand.u32 2147483648, %v6322_v56 }
 0x214   : > { %v1256_v62 = vadd.f32 %v6243_v4, %v1184_v59  ;;  %1962 = vperm.xlu0 %5358, %v1551_v61   ;;  %v1555_v2 = vsub.f32 1.0, %v1554_v50  ;;  %v1577_v50 = vand.u32 2147483647, %v6322_v56 }
 0x216   : > { %v1288_v60 = vsub.f32 0.0, %v1256_v62  ;;  %v1556_v26 = vmul.f32 %v5393_v38, %v1555_v2  ;;  %vm1578_vm13 = vcmp.eq.f32.partialorder %v1577_v50, 8.507059e+37  ;;  %v1245_v2 = vadd.f32 %v6243_v4, %v6232_v54 }
 0x218   : > { %v5395_v55 = vpop.eup %5394  ;;  %v1333_v8 = vmul.f32 1.442695, %v1288_v60  ;;  %v1557_v9 = vadd.f32 %v5393_v38, %v1556_v26 }
 0x219   : > { %v1383_v24 = vadd.f32 1.0, %v5395_v55  ;;  %v6331_v15 = vpop.eup %5396 }
 0x21a   : > { %5398 = vpow2.f32 %v1333_v8  ;;  %v1561_v12 = vsel %vm1560_vm14, %v5393_v38, %v1557_v9  ;;  %v1569_v16 = vmul.f32 %v6331_v15, %v6322_v56  ;;  %vm1574_vm7 = vweird.f32 %v6331_v15 }
 0x21b   : > { %5400 = vrcp.f32 %v1383_v24  ;;  %v1566_v13 = vsel %vm1563_vm15, %v1565_v11, %v1561_v12  ;;  %v1594_v25 = vand.u32 2147483648, %v1383_v24  ;;  %v1187_v27 = vpop.xlane.xlu0 %1186  ;;  %v1592_v30 = vand.u32 2147483647, %v1383_v24  ;;  %vm6344_vm9 = vmor %vm1573_vm6, %vm1574_vm7 }
 0x21c   : > { %1967 = vperm.xlu1 %5359, %v1566_v13   ;;  %1219 = vadd.xlane.f32.xlu2 %v1218_v14  ;;  %v1570_v3 = vsub.f32 1.0, %v1569_v16  ;;  %vm1588_vm3 = vweird.f32 %v1383_v24  ;;  %v1257_v40 = vadd.f32 %v6243_v4, %v1187_v27  ;;  %v1580_v8 = vor.u32 1.1754944e-38, %v1579_v53 }
 0x21d   : > { %v1595_v41 = vor.u32 1.1754944e-38, %v1594_v25  ;;  %vm1593_vm5 = vcmp.eq.f32.partialorder %v1592_v30, 8.507059e+37  ;;  %v1243_v12 = vadd.f32 %v6243_v4, %v6251_v19 }
 0x21e   : > { %v1571_v37 = vmul.f32 %v6331_v15, %v1570_v3  ;;  %v1289_v45 = vsub.f32 0.0, %v1257_v40 }
 0x21f   : > { %v1275_v14 = vsub.f32 0.0, %v1243_v12 }
 0x220   : > { %v5399_v10 = vpop.eup %5398  ;;  %v1572_v38 = vadd.f32 %v6331_v15, %v1571_v37  ;;  %v1335_v7 = vmul.f32 1.442695, %v1289_v45 }
 0x221   : > { %v5401_v17 = vpop.eup %5400  ;;  %v1384_v18 = vadd.f32 1.0, %v5399_v10  ;;  %v1072_v10 = vadd.f32 %v6120_v5, %v6183_v44 }
 0x222   : > { %v1584_v20 = vmul.f32 %v5401_v17, %v1383_v24  ;;  %vm1589_vm2 = vweird.f32 %v5401_v17  ;;  %v1576_v6 = vsel %vm6344_vm9, %v6331_v15, %v1572_v38 }
 0x223   : > { %5402 = vrcp.f32 %v1384_v18  ;;  %v1190_v21 = vpop.xlane.xlu1 %1189  ;;  %vm1590_vm4 = vmor %vm1588_vm3, %vm1589_vm2  ;;  %v1609_v48 = vand.u32 2147483648, %v1384_v18  ;;  %v1607_v62 = vand.u32 2147483647, %v1384_v18  ;;  %vm1603_vm10 = vweird.f32 %v1384_v18 }
 0x224   : > { %v1258_v22 = vadd.f32 %v6243_v4, %v1190_v21  ;;  %v1585_v23 = vsub.f32 1.0, %v1584_v20  ;;  %v1581_v11 = vsel %vm1578_vm13, %v1580_v8, %v1576_v6  ;;  %v1307_v20 = vmul.f32 1.442695, %v1275_v14  ;;  %v5509_v14 = vld [vmem:[%s8562_s5] ss:$0 sm:$0xff] }
 0x225   : > { %v1610_v56 = vor.u32 1.1754944e-38, %v1609_v48  ;;  %vm1608_vm12 = vcmp.eq.f32.partialorder %v1607_v62, 8.507059e+37 }
 0x226   : > { %v1290_v28 = vsub.f32 0.0, %v1258_v22  ;;  %v1586_v29 = vmul.f32 %v5401_v17, %v1585_v23  ;;  %v1105_v22 = vmax.f32 %v1072_v10, 0.0  ;;  %v1244_v23 = vadd.f32 %v6243_v4, %v6221_v43 }
 0x228   : > { %v1337_v32 = vmul.f32 1.442695, %v1290_v28  ;;  %v1587_v33 = vadd.f32 %v5401_v17, %v1586_v29  ;;  %v1276_v44 = vsub.f32 0.0, %v1244_v23 }
 0x229   : > { %v5403_v39 = vpop.eup %5402 }
 0x22a   : > { %5404 = vpow2.f32 %v1337_v32  ;;  %v1591_v42 = vsel %vm1590_vm4, %v5401_v17, %v1587_v33  ;;  %v1599_v57 = vmul.f32 %v5403_v39, %v1384_v18  ;;  %vm1604_vm8 = vweird.f32 %v5403_v39  ;;  %v6362_v32 = vld [vmem:[%s8563_s6] ss:$0 sm:$0xff] }
 0x22b   : > { %v1193_v35 = vpop.xlane.xlu2 %1192  ;;  %v1596_v47 = vsel %vm1593_vm5, %v1595_v41, %v1591_v42  ;;  %vm1605_vm11 = vmor %vm1603_vm10, %vm1604_vm8  ;;  %v1141_v43 = vmul.f32 %v6362_v32, %v1105_v22 }
 0x22c   : > { %v1259_v34 = vadd.f32 %v6243_v4, %v1193_v35  ;;  %1977 = vperm.xlu0 %5358, %v1596_v47   ;;  %v1600_v49 = vsub.f32 1.0, %v1599_v57 }
 0x22d   : > { %v1236_v35 = vsel %vm1142_vm1, %v1141_v43, 0.0 }
 0x22e   : > { %v1291_v59 = vsub.f32 0.0, %v1259_v34  ;;  %v1601_v61 = vmul.f32 %v5403_v39, %v1600_v49  ;;  %v1309_v49 = vmul.f32 1.442695, %v1276_v44 }
 0x230   : > { %v5405_v0 = vpop.eup %5404  ;;  %v1339_v60 = vmul.f32 1.442695, %v1291_v59  ;;  %v1602_v26 = vadd.f32 %v5403_v39, %v1601_v61 }
 0x231   : > { %v1386_v55 = vadd.f32 1.0, %v5405_v0 }
 0x232   : > { %5406 = vpow2.f32 %v1339_v60  ;;  %v1606_v9 = vsel %vm1605_vm11, %v5403_v39, %v1602_v26 }
 0x233   : > { %5408 = vrcp.f32 %v1386_v55  ;;  %v1611_v24 = vsel %vm1608_vm12, %v1610_v56, %v1606_v9  ;;  %v1639_v19 = vand.u32 2147483648, %v1386_v55  ;;  %v1637_v27 = vand.u32 2147483647, %v1386_v55  ;;  %v1196_v28 = vpop.xlane.xlu1 %1195 }
 0x234   : > { %1982 = vperm.xlu0 %5358, %v1611_v24   ;;  %1972 = vperm.xlu2 %5357, %v1581_v11   ;;  %5410 = vpow2.f32 %v1335_v7  ;;  %vm1633_vm15 = vweird.f32 %v1386_v55  ;;  %v1260_v40 = vadd.f32 %v6243_v4, %v1196_v28  ;;  %v1277_v9 = vsub.f32 0.0, %v1245_v2 }
 0x235   : > { %v1640_v30 = vor.u32 1.1754944e-38, %v1639_v19  ;;  %vm1638_vm3 = vcmp.eq.f32.partialorder %v1637_v27, 8.507059e+37 }
 0x236   : > { %v1292_v48 = vsub.f32 0.0, %v1260_v40  ;;  %v1311_v10 = vmul.f32 1.442695, %v1277_v9 }
 0x238   : > { %v5407_v13 = vpop.eup %5406  ;;  %v1341_v60 = vmul.f32 1.442695, %v1292_v48 }
 0x239   : > { %v5409_v15 = vpop.eup %5408  ;;  %v1387_v16 = vadd.f32 1.0, %v5407_v13 }
 0x23a   : > { %v1629_v17 = vmul.f32 %v5409_v15, %v1386_v55  ;;  %v5411_v18 = vpop.eup %5410  ;;  %vm1634_vm14 = vweird.f32 %v5409_v15 }
 0x23b   : > { %5412 = vrcp.f32 %v1387_v16  ;;  %v6357_v3 = vadd.f32 1.0, %v5411_v18  ;;  %vm1635_vm2 = vmor %vm1633_vm15, %vm1634_vm14  ;;  %v1199_v33 = vpop.xlane.xlu0 %1198  ;;  %v1654_v47 = vand.u32 2147483648, %v1387_v16  ;;  %v1652_v45 = vand.u32 2147483647, %v1387_v16 }
 0x23c   : > { %v1630_v21 = vsub.f32 1.0, %v1629_v17  ;;  %5414 = vpow2.f32 %v1307_v20  ;;  %v1261_v57 = vadd.f32 %v6243_v4, %v1199_v33  ;;  %vm1648_vm5 = vweird.f32 %v1387_v16 }
 0x23d   : > { %5416 = vrcp.f32 %v6357_v3  ;;  %v1655_v62 = vor.u32 1.1754944e-38, %v1654_v47  ;;  %vm1653_vm7 = vcmp.eq.f32.partialorder %v1652_v45, 8.507059e+37  ;;  %v1624_v33 = vand.u32 2147483648, %v6357_v3  ;;  %v5244_v47 = vld [vmem:[%s8631_s30 + $0xb0] sm:$0xff] }
 0x23e   : > { %v1631_v25 = vmul.f32 %v5409_v15, %v1630_v21  ;;  %v1293_v61 = vsub.f32 0.0, %v1261_v57  ;;  %5418 = vpow2.f32 %v1309_v49  ;;  %vm1618_vm9 = vweird.f32 %v6357_v3 }
 0x23f   : > { %v1622_v40 = vand.u32 2147483647, %v6357_v3  ;;  %v1625_v48 = vor.u32 1.1754944e-38, %v1624_v33 }
 0x240   : > { %v1632_v29 = vadd.f32 %v5409_v15, %v1631_v25  ;;  %v1343_v8 = vmul.f32 1.442695, %v1293_v61  ;;  %v2197_v25 = vadd.f32 %v5509_v14, %v6188_v51  ;;  %v1246_v51 = vadd.f32 %v6243_v4, %v6239_v63  ;;  %v5243_v61 = vld [vmem:[%s8631_s30 + $0xa8] sm:$0xff] }
 0x241   : > { %v5413_v5 = vpop.eup %5412  ;;  %vm1623_vm11 = vcmp.eq.f32.partialorder %v1622_v40, 8.507059e+37 }
 0x242   : > { %v1636_v37 = vsel %vm1635_vm2, %v5409_v15, %v1632_v29  ;;  %v1644_v39 = vmul.f32 %v5413_v5, %v1387_v16  ;;  %v5415_v34 = vpop.eup %5414  ;;  %vm1649_vm4 = vweird.f32 %v5413_v5  ;;  %v1070_v15 = vadd.f32 %v5509_v14, %v6174_v31  ;;  %v5245_v29 = vld [vmem:[%s8631_s30 + $0xb8] sm:$0xff] }
 0x243   : > { %v1641_v41 = vsel %vm1638_vm3, %v1640_v30, %v1636_v37  ;;  %v6369_v50 = vpop.eup %5416  ;;  %v6371_v59 = vadd.f32 1.0, %v5415_v34  ;;  %vm1650_vm6 = vmor %vm1648_vm5, %vm1649_vm4  ;;  %v1202_v26 = vpop.xlane.xlu1 %1201  ;;  %5275 = vmatpush.bf16.msra.mxu3 %v5245_v29 }
 0x244   : > { %1992 = vperm.xlu0 %5358, %v1641_v41   ;;  %v1645_v42 = vsub.f32 1.0, %v1644_v39  ;;  %v1614_v55 = vmul.f32 %v6369_v50, %v6357_v3  ;;  %v5419_v54 = vpop.eup %5418  ;;  %v1262_v13 = vadd.f32 %v6243_v4, %v1202_v26  ;;  %v1104_v19 = vmax.f32 %v1070_v15, 0.0 }
 0x245   : > { %5420 = vrcp.f32 %v6371_v59  ;;  %v6384_v16 = vadd.f32 1.0, %v5419_v54  ;;  %vm1619_vm8 = vweird.f32 %v6369_v50  ;;  %v2206_v41 = vmax.f32 %v2197_v25, 0.0 }
 0x246   : > { %1237 = vadd.xlane.f32.xlu1 %v1236_v35  ;;  %v1646_v38 = vmul.f32 %v5413_v5, %v1645_v42  ;;  %5422 = vpow2.f32 %v1341_v60  ;;  %v1615_v11 = vsub.f32 1.0, %v1614_v55  ;;  %v1294_v23 = vsub.f32 0.0, %v1262_v13  ;;  %vm6412_vm10 = vmor %vm1618_vm9, %vm1619_vm8 }
 0x247   : > { %5424 = vpow2.f32 %v1343_v8  ;;  %v1140_v3 = vmul.f32 %v6362_v32, %v1104_v19  ;;  %5276 = vmatpush.bf16.msra.mxu3 %v5244_v47  ;;  %v1414_v2 = vand.u32 2147483648, %v6371_v59  ;;  %v1429_v60 = vand.u32 2147483648, %v6384_v16  ;;  %v5511_v19 = vld [vmem:[%s6053_s25 + $0x20] sm:$0xff] }
 0x248   : > { %v1647_v53 = vadd.f32 %v5413_v5, %v1646_v38  ;;  %v1616_v18 = vmul.f32 %v6369_v50, %v1615_v11  ;;  %v1345_v37 = vmul.f32 1.442695, %v1294_v23  ;;  %v6426_v38 = vadd.f32 %v6243_v4, %v6224_v46  ;;  %v5510_v23 = vld [vmem:[%s5939_s28 + $0x20] sm:$0xff] }
 0x249   : > { %v6441_v55 = vsel %vm1142_vm1, %v1140_v3, 0.0  ;;  %vm1408_vm12 = vweird.f32 %v6371_v59  ;;  %v6456_v13 = vor.u32 1.1754944e-38, %v1414_v2  ;;  %v1887_v25 = vsub.f32 %v5511_v19, %v5510_v23 }
 0x24a   : > { %v1651_v0 = vsel %vm1650_vm6, %v5413_v5, %v1647_v53  ;;  %v1617_v31 = vadd.f32 %v6369_v50, %v1616_v18  ;;  %v5520_v18 = vld [vmem:[%s6053_s25 + $0x38] sm:$0xff] }
 0x24b   : > { %v1205_v6 = vpop.xlane.xlu2 %1204  ;;  %v1656_v7 = vsel %vm1653_vm7, %v1655_v62, %v1651_v0  ;;  %v6387_v20 = vpop.eup %5420  ;;  %5277 = vmatpush.bf16.msra.mxu3 %v5243_v61 }
 0x24c   : > { %v1263_v56 = vadd.f32 %v6243_v4, %v1205_v6  ;;  %1997 = vperm.xlu2 %5357, %v1656_v7   ;;  %v5423_v22 = vpop.eup %5422  ;;  %v1404_v5 = vmul.f32 %v6387_v20, %v6371_v59  ;;  %v1621_v35 = vsel %vm6412_vm10, %v6369_v50, %v1617_v31  ;;  %v1278_v50 = vsub.f32 0.0, %v1246_v51 }
 0x24d   : > { %v5425_v28 = vpop.eup %5424  ;;  %v6401_v30 = vadd.f32 1.0, %v5423_v22  ;;  %v1626_v46 = vsel %vm1623_vm11, %v1625_v48, %v1621_v35  ;;  %vm1409_vm13 = vweird.f32 %v6387_v20  ;;  %v2338_v48 = vlaneseq }
 0x24e   : > { %v1295_v24 = vsub.f32 0.0, %v1263_v56  ;;  %v6408_v42 = vadd.f32 1.0, %v5425_v28  ;;  %v1405_v34 = vsub.f32 1.0, %v1404_v5  ;;  %v6444_v56 = vmul.f32 %v6362_v32, %v2206_v41  ;;  %vm6481_vm15 = vmor %vm1408_vm12, %vm1409_vm13 }
 0x24f   : > { %v1313_v9 = vmul.f32 1.442695, %v1278_v50  ;;  %vm1663_vm6 = vweird.f32 %v6401_v30 }
 0x250   : > { %v1347_v12 = vmul.f32 1.442695, %v1295_v24  ;;  %v1406_v0 = vmul.f32 %v6387_v20, %v1405_v34  ;;  %vm1678_vm13 = vweird.f32 %v6408_v42 }
 0x252   : > { %5426 = vpow2.f32 %v1347_v12 }
 0x253   : > { %v1208_v17 = vpop.xlane.xlu1 %1207  ;;  %5428 = vpow2.f32 %v1311_v10  ;;  %v5242_v10 = vld [vmem:[%s8631_s30 + $0xa0] sm:$0xff]  ;;  %v1938_v29 = vpop.permute.xlu2 %1937 }
 0x254   : > { %v1264_v21 = vadd.f32 %v6243_v4, %v1208_v17  ;;  %5430 = vrcp.f32 %v6384_v16  ;;  %v6463_v17 = vadd.f32 %v6387_v20, %v1406_v0  ;;  %5278 = vmatpush.bf16.msra.mxu3 %v5242_v10  ;;  %v2079_v35 = vmul.f32 %v1938_v29, %v1887_v25  ;;  %v5512_v0 = vld [vmem:[%s5939_s28 + $0x28] sm:$0xff] }
 0x255   : > { %v6519_v25 = vshrl.u32 %v2338_v48, 7 }
 0x256   : > { %v1296_v27 = vsub.f32 0.0, %v1264_v21  ;;  %v6466_v21 = vor.u32 1.1754944e-38, %v1429_v60  ;;  %v5513_v60 = vld [vmem:[%s6053_s25 + $0x28] sm:$0xff] }
 0x257   : > { %vm2879_vm10 = vcmp.lt.s32.totalorder %v6519_v25, 1 }
 0x258   : > { %v5427_v44 = vpop.eup %5426  ;;  %v1349_v43 = vmul.f32 1.442695, %v1296_v27 }
 0x259   : > { %v6404_v39 = vadd.f32 1.0, %v5427_v44  ;;  %v5429_v49 = vpop.eup %5428 }
 0x25a   : > { %5432 = vpow2.f32 %v1349_v43  ;;  %v6430_v53 = vpop.eup %5430  ;;  %v6473_v31 = vadd.f32 1.0, %v5429_v49  ;;  %v6498_v49 = vadd.f32 %v6243_v4, %v6237_v58 }
 0x25b   : > { %5434 = vrcp.f32 %v6404_v39  ;;  %v1211_v57 = vpop.xlane.xlu0 %1210  ;;  %v1419_v11 = vmul.f32 %v6430_v53, %v6384_v16  ;;  %v1714_v5 = vand.u32 2147483648, %v6404_v39  ;;  %v1712_v33 = vand.u32 2147483647, %v6404_v39 }
 0x25c   : > { %5436 = vrcp.f32 %v6401_v30  ;;  %v1265_v45 = vadd.f32 %v6243_v4, %v1211_v57  ;;  %vm1708_vm2 = vweird.f32 %v6404_v39  ;;  %v2349_v57 = vadd.s32 80, %v6519_v25 }
 0x25d   : > { %5438 = vpow2.f32 %v1345_v37  ;;  %v1420_v44 = vsub.f32 1.0, %v1419_v11  ;;  %vm1713_vm4 = vcmp.eq.f32.partialorder %v1712_v33, 8.507059e+37  ;;  %v2346_v33 = vadd.s32 56, %v6519_v25  ;;  %v5522_v11 = vld [vmem:[%s6053_s25 + $0x48] sm:$0xff] }
 0x25e   : > { %5440 = vrcp.f32 %v6408_v42  ;;  %v1297_v62 = vsub.f32 0.0, %v1265_v45  ;;  %v1715_v45 = vor.u32 1.1754944e-38, %v1714_v5  ;;  %v1684_v5 = vand.u32 2147483648, %v6408_v42 }
 0x25f   : > { %1987 = vperm.xlu1 %5359, %v1626_v46   ;;  %v6501_v50 = vmul.f32 %v6430_v53, %v1420_v44 }
 0x260   : > { %v5433_v26 = vpop.eup %5432  ;;  %v1351_v7 = vmul.f32 1.442695, %v1297_v62 }
 0x261   : > { %v5435_v8 = vpop.eup %5434  ;;  %v6446_v24 = vadd.f32 1.0, %v5433_v26  ;;  %v1888_v26 = vsub.f32 %v5513_v60, %v5512_v0 }
 0x262   : > { %v6451_v54 = vpop.eup %5436  ;;  %v1704_v12 = vmul.f32 %v5435_v8, %v6404_v39  ;;  %vm1709_vm14 = vweird.f32 %v5435_v8 }
 0x263   : > { %v5439_v14 = vpop.eup %5438  ;;  %5442 = vrcp.f32 %v6446_v24  ;;  %v1214_v15 = vpop.xlane.xlu1 %1213  ;;  %v1659_v63 = vmul.f32 %v6451_v54, %v6401_v30  ;;  %vm1710_vm3 = vmor %vm1708_vm2, %vm1709_vm14  ;;  %vm1723_vm7 = vweird.f32 %v6446_v24  ;;  %vm1664_vm12 = vweird.f32 %v6451_v54 }
 0x264   : > { %v6468_v22 = vpop.eup %5440  ;;  %5444 = vpow2.f32 %v1351_v7  ;;  %v1266_v27 = vadd.f32 %v6243_v4, %v1214_v15  ;;  %v1705_v28 = vsub.f32 1.0, %v1704_v12  ;;  %v6485_v40 = vadd.f32 1.0, %v5439_v14 }
 0x265   : > { %5446 = vpow2.f32 %v1313_v9  ;;  %v1674_v41 = vmul.f32 %v6468_v22, %v6408_v42  ;;  %v1660_v4 = vsub.f32 1.0, %v1659_v63  ;;  %v6509_v7 = vadd.f32 %v5510_v23, %v2079_v35 }
 0x266   : > { %v1298_v51 = vsub.f32 0.0, %v1266_v27  ;;  %v1706_v43 = vmul.f32 %v5435_v8, %v1705_v28  ;;  %v1729_v12 = vand.u32 2147483648, %v6446_v24  ;;  %v1682_v14 = vand.u32 2147483647, %v6408_v42 }
 0x267   : > { %v1675_v58 = vsub.f32 1.0, %v1674_v41  ;;  %v1669_v15 = vand.u32 2147483648, %v6401_v30  ;;  %v1727_v23 = vand.u32 2147483647, %v6446_v24  ;;  %v1661_v44 = vmul.f32 %v6451_v54, %v1660_v4 }
 0x268   : > { %v1353_v3 = vmul.f32 1.442695, %v1298_v51  ;;  %v1707_v47 = vadd.f32 %v5435_v8, %v1706_v43  ;;  %v8577_v43 = vrot.slane %v6509_v7, 7  ;;  %v1730_v35 = vor.u32 1.1754944e-38, %v1729_v12 }
 0x269   : > { %v5443_v34 = vpop.eup %5442  ;;  %v1676_v29 = vmul.f32 %v6468_v22, %v1675_v58  ;;  %vm1728_vm9 = vcmp.eq.f32.partialorder %v1727_v23, 8.507059e+37  ;;  %vm1679_vm11 = vweird.f32 %v6468_v22  ;;  %vm6562_vm14 = vcmp.eq.f32.partialorder %v1682_v14, 8.507059e+37 }
 0x26a   : > { %v5445_v61 = vpop.eup %5444  ;;  %5448 = vpow2.f32 %v1353_v3  ;;  %v1711_v62 = vsel %vm1710_vm3, %v5435_v8, %v1707_v47  ;;  %v1719_v46 = vmul.f32 %v5443_v34, %v6446_v24  ;;  %vm1724_vm5 = vweird.f32 %v5443_v34  ;;  %v6536_v47 = vld [vmem:[#allocation2] ss:$0 sm:$0xff]  ;;  %vm6573_vm3 = vmor %vm1663_vm6, %vm1664_vm12 }
 0x26b   : > { %v6504_v2 = vpop.eup %5446  ;;  %v1716_v39 = vsel %vm1713_vm4, %v1715_v45, %v1711_v62  ;;  %5450 = vrcp.f32 %v6485_v40  ;;  %v6512_v8 = vadd.f32 1.0, %v5445_v61  ;;  %v1217_v27 = vpop.xlane.xlu1 %1216  ;;  %vm1725_vm8 = vmor %vm1723_vm7, %vm1724_vm5  ;;  %v5515_v62 = vld [vmem:[%s5939_s28 + $0x30] sm:$0xff]  ;;  %v1677_v60 = vadd.f32 %v6468_v22, %v1676_v29 }
 0x26c   : > { %2017 = vperm.xlu2 %5357, %v1716_v39   ;;  %v1720_v9 = vsub.f32 1.0, %v1719_v46  ;;  %v1267_v45 = vadd.f32 %v6536_v47, %v1217_v27  ;;  %v5516_v46 = vld [vmem:[%s6053_s25 + $0x30] sm:$0xff]  ;;  %v1685_v27 = vor.u32 1.1754944e-38, %v1684_v5  ;;  %vm3096_vm2 = vcmp.lt.s32.totalorder %v6519_v25, 7  ;;  %vm6581_vm4 = vmor %vm1678_vm13, %vm1679_vm11 }
 0x26d   : > { %5452 = vrcp.f32 %v6512_v8  ;;  %v1889_v39 = vsub.f32 %v5516_v46, %v5515_v62  ;;  %v2347_v42 = vadd.s32 64, %v6519_v25  ;;  %v8576_v14 = vrot.slane %v6509_v7, 1  ;;  %v5521_v5 = vld [vmem:[%s5939_s28 + $0x48] sm:$0xff] }
 0x26e   : > { %v1943_v10 = vpop.permute.xlu0 %1942  ;;  %1234 = vadd.xlane.f32.xlu0 %v6441_v55  ;;  %v1721_v19 = vmul.f32 %v5443_v34, %v1720_v9  ;;  %v1299_v9 = vsub.f32 0.0, %v1267_v45  ;;  %v1892_v45 = vsub.f32 %v5522_v11, %v5521_v5 }
 0x26f   : > { %v2080_v28 = vmul.f32 %v1943_v10, %v1888_v26  ;;  %v2428_v26 = vand.u32 15, %v2346_v33 }
 0x270   : > { %v5449_v51 = vpop.eup %5448  ;;  %v1722_v55 = vadd.f32 %v5443_v34, %v1721_v19 }
 0x271   : > { %v6529_v41 = vadd.f32 1.0, %v5449_v51  ;;  %v6531_v63 = vadd.f32 %v5512_v0, %v2080_v28  ;;  %v6534_v3 = vpop.eup %5450  ;;  %v6546_v0 = vadd.f32 %v6451_v54, %v1661_v44  ;;  %v3283_v44 = vpack.c.bf16 %v6509_v7, %v6509_v7 }
 0x272   : > { %v1726_v24 = vsel %vm1725_vm8, %v5443_v34, %v1722_v55  ;;  %v6549_v34 = vor.u32 1.1754944e-38, %v1669_v15  ;;  %v1689_v58 = vmul.f32 %v6534_v3, %v6485_v40  ;;  %vm6600_vm5 = vcmp.eq.s32.totalorder %v2428_v26, 15 }
 0x273   : > { %5454 = vrcp.f32 %v6529_v41  ;;  %v2850_v48 = vrot.slane %v6531_v63, 7  ;;  %v1731_v61 = vsel %vm1728_vm9, %v1730_v35, %v1726_v24  ;;  %v3067_v12 = vrot.slane %v6531_v63, 1  ;;  %v6566_v19 = vpop.eup %5452 }
 0x274   : > { %2022 = vperm.xlu2 %5357, %v1731_v61   ;;  %v3284_v51 = vpack.c.bf16 %v6531_v63, %v6531_v63  ;;  %v1681_v35 = vsel %vm6581_vm4, %v6468_v22, %v1677_v60  ;;  %v1690_v24 = vsub.f32 1.0, %v1689_v58  ;;  %v1355_v61 = vmul.f32 1.442695, %v1299_v9  ;;  %v5517_v58 = vld [vmem:[%s5939_s28 + $0x40] sm:$0xff] }
 0x275   : > { %v6558_v4 = vsel %vm2879_vm10, %v8577_v43, %v2850_v48  ;;  %v3125_v46 = vsel %vm3096_vm2, %v8576_v14, %v3067_v12  ;;  %v2348_v60 = vadd.s32 72, %v6519_v25  ;;  %v2435_v26 = vand.u32 15, %v2347_v42  ;;  %v5518_v9 = vld [vmem:[%s6053_s25 + $0x40] sm:$0xff] }
 0x276   : > { %v1948_v10 = vpop.permute.xlu0 %1947  ;;  %v6619_v14 = vunpack.c.l.b16 %v3284_v51  ;;  %v3319_v6 = vpack.c.bf16 %v3125_v46, %v3125_v46  ;;  %v6629_v15 = vunpack.c.l.b16 %v3283_v44  ;;  %5456 = vpow2.f32 %v1355_v61  ;;  %v5519_v44 = vld [vmem:[%s5939_s28 + $0x38] sm:$0xff] }
 0x277   : > { %v2081_v23 = vmul.f32 %v1948_v10, %v1889_v39  ;;  %v1891_v10 = vsub.f32 %v5518_v9, %v5517_v58  ;;  %v6635_v46 = vmul.f32 %v6534_v3, %v1690_v24  ;;  %vm6637_vm6 = vcmp.eq.s32.totalorder %v2435_v26, 0 }
 0x278   : > { %8644 = vst [vmem:[#allocation19_spill] sm:$0xff] %v6629_v15  ;;  %v1890_v61 = vsub.f32 %v5520_v18, %v5519_v44  ;;  %v1742_v24 = vand.u32 2147483647, %v6512_v8  ;;  %v1759_v18 = vand.u32 2147483648, %v6529_v41  ;;  %vm1753_vm9 = vweird.f32 %v6529_v41 }
 0x279   : > { %v6593_v55 = vpop.eup %5454  ;;  %v6595_v33 = vadd.f32 %v5515_v62, %v2081_v23  ;;  %v1734_v62 = vmul.f32 %v6566_v19, %v6512_v8  ;;  %v1686_v23 = vsel %vm6562_vm14, %v1685_v27, %v1681_v35  ;;  %vm1739_vm13 = vweird.f32 %v6566_v19 }
 0x27a   : > { %v1749_v63 = vmul.f32 %v6593_v55, %v6529_v41  ;;  %vm1754_vm7 = vweird.f32 %v6593_v55  ;;  %vm1738_vm14 = vweird.f32 %v6512_v8  ;;  %vm6719_vm4 = vcmp.eq.f32.partialorder %v1742_v24, 8.507059e+37 }
 0x27b   : > { %v8578_v39 = vrot.slane %v6595_v33, 7  ;;  %v8579_v22 = vrot.slane %v6595_v33, 1  ;;  %vm6669_vm11 = vmor %vm1753_vm9, %vm1754_vm7 }
 0x27c   : > { %v1750_v29 = vsub.f32 1.0, %v1749_v63  ;;  %v1735_v63 = vsub.f32 1.0, %v1734_v62  ;;  %v3607_v62 = vunpack.c.l.b16 %v3319_v6  ;;  %v3285_v6 = vpack.c.bf16 %v6595_v33, %v6595_v33  ;;  %vm6750_vm7 = vmor %vm1738_vm14, %vm1739_vm13 }
 0x27d   : > { %v3124_v43 = vsel %vm3096_vm2, %v3067_v12, %v8579_v22  ;;  %v2907_v42 = vsel %vm2879_vm10, %v2850_v48, %v8578_v39  ;;  %v2442_v12 = vand.u32 15, %v2348_v60  ;;  %v1757_v60 = vand.u32 2147483647, %v6529_v41 }
 0x27e   : > { %v1958_v27 = vpop.permute.xlu0 %1957  ;;  %v3212_v51 = vsel %vm6600_vm5, 0.0, %v3124_v43  ;;  %v1751_v35 = vmul.f32 %v6593_v55, %v1750_v29  ;;  %v1736_v11 = vmul.f32 %v6566_v19, %v1735_v63  ;;  %v2996_v63 = vsel %vm6637_vm6, 0.0, %v2907_v42 }
 0x27f   : > { %v3320_v9 = vpack.c.bf16 %v3212_v51, %v3212_v51  ;;  %v2083_v48 = vmul.f32 %v1958_v27, %v1891_v10  ;;  %vm6657_vm8 = vcmp.eq.s32.totalorder %v2442_v12, 15  ;;  %vm6673_vm12 = vcmp.eq.f32.partialorder %v1757_v60, 8.507059e+37 }
 0x280   : > { %v1752_v26 = vadd.f32 %v6593_v55, %v1751_v35  ;;  %v5457_v35 = vpop.eup %5456  ;;  %v6687_v60 = vadd.f32 %v6566_v19, %v1736_v11  ;;  %v3483_v39 = vunpack.c.l.b16 %v3285_v6  ;;  %v3249_v22 = vpack.c.bf16 %v2996_v63, %v2996_v63 }
 0x281   : > { %v3608_v29 = vunpack.c.l.b16 %v3320_v9  ;;  %v6662_v9 = vadd.f32 %v5517_v58, %v2083_v48  ;;  %v5524_v58 = vld [vmem:[%s6053_s25 + $0x50] sm:$0xff]  ;;  %v6690_v32 = vadd.f32 1.0, %v5457_v35  ;;  %v8654_v6 = vrot.slane %v6595_v33, 1 }
 0x282   : > { %2007 = vperm.xlu0 %5358, %v1686_v23   ;;  %v1760_v23 = vor.u32 1.1754944e-38, %v1759_v18  ;;  %v2449_v18 = vand.u32 15, %v2349_v57  ;;  %v8655_v35 = vrot.slane %v6595_v33, 7  ;;  %v6724_v51 = vunpack.c.l.b16 %v3249_v22 }
 0x283   : > { %v1953_v10 = vpop.permute.xlu1 %1952  ;;  %v6653_v27 = vpack.c.b16 %v3608_v29, %v3607_v62  ;;  %v5523_v29 = vld [vmem:[%s5939_s28 + $0x50] sm:$0xff]  ;;  %5458 = vrcp.f32 %v6690_v32  ;;  %v8672_v37 = vrot.slane %v6662_v9, 1 }
 0x284   : > { %v2082_v43 = vmul.f32 %v1953_v10, %v1890_v61  ;;  %v1893_v48 = vsub.f32 %v5524_v58, %v5523_v29  ;;  %v6680_v61 = vadd.s32 88, %v6519_v25  ;;  %v1756_v10 = vsel %vm6669_vm11, %v6593_v55, %v1752_v26 }
 0x285   : > { %8647 = vst [vmem:[#allocation20_spill] sm:$0xff] %v6653_v27  ;;  %5039 = vmatmul.msk.bf16.vlgmr.msra.gmra.mxu3 %vm852_vm0, %v6653_v27  ;;  %v8583_v27 = vrot.slane %v6662_v9, 1  ;;  %v1761_v55 = vsel %vm6673_vm12, %v1760_v23, %v1756_v10  ;;  %v3287_v26 = vpack.c.bf16 %v6662_v9, %v6662_v9  ;;  %vm2817_vm5 = vcmp.eq.s32.totalorder %v2449_v18, 0 }
 0x286   : > { %v2114_v41 = vadd.f32 %v5519_v44, %v2082_v43  ;;  %v1963_v42 = vpop.permute.xlu0 %1962  ;;  %vm1424_vm12 = vweird.f32 %v6430_v53 }
 0x287   : > { %v2084_v58 = vmul.f32 %v1963_v42, %v1892_v45 }
 0x288   : > { %v2852_v15 = vrot.slane %v2114_v41, 7  ;;  %v3069_v44 = vrot.slane %v2114_v41, 1  ;;  %v3286_v43 = vpack.c.bf16 %v2114_v41, %v2114_v41  ;;  %v2853_v41 = vrot.slane %v6662_v9, 7 }
 0x289   : > { %v6694_v62 = vadd.f32 %v5521_v5, %v2084_v58 }
 0x28a   : > { %2032 = vperm.xlu0 %5358, %v1761_v55   ;;  %v3484_v45 = vunpack.c.l.b16 %v3286_v43  ;;  %v3122_v11 = vsel %vm3096_vm2, %v3069_v44, %v8583_v27  ;;  %v3123_v5 = vsel %vm3096_vm2, %v8654_v6, %v3069_v44  ;;  %v2906_v23 = vsel %vm2879_vm10, %v8655_v35, %v2852_v15 }
 0x28b   : > { %v2854_v63 = vrot.slane %v6694_v62, 7  ;;  %v3288_v12 = vpack.c.bf16 %v6694_v62, %v6694_v62  ;;  %v3214_v57 = vsel %vm6657_vm8, 0.0, %v3122_v11  ;;  %v3321_v10 = vpack.c.bf16 %v3123_v5, %v3123_v5 }
 0x28c   : > { %v3515_v42 = vpack.c.b16 %v3484_v45, %v3483_v39  ;;  %v3322_v58 = vpack.c.bf16 %v3214_v57, %v3214_v57  ;;  %v3485_v44 = vunpack.c.l.b16 %v3287_v26  ;;  %v3250_v55 = vpack.c.bf16 %v2906_v23, %v2906_v23 }
 0x28d   : > { %v3486_v43 = vunpack.c.l.b16 %v3288_v12  ;;  %v3609_v35 = vunpack.c.l.b16 %v3321_v10  ;;  %v2904_v39 = vsel %vm2879_vm10, %v2853_v41, %v2854_v63  ;;  %v2905_v26 = vsel %vm2879_vm10, %v2852_v15, %v2853_v41 }
 0x28e   : > { %3537 = vrot.lane.b32.xlu2 %v3515_v42, %s5770_s7  ;;  %v1968_v6 = vpop.permute.xlu1 %1967  ;;  %v3610_v27 = vunpack.c.l.b16 %v3322_v58  ;;  %v6728_v5 = vunpack.c.l.b16 %v3250_v55  ;;  %v8658_v23 = vand.u32 2147483647, %v6371_v59  ;;  %v2456_v12 = vand.u32 15, %v6680_v61  ;;  %v6741_v42 = vpop.eup %5458  ;;  %v5525_v55 = vld [vmem:[%s5939_s28 + $0x58] sm:$0xff] }
 0x28f   : > { %v2085_v45 = vmul.f32 %v1968_v6, %v1893_v48  ;;  %v1220_v11 = vpop.xlane.xlu2 %1219  ;;  %v3516_v24 = vpack.c.b16 %v3486_v43, %v3485_v44  ;;  %v2998_v48 = vsel %vm2817_vm5, 0.0, %v2905_v26  ;;  %v2351_v57 = vadd.s32 96, %v6519_v25  ;;  %v5526_v6 = vld [vmem:[%s6053_s25 + $0x58] sm:$0xff] }
 0x290   : > { %v1268_v18 = vadd.f32 %v6536_v47, %v1220_v11  ;;  %vm6735_vm6 = vcmp.eq.f32.partialorder %v8658_v23, 8.507059e+37  ;;  %v3425_v15 = vpack.c.b16 %v6728_v5, %v6724_v51  ;;  %v3251_v61 = vpack.c.bf16 %v2998_v48, %v2998_v48 }
 0x291   : > { %v6743_v10 = vadd.f32 %v5523_v29, %v2085_v45  ;;  %3539 = vrot.lane.b32.xlu1 %v3516_v24, %s5770_s7  ;;  %v3252_v41 = vpack.c.bf16 %v2904_v39, %v2904_v39  ;;  %v1741_v29 = vsel %vm6750_vm7, %v6566_v19, %v6687_v60  ;;  %v8663_v44 = vand.u32 2147483648, %v6512_v8 }
 0x292   : > { %v1300_v58 = vsub.f32 0.0, %v1268_v18  ;;  %v1894_v45 = vsub.f32 %v5526_v6, %v5525_v55  ;;  %vm1423_vm8 = vweird.f32 %v6384_v16  ;;  %v3071_v11 = vrot.slane %v6694_v62, 1 }
 0x293   : > { %v1745_v43 = vor.u32 1.1754944e-38, %v8663_v44  ;;  %v2855_v24 = vrot.slane %v6743_v10, 7  ;;  %v3072_v39 = vrot.slane %v6743_v10, 1  ;;  %v6768_v26 = vpack.c.b16 %v3610_v27, %v3609_v35 }
 0x294   : > { %v1357_v18 = vmul.f32 1.442695, %v1300_v58  ;;  %v6770_v23 = vunpack.c.l.b16 %v3251_v61  ;;  %v6772_v19 = vunpack.c.l.b16 %v3252_v41  ;;  %v2463_v8 = vand.u32 15, %v2351_v57 }
 0x295   : > { %5040 = vmatmul.msk.bf16.gmra.mxu3 %vm852_vm0, %v6768_v26  ;;  %v1746_v60 = vsel %vm6719_vm4, %v1745_v43, %v1741_v29  ;;  %vm3035_vm9 = vcmp.eq.s32.totalorder %v2456_v12, 15  ;;  %v3120_v62 = vsel %vm3096_vm2, %v3071_v11, %v3072_v39  ;;  %v2903_v27 = vsel %vm2879_vm10, %v2854_v63, %v2855_v24  ;;  %v5528_v43 = vld [vmem:[%s6053_s25 + $0x60] sm:$0xff] }
 0x296   : > { %5460 = vpow2.f32 %v1357_v18  ;;  %2027 = vperm.xlu2 %5357, %v1746_v60   ;;  %v8664_v35 = vand.u32 2147483647, %v6401_v30  ;;  %v3426_v33 = vpack.c.b16 %v6772_v19, %v6770_v23  ;;  %v6791_v12 = vadd.f32 1.0, %v6504_v2 }
 0x297   : > { %5462 = vrcp.f32 %v6473_v31  ;;  %v1973_v48 = vpop.permute.xlu2 %1972  ;;  %v8665_v63 = vsel %vm6573_vm3, %v6451_v54, %v6546_v0  ;;  %v1422_v30 = vadd.f32 %v6430_v53, %v6501_v50  ;;  %v8666_v59 = vand.u32 2147483647, %v6384_v16 }
 0x298   : > { %vm1668_vm11 = vcmp.eq.f32.partialorder %v8664_v35, 8.507059e+37  ;;  %v2086_v2 = vmul.f32 %v1973_v48, %v1894_v45  ;;  %v3216_v41 = vsel %vm3035_vm9, 0.0, %v3120_v62  ;;  %v1764_v28 = vmul.f32 %v6741_v42, %v6690_v32 }
 0x299   : > { %v1671_v57 = vsel %vm1668_vm11, %v6549_v34, %v8665_v63  ;;  %vm6803_vm13 = vcmp.eq.f32.partialorder %v8666_v59, 8.507059e+37  ;;  %vm6809_vm14 = vcmp.eq.s32.totalorder %v2463_v8, 0  ;;  %v1303_v0 = vsub.f32 0.0, %v6498_v49 }
 0x29a   : > { %2002 = vperm.xlu1 %5359, %v1671_v57   ;;  %v8671_v50 = vsel %vm6481_vm15, %v6387_v20, %v6463_v17  ;;  %v1692_v58 = vadd.f32 %v6534_v3, %v6635_v46  ;;  %vm1694_vm3 = vweird.f32 %v6534_v3  ;;  %v6825_v29 = vadd.f32 %v5525_v55, %v2086_v2  ;;  %v5527_v17 = vld [vmem:[%s5939_s28 + $0x60] sm:$0xff]  ;;  %vm6840_vm15 = vmor %vm1423_vm8, %vm1424_vm12 }
 0x29b   : > { %v1416_v34 = vsel %vm6735_vm6, %v6456_v13, %v8671_v50  ;;  %vm1693_vm4 = vweird.f32 %v6485_v40  ;;  %v1699_v44 = vand.u32 2147483648, %v6485_v40  ;;  %v3121_v20 = vsel %vm3096_vm2, %v8672_v37, %v3071_v11 }
 0x29c   : > { %v1895_v22 = vsub.f32 %v5528_v43, %v5527_v17  ;;  %v1697_v13 = vand.u32 2147483647, %v6485_v40  ;;  %v3324_v6 = vpack.c.bf16 %v3216_v41, %v3216_v41  ;;  %v3000_v9 = vsel %vm6809_vm14, 0.0, %v2903_v27  ;;  %v5461_v55 = vpop.eup %5460  ;;  %vm6850_vm5 = vmor %vm1693_vm4, %vm1694_vm3 }
 0x29d   : > { %5464 = vrcp.f32 %v6791_v12  ;;  %v2856_v45 = vrot.slane %v6825_v29, 7  ;;  %v1426_v16 = vsel %vm6840_vm15, %v6430_v53, %v1422_v30  ;;  %v1765_v11 = vsub.f32 1.0, %v1764_v28  ;;  %v6857_v18 = vpop.eup %5462 }
 0x29e   : > { %v6859_v8 = vadd.f32 1.0, %v5461_v55  ;;  %v1696_v60 = vsel %vm6850_vm5, %v6534_v3, %v1692_v58  ;;  %v3323_v62 = vpack.c.bf16 %v3121_v20, %v3121_v20  ;;  %v2352_v27 = vadd.s32 104, %v6519_v25  ;;  %v1978_v35 = vpop.permute.xlu0 %1977  ;;  %1917 = vperm.xlu2 %5357, %v1416_v34   ;;  %v5529_v58 = vld [vmem:[%s5939_s28 + $0x68] sm:$0xff] }
 0x29f   : > { %v1700_v48 = vor.u32 1.1754944e-38, %v1699_v44  ;;  %v2902_v63 = vsel %vm2879_vm10, %v2855_v24, %v2856_v45  ;;  %v3253_v57 = vpack.c.bf16 %v3000_v9, %v3000_v9  ;;  %v2353_v53 = vadd.s32 112, %v6519_v25  ;;  %v5530_v44 = vld [vmem:[%s6053_s25 + $0x68] sm:$0xff] }
 0x2a0   : > { %5466 = vrcp.f32 %v6859_v8  ;;  %v2087_v30 = vmul.f32 %v1978_v35, %v1895_v22  ;;  %vm1698_vm6 = vcmp.eq.f32.partialorder %v1697_v13, 8.507059e+37  ;;  %v3612_v59 = vunpack.c.l.b16 %v3324_v6 }
 0x2a1   : > { %v1701_v3 = vsel %vm1698_vm6, %v1700_v48, %v1696_v60  ;;  %v1431_v2 = vsel %vm6803_vm13, %v6466_v21, %v1426_v16  ;;  %v1766_v41 = vmul.f32 %v6741_v42, %v1765_v11  ;;  %v3254_v28 = vpack.c.bf16 %v2902_v63, %v2902_v63 }
 0x2a2   : > { %v6873_v54 = vadd.f32 %v5527_v17, %v2087_v30  ;;  %2012 = vperm.xlu1 %5359, %v1701_v3   ;;  %v3611_v24 = vunpack.c.l.b16 %v3323_v62  ;;  %vm1768_vm7 = vweird.f32 %v6690_v32  ;;  %v2470_v50 = vand.u32 15, %v2352_v27 }
 0x2a3   : > { %v6876_v34 = vpop.eup %5464  ;;  %v1896_v37 = vsub.f32 %v5530_v44, %v5529_v58  ;;  %v6880_v20 = vunpack.c.l.b16 %v3253_v57  ;;  %v6882_v43 = vunpack.c.l.b16 %v3254_v28  ;;  %v2477_v21 = vand.u32 15, %v2353_v53 }
 0x2a4   : > { %v3073_v61 = vrot.slane %v6825_v29, 1  ;;  %v2857_v17 = vrot.slane %v6873_v54, 7  ;;  %v3074_v22 = vrot.slane %v6873_v54, 1  ;;  %v6887_v13 = vpack.c.b16 %v3612_v59, %v3611_v24 }
 0x2a5   : > { %v1767_v6 = vadd.f32 %v6741_v42, %v1766_v41  ;;  %vm1769_vm8 = vweird.f32 %v6741_v42  ;;  %v1772_v46 = vand.u32 2147483647, %v6690_v32  ;;  %v1774_v40 = vand.u32 2147483648, %v6690_v32 }
 0x2a6   : > { %v5467_v55 = vpop.eup %5466  ;;  %5041 = vmatmul.msk.bf16.gmra.mxu3 %vm852_vm0, %v6887_v13  ;;  %vm6897_vm9 = vcmp.eq.s32.totalorder %v2470_v50, 15  ;;  %v3118_v11 = vsel %vm3096_vm2, %v3073_v61, %v3074_v22  ;;  %v2901_v60 = vsel %vm2879_vm10, %v2856_v45, %v2857_v17  ;;  %v8679_v62 = vsub.f32 0.0, %v6426_v38  ;;  %v1983_v48 = vpop.permute.xlu0 %1982  ;;  %1922 = vperm.xlu2 %5357, %v1431_v2   ;;  %vm6920_vm12 = vmor %vm1768_vm7, %vm1769_vm8 }
 0x2a7   : > { %v6911_v35 = vadd.f32 %v6536_v47, %v6229_v52  ;;  %v1779_v63 = vmul.f32 %v5467_v55, %v6859_v8  ;;  %vm2821_vm11 = vcmp.eq.s32.totalorder %v2477_v21, 0  ;;  %v1363_v57 = vmul.f32 1.442695, %v1303_v0 }
 0x2a8   : > { %v1359_v27 = vmul.f32 1.442695, %v8679_v62  ;;  %v2088_v53 = vmul.f32 %v1983_v48, %v1896_v37  ;;  %v1449_v52 = vmul.f32 %v6876_v34, %v6791_v12  ;;  %v6928_v45 = vmul.f32 %v6857_v18, %v6473_v31  ;;  %v5531_v62 = vld [vmem:[%s5939_s28 + $0x80] sm:$0xff] }
 0x2a9   : > { %v1771_v49 = vsel %vm6920_vm12, %v6741_v42, %v1767_v6  ;;  %vm1773_vm13 = vcmp.eq.f32.partialorder %v1772_v46, 8.507059e+37  ;;  %v1780_v0 = vsub.f32 1.0, %v1779_v63  ;;  %v3218_v32 = vsel %vm6897_vm9, 0.0, %v3118_v11  ;;  %v5532_v48 = vld [vmem:[%s6053_s25 + $0x80] sm:$0xff] }
 0x2aa   : > { %v6935_v30 = vadd.f32 %v5529_v58, %v2088_v53  ;;  %v1775_v59 = vor.u32 1.1754944e-38, %v1774_v40  ;;  %v1789_v3 = vand.u32 2147483648, %v6859_v8  ;;  %v3002_v2 = vsel %vm2821_vm11, 0.0, %v2901_v60  ;;  %v5241_v58 = vld [vmem:[%s8631_s30 + $0x98] sm:$0xff] }
 0x2ab   : > { %v1781_v41 = vmul.f32 %v5467_v55, %v1780_v0  ;;  %vm1784_vm14 = vweird.f32 %v5467_v55  ;;  %v1787_v28 = vand.u32 2147483647, %v6859_v8  ;;  %v3119_v42 = vsel %vm3096_vm2, %v3072_v39, %v3073_v61  ;;  %5267 = vmatpush.bf16.msra.mxu2 %v5241_v58  ;;  %3896 = vmatpush.bf16.msra.mxu1 %v5241_v58 }
 0x2ac   : > { %v2858_v24 = vrot.slane %v6935_v30, 7  ;;  %v1776_v50 = vsel %vm1773_vm13, %v1775_v59, %v1771_v49  ;;  %v3326_v44 = vpack.c.bf16 %v3218_v32, %v3218_v32  ;;  %v1450_v37 = vsub.f32 1.0, %v1449_v52  ;;  %v1998_v52 = vpop.permute.xlu2 %1997 }
 0x2ad   : > { %v1782_v21 = vadd.f32 %v5467_v55, %v1781_v41  ;;  %vm1783_vm3 = vweird.f32 %v6859_v8  ;;  %v3290_v6 = vpack.c.bf16 %v6825_v29, %v6825_v29  ;;  %v3255_v46 = vpack.c.bf16 %v3002_v2, %v3002_v2 }
 0x2ae   : > { %vm6950_vm4 = vmor %vm1783_vm3, %vm1784_vm14  ;;  %v1790_v61 = vor.u32 1.1754944e-38, %v1789_v3  ;;  %v3325_v40 = vpack.c.bf16 %v3119_v42, %v3119_v42  ;;  %v3289_v16 = vpack.c.bf16 %v6743_v10, %v6743_v10  ;;  %v2900_v8 = vsel %vm2879_vm10, %v2857_v17, %v2858_v24  ;;  %2037 = vperm.xlu2 %5357, %v1776_v50  }
 0x2af   : > { %v1786_v29 = vsel %vm6950_vm4, %v5467_v55, %v1782_v21  ;;  %vm1788_vm15 = vcmp.eq.f32.partialorder %v1787_v28, 8.507059e+37  ;;  %v3292_v11 = vpack.c.bf16 %v6935_v30, %v6935_v30  ;;  %v3256_v60 = vpack.c.bf16 %v2900_v8, %v2900_v8  ;;  %v5240_v28 = vld [vmem:[%s8631_s30 + $0x90] sm:$0xff] }
 0x2b0   : > { %v1899_v63 = vsub.f32 %v5532_v48, %v5531_v62  ;;  %v1791_v10 = vsel %vm1788_vm15, %v1790_v61, %v1786_v29  ;;  %v3614_v53 = vunpack.c.l.b16 %v3326_v44  ;;  %v1435_v38 = vsub.f32 1.0, %v6928_v45  ;;  %v5534_v44 = vld [vmem:[%s6053_s25 + $0x78] sm:$0xff]  ;;  %5268 = vmatpush.bf16.msra.mxu2 %v5240_v28  ;;  %3897 = vmatpush.bf16.msra.mxu1 %v5240_v28  ;;  %v5239_v61 = vld [vmem:[%s8631_s30 + $0x88] sm:$0xff]  ;;  %v5238_v48 = vld [vmem:[%s8631_s30 + $0x80] sm:$0xff] }
 0x2b1   : > { %2042 = vperm.xlu1 %5359, %v1791_v10   ;;  %v3488_v17 = vunpack.c.l.b16 %v3290_v6  ;;  %v3291_v49 = vpack.c.bf16 %v6873_v54, %v6873_v54  ;;  %v6969_v55 = vunpack.c.l.b16 %v3255_v46  ;;  %v6971_v0 = vunpack.c.l.b16 %v3256_v60 }
 0x2b2   : > { %5468 = vpow2.f32 %v1359_v27  ;;  %v1302_v32 = vsub.f32 0.0, %v6911_v35  ;;  %v2214_v59 = vsel %vm1142_vm1, %v6444_v56, 0.0  ;;  %v3613_v3 = vunpack.c.l.b16 %v3325_v40  ;;  %v5533_v35 = vld [vmem:[%s5939_s28 + $0x78] sm:$0xff] }
 0x2b3   : > { %v3487_v45 = vunpack.c.l.b16 %v3289_v16  ;;  %v3490_v2 = vunpack.c.l.b16 %v3292_v11  ;;  %v1451_v41 = vmul.f32 %v6876_v34, %v1450_v37  ;;  %5470 = vpow2.f32 %v1363_v57 }
 0x2b4   : > { %v2091_v50 = vmul.f32 %v1998_v52, %v1899_v63  ;;  %v6982_v27 = vpack.c.b16 %v3614_v53, %v3613_v3  ;;  %v1898_v58 = vsub.f32 %v5534_v44, %v5533_v35  ;;  %2215 = vadd.xlane.f32.xlu0 %v2214_v59  ;;  %v3489_v21 = vunpack.c.l.b16 %v3291_v49  ;;  %5269 = vmatpush.bf16.msra.mxu2 %v5239_v61  ;;  %v5539_v59 = vld [vmem:[%s5939_s28 + $0x70] sm:$0xff] }
 0x2b5   : > { %v3517_v56 = vpack.c.b16 %v3488_v17, %v3487_v45  ;;  %v1436_v6 = vmul.f32 %v6857_v18, %v1435_v38  ;;  %v1361_v37 = vmul.f32 1.442695, %v1302_v32  ;;  %v1452_v39 = vadd.f32 %v6876_v34, %v1451_v41  ;;  %3898 = vmatpush.bf16.msra.mxu1 %v5239_v61 }
 0x2b6   : > { %5042 = vmatmul.msk.bf16.gmra.mxu3 %vm852_vm0, %v6982_v27  ;;  %v1993_v46 = vpop.permute.xlu0 %1992  ;;  %v3518_v57 = vpack.c.b16 %v3490_v2, %v3489_v21  ;;  %vm1454_vm5 = vweird.f32 %v6876_v34  ;;  %v6995_v16 = vadd.f32 %v5531_v62, %v2091_v50  ;;  %v1459_v29 = vand.u32 2147483648, %v6791_v12  ;;  %v5535_v21 = vld [vmem:[%s5939_s28 + $0xa0] sm:$0xff] }
 0x2b7   : > { %3541 = vrot.lane.b32.xlu2 %v3517_v56, %s5770_s7  ;;  %v2090_v8 = vmul.f32 %v1993_v46, %v1898_v58  ;;  %vm1453_vm6 = vweird.f32 %v6791_v12  ;;  %v1457_v11 = vand.u32 2147483647, %v6791_v12  ;;  %v1437_v60 = vadd.f32 %v6857_v18, %v1436_v6  ;;  %v5536_v6 = vld [vmem:[%s6053_s25 + $0xa0] sm:$0xff] }
 0x2b8   : > { %v5469_v40 = vpop.eup %5468  ;;  %vm1439_vm7 = vweird.f32 %v6857_v18  ;;  %5472 = vpow2.f32 %v1361_v37  ;;  %vm7010_vm8 = vmor %vm1453_vm6, %vm1454_vm5  ;;  %v1444_v12 = vand.u32 2147483648, %v6473_v31  ;;  %vm1438_vm9 = vweird.f32 %v6473_v31  ;;  %5270 = vmatpush.bf16.msra.mxu2 %v5238_v48 }
 0x2b9   : > { %3543 = vrot.lane.b32.xlu1 %v3518_v57, %s5770_s7  ;;  %v5471_v62 = vpop.eup %5470  ;;  %v7006_v63 = vadd.f32 %v5533_v35, %v2090_v8  ;;  %v7015_v53 = vadd.f32 1.0, %v5469_v40  ;;  %v1456_v38 = vsel %vm7010_vm8, %v6876_v34, %v1452_v39  ;;  %v1442_v52 = vand.u32 2147483647, %v6473_v31  ;;  %vm7026_vm11 = vmor %vm1438_vm9, %vm1439_vm7  ;;  %v5237_v31 = vld [vmem:[%s8631_s30 + $0x78] sm:$0xff]  ;;  %3899 = vmatpush.bf16.msra.mxu1 %v5238_v48  ;;  %v5235_v39 = vld [vmem:[%s8631_s30 + $0x68] sm:$0xff]  ;;  %v7067_v40 = vpop.xlane.xlu1 %1237 }
 0x2ba   : > { %v8586_v17 = vrot.slane %v6995_v16, 7  ;;  %v1460_v32 = vor.u32 1.1754944e-38, %v1459_v29  ;;  %v7030_v3 = vadd.f32 1.0, %v5471_v62  ;;  %vm1458_vm12 = vcmp.eq.f32.partialorder %v1457_v11, 8.507059e+37  ;;  %v5234_v11 = vld [vmem:[%s8631_s30 + $0x60] sm:$0xff]  ;;  %v5538_v48 = vld [vmem:[%s6053_s25 + $0xa8] sm:$0xff] }
 0x2bb   : > { %v2860_v49 = vrot.slane %v7006_v63, 7  ;;  %v1441_v34 = vsel %vm7026_vm11, %v6857_v18, %v1437_v60  ;;  %v2227_v45 = vadd.f32 %v6536_v47, %v6301_v1  ;;  %v1445_v41 = vor.u32 1.1754944e-38, %v1444_v12  ;;  %v5236_v1 = vld [vmem:[%s8631_s30 + $0x70] sm:$0xff] }
 0x2bc   : > { %v1461_v2 = vsel %vm1458_vm12, %v1460_v32, %v1456_v38  ;;  %5474 = vrcp.f32 %v7015_v53  ;;  %vm1443_vm13 = vcmp.eq.f32.partialorder %v1442_v52, 8.507059e+37  ;;  %5271 = vmatpush.bf16.msra.mxu2 %v5237_v31  ;;  %v1903_v37 = vsub.f32 %v5536_v6, %v5535_v21  ;;  %v5537_v60 = vld [vmem:[%s5939_s28 + $0xa8] sm:$0xff] }
 0x2bd   : > { %v7046_v28 = vsel %vm2879_vm10, %v2860_v49, %v8586_v17  ;;  %v1446_v50 = vsel %vm1443_vm13, %v1445_v41, %v1441_v34  ;;  %5476 = vrcp.f32 %v7030_v3  ;;  %v2231_v35 = vsub.f32 0.0, %v2227_v45  ;;  %3900 = vmatpush.bf16.msra.mxu1 %v5237_v31  ;;  %v5540_v34 = vld [vmem:[%s6053_s25 + $0x70] sm:$0xff]  ;;  %v5541_v41 = vld [vmem:[%s8631_s30 + $0xb8] sm:$0xff] }
 0x2be   : > { %v5473_v18 = vpop.eup %5472  ;;  %v1904_v62 = vsub.f32 %v5538_v48, %v5537_v60  ;;  %v1897_v31 = vsub.f32 %v5540_v34, %v5539_v59  ;;  %v2354_v45 = vadd.s32 120, %v6519_v25  ;;  %vm1828_vm14 = vweird.f32 %v7030_v3 }
 0x2bf   : > { %1932 = vperm.xlu2 %5357, %v1461_v2   ;;  %v7053_v44 = vadd.f32 1.0, %v5473_v18  ;;  %v2236_v56 = vmul.f32 1.442695, %v2231_v35  ;;  %v1802_v2 = vand.u32 2147483647, %v7015_v53  ;;  %v1804_v35 = vand.u32 2147483648, %v7015_v53 }
 0x2c0   : > { %5272 = vmatpush.bf16.msra.mxu2 %v5236_v1  ;;  %v1832_v6 = vand.u32 2147483647, %v7030_v3  ;;  %vm1798_vm3 = vweird.f32 %v7015_v53  ;;  %v3295_v19 = vpack.c.bf16 %v6995_v16, %v6995_v16 }
 0x2c1   : > { %1927 = vperm.xlu1 %5359, %v1446_v50   ;;  %3901 = vmatpush.bf16.msra.mxu1 %v5236_v1  ;;  %5478 = vrcp.f32 %v7053_v44  ;;  %vm1803_vm11 = vcmp.eq.f32.partialorder %v1802_v2, 8.507059e+37  ;;  %vm1813_vm13 = vweird.f32 %v7053_v44 }
 0x2c2   : > { %v7055_v58 = vpop.eup %5474  ;;  %5480 = vpow2.f32 %v2236_v56  ;;  %vm1833_vm9 = vcmp.eq.f32.partialorder %v1832_v6, 8.507059e+37  ;;  %v3078_v6 = vrot.slane %v6995_v16, 1 }
 0x2c3   : > { %v7059_v46 = vpop.eup %5476  ;;  %v1794_v61 = vmul.f32 %v7055_v58, %v7015_v53  ;;  %vm1799_vm4 = vweird.f32 %v7055_v58 }
 0x2c4   : > { %5273 = vmatpush.bf16.msra.mxu2 %v5235_v39  ;;  %v1824_v29 = vmul.f32 %v7059_v46, %v7030_v3  ;;  %vm1829_vm5 = vweird.f32 %v7059_v46  ;;  %vm7184_vm8 = vmor %vm1798_vm3, %vm1799_vm4 }
 0x2c5   : > { %3902 = vmatpush.bf16.msra.mxu1 %v5235_v39  ;;  %v1795_v10 = vsub.f32 1.0, %v1794_v61  ;;  %vm7164_vm7 = vmor %vm1828_vm14, %vm1829_vm5 }
 0x2c6   : > { %v2018_v57 = vpop.permute.xlu2 %2017  ;;  %v1825_v52 = vsub.f32 1.0, %v1824_v29  ;;  %v1834_v29 = vand.u32 2147483648, %v7030_v3 }
 0x2c7   : > { %v2095_v8 = vmul.f32 %v2018_v57, %v1903_v37  ;;  %v7076_v12 = vpop.eup %5478  ;;  %v1796_v1 = vmul.f32 %v7055_v58, %v1795_v10  ;;  %v2355_v37 = vadd.s32 128, %v6519_v25  ;;  %v2484_v10 = vand.u32 15, %v2354_v45 }
 0x2c8   : > { %5274 = vmatpush.bf16.msra.mxu2 %v5234_v11  ;;  %v5481_v18 = vpop.eup %5480  ;;  %v7091_v56 = vmul.f32 %v7076_v12, %v7053_v44  ;;  %vm1814_vm14 = vweird.f32 %v7076_v12 }
 0x2c9   : > { %v7078_v38 = vadd.f32 %v5535_v21, %v2095_v8  ;;  %3903 = vmatpush.bf16.msra.mxu1 %v5234_v11  ;;  %v3075_v21 = vrot.slane %v6935_v30, 1  ;;  %v1826_v8 = vmul.f32 %v7059_v46, %v1825_v52  ;;  %v7105_v11 = vadd.f32 1.0, %v5481_v18  ;;  %vm1815_vm3 = vmor %vm1813_vm13, %vm1814_vm14 }
 0x2ca   : > { %vm3039_vm15 = vcmp.eq.s32.totalorder %v2484_v10, 15 }
 0x2cb   : > { %v3299_v61 = vpack.c.bf16 %v7078_v38, %v7078_v38  ;;  %v8584_v48 = vrot.slane %v7078_v38, 7  ;;  %v3117_v45 = vsel %vm3096_vm2, %v3074_v22, %v3075_v21  ;;  %5482 = vrcp.f32 %v7105_v11 }
 0x2cc   : > { %v2270_v5 = vand.u32 2147483647, %v7105_v11 }
 0x2cd   : > { %3989 = vmatpush.bf16.msrb.mxu1 %v5541_v41 }
 0x2ce   : > { %v2023_v32 = vpop.permute.xlu2 %2022 }
 0x2cf   : > { %v2096_v50 = vmul.f32 %v2023_v32, %v1904_v62  ;;  %v8585_v32 = vrot.slane %v7078_v38, 1 }
 0x2d1   : > { %v7097_v57 = vadd.f32 %v5537_v60, %v2096_v50  ;;  %v1988_v39 = vpop.permute.xlu1 %1987  ;;  %v5542_v60 = vld [vmem:[%s8631_s30 + $0xb0] sm:$0xff]  ;;  %v2491_v50 = vand.u32 15, %v2355_v37 }
 0x2d2   : > { %v2089_v62 = vmul.f32 %v1988_v39, %v1897_v31  ;;  %3990 = vmatpush.bf16.msrb.mxu1 %v5542_v60  ;;  %v3294_v31 = vpack.c.bf16 %v7006_v63, %v7006_v63  ;;  %v3497_v39 = vunpack.c.l.b16 %v3299_v61  ;;  %v5543_v61 = vld [vmem:[%s8631_s30 + $0xa8] sm:$0xff] }
 0x2d3   : > { %v2866_v52 = vrot.slane %v7097_v57, 7  ;;  %v3083_v34 = vrot.slane %v7097_v57, 1  ;;  %v3300_v41 = vpack.c.bf16 %v7097_v57, %v7097_v57  ;;  %vm7151_vm6 = vcmp.eq.s32.totalorder %v2491_v50, 0  ;;  %v5544_v50 = vld [vmem:[%s8631_s30 + $0xa0] sm:$0xff] }
 0x2d4   : > { %v7116_v18 = vadd.f32 %v5539_v59, %v2089_v62 }
 0x2d5   : > { %v3498_v60 = vunpack.c.l.b16 %v3300_v41  ;;  %v7130_v42 = vsel %vm3096_vm2, %v8585_v32, %v3083_v34  ;;  %v7138_v54 = vsel %vm2879_vm10, %v8584_v48, %v2866_v52  ;;  %v3327_v41 = vpack.c.bf16 %v3117_v45, %v3117_v45 }
 0x2d6   : > { %v2859_v22 = vrot.slane %v7116_v18, 7  ;;  %v3076_v59 = vrot.slane %v7116_v18, 1  ;;  %v3293_v37 = vpack.c.bf16 %v7116_v18, %v7116_v18  ;;  %3991 = vmatpush.bf16.msrb.mxu1 %v5543_v61  ;;  %v3492_v32 = vunpack.c.l.b16 %v3294_v31 }
 0x2d7   : > { %v3522_v62 = vpack.c.b16 %v3498_v60, %v3497_v39  ;;  %v1827_v18 = vadd.f32 %v7059_v46, %v1826_v8  ;;  %v2356_v61 = vadd.s32 136, %v6519_v25  ;;  %v3615_v30 = vunpack.c.l.b16 %v3327_v41 }
 0x2d8   : > { %v3491_v48 = vunpack.c.l.b16 %v3293_v37  ;;  %v3116_v9 = vsel %vm3096_vm2, %v3075_v21, %v3076_v59  ;;  %v2898_v45 = vsel %vm2879_vm10, %v2859_v22, %v2860_v49  ;;  %v1835_v49 = vor.u32 1.1754944e-38, %v1834_v29 }
 0x2d9   : > { %3551 = vrot.lane.b32.xlu0 %v3522_v62, %s5770_s7  ;;  %v3220_v10 = vsel %vm3039_vm15, 0.0, %v3116_v9  ;;  %v2899_v9 = vsel %vm2879_vm10, %v2858_v24, %v2859_v22  ;;  %v3258_v8 = vpack.c.bf16 %v2898_v45, %v2898_v45  ;;  %v1831_v17 = vsel %vm7164_vm7, %v7059_v46, %v1827_v18 }
 0x2da   : > { %v3519_v31 = vpack.c.b16 %v3492_v32, %v3491_v48  ;;  %v3328_v39 = vpack.c.bf16 %v3220_v10, %v3220_v10  ;;  %3992 = vmatpush.bf16.msrb.mxu1 %v5544_v50  ;;  %v1797_v48 = vadd.f32 %v7055_v58, %v1796_v1  ;;  %v1810_v32 = vsub.f32 1.0, %v7091_v56  ;;  %v7190_v1 = vpop.eup %5482 }
 0x2db   : > { %v3004_v60 = vsel %vm7151_vm6, 0.0, %v2899_v9  ;;  %v7188_v22 = vunpack.c.l.b16 %v3258_v8  ;;  %v3077_v56 = vrot.slane %v7006_v63, 1  ;;  %v2498_v41 = vand.u32 15, %v2356_v61 }
 0x2dc   : > { %3545 = vrot.lane.b32.xlu2 %v3519_v31, %s5770_s7  ;;  %v3616_v37 = vunpack.c.l.b16 %v3328_v39  ;;  %v3257_v29 = vpack.c.bf16 %v3004_v60, %v3004_v60  ;;  %v1801_v45 = vsel %vm7184_vm8, %v7055_v58, %v1797_v48  ;;  %v1805_v46 = vor.u32 1.1754944e-38, %v1804_v35  ;;  %v5562_v58 = vld [vmem:[%s5939_s28 + $0x18] sm:$0xff] }
 0x2dd   : > { %v1811_v3 = vmul.f32 %v7076_v12, %v1810_v32  ;;  %v1836_v63 = vsel %vm1833_vm9, %v1835_v49, %v1831_v17  ;;  %v2262_v18 = vmul.f32 %v7190_v1, %v7105_v11  ;;  %vm3041_vm12 = vcmp.eq.s32.totalorder %v2498_v41, 15 }
 0x2de   : > { %v7198_v62 = vpack.c.b16 %v3616_v37, %v3615_v30  ;;  %v7200_v10 = vunpack.c.l.b16 %v3257_v29  ;;  %v3114_v53 = vsel %vm3096_vm2, %v3077_v56, %v3078_v6  ;;  %v1806_v35 = vsel %vm1803_vm11, %v1805_v46, %v1801_v45 }
 0x2df   : > { %v3115_v31 = vsel %vm3096_vm2, %v3076_v59, %v3077_v56  ;;  %v1812_v21 = vadd.f32 %v7076_v12, %v1811_v3  ;;  %v2263_v9 = vsub.f32 1.0, %v2262_v18  ;;  %v1819_v8 = vand.u32 2147483648, %v7053_v44  ;;  %v5546_v56 = vld [vmem:[%s6053_s25 + $0xb0] sm:$0xff] }
 0x2e0   : > { %8694 = vst [vmem:[#allocation21_spill] sm:$0xff] %v7198_v62  ;;  %5043 = vmatmul.msk.bf16.gmra.mxu3 %vm852_vm0, %v7198_v62  ;;  %v3222_v50 = vsel %vm3041_vm12, 0.0, %v3114_v53  ;;  %v3329_v48 = vpack.c.bf16 %v3115_v31, %v3115_v31  ;;  %vm2266_vm15 = vweird.f32 %v7105_v11  ;;  %vm2267_vm5 = vweird.f32 %v7190_v1 }
 0x2e1   : > { %v1235_v61 = vpop.xlane.xlu0 %1234  ;;  %2057 = vperm.xlu0 %5358, %v1836_v63   ;;  %v1816_v60 = vsel %vm1815_vm3, %v7076_v12, %v1812_v21  ;;  %v3330_v30 = vpack.c.bf16 %v3222_v50, %v3222_v50  ;;  %v2264_v59 = vmul.f32 %v7190_v1, %v2263_v9  ;;  %v2272_v29 = vand.u32 2147483648, %v7105_v11  ;;  %vm2268_vm6 = vmor %vm2266_vm15, %vm2267_vm5 }
 0x2e2   : > { %v1273_v2 = vadd.f32 %v6536_v47, %v1235_v61  ;;  %v1817_v47 = vand.u32 2147483647, %v7053_v44  ;;  %v1820_v44 = vor.u32 1.1754944e-38, %v1819_v8  ;;  %v3617_v24 = vunpack.c.l.b16 %v3329_v48 }
 0x2e3   : > { %v3618_v17 = vunpack.c.l.b16 %v3330_v30  ;;  %v2265_v51 = vadd.f32 %v7190_v1, %v2264_v59  ;;  %v2362_v45 = vadd.s32 184, %v6519_v25  ;;  %v2273_v3 = vor.u32 1.1754944e-38, %v2272_v29  ;;  %v5547_v30 = vld [vmem:[%s5939_s28] sm:$0xff] }
 0x2e4   : > { %v1305_v39 = vsub.f32 0.0, %v1273_v2  ;;  %2047 = vperm.xlu2 %5357, %v1806_v35   ;;  %vm1818_vm4 = vcmp.eq.f32.partialorder %v1817_v47, 8.507059e+37  ;;  %vm2271_vm7 = vcmp.eq.f32.partialorder %v2270_v5, 8.507059e+37  ;;  %v2363_v21 = vadd.s32 192, %v6519_v25  ;;  %v5548_v59 = vld [vmem:[%s6053_s25] sm:$0xff] }
 0x2e5   : > { %v1821_v12 = vsel %vm1818_vm4, %v1820_v44, %v1816_v60  ;;  %v7246_v46 = vpack.c.b16 %v3618_v17, %v3617_v24  ;;  %v2269_v61 = vsel %vm2268_vm6, %v7190_v1, %v2265_v51  ;;  %v2540_v53 = vand.u32 15, %v2362_v45  ;;  %v5549_v24 = vld [vmem:[%s5939_s28 + $0xb8] sm:$0xff] }
 0x2e6   : > { %v1367_v49 = vmul.f32 1.442695, %v1305_v39  ;;  %v2274_v31 = vsel %vm2271_vm7, %v2273_v3, %v2269_v61  ;;  %v2357_v8 = vadd.s32 144, %v6519_v25  ;;  %v2547_v60 = vand.u32 15, %v2363_v21 }
 0x2e7   : > { %8695 = vst [vmem:[#allocation22_spill] sm:$0xff] %v7246_v46  ;;  %vm3047_vm8 = vcmp.eq.s32.totalorder %v2540_v53, 15  ;;  %v1883_v44 = vsub.f32 %v5548_v59, %v5547_v30 }
 0x2e8   : > { %v3538_v32 = vpop.permute.xlu2 %3537  ;;  %5484 = vpow2.f32 %v1367_v49  ;;  %v2505_v17 = vand.u32 15, %v2357_v8  ;;  %vm2831_vm9 = vcmp.eq.s32.totalorder %v2547_v60, 0 }
 0x2e9   : > { %v7235_v37 = vsel %vm852_vm0, %v3425_v15, %v3538_v32  ;;  %v5545_v15 = vld [vmem:[%s5939_s28 + $0xb0] sm:$0xff]  ;;  %v3335_v32 = vpack.c.bf16 %v7130_v42, %v7130_v42  ;;  %v5551_v42 = vld [vmem:[%s5939_s28 + $0x8] sm:$0xff] }
 0x2ea   : > { %3919 = vmatmul.bf16.vlgmr.msra.gmra.mxu2 %v7235_v37  ;;  %v1905_v41 = vsub.f32 %v5546_v56, %v5545_v15  ;;  %vm2825_vm11 = vcmp.eq.s32.totalorder %v2505_v17, 0  ;;  %v5556_v17 = vld [vmem:[%s5939_s28 + $0xc0] sm:$0xff] }
 0x2eb   : > { %v3623_v51 = vunpack.c.l.b16 %v3335_v32  ;;  %v5555_v32 = vld [vmem:[%s6053_s25 + $0x90] sm:$0xff] }
 0x2ec   : > { %2052 = vperm.xlu2 %5357, %v1821_v12  }
 0x2ee   : > { %v5485_v63 = vpop.eup %5484 }
 0x2ef   : > { %v7251_v11 = vadd.f32 1.0, %v5485_v63 }
 0x2f0   : > { %v2028_v18 = vpop.permute.xlu2 %2027  ;;  %5044 = vmatmul.msk.bf16.gmra.mxu3 %vm852_vm0, %v7246_v46 }
 0x2f1   : > { %v2097_v2 = vmul.f32 %v2028_v18, %v1905_v41  ;;  %5486 = vrcp.f32 %v7251_v11  ;;  %v5552_v41 = vld [vmem:[%s6053_s25 + $0x8] sm:$0xff]  ;;  %vm1858_vm12 = vweird.f32 %v7251_v11 }
 0x2f2   : > { %v1884_v45 = vsub.f32 %v5552_v41, %v5551_v42 }
 0x2f3   : > { %v7253_v35 = vadd.f32 %v5545_v15, %v2097_v2 }
 0x2f4   : > { %v7255_v39 = vpop.permute.xlu0 %2007  ;;  %2317 = vperm.xlu2 %5357, %v2274_v31  }
 0x2f5   : > { %v2867_v9 = vrot.slane %v7253_v35, 7  ;;  %v8589_v1 = vrot.slane %v7253_v35, 1  ;;  %v3301_v18 = vpack.c.bf16 %v7253_v35, %v7253_v35 }
 0x2f7   : > { %v3108_v47 = vsel %vm3096_vm2, %v3083_v34, %v8589_v1  ;;  %v2891_v50 = vsel %vm2879_vm10, %v2866_v52, %v2867_v9  ;;  %v5550_v34 = vld [vmem:[%s6053_s25 + $0xb8] sm:$0xff]  ;;  %v7278_v52 = vpop.eup %5486 }
 0x2f8   : > { %v1918_v49 = vpop.permute.xlu2 %1917  ;;  %v3228_v48 = vsel %vm3047_vm8, 0.0, %v3108_v47  ;;  %v1906_v12 = vsub.f32 %v5550_v34, %v5549_v24  ;;  %v3012_v61 = vsel %vm2831_vm9, 0.0, %v2891_v50  ;;  %v1854_v53 = vmul.f32 %v7278_v52, %v7251_v11  ;;  %v5554_v50 = vld [vmem:[%s5939_s28 + $0x90] sm:$0xff] }
 0x2f9   : > { %v3336_v29 = vpack.c.bf16 %v3228_v48, %v3228_v48  ;;  %v2075_v15 = vmul.f32 %v1918_v49, %v1883_v44  ;;  %v7295_v49 = vld [vmem:[#allocation2] ss:$0 sm:$0xff]  ;;  %v1901_v60 = vsub.f32 %v5555_v32, %v5554_v50  ;;  %v3265_v59 = vpack.c.bf16 %v3012_v61, %v3012_v61 }
 0x2fa   : > { %v7299_v48 = vadd.f32 %v7295_v49, %v6259_v36  ;;  %v3499_v34 = vunpack.c.l.b16 %v3301_v18  ;;  %v2358_v32 = vadd.s32 152, %v6519_v25  ;;  %vm1859_vm13 = vweird.f32 %v7278_v52 }
 0x2fb   : > { %v3624_v5 = vunpack.c.l.b16 %v3336_v29  ;;  %v7290_v31 = vadd.f32 %v5547_v30, %v2075_v15  ;;  %v3006_v30 = vsel %vm2825_vm11, 0.0, %v7046_v28  ;;  %vm7386_vm3 = vmor %vm1858_vm12, %vm1859_vm13 }
 0x2fc   : > { %v2033_v57 = vpop.permute.xlu0 %2032 }
 0x2fd   : > { %v2098_v56 = vmul.f32 %v2033_v57, %v1906_v12  ;;  %v7282_v3 = vpack.c.b16 %v3624_v5, %v3623_v51  ;;  %v5557_v57 = vld [vmem:[%s6053_s25 + $0xc0] sm:$0xff]  ;;  %v1855_v51 = vsub.f32 1.0, %v1854_v53  ;;  %v8587_v15 = vrot.slane %v7290_v31, 7 }
 0x2fe   : > { %v1907_v28 = vsub.f32 %v5557_v57, %v5556_v17  ;;  %v3279_v18 = vpack.c.bf16 %v7290_v31, %v7290_v31  ;;  %v1864_v57 = vand.u32 2147483648, %v7251_v11 }
 0x2ff   : > { %v7284_v63 = vadd.f32 %v5549_v24, %v2098_v56 }
 0x300   : > { %v1923_v2 = vpop.permute.xlu2 %1922 }
 0x301   : > { %v2868_v21 = vrot.slane %v7284_v63, 7  ;;  %v2076_v47 = vmul.f32 %v1923_v2, %v1884_v45  ;;  %v3302_v8 = vpack.c.bf16 %v7284_v63, %v7284_v63  ;;  %v2093_v45 = vmul.f32 %v7255_v39, %v1901_v60 }
 0x302   : > { %v3477_v60 = vunpack.c.l.b16 %v3279_v18  ;;  %v1865_v18 = vor.u32 1.1754944e-38, %v1864_v57 }
 0x303   : > { %v7304_v44 = vadd.f32 %v5551_v42, %v2076_v47  ;;  %v3540_v24 = vpop.permute.xlu1 %3539  ;;  %v3500_v12 = vunpack.c.l.b16 %v3302_v8  ;;  %v2890_v29 = vsel %vm2879_vm10, %v2867_v9, %v2868_v21  ;;  %v7325_v42 = vunpack.c.l.b16 %v3265_v59  ;;  %v5558_v47 = vld [vmem:[%s5939_s28 + $0x88] sm:$0xff] }
 0x304   : > { %v7314_v36 = vsel %vm852_vm0, %v3426_v33, %v3540_v24  ;;  %v3266_v5 = vpack.c.bf16 %v2890_v29, %v2890_v29  ;;  %v3259_v33 = vpack.c.bf16 %v3006_v30, %v3006_v30  ;;  %v5559_v8 = vld [vmem:[%s6053_s25 + $0x88] sm:$0xff]  ;;  %v1856_v24 = vmul.f32 %v7278_v52, %v1855_v51 }
 0x305   : > { %v8588_v56 = vrot.slane %v7304_v44, 7  ;;  %3924 = vmatmul.bf16.gmra.mxu2 %v7314_v36  ;;  %v3523_v9 = vpack.c.b16 %v3500_v12, %v3499_v34  ;;  %v3280_v23 = vpack.c.bf16 %v7304_v44, %v7304_v44  ;;  %v1900_v39 = vsub.f32 %v5559_v8, %v5558_v47 }
 0x306   : > { %v7327_v41 = vunpack.c.l.b16 %v3266_v5  ;;  %v2359_v34 = vadd.s32 160, %v6519_v25  ;;  %v3493_v12 = vunpack.c.l.b16 %v3295_v19  ;;  %v1862_v29 = vand.u32 2147483647, %v7251_v11 }
 0x307   : > { %3553 = vrot.lane.b32.xlu0 %v3523_v9, %s5770_s7  ;;  %v7339_v61 = vsel %vm2879_vm10, %v8587_v15, %v8588_v56  ;;  %v3478_v59 = vunpack.c.l.b16 %v3280_v23  ;;  %v7351_v5 = vunpack.c.l.b16 %v3259_v33  ;;  %v7353_v9 = vadd.f32 %v5554_v50, %v2093_v45  ;;  %v5561_v23 = vld [vmem:[%s6053_s25 + $0x98] sm:$0xff] }
 0x308   : > { %v2038_v53 = vpop.permute.xlu2 %2037  ;;  %v2512_v19 = vand.u32 15, %v2358_v32  ;;  %v1857_v50 = vadd.f32 %v7278_v52, %v1856_v24  ;;  %vm7363_vm14 = vcmp.eq.f32.partialorder %v1862_v29, 8.507059e+37 }
 0x309   : > { %v2099_v30 = vmul.f32 %v2038_v53, %v1907_v28  ;;  %v5560_v28 = vld [vmem:[%s5939_s28 + $0x98] sm:$0xff]  ;;  %v3512_v56 = vpack.c.b16 %v3478_v59, %v3477_v60  ;;  %v8591_v1 = vrot.slane %v7353_v9, 1  ;;  %v3297_v32 = vpack.c.bf16 %v7353_v9, %v7353_v9 }
 0x30a   : > { %v1902_v51 = vsub.f32 %v5561_v23, %v5560_v28  ;;  %v5563_v23 = vld [vmem:[%s6053_s25 + $0x18] sm:$0xff]  ;;  %vm3043_vm4 = vcmp.eq.s32.totalorder %v2512_v19, 15  ;;  %v1861_v29 = vsel %vm7386_vm3, %v7278_v52, %v1857_v50  ;;  %v8702_v52 = vrot.slane %v6995_v16, 7 }
 0x30b   : > { %v7355_v8 = vadd.f32 %v5556_v17, %v2099_v30  ;;  %v2519_v17 = vand.u32 15, %v2359_v34 }
 0x30c   : > { %v2003_v15 = vpop.permute.xlu1 %2002 }
 0x30d   : > { %v2092_v53 = vmul.f32 %v2003_v15, %v1900_v39  ;;  %v8590_v33 = vrot.slane %v7355_v8, 7  ;;  %v1886_v15 = vsub.f32 %v5563_v23, %v5562_v58  ;;  %v2863_v39 = vrot.slane %v7353_v9, 7 }
 0x30e   : > { %vm7394_vm15 = vcmp.eq.s32.totalorder %v2519_v17, 0  ;;  %v8703_v23 = vpack.c.b16 %v6882_v43, %v6880_v20  ;;  %v2345_v20 = vadd.s32 48, %v6519_v25  ;;  %v8704_v43 = vsub.f32 0.0, %v7299_v48 }
 0x30f   : > { %v2124_v45 = vadd.f32 %v5558_v47, %v2092_v53  ;;  %3531 = vrot.lane.b32.xlu0 %v3512_v56, %s5770_s7  ;;  %v7380_v47 = vsel %vm2879_vm10, %v2868_v21, %v8590_v33  ;;  %v2360_v21 = vadd.s32 168, %v6519_v25  ;;  %v2361_v53 = vadd.s32 176, %v6519_v25 }
 0x310   : > { %v2421_v30 = vand.u32 15, %v2345_v20 }
 0x311   : > { %v2862_v60 = vrot.slane %v2124_v45, 7  ;;  %v3079_v59 = vrot.slane %v2124_v45, 1  ;;  %v3542_v24 = vpop.permute.xlu2 %3541  ;;  %v3296_v34 = vpack.c.bf16 %v2124_v45, %v2124_v45 }
 0x312   : > { %vm7462_vm7 = vcmp.eq.s32.totalorder %v2421_v30, 0 }
 0x313   : > { %v3494_v45 = vunpack.c.l.b16 %v3296_v34  ;;  %v3112_v11 = vsel %vm3096_vm2, %v3079_v59, %v8591_v1  ;;  %v3113_v19 = vsel %vm3096_vm2, %v3078_v6, %v3079_v59  ;;  %v2896_v50 = vsel %vm2879_vm10, %v8702_v52, %v2862_v60 }
 0x314   : > { %v2013_v17 = vpop.permute.xlu1 %2012  ;;  %v7415_v34 = vsel %vm852_vm0, %v8703_v23, %v3542_v24  ;;  %v3224_v56 = vsel %vm3043_vm4, 0.0, %v3112_v11  ;;  %v3331_v33 = vpack.c.bf16 %v3113_v19, %v3113_v19  ;;  %v3260_v1 = vpack.c.bf16 %v2896_v50, %v2896_v50 }
 0x315   : > { %v2094_v2 = vmul.f32 %v2013_v17, %v1902_v51  ;;  %v3520_v46 = vpack.c.b16 %v3494_v45, %v3493_v12  ;;  %v3332_v62 = vpack.c.bf16 %v3224_v56, %v3224_v56  ;;  %v2895_v6 = vsel %vm2879_vm10, %v2862_v60, %v2863_v39  ;;  %3929 = vmatmul.bf16.gmra.mxu2 %v7415_v34 }
 0x316   : > { %v3619_v16 = vunpack.c.l.b16 %v3331_v33  ;;  %v2526_v59 = vand.u32 15, %v2360_v21  ;;  %v7420_v52 = vunpack.c.l.b16 %v3260_v1  ;;  %v1365_v24 = vmul.f32 1.442695, %v8704_v43 }
 0x317   : > { %v2126_v11 = vadd.f32 %v5560_v28, %v2094_v2  ;;  %3547 = vrot.lane.b32.xlu1 %v3520_v46, %s5770_s7  ;;  %v1866_v12 = vsel %vm7363_vm14, %v1865_v18, %v1861_v29  ;;  %v3620_v51 = vunpack.c.l.b16 %v3332_v62  ;;  %v3495_v60 = vunpack.c.l.b16 %v3297_v32 }
 0x318   : > { %2067 = vperm.xlu0 %5358, %v1866_v12   ;;  %v3008_v1 = vsel %vm7394_vm15, 0.0, %v2895_v6  ;;  %v2533_v21 = vand.u32 15, %v2361_v53  ;;  %vm7434_vm5 = vcmp.eq.s32.totalorder %v2526_v59, 15  ;;  %v2365_v62 = vadd.s32 208, %v6519_v25 }
 0x319   : > { %v2864_v45 = vrot.slane %v2126_v11, 7  ;;  %v3081_v19 = vrot.slane %v2126_v11, 1  ;;  %v1933_v48 = vpop.permute.xlu2 %1932  ;;  %v7432_v50 = vpack.c.b16 %v3620_v51, %v3619_v16  ;;  %v3298_v2 = vpack.c.bf16 %v2126_v11, %v2126_v11  ;;  %v5565_v51 = vld [vmem:[%s6053_s25 + $0xc8] sm:$0xff] }
 0x31a   : > { %v2078_v46 = vmul.f32 %v1933_v48, %v1886_v15  ;;  %v8707_v32 = vrot.slane %v7078_v38, 1  ;;  %v3261_v15 = vpack.c.bf16 %v3008_v1, %v3008_v1  ;;  %5488 = vpow2.f32 %v1365_v24 }
 0x31b   : > { %5045 = vmatmul.msk.bf16.gmra.mxu3 %vm852_vm0, %v7432_v50  ;;  %v3496_v18 = vunpack.c.l.b16 %v3298_v2  ;;  %v2894_v57 = vsel %vm2879_vm10, %v2863_v39, %v2864_v45  ;;  %vm2829_vm6 = vcmp.eq.s32.totalorder %v2533_v21, 0  ;;  %v8708_v56 = vrot.slane %v7078_v38, 7  ;;  %v2201_v38 = vpop.f32.mrf.mxu1 }
 0x31c   : > { %v3110_v29 = vsel %vm3096_vm2, %v3081_v19, %v8707_v32  ;;  %v7447_v53 = vadd.f32 %v5562_v58, %v2078_v46  ;;  %v3262_v23 = vpack.c.bf16 %v2894_v57, %v2894_v57  ;;  %v3264_v16 = vpack.c.bf16 %v7138_v54, %v7138_v54 }
 0x31d   : > { %v3521_v17 = vpack.c.b16 %v3496_v18, %v3495_v60  ;;  %v2893_v6 = vsel %vm2879_vm10, %v2864_v45, %v8708_v56  ;;  %v8709_v39 = vrot.slane %v7353_v9, 1  ;;  %v3226_v20 = vsel %vm7434_vm5, 0.0, %v3110_v29  ;;  %v5564_v9 = vld [vmem:[%s5939_s28 + $0xc8] sm:$0xff] }
 0x31e   : > { %v8598_v59 = vrot.slane %v7447_v53, 7  ;;  %v7467_v24 = vunpack.c.l.b16 %v3261_v15  ;;  %v7469_v54 = vunpack.c.l.b16 %v3262_v23  ;;  %v3010_v11 = vsel %vm2829_vm6, 0.0, %v2893_v6 }
 0x31f   : > { %v3111_v58 = vsel %vm3096_vm2, %v8709_v39, %v3081_v19  ;;  %3549 = vrot.lane.b32.xlu2 %v3521_v17, %s5770_s7  ;;  %v2561_v12 = vand.u32 15, %v2365_v62  ;;  %v1908_v60 = vsub.f32 %v5565_v51, %v5564_v9  ;;  %v3263_v1 = vpack.c.bf16 %v3010_v11, %v3010_v11 }
 0x320   : > { %v8712_v21 = vrot.slane %v6509_v7, 7  ;;  %v3248_v19 = vpack.c.bf16 %v6558_v4, %v6558_v4  ;;  %v3333_v48 = vpack.c.bf16 %v3111_v58, %v3111_v58  ;;  %v3334_v2 = vpack.c.bf16 %v3226_v20, %v3226_v20  ;;  %v5489_v62 = vpop.eup %5488 }
 0x321   : > { %v7485_v30 = vunpack.c.l.b16 %v3263_v1  ;;  %v7487_v18 = vunpack.c.l.b16 %v3264_v16  ;;  %vm2833_vm8 = vcmp.eq.s32.totalorder %v2561_v12, 0  ;;  %v7500_v58 = vadd.f32 1.0, %v5489_v62 }
 0x322   : > { %v2909_v45 = vsel %vm2879_vm10, %v8598_v59, %v8712_v21  ;;  %v7493_v17 = vunpack.c.l.b16 %v3248_v19  ;;  %v3621_v23 = vunpack.c.l.b16 %v3333_v48  ;;  %v3622_v56 = vunpack.c.l.b16 %v3334_v2 }
 0x323   : > { %v2994_v28 = vsel %vm7462_vm7, 0.0, %v2909_v45  ;;  %v2043_v29 = vpop.permute.xlu1 %2042  ;;  %v3014_v39 = vsel %vm2833_vm8, 0.0, %v7380_v47  ;;  %v2203_v11 = vpop.f32.mrf.mxu1  ;;  %v1274_v47 = vadd.f32 %v7295_v49, %v7067_v40  ;;  %v8713_v21 = vrot.slane %v7355_v8, 7 }
 0x324   : > { %v3247_v32 = vpack.c.bf16 %v2994_v28, %v2994_v28  ;;  %v2100_v57 = vmul.f32 %v2043_v29, %v1908_v60  ;;  %v7504_v51 = vpack.c.b16 %v3622_v56, %v3621_v23  ;;  %v3267_v60 = vpack.c.bf16 %v3014_v39, %v3014_v39 }
 0x325   : > { %5490 = vrcp.f32 %v7500_v58  ;;  %v1306_v56 = vsub.f32 0.0, %v1274_v47  ;;  %v3063_v39 = vrot.slane %v7304_v44, 1  ;;  %v8715_v4 = vrot.slane %v6509_v7, 1 }
 0x326   : > { %v7491_v15 = vunpack.c.l.b16 %v3247_v32  ;;  %v7495_v6 = vadd.f32 %v5564_v9, %v2100_v57  ;;  %v5566_v9 = vld [vmem:[%s8562_s5] ss:$0 sm:$0xff]  ;;  %v7527_v32 = vunpack.c.l.b16 %v3267_v60  ;;  %v2344_v57 = vadd.s32 40, %v6519_v25  ;;  %v5567_v60 = vld [vmem:[%s5939_s28 + $0x10] sm:$0xff] }
 0x327   : > { %v2216_v43 = vpop.xlane.xlu0 %2215  ;;  %v2202_v1 = vadd.f32 %v5566_v9, %v2201_v38  ;;  %v2204_v28 = vadd.f32 %v5566_v9, %v2203_v11  ;;  %v8714_v38 = vpack.c.b16 %v6971_v0, %v6969_v55  ;;  %v2342_v55 = vadd.s32 24, %v6519_v25  ;;  %v5568_v9 = vld [vmem:[%s6053_s25 + $0x10] sm:$0xff] }
 0x328   : > { %v8597_v20 = vrot.slane %v7495_v6, 7  ;;  %v2226_v12 = vadd.f32 %v7295_v49, %v2216_v43  ;;  %v2364_v0 = vadd.s32 200, %v6519_v25  ;;  %v2414_v47 = vand.u32 15, %v2344_v57 }
 0x329   : > { %v2208_v23 = vmax.f32 %v2202_v1, 0.0  ;;  %v2209_v11 = vmax.f32 %v2204_v28, 0.0  ;;  %v3065_v1 = vrot.slane %v7447_v53, 1  ;;  %v3085_v43 = vrot.slane %v7284_v63, 1 }
 0x32a   : > { %v2888_v45 = vsel %vm2879_vm10, %v8713_v21, %v8597_v20  ;;  %v2230_v19 = vsub.f32 0.0, %v2226_v12  ;;  %v8596_v12 = vrot.slane %v7290_v31, 1  ;;  %v1885_v21 = vsub.f32 %v5568_v9, %v5567_v60  ;;  %v5571_v20 = vld [vmem:[%s6053_s25 + $0xd0] sm:$0xff] }
 0x32b   : > { %5046 = vmatmul.msk.bf16.gmra.mxu3 %vm852_vm0, %v7504_v51  ;;  %v3544_v48 = vpop.permute.xlu1 %3543  ;;  %v3268_v2 = vpack.c.bf16 %v2888_v45, %v2888_v45  ;;  %v7540_v45 = vpop.eup %5490  ;;  %v2554_v16 = vand.u32 15, %v2364_v0  ;;  %vm3029_vm9 = vcmp.eq.s32.totalorder %v2414_v47, 15  ;;  %v3282_v47 = vpack.c.bf16 %v7447_v53, %v7447_v53 }
 0x32c   : > { %v7524_v40 = vsel %vm852_vm0, %v8714_v38, %v3544_v48  ;;  %v2234_v62 = vmul.f32 1.442695, %v2230_v19  ;;  %v1369_v19 = vmul.f32 1.442695, %v1306_v56  ;;  %v3129_v48 = vsel %vm3096_vm2, %v8596_v12, %v3063_v39 }
 0x32d   : > { %3934 = vmatmul.bf16.gmra.mxu2 %v7524_v40  ;;  %v7529_v29 = vunpack.c.l.b16 %v3268_v2  ;;  %v2343_v2 = vadd.s32 32, %v6519_v25  ;;  %v2400_v38 = vand.u32 15, %v2342_v55  ;;  %v7556_v56 = vmul.f32 %v7540_v45, %v7500_v58 }
 0x32e   : > { %5492 = vpow2.f32 %v2234_v62  ;;  %v5569_v62 = vld [vmem:[%s8563_s6] ss:$0 sm:$0xff]  ;;  %v3315_v33 = vpack.c.bf16 %v3129_v48, %v3129_v48  ;;  %v8599_v55 = vrot.slane %v7355_v8, 1  ;;  %vm7572_vm12 = vcmp.eq.s32.totalorder %v2554_v16, 15 }
 0x32f   : > { %v2212_v9 = vmul.f32 %v5569_v62, %v2208_v23  ;;  %v7552_v57 = vmul.f32 %v5569_v62, %v2209_v11  ;;  %v3126_v23 = vsel %vm3096_vm2, %v3065_v1, %v8715_v4  ;;  %5494 = vpow2.f32 %v1369_v19 }
 0x330   : > { %v2407_v11 = vand.u32 15, %v2343_v2  ;;  %vm7565_vm11 = vcmp.eq.s32.totalorder %v2400_v38, 15  ;;  %v3106_v2 = vsel %vm3096_vm2, %v3085_v43, %v8599_v55  ;;  %v8720_v38 = vrot.slane %v7253_v35, 1 }
 0x331   : > { %v2220_v7 = vsel %vm1142_vm1, %v2212_v9, 0.0  ;;  %v5570_v9 = vld [vmem:[%s5939_s28 + $0xd0] sm:$0xff]  ;;  %vm1843_vm6 = vweird.f32 %v7500_v58  ;;  %vm1844_vm7 = vweird.f32 %v7540_v45 }
 0x332   : > { %v3107_v16 = vsel %vm3096_vm2, %v8720_v38, %v3085_v43  ;;  %v1909_v59 = vsub.f32 %v5571_v20, %v5570_v9  ;;  %vm2811_vm13 = vcmp.eq.s32.totalorder %v2407_v11, 0  ;;  %v3480_v43 = vunpack.c.l.b16 %v3282_v47  ;;  %vm7696_vm8 = vmor %vm1843_vm6, %vm1844_vm7 }
 0x333   : > { %v1928_v28 = vpop.permute.xlu1 %1927  ;;  %v8722_v20 = vpack.c.b16 %v7188_v22, %v7200_v10  ;;  %v3230_v47 = vsel %vm7572_vm12, 0.0, %v3106_v2 }
 0x334   : > { %v2077_v46 = vmul.f32 %v1928_v28, %v1885_v21  ;;  %v5493_v12 = vpop.eup %5492  ;;  %v2367_v28 = vadd.s32 224, %v6519_v25 }
 0x335   : > { %v7563_v0 = vadd.f32 1.0, %v5493_v12  ;;  %v3210_v12 = vsel %vm3029_vm9, 0.0, %v3126_v23  ;;  %v5495_v55 = vpop.eup %5494 }
 0x336   : > { %v2109_v63 = vadd.f32 %v5567_v60, %v2077_v46  ;;  %v3546_v48 = vpop.permute.xlu2 %3545  ;;  %v3603_v60 = vunpack.c.l.b16 %v3315_v33  ;;  %v8721_v33 = vrot.slane %v7447_v53, 7  ;;  %v3318_v38 = vpack.c.bf16 %v3210_v12, %v3210_v12 }
 0x337   : > { %5496 = vrcp.f32 %v7563_v0  ;;  %v7601_v11 = vsel %vm852_vm0, %v8722_v20, %v3546_v48  ;;  %v8723_v53 = vrot.slane %v7304_v44, 7  ;;  %v7614_v20 = vadd.f32 1.0, %v5495_v55 }
 0x338   : > { %v2847_v46 = vrot.slane %v2109_v63, 7  ;;  %v3064_v4 = vrot.slane %v2109_v63, 1  ;;  %v3281_v19 = vpack.c.bf16 %v2109_v63, %v2109_v63  ;;  %v3606_v2 = vunpack.c.l.b16 %v3318_v38 }
 0x339   : > { %v3337_v55 = vpack.c.bf16 %v3107_v16, %v3107_v16  ;;  %v5572_v16 = vld [vmem:[%s5939_s28 + $0xd8] sm:$0xff]  ;;  %5498 = vrcp.f32 %v7614_v20  ;;  %vm2251_vm3 = vweird.f32 %v7563_v0 }
 0x33a   : > { %v3128_v62 = vsel %vm3096_vm2, %v3063_v39, %v3064_v4  ;;  %v2910_v23 = vsel %vm2879_vm10, %v2847_v46, %v8721_v33  ;;  %v3479_v35 = vunpack.c.l.b16 %v3281_v19  ;;  %v2911_v21 = vsel %vm2879_vm10, %v8723_v53, %v2847_v46 }
 0x33b   : > { %v3208_v63 = vsel %vm7565_vm11, 0.0, %v3128_v62  ;;  %5047 = vmatmul.msk.bf16.gmra.mxu3 %vm852_vm0, %v7282_v3  ;;  %v3246_v62 = vpack.c.bf16 %v2910_v23, %v2910_v23  ;;  %v2992_v12 = vsel %vm2811_vm13, 0.0, %v2911_v21  ;;  %v3127_v19 = vsel %vm3096_vm2, %v3064_v4, %v3065_v1 }
 0x33c   : > { %v3316_v39 = vpack.c.bf16 %v3208_v63, %v3208_v63  ;;  %v3513_v33 = vpack.c.b16 %v3480_v43, %v3479_v35  ;;  %v3245_v48 = vpack.c.bf16 %v2992_v12, %v2992_v12  ;;  %v3317_v44 = vpack.c.bf16 %v3127_v19, %v3127_v19 }
 0x33d   : > { %3939 = vmatmul.bf16.gmra.mxu2 %v7601_v11  ;;  %v5497_v22 = vpop.eup %5496  ;;  %v7612_v63 = vunpack.c.l.b16 %v3246_v62  ;;  %v3338_v53 = vpack.c.bf16 %v3230_v47, %v3230_v47  ;;  %v2366_v21 = vadd.s32 216, %v6519_v25  ;;  %v2255_v12 = vand.u32 2147483647, %v7563_v0  ;;  %v5573_v47 = vld [vmem:[%s6053_s25 + $0xd8] sm:$0xff] }
 0x33e   : > { %v3604_v10 = vunpack.c.l.b16 %v3316_v39  ;;  %v2048_v46 = vpop.permute.xlu2 %2047  ;;  %3533 = vrot.lane.b32.xlu0 %v3513_v33, %s5770_s7  ;;  %v2247_v23 = vmul.f32 %v5497_v22, %v7563_v0  ;;  %v7619_v43 = vunpack.c.l.b16 %v3245_v48  ;;  %v3605_v4 = vunpack.c.l.b16 %v3317_v44 }
 0x33f   : > { %v2101_v35 = vmul.f32 %v2048_v46, %v1909_v59  ;;  %v2257_v33 = vand.u32 2147483648, %v7563_v0  ;;  %vm2252_vm14 = vweird.f32 %v5497_v22  ;;  %v2575_v19 = vand.u32 15, %v2367_v28 }
 0x340   : > { %v7621_v1 = vpack.c.b16 %v3604_v10, %v3603_v60  ;;  %v2248_v39 = vsub.f32 1.0, %v2247_v23  ;;  %v7629_v38 = vpack.c.b16 %v3606_v2, %v3605_v4  ;;  %v1910_v10 = vsub.f32 %v5573_v47, %v5572_v16  ;;  %vm2253_vm4 = vmor %vm2251_vm3, %vm2252_vm14 }
 0x341   : > { %2221 = vadd.xlane.f32.xlu1 %v2220_v7  ;;  %v7624_v62 = vadd.f32 %v5570_v9, %v2101_v35  ;;  %v2223_v9 = vsel %vm1142_vm1, %v7552_v57, 0.0  ;;  %v1840_v48 = vsub.f32 1.0, %v7556_v56  ;;  %v3626_v46 = vunpack.c.l.b16 %v3338_v53 }
 0x342   : > { %v2249_v60 = vmul.f32 %v5497_v22, %v2248_v39  ;;  %v2258_v23 = vor.u32 1.1754944e-38, %v2257_v33  ;;  %v3625_v2 = vunpack.c.l.b16 %v3337_v55  ;;  %v2568_v28 = vand.u32 15, %v2366_v21 }
 0x343   : > { %v2871_v7 = vrot.slane %v7624_v62, 7  ;;  %v8724_v35 = vrot.slane %v7495_v6, 7  ;;  %v8600_v39 = vrot.slane %v7624_v62, 1  ;;  %vm2256_vm1 = vcmp.eq.f32.partialorder %v2255_v12, 8.507059e+37 }
 0x344   : > { %v2250_v44 = vadd.f32 %v5497_v22, %v2249_v60  ;;  %vm2835_vm15 = vcmp.eq.s32.totalorder %v2575_v19, 0  ;;  %v3087_v53 = vrot.slane %v7495_v6, 1  ;;  %v7646_v55 = vpack.c.b16 %v3626_v46, %v3625_v2  ;;  %v7650_v60 = vpop.eup %5498 }
 0x345   : > { %v2887_v4 = vsel %vm2879_vm10, %v8724_v35, %v2871_v7  ;;  %vm3051_vm5 = vcmp.eq.s32.totalorder %v2568_v28, 15  ;;  %v2341_v46 = vadd.s32 16, %v6519_v25  ;;  %v1869_v35 = vmul.f32 %v7650_v60, %v7614_v20 }
 0x346   : > { %v2053_v57 = vpop.permute.xlu2 %2052  ;;  %v2254_v47 = vsel %vm2253_vm4, %v5497_v22, %v2250_v44  ;;  %v3016_v33 = vsel %vm2835_vm15, 0.0, %v2887_v4  ;;  %v1841_v22 = vmul.f32 %v7540_v45, %v1840_v48  ;;  %v3104_v12 = vsel %vm3096_vm2, %v3087_v53, %v8600_v39 }
 0x347   : > { %v2102_v56 = vmul.f32 %v2053_v57, %v1910_v10  ;;  %v2259_v0 = vsel %vm2256_vm1, %v2258_v23, %v2254_v47  ;;  %v8725_v23 = vpack.c.b16 %v7487_v18, %v7485_v30  ;;  %v3269_v2 = vpack.c.bf16 %v3016_v33, %v3016_v33 }
 0x348   : > { %2224 = vadd.xlane.f32.xlu2 %v2223_v9  ;;  %2312 = vperm.xlu0 %5358, %v2259_v0   ;;  %v5574_v9 = vld [vmem:[%s6021_s12 + $0x8] sm:$0xff]  ;;  %v3232_v28 = vsel %vm3051_vm5, 0.0, %v3104_v12  ;;  %v1842_v30 = vadd.f32 %v7540_v45, %v1841_v22  ;;  %v1847_v18 = vand.u32 2147483647, %v7500_v58  ;;  %v1849_v0 = vand.u32 2147483648, %v7500_v58 }
 0x349   : > { %v7648_v21 = vadd.f32 %v5572_v16, %v2102_v56  ;;  %v5575_v16 = vld [vmem:[%s5949_s27 + $0x8] sm:$0xff]  ;;  %v8726_v33 = vrot.slane %v7355_v8, 1  ;;  %v3340_v59 = vpack.c.bf16 %v3232_v28, %v3232_v28  ;;  %v7686_v39 = vunpack.c.l.b16 %v3269_v2 }
 0x34a   : > { %v2307_v44 = vsub.f32 %v5575_v16, %v5574_v9  ;;  %v5576_v16 = vld [vmem:[%s5939_s28 + $0xe0] sm:$0xff]  ;;  %vm1848_vm11 = vcmp.eq.f32.partialorder %v1847_v18, 8.507059e+37  ;;  %v1850_v58 = vor.u32 1.1754944e-38, %v1849_v0  ;;  %vm1874_vm12 = vweird.f32 %v7650_v60 }
 0x34b   : > { %5048 = vmatmul.msk.bf16.gmra.mxu3 %vm852_vm0, %v7646_v55  ;;  %v8601_v19 = vrot.slane %v7648_v21, 7  ;;  %v3552_v10 = vpop.permute.xlu0 %3551  ;;  %v3105_v12 = vsel %vm3096_vm2, %v8726_v33, %v3087_v53  ;;  %vm1873_vm14 = vweird.f32 %v7614_v20 }
 0x34c   : > { %v7667_v48 = vsel %vm852_vm0, %v8725_v23, %v3552_v10  ;;  %v2393_v10 = vand.u32 15, %v2341_v46  ;;  %v5577_v23 = vld [vmem:[%s6053_s25 + $0xe0] sm:$0xff]  ;;  %v3339_v53 = vpack.c.bf16 %v3105_v12, %v3105_v12  ;;  %v2368_v46 = vadd.s32 232, %v6519_v25  ;;  %vm1875_vm3 = vmor %vm1873_vm14, %vm1874_vm12 }
 0x34d   : > { %v2886_v4 = vsel %vm2879_vm10, %v2871_v7, %v8601_v19  ;;  %v1911_v7 = vsub.f32 %v5577_v23, %v5576_v16  ;;  %v8729_v12 = vrot.slane %v7290_v31, 7 }
 0x34e   : > { %v2318_v57 = vpop.permute.xlu2 %2317  ;;  %v3270_v47 = vpack.c.bf16 %v2886_v4, %v2886_v4  ;;  %v1870_v4 = vsub.f32 1.0, %v1869_v35  ;;  %vm2809_vm9 = vcmp.eq.s32.totalorder %v2393_v10, 0  ;;  %v3627_v18 = vunpack.c.l.b16 %v3339_v53 }
 0x34f   : > { %v2331_v56 = vmul.f32 %v2318_v57, %v2307_v44  ;;  %v2582_v0 = vand.u32 15, %v2368_v46 }
 0x350   : > { %v7688_v22 = vunpack.c.l.b16 %v3270_v47  ;;  %v3628_v47 = vunpack.c.l.b16 %v3340_v59  ;;  %v1871_v33 = vmul.f32 %v7650_v60, %v1870_v4  ;;  %v3089_v4 = vrot.slane %v7648_v21, 1 }
 0x351   : > { %v7690_v19 = vadd.f32 %v5574_v9, %v2331_v56  ;;  %v1846_v9 = vsel %vm7696_vm8, %v7540_v45, %v1842_v30  ;;  %v3304_v56 = vpack.c.bf16 %v7495_v6, %v7495_v6  ;;  %v3244_v45 = vpack.c.bf16 %v7339_v61, %v7339_v61 }
 0x352   : > { %v1851_v10 = vsel %vm1848_vm11, %v1850_v58, %v1846_v9  ;;  %v3303_v6 = vpack.c.bf16 %v7355_v8, %v7355_v8  ;;  %v1879_v8 = vand.u32 2147483648, %v7614_v20  ;;  %vm3053_vm13 = vcmp.eq.s32.totalorder %v2582_v0, 15 }
 0x353   : > { %v8602_v28 = vrot.slane %v7690_v19, 7  ;;  %v2058_v57 = vpop.permute.xlu0 %2057  ;;  %v3502_v61 = vunpack.c.l.b16 %v3304_v56  ;;  %v3388_v46 = vunpack.c.l.b16 %v3244_v45  ;;  %v1877_v56 = vand.u32 2147483647, %v7614_v20 }
 0x354   : > { %v2103_v35 = vmul.f32 %v2058_v57, %v1911_v7  ;;  %v1880_v0 = vor.u32 1.1754944e-38, %v1879_v8 }
 0x355   : > { %v2913_v23 = vsel %vm2879_vm10, %v8602_v28, %v8729_v12  ;;  %v7726_v12 = vpack.c.b16 %v3628_v47, %v3627_v18  ;;  %v3501_v47 = vunpack.c.l.b16 %v3303_v6  ;;  %vm1878_vm4 = vcmp.eq.f32.partialorder %v1877_v56, 8.507059e+37  ;;  %v5252_v56 = vld [vmem:[%s8631_s30 + $0xf0] sm:$0xff]  ;;  %v5231_v28 = vld [vmem:[%s8631_s30 + $0x48] sm:$0xff] }
 0x356   : > { %v7718_v30 = vadd.f32 %v5576_v16, %v2103_v35  ;;  %v2990_v59 = vsel %vm2809_vm9, 0.0, %v2913_v23  ;;  %v1872_v16 = vadd.f32 %v7650_v60, %v1871_v33  ;;  %v8731_v35 = vrot.slane %v7648_v21, 7 }
 0x357   : > { %v3243_v7 = vpack.c.bf16 %v2990_v59, %v2990_v59  ;;  %8730 = vst [vmem:[#allocation23_spill] sm:$0xff] %v7726_v12  ;;  %v3524_v23 = vpack.c.b16 %v3502_v61, %v3501_v47  ;;  %v3306_v59 = vpack.c.bf16 %v7648_v21, %v7648_v21  ;;  %v3305_v61 = vpack.c.bf16 %v7624_v62, %v7624_v62  ;;  %v5233_v21 = vld [vmem:[%s8631_s30 + $0x58] sm:$0xff] }
 0x358   : > { %v8603_v44 = vrot.slane %v7718_v30, 7  ;;  %v3090_v57 = vrot.slane %v7718_v30, 1  ;;  %v1876_v45 = vsel %vm1875_vm3, %v7650_v60, %v1872_v16  ;;  %4242 = vmatpush.bf16.msrb.mxu3 %v5233_v21  ;;  %v5253_v47 = vld [vmem:[%s8631_s30 + $0xf8] sm:$0xff] }
 0x359   : > { %v3387_v53 = vunpack.c.l.b16 %v3243_v7  ;;  %v1881_v6 = vsel %vm1878_vm4, %v1880_v0, %v1876_v45  ;;  %v3504_v16 = vunpack.c.l.b16 %v3306_v59  ;;  %4427 = vmatpush.bf16.msrb.mxu0 %v5253_v47  ;;  %v5257_v45 = vld [vmem:[%s8631_s30 + $0x118] sm:$0xff] }
 0x35a   : > { %2062 = vperm.xlu1 %5359, %v1851_v10   ;;  %v3102_v9 = vsel %vm3096_vm2, %v3089_v4, %v3090_v57  ;;  %v7742_v58 = vsel %vm2879_vm10, %v8731_v35, %v8603_v44  ;;  %v8732_v10 = vrot.slane %v7624_v62, 1  ;;  %v8734_v62 = vld [vmem:[#allocation19_spill] sm:$0xff]  ;;  %4520 = vmatpush.bf16.msrb.mxu2 %v5257_v45  ;;  %v5249_v59 = vld [vmem:[%s8631_s30 + $0xd8] sm:$0xff]  ;;  %v2369_v45 = vadd.s32 240, %v6519_v25 }
 0x35b   : > { %5049 = vmatmul.msk.bf16.gmra.mxu3 %vm852_vm0, %v7726_v12  ;;  %v3422_v33 = vpack.c.b16 %v3388_v46, %v3387_v53  ;;  %v3234_v18 = vsel %vm3053_vm13, 0.0, %v3102_v9  ;;  %v3503_v46 = vunpack.c.l.b16 %v3305_v61 }
 0x35c   : > { %v3103_v20 = vsel %vm3096_vm2, %v8732_v10, %v3089_v4  ;;  %v3342_v7 = vpack.c.bf16 %v3234_v18, %v3234_v18  ;;  %v8735_v4 = vpack.c.b16 %v6619_v14, %v8734_v62  ;;  %v5251_v14 = vld [vmem:[%s8631_s30 + $0xe8] sm:$0xff]  ;;  %v5250_v18 = vld [vmem:[%s8631_s30 + $0xe0] sm:$0xff] }
 0x35d   : > { %v3341_v60 = vpack.c.bf16 %v3103_v20, %v3103_v20  ;;  %v3525_v9 = vpack.c.b16 %v3504_v16, %v3503_v46  ;;  %4428 = vmatpush.bf16.msrb.mxu0 %v5252_v56  ;;  %v5248_v20 = vld [vmem:[%s8631_s30 + $0xd0] sm:$0xff] }
 0x35e   : > { %v3630_v53 = vunpack.c.l.b16 %v3342_v7  ;;  %v8736_v7 = vpack.c.b16 %v7420_v52, %v7351_v5  ;;  %v5232_v46 = vld [vmem:[%s8631_s30 + $0x50] sm:$0xff] }
 0x35f   : > { %v3629_v8 = vunpack.c.l.b16 %v3341_v60  ;;  %v5246_v60 = vld [vmem:[%s8631_s30 + $0xc0] sm:$0xff]  ;;  %4243 = vmatpush.bf16.msrb.mxu3 %v5232_v46 }
 0x360   : > { %3555 = vrot.lane.b32.xlu2 %v3524_v23, %s5770_s7 }
 0x361   : > { %v7758_v35 = vpack.c.b16 %v3630_v53, %v3629_v8  ;;  %4429 = vmatpush.bf16.msrb.mxu0 %v5251_v14  ;;  %v8737_v53 = vpack.c.b16 %v7469_v54, %v7467_v24  ;;  %v8738_v24 = vpack.c.b16 %v7612_v63, %v7619_v43  ;;  %v8739_v63 = vpack.c.b16 %v7327_v41, %v7325_v42  ;;  %v5581_v42 = vld [vmem:[%s6053_s25 + $0xf0] sm:$0xff] }
 0x362   : > { %2072 = vperm.xlu1 %5359, %v1881_v6  }
 0x363   : > { %8733 = vst [vmem:[#allocation24_spill] sm:$0xff] %v7758_v35  ;;  %4244 = vmatpush.bf16.msrb.mxu3 %v5231_v28 }
 0x365   : > { %4430 = vmatpush.bf16.msrb.mxu0 %v5250_v18 }
 0x369   : > { %4431 = vmatpush.bf16.msrb.mxu0 %v5249_v59 }
 0x36a   : > { %3557 = vrot.lane.b32.xlu1 %v3525_v9, %s5770_s7  ;;  %v5256_v9 = vld [vmem:[%s8631_s30 + $0x110] sm:$0xff] }
 0x36b   : > { %5050 = vmatmul.msk.bf16.gmra.mxu3 %vm852_vm0, %v7758_v35  ;;  %4521 = vmatpush.bf16.msrb.mxu2 %v5256_v9  ;;  %v3278_v9 = vpack.c.bf16 %v7690_v19, %v7690_v19 }
 0x36d   : > { %4432 = vmatpush.bf16.msrb.mxu0 %v5248_v20  ;;  %v5578_v20 = vld [vmem:[%s6021_s12] sm:$0xff] }
 0x372   : > { %3535 = vrot.lane.b32.xlu1 %v8735_v4, %s5770_s7 }
 0x379   : > { %v3554_v23 = vpop.permute.xlu0 %3553  ;;  %v3550_v16 = vpop.permute.xlu2 %3549 }
 0x37a   : > { %v7812_v5 = vsel %vm852_vm0, %v8737_v53, %v3550_v16  ;;  %v7835_v43 = vsel %vm852_vm0, %v8739_v63, %v3554_v23 }
 0x381   : > { %v3532_v0 = vpop.permute.xlu0 %3531 }
 0x382   : > { %v7789_v10 = vsel %vm852_vm0, %v3422_v33, %v3532_v0  ;;  %v5247_v33 = vld [vmem:[%s8631_s30 + $0xc8] sm:$0xff]  ;;  %v2589_v0 = vand.u32 15, %v2369_v45 }
 0x383   : > { %3904 = vmatmul.bf16.vlgmr.msra.gmra.mxu1 %v7789_v10  ;;  %4433 = vmatpush.bf16.msrb.mxu0 %v5247_v33 }
 0x384   : > { %vm2837_vm1 = vcmp.eq.s32.totalorder %v2589_v0, 0 }
 0x387   : > { %4434 = vmatpush.bf16.msrb.mxu0 %v5246_v60  ;;  %v5580_v60 = vld [vmem:[%s5939_s28 + $0xf0] sm:$0xff] }
 0x388   : > { %v1913_v41 = vsub.f32 %v5581_v42, %v5580_v60 }
 0x389   : > { %v3548_v6 = vpop.permute.xlu1 %3547 }
 0x38a   : > { %v7799_v61 = vsel %vm852_vm0, %v8736_v7, %v3548_v6  ;;  %v2068_v52 = vpop.permute.xlu0 %2067  ;;  %v5579_v6 = vld [vmem:[%s5949_s27] sm:$0xff] }
 0x38b   : > { %3944 = vmatmul.bf16.gmra.mxu2 %v7799_v61  ;;  %v2306_v7 = vsub.f32 %v5579_v6, %v5578_v20  ;;  %v2105_v46 = vmul.f32 %v2068_v52, %v1913_v41  ;;  %v5583_v52 = vld [vmem:[%s6053_s25 + $0xe8] sm:$0xff]  ;;  %v7867_v6 = vunpack.c.l.b16 %v3278_v9 }
 0x39b   : > { %3949 = vmatmul.bf16.gmra.mxu2 %v7812_v5 }
 0x3ab   : > { %3954 = vmatmul.bf16.gmra.mxu2 %v7667_v48 }
 0x3b0   : > { %v3534_v8 = vpop.permute.xlu0 %3533 }
 0x3b1   : > { %v7826_v54 = vsel %vm852_vm0, %v8738_v24, %v3534_v8 }
 0x3b2   : > { %3909 = vmatmul.bf16.gmra.mxu1 %v7826_v54  ;;  %4435 = vmatmul.bf16.vlgmr.msrb.gmra.mxu0 %v7826_v54 }
 0x3b4   : > { %v2222_v21 = vpop.xlane.xlu1 %2221 }
 0x3b5   : > { %v2228_v62 = vadd.f32 %v7295_v49, %v2222_v21 }
 0x3b7   : > { %v2232_v4 = vsub.f32 0.0, %v2228_v62  ;;  %v3307_v62 = vpack.c.bf16 %v7718_v30, %v7718_v30 }
 0x3b9   : > { %v2238_v47 = vmul.f32 1.442695, %v2232_v4  ;;  %v2370_v4 = vadd.s32 248, %v6519_v25 }
 0x3ba   : > { %v2313_v23 = vpop.permute.xlu0 %2312 }
 0x3bb   : > { %5500 = vpow2.f32 %v2238_v47  ;;  %v2225_v56 = vpop.xlane.xlu2 %2224  ;;  %3959 = vmatmul.bf16.gmra.mxu2 %v7835_v43  ;;  %v2330_v53 = vmul.f32 %v2313_v23, %v2306_v7  ;;  %v7852_v47 = vadd.f32 %v5580_v60, %v2105_v46  ;;  %v3505_v60 = vunpack.c.l.b16 %v3307_v62  ;;  %v5585_v62 = vld [vmem:[%s6053_s25 + $0xf8] sm:$0xff]  ;;  %s4753_s25 = sshll.u32 %s8307_s11, 4  ;;  %s4754_s25 = int_to_ptr.vmem [resolvable:$true] %s4753_s25 }
 0x3bc   : > { %v2229_v14 = vadd.f32 %v7295_v49, %v2225_v56  ;;  %v3018_v49 = vsel %vm2837_vm1, 0.0, %v7742_v58  ;;  %v5582_v56 = vld [vmem:[%s5939_s28 + $0xe8] sm:$0xff]  ;;  %v2596_v42 = vand.u32 15, %v2370_v4 }
 0x3bd   : > { %v7847_v21 = vadd.f32 %v5578_v20, %v2330_v53  ;;  %v1912_v45 = vsub.f32 %v5583_v52, %v5582_v56  ;;  %v3271_v58 = vpack.c.bf16 %v3018_v49, %v3018_v49  ;;  %v8604_v46 = vrot.slane %v7852_v47, 1  ;;  %v5584_v52 = vld [vmem:[%s5939_s28 + $0xf8] sm:$0xff] }
 0x3be   : > { %v2233_v18 = vsub.f32 0.0, %v2229_v14  ;;  %v1914_v4 = vsub.f32 %v5585_v62, %v5584_v52  ;;  %vm7883_vm7 = vcmp.eq.s32.totalorder %v2596_v42, 15 }
 0x3bf   : > { %v7872_v53 = vunpack.c.l.b16 %v3271_v58 }
 0x3c0   : > { %v2240_v59 = vmul.f32 1.442695, %v2233_v18  ;;  %v8740_v18 = vpack.c.b16 %v7529_v29, %v7527_v32  ;;  %v3277_v32 = vpack.c.bf16 %v7847_v21, %v7847_v21 }
 0x3c1   : > { %v5501_v33 = vpop.eup %5500 }
 0x3c2   : > { %v2244_v16 = vadd.f32 1.0, %v5501_v33  ;;  %5502 = vpow2.f32 %v2240_v59  ;;  %v2371_v59 = vadd.s32 256, %v6519_v25  ;;  %v3475_v58 = vunpack.c.l.b16 %v3277_v32 }
 0x3c3   : > { %v3556_v8 = vpop.permute.xlu2 %3555 }
 0x3c4   : > { %5504 = vrcp.f32 %v2244_v16  ;;  %v7862_v0 = vsel %vm852_vm0, %v8740_v18, %v3556_v8  ;;  %v2285_v33 = vand.u32 2147483647, %v2244_v16  ;;  %v2287_v49 = vand.u32 2147483648, %v2244_v16 }
 0x3c5   : > { %v3309_v8 = vpack.c.bf16 %v7852_v47, %v7852_v47  ;;  %v2603_v9 = vand.u32 15, %v2371_v59  ;;  %vm2281_vm5 = vweird.f32 %v2244_v16 }
 0x3c6   : > { %vm7879_vm6 = vcmp.eq.f32.partialorder %v2285_v33, 8.507059e+37  ;;  %v3511_v33 = vpack.c.b16 %v7867_v6, %v3475_v58 }
 0x3c7   : > { %vm7894_vm11 = vcmp.eq.s32.totalorder %v2603_v9, 0 }
 0x3c8   : > { %v5503_v24 = vpop.eup %5502 }
 0x3c9   : > { %v7854_v63 = vadd.f32 1.0, %v5503_v24 }
 0x3ca   : > { %v5505_v14 = vpop.eup %5504 }
 0x3cb   : > { %5506 = vrcp.f32 %v7854_v63  ;;  %3964 = vmatmul.bf16.gmra.mxu2 %v7862_v0  ;;  %v2277_v20 = vmul.f32 %v5505_v14, %v2244_v16  ;;  %vm2282_vm15 = vweird.f32 %v5505_v14  ;;  %vm2296_vm9 = vweird.f32 %v7854_v63 }
 0x3cc   : > { %v2063_v7 = vpop.permute.xlu1 %2062  ;;  %vm2283_vm8 = vmor %vm2281_vm5, %vm2282_vm15 }
 0x3cd   : > { %v2104_v41 = vmul.f32 %v2063_v7, %v1912_v45  ;;  %v2278_v23 = vsub.f32 1.0, %v2277_v20  ;;  %v7889_v7 = vpop.f32.mrf.mxu3 }
 0x3cf   : > { %v2136_v24 = vadd.f32 %v5582_v56, %v2104_v41  ;;  %v2279_v18 = vmul.f32 %v5505_v14, %v2278_v23  ;;  %v2288_v23 = vor.u32 1.1754944e-38, %v2287_v49 }
 0x3d1   : > { %v7887_v20 = vpop.eup %5506  ;;  %v2874_v56 = vrot.slane %v2136_v24, 7  ;;  %v3091_v59 = vrot.slane %v2136_v24, 1  ;;  %v2280_v41 = vadd.f32 %v5505_v14, %v2279_v18  ;;  %v3308_v62 = vpack.c.bf16 %v2136_v24, %v2136_v24 }
 0x3d2   : > { %v2292_v16 = vmul.f32 %v7887_v20, %v7854_v63  ;;  %vm2297_vm12 = vweird.f32 %v7887_v20 }
 0x3d3   : > { %v2284_v42 = vsel %vm2283_vm8, %v5505_v14, %v2280_v41  ;;  %v3506_v32 = vunpack.c.l.b16 %v3308_v62  ;;  %v3100_v2 = vsel %vm3096_vm2, %v3091_v59, %v8604_v46  ;;  %v3101_v49 = vsel %vm3096_vm2, %v3090_v57, %v3091_v59  ;;  %vm7942_vm13 = vmor %vm2296_vm9, %vm2297_vm12 }
 0x3d4   : > { %v2073_v24 = vpop.permute.xlu1 %2072  ;;  %v2289_v18 = vsel %vm7879_vm6, %v2288_v23, %v2284_v42  ;;  %v3236_v9 = vsel %vm7883_vm7, 0.0, %v3100_v2  ;;  %v3343_v29 = vpack.c.bf16 %v3101_v49, %v3101_v49  ;;  %v2293_v14 = vsub.f32 1.0, %v2292_v16  ;;  %v5230_v42 = vld [vmem:[%s8631_s30 + $0x40] sm:$0xff] }
 0x3d5   : > { %v2106_v41 = vmul.f32 %v2073_v24, %v1914_v4  ;;  %2322 = vperm.xlu1 %5359, %v2289_v18   ;;  %v3526_v62 = vpack.c.b16 %v3506_v32, %v3505_v60  ;;  %v3344_v44 = vpack.c.bf16 %v3236_v9, %v3236_v9  ;;  %v8747_v46 = vrot.slane %v7718_v30, 7  ;;  %v7948_v18 = vpop.f32.mrf.mxu3  ;;  %4245 = vmatpush.bf16.msrb.mxu3 %v5230_v42  ;;  %v5223_v42 = vld [vmem:[%s8631_s30 + $0x8] sm:$0xff] }
 0x3d6   : > { %v3631_v12 = vunpack.c.l.b16 %v3343_v29  ;;  %v2294_v57 = vmul.f32 %v7887_v20, %v2293_v14  ;;  %v8748_v2 = vrot.slane %v7852_v47, 7  ;;  %v2300_v59 = vand.u32 2147483647, %v7854_v63 }
 0x3d7   : > { %v2884_v35 = vsel %vm2879_vm10, %v8747_v46, %v2874_v56  ;;  %v7922_v60 = vadd.f32 %v5584_v52, %v2106_v41  ;;  %3559 = vrot.lane.b32.xlu0 %v3526_v62, %s5770_s7  ;;  %v3632_v30 = vunpack.c.l.b16 %v3344_v44  ;;  %v3507_v32 = vunpack.c.l.b16 %v3309_v8 }
 0x3d8   : > { %v3272_v45 = vpack.c.bf16 %v2884_v35, %v2884_v35  ;;  %v2883_v4 = vsel %vm2879_vm10, %v2874_v56, %v8748_v2  ;;  %v2295_v46 = vadd.f32 %v7887_v20, %v2294_v57  ;;  %v2302_v35 = vand.u32 2147483648, %v7854_v63 }
 0x3d9   : > { %v3020_v29 = vsel %vm7894_vm11, 0.0, %v2883_v4  ;;  %v8609_v52 = vrot.slane %v7922_v60, 7  ;;  %v8610_v56 = vrot.slane %v7922_v60, 1  ;;  %v7935_v16 = vpack.c.b16 %v3632_v30, %v3631_v12 }
 0x3da   : > { %v7931_v23 = vunpack.c.l.b16 %v3272_v45  ;;  %v3310_v44 = vpack.c.bf16 %v7922_v60, %v7922_v60  ;;  %v3273_v24 = vpack.c.bf16 %v3020_v29, %v3020_v29  ;;  %v2299_v12 = vsel %vm7942_vm13, %v7887_v20, %v2295_v46 }
 0x3db   : > { %8749 = vst [vmem:[#allocation19_spill] sm:$0xff] %v7935_v16  ;;  %5051 = vmatmul.msk.bf16.gmra.mxu3 %vm852_vm0, %v7935_v16  ;;  %v8752_v63 = vrot.slane %v7852_v47, 1  ;;  %v8753_v58 = vmov %v8748_v2  ;;  %v2303_v41 = vor.u32 1.1754944e-38, %v2302_v35  ;;  %v8754_v20 = vpack.c.b16 %v7688_v22, %v7686_v39  ;;  %v5255_v39 = vld [vmem:[%s8631_s30 + $0x108] sm:$0xff]  ;;  %v8002_v35 = vpop.f32.mrf.mxu2 }
 0x3dc   : > { %v3508_v6 = vunpack.c.l.b16 %v3310_v44  ;;  %v2882_v9 = vsel %vm2879_vm10, %v8753_v58, %v8609_v52  ;;  %v3558_v14 = vpop.permute.xlu1 %3557  ;;  %vm2301_vm14 = vcmp.eq.f32.partialorder %v2300_v59, 8.507059e+37  ;;  %v7977_v47 = vunpack.c.l.b16 %v3273_v24  ;;  %4522 = vmatpush.bf16.msrb.mxu2 %v5255_v39  ;;  %v5225_v39 = vld [vmem:[%s8631_s30 + $0x18] sm:$0xff] }
 0x3dd   : > { %v7961_v8 = vsel %vm3096_vm2, %v8752_v63, %v8610_v56  ;;  %v3274_v62 = vpack.c.bf16 %v2882_v9, %v2882_v9  ;;  %3529 = vrot.lane.b32.xlu1 %v3511_v33, %s5770_s7  ;;  %v7974_v57 = vsel %vm852_vm0, %v8754_v20, %v3558_v14  ;;  %v2304_v45 = vsel %vm2301_vm14, %v2303_v41, %v2299_v12  ;;  %v7995_v46 = vpop.f32.mrf.mxu3  ;;  %v5228_v9 = vld [vmem:[%s8631_s30 + $0x30] sm:$0xff]  ;;  %v5226_v20 = vld [vmem:[%s8631_s30 + $0x20] sm:$0xff] }
 0x3de   : > { %v3527_v28 = vpack.c.b16 %v3508_v6, %v3507_v32  ;;  %3969 = vmatmul.bf16.gmra.mxu2 %v7974_v57  ;;  %v8755_v30 = vpack.c.b16 %v7493_v17, %v7491_v15  ;;  %v5254_v32 = vld [vmem:[%s8631_s30 + $0x100] sm:$0xff]  ;;  %v5229_v6 = vld [vmem:[%s8631_s30 + $0x38] sm:$0xff]  ;;  %v2340_v4 = vadd.s32 8, %v6519_v25 }
 0x3df   : > { %v7979_v2 = vunpack.c.l.b16 %v3274_v62  ;;  %2327 = vperm.xlu0 %5358, %v2304_v45   ;;  %4149 = vmatpush.bf16.msra.mxu1 %v5229_v6  ;;  %v5227_v62 = vld [vmem:[%s8631_s30 + $0x28] sm:$0xff]  ;;  %v5222_v6 = vld [vmem:[%s8631_s30] sm:$0xff] }
 0x3e0   : > { %3561 = vrot.lane.b32.xlu2 %v3527_v28, %s5770_s7  ;;  %4523 = vmatpush.bf16.msrb.mxu2 %v5254_v32 }
 0x3e3   : > { %v8006_v15 = vpop.f32.mrf.mxu2  ;;  %4150 = vmatpush.bf16.msra.mxu1 %v5228_v9  ;;  %v5586_v9 = vld [vmem:[%s6021_s12 + $0x10] sm:$0xff] }
 0x3e4   : > { %v3536_v22 = vpop.permute.xlu1 %3535 }
 0x3e5   : > { %v7991_v29 = vsel %vm852_vm0, %v8755_v30, %v3536_v22  ;;  %v8000_v59 = vpop.f32.mrf.mxu3  ;;  %v5224_v22 = vld [vmem:[%s8631_s30 + $0x10] sm:$0xff] }
 0x3e6   : > { %3914 = vmatmul.bf16.gmra.mxu1 %v7991_v29  ;;  %4440 = vmatmul.bf16.gmra.mxu0 %v7991_v29 }
 0x3e7   : > { %4151 = vmatpush.bf16.msra.mxu1 %v5227_v62  ;;  %v5587_v62 = vld [vmem:[%s5949_s27 + $0x10] sm:$0xff] }
 0x3eb   : > { %v8011_v17 = vpop.f32.mrf.mxu2  ;;  %4152 = vmatpush.bf16.msra.mxu1 %v5226_v20  ;;  %v2308_v20 = vsub.f32 %v5587_v62, %v5586_v9 }
 0x3ed   : > { %v8004_v44 = vpop.f32.mrf.mxu3 }
 0x3ef   : > { %4153 = vmatpush.bf16.msra.mxu1 %v5225_v39  ;;  %v2372_v39 = vadd.s32 264, %v6519_v25 }
 0x3f1   : > { %v2610_v56 = vand.u32 15, %v2372_v39 }
 0x3f3   : > { %v8022_v24 = vpop.f32.mrf.mxu2  ;;  %4154 = vmatpush.bf16.msra.mxu1 %v5224_v22  ;;  %vm3057_vm3 = vcmp.eq.s32.totalorder %v2610_v56, 15 }
 0x3f4   : > { %8757 = vst [vmem:[#allocation26_spill] sm:$0xff] %v8022_v24 }
 0x3f5   : > { %v8013_v33 = vpop.f32.mrf.mxu3 }
 0x3f6   : > { %5037 = vmatmul.msk.bf16.vlgmr.msrb.gmra.mxu1 %vm852_vm0, %v7621_v1  ;;  %4445 = vmatmul.bf16.gmra.mxu0 %v7235_v37  ;;  %8756 = vst [vmem:[#allocation25_spill] sm:$0xff] %v8013_v33 }
 0x3f7   : > { %4155 = vmatpush.bf16.msra.mxu1 %v5223_v42 }
 0x3fb   : > { %v8029_v63 = vpop.f32.mrf.mxu2  ;;  %4156 = vmatpush.bf16.msra.mxu1 %v5222_v6 }
 0x3fc   : > { %8759 = vst [vmem:[#allocation28_spill] sm:$0xff] %v8029_v63 }
 0x3fd   : > { %v8024_v12 = vpop.f32.mrf.mxu3 }
 0x3fe   : > { %8758 = vst [vmem:[#allocation27_spill] sm:$0xff] %v8024_v12 }
 0x403   : > { %v8039_v41 = vpop.f32.mrf.mxu2 }
 0x404   : > { %8762 = vst [vmem:[#allocation31_spill] sm:$0xff] %v8039_v41 }
 0x405   : > { %v8031_v58 = vpop.f32.mrf.mxu3 }
 0x406   : > { %5038 = vmatmul.msk.bf16.gmra.mxu1 %vm852_vm0, %v7629_v38  ;;  %4450 = vmatmul.bf16.gmra.mxu0 %v7314_v36  ;;  %8760 = vst [vmem:[#allocation29_spill] sm:$0xff] %v8031_v58 }
 0x40b   : > { %v8047_v28 = vpop.f32.mrf.mxu2 }
 0x40c   : > { %8763 = vst [vmem:[#allocation32_spill] sm:$0xff] %v8047_v28 }
 0x40d   : > { %v8037_v14 = vpop.f32.mrf.mxu3 }
 0x40e   : > { %8761 = vst [vmem:[#allocation30_spill] sm:$0xff] %v8037_v14  ;;  %v2386_v14 = vand.u32 15, %v2340_v4  ;;  %v2374_v4 = vadd.s32 280, %v6519_v25 }
 0x410   : > { %vm8095_vm4 = vcmp.eq.s32.totalorder %v2386_v14, 15 }
 0x413   : > { %v8058_v30 = vpop.f32.mrf.mxu2 }
 0x414   : > { %8765 = vst [vmem:[#allocation34_spill] sm:$0xff] %v8058_v30  ;;  %v8769_v30 = vpack.c.b16 %v7931_v23, %v7872_v53  ;;  %v3345_v23 = vpack.c.bf16 %v7961_v8, %v7961_v8 }
 0x415   : > { %v8049_v45 = vpop.f32.mrf.mxu3 }
 0x416   : > { %4455 = vmatmul.bf16.gmra.mxu0 %v7415_v34  ;;  %8764 = vst [vmem:[#allocation33_spill] sm:$0xff] %v8049_v45  ;;  %v2373_v45 = vadd.s32 272, %v6519_v25 }
 0x41b   : > { %v8073_v52 = vpop.f32.mrf.mxu2 }
 0x41c   : > { %8767 = vst [vmem:[#allocation36_spill] sm:$0xff] %v8073_v52  ;;  %v5589_v52 = vld [vmem:[%s5949_s27 + $0x18] sm:$0xff] }
 0x41d   : > { %v8063_v32 = vpop.f32.mrf.mxu3 }
 0x41e   : > { %8766 = vst [vmem:[#allocation35_spill] sm:$0xff] %v8063_v32 }
 0x423   : > { %v8111_v16 = vpop.f32.mrf.mxu2 }
 0x425   : > { %v8075_v49 = vpop.f32.mrf.mxu3 }
 0x426   : > { %4460 = vmatmul.bf16.gmra.mxu0 %v7524_v40  ;;  %8768 = vst [vmem:[#allocation37_spill] sm:$0xff] %v8075_v49  ;;  %v5588_v49 = vld [vmem:[%s6021_s12 + $0x18] sm:$0xff]  ;;  %s8800_s12 = sld [smem:[#allocation56_spill]] }
 0x427   : > { %v2309_v58 = vsub.f32 %v5589_v52, %v5588_v49  ;;  %v8773_v52 = vrot.slane %v7290_v31, 1  ;;  %v2379_v31 = vand.u32 15, %v6519_v25 }
 0x429   : > { %vm2807_vm15 = vcmp.eq.s32.totalorder %v2379_v31, 0  ;;  %v8777_v31 = vpack.c.b16 %v7979_v2, %v7977_v47 }
 0x42d   : > { %v8104_v41 = vpop.f32.mrf.mxu3 }
 0x42e   : > { %8774 = vst [vmem:[#allocation38_spill] sm:$0xff] %v8104_v41 }
 0x436   : > { %4465 = vmatmul.bf16.gmra.mxu0 %v7601_v11 }
 0x446   : > { %4470 = vmatmul.bf16.gmra.mxu0 %v7799_v61 }
 0x447   : > { %v2323_v22 = vpop.permute.xlu1 %2322 }
 0x448   : > { %v2332_v42 = vmul.f32 %v2323_v22, %v2308_v20  ;;  %v3061_v20 = vrot.slane %v7690_v19, 1  ;;  %v2617_v22 = vand.u32 15, %v2373_v45  ;;  %v2843_v45 = vrot.slane %v7847_v21, 7 }
 0x449   : > { %v3560_v32 = vpop.permute.xlu0 %3559 }
 0x44a   : > { %v2336_v62 = vadd.f32 %v5586_v9, %v2332_v42  ;;  %v8082_v6 = vsel %vm852_vm0, %v8769_v30, %v3560_v32  ;;  %v8770_v9 = vrot.slane %v7922_v60, 1  ;;  %v3130_v42 = vsel %vm3096_vm2, %v3061_v20, %v8773_v52 }
 0x44b   : > { %3974 = vmatmul.bf16.gmra.mxu2 %v8082_v6  ;;  %vm2841_vm1 = vcmp.eq.s32.totalorder %v2617_v22, 0  ;;  %v2624_v52 = vand.u32 15, %v2374_v4 }
 0x44c   : > { %v3094_v28 = vrot.slane %v2336_v62, 1  ;;  %v2877_v39 = vrot.slane %v2336_v62, 7  ;;  %v3311_v33 = vpack.c.bf16 %v2336_v62, %v2336_v62 }
 0x44d   : > { %vm3059_vm5 = vcmp.eq.s32.totalorder %v2624_v52, 15 }
 0x44e   : > { %v3098_v53 = vsel %vm3096_vm2, %v8770_v9, %v3094_v28  ;;  %v3060_v9 = vrot.slane %v7847_v21, 1  ;;  %v8776_v21 = vrot.slane %v7690_v19, 7  ;;  %v3562_v19 = vpop.permute.xlu2 %3561 }
 0x44f   : > { %v3238_v30 = vsel %vm3057_vm3, 0.0, %v3098_v53  ;;  %v8775_v53 = vrot.slane %v7922_v60, 7 }
 0x450   : > { %v3346_v32 = vpack.c.bf16 %v3238_v30, %v3238_v30  ;;  %v3633_v30 = vunpack.c.l.b16 %v3345_v23  ;;  %v2914_v60 = vsel %vm2879_vm10, %v2843_v45, %v8776_v21 }
 0x451   : > { %v2328_v8 = vpop.permute.xlu0 %2327  ;;  %v2881_v14 = vsel %vm2879_vm10, %v8775_v53, %v2877_v39  ;;  %v3206_v53 = vsel %vm8095_vm4, 0.0, %v3130_v42 }
 0x452   : > { %v2333_v12 = vmul.f32 %v2328_v8, %v2309_v58  ;;  %v3634_v63 = vunpack.c.l.b16 %v3346_v32  ;;  %v3022_v22 = vsel %vm2841_vm1, 0.0, %v2881_v14  ;;  %v3131_v58 = vsel %vm3096_vm2, %v3060_v9, %v3061_v20 }
 0x453   : > { %v3275_v62 = vpack.c.bf16 %v3022_v22, %v3022_v22 }
 0x454   : > { %v2337_v24 = vadd.f32 %v5588_v49, %v2333_v12  ;;  %v8114_v41 = vpack.c.b16 %v3634_v63, %v3633_v30  ;;  %v3509_v12 = vunpack.c.l.b16 %v3311_v33  ;;  %v3242_v63 = vpack.c.bf16 %v2914_v60, %v2914_v60  ;;  %v8135_v33 = vpop.f32.mrf.mxu2  ;;  %v8143_v60 = vpop.f32.mrf.mxu3 }
 0x456   : > { %v2878_v23 = vrot.slane %v2337_v24, 7  ;;  %v3095_v32 = vrot.slane %v2337_v24, 1  ;;  %5052 = vmatmul.msk.bf16.gmra.mxu3 %vm852_vm0, %v8114_v41  ;;  %4475 = vmatmul.bf16.gmra.mxu0 %v7812_v5  ;;  %v3312_v49 = vpack.c.bf16 %v2337_v24, %v2337_v24  ;;  %v3386_v2 = vunpack.c.l.b16 %v3242_v63 }
 0x458   : > { %v2915_v4 = vsel %vm2879_vm10, %v2878_v23, %v2843_v45  ;;  %v3510_v56 = vunpack.c.l.b16 %v3312_v49  ;;  %v2880_v20 = vsel %vm2879_vm10, %v2877_v39, %v2878_v23  ;;  %v3097_v42 = vsel %vm3096_vm2, %v3094_v28, %v3095_v32 }
 0x459   : > { %v2988_v8 = vsel %vm2807_vm15, 0.0, %v2915_v4  ;;  %v3276_v14 = vpack.c.bf16 %v2880_v20, %v2880_v20  ;;  %v3132_v24 = vsel %vm3096_vm2, %v3095_v32, %v3060_v9  ;;  %v3347_v30 = vpack.c.bf16 %v3097_v42, %v3097_v42  ;;  %v3530_v4 = vpop.permute.xlu1 %3529 }
 0x45a   : > { %v8141_v45 = vsel %vm852_vm0, %v8777_v31, %v3562_v19  ;;  %v3528_v52 = vpack.c.b16 %v3510_v56, %v3509_v12  ;;  %v3241_v21 = vpack.c.bf16 %v2988_v8, %v2988_v8  ;;  %v3240_v39 = vsel %vm3059_vm5, 0.0, %v3132_v24  ;;  %v8778_v31 = vld [vmem:[#allocation20_spill] sm:$0xff] }
 0x45b   : > { %3979 = vmatmul.bf16.gmra.mxu2 %v8141_v45  ;;  %v8146_v28 = vunpack.c.l.b16 %v3275_v62  ;;  %v8148_v25 = vunpack.c.l.b16 %v3276_v14  ;;  %v3348_v9 = vpack.c.bf16 %v3240_v39, %v3240_v39  ;;  %v8150_v22 = vunpack.c.l.b16 %v3347_v30  ;;  %v8187_v39 = vpop.f32.mrf.mxu0 }
 0x45c   : > { %v3313_v23 = vpack.c.bf16 %v3131_v58, %v3131_v58  ;;  %3563 = vrot.lane.b32.xlu2 %v3528_v52, %s5770_s7  ;;  %v3385_v47 = vunpack.c.l.b16 %v3241_v21  ;;  %v3314_v19 = vpack.c.bf16 %v3206_v53, %v3206_v53  ;;  %v8160_v42 = vpop.f32.mrf.mxu2  ;;  %v8162_v63 = vpop.f32.mrf.mxu3 }
 0x45d   : > { %v8155_v49 = vunpack.c.l.b16 %v3348_v9  ;;  %v8182_v52 = vpop.f32.mrf.mxu1 }
 0x45e   : > { %v3421_v12 = vpack.c.b16 %v3386_v2, %v3385_v47  ;;  %v3601_v56 = vunpack.c.l.b16 %v3313_v23  ;;  %v3602_v58 = vunpack.c.l.b16 %v3314_v19 }
 0x460   : > { %v3657_v20 = vsel %vm852_vm0, %v3421_v12, %v3530_v4  ;;  %v3637_v8 = vpack.c.b16 %v3602_v58, %v3601_v56 }
 0x461   : > { %4157 = vmatmul.bf16.vlgmr.msra.gmra.mxu1 %v3657_v20 }
 0x463   : > { %v8200_v23 = vpop.f32.mrf.mxu0 }
 0x464   : > { %v8168_v53 = vpop.f32.mrf.mxu2  ;;  %v8170_v14 = vpop.f32.mrf.mxu3 }
 0x466   : > { %5101 = vmatmul.msk.bf16.vlgmr.msrb.gmra.mxu3 %vm852_vm0, %v3637_v8  ;;  %4480 = vmatmul.bf16.gmra.mxu0 %v7667_v48 }
 0x46b   : > { %5189 = vmatmul.msk.bf16.vlgmr.msrb.gmra.mxu2 %vm852_vm0, %v7629_v38  ;;  %v8207_v2 = vpop.f32.mrf.mxu0 }
 0x46c   : > { %v8176_v24 = vpop.f32.mrf.mxu2  ;;  %v8178_v30 = vpop.f32.mrf.mxu3 }
 0x471   : > { %4162 = vmatmul.bf16.gmra.mxu1 %v7789_v10 }
 0x473   : > { %v8220_v4 = vpop.f32.mrf.mxu0 }
 0x474   : > { %v8185_v21 = vpop.f32.mrf.mxu2  ;;  %v8189_v10 = vpop.f32.mrf.mxu3 }
 0x475   : > { %8779 = vst [vmem:[#allocation20_spill] sm:$0xff] %v8189_v10 }
 0x476   : > { %5102 = vmatmul.msk.bf16.gmra.mxu3 %vm852_vm0, %v7621_v1  ;;  %4485 = vmatmul.bf16.gmra.mxu0 %v7835_v43  ;;  %v8194_v1 = vpop.f32.mrf.mxu1 }
 0x47b   : > { %5190 = vmatmul.msk.bf16.gmra.mxu2 %vm852_vm0, %v8778_v31  ;;  %v8232_v58 = vpop.f32.mrf.mxu0 }
 0x47c   : > { %v8198_v9 = vpop.f32.mrf.mxu2 }
 0x47d   : > { %8780 = vst [vmem:[#allocation39_spill] sm:$0xff] %v8198_v9 }
 0x47e   : > { %v8205_v47 = vpop.f32.mrf.mxu1 }
 0x481   : > { %4167 = vmatmul.bf16.gmra.mxu1 %v7826_v54  ;;  %v8202_v54 = vpop.f32.mrf.mxu3 }
 0x482   : > { %8781 = vst [vmem:[#allocation40_spill] sm:$0xff] %v8202_v54 }
 0x486   : > { %5103 = vmatmul.msk.bf16.gmra.mxu3 %vm852_vm0, %v7629_v38  ;;  %4490 = vmatmul.bf16.gmra.mxu0 %v7862_v0  ;;  %v8209_v38 = vpop.f32.mrf.mxu2  ;;  %v8218_v12 = vpop.f32.mrf.mxu1 }
 0x487   : > { %8782 = vst [vmem:[#allocation41_spill] sm:$0xff] %v8209_v38 }
 0x489   : > { %v8214_v19 = vpop.f32.mrf.mxu3 }
 0x48a   : > { %8783 = vst [vmem:[#allocation42_spill] sm:$0xff] %v8214_v19 }
 0x48b   : > { %5191 = vmatmul.msk.bf16.gmra.mxu2 %vm852_vm0, %v6768_v26 }
 0x48e   : > { %v8227_v20 = vpop.f32.mrf.mxu1 }
 0x491   : > { %4172 = vmatmul.bf16.gmra.mxu1 %v7991_v29  ;;  %v8222_v29 = vpop.f32.mrf.mxu2  ;;  %v8224_v56 = vpop.f32.mrf.mxu3 }
 0x492   : > { %8784 = vst [vmem:[#allocation43_spill] sm:$0xff] %v8222_v29 }
 0x493   : > { %8785 = vst [vmem:[#allocation44_spill] sm:$0xff] %v8224_v56 }
 0x496   : > { %5104 = vmatmul.msk.bf16.gmra.mxu3 %vm852_vm0, %v8778_v31  ;;  %4495 = vmatmul.bf16.gmra.mxu0 %v7974_v57  ;;  %v8240_v62 = vpop.f32.mrf.mxu1 }
 0x499   : > { %v8234_v8 = vpop.f32.mrf.mxu2  ;;  %v8236_v31 = vpop.f32.mrf.mxu3 }
 0x49a   : > { %8786 = vst [vmem:[#allocation45_spill] sm:$0xff] %v8234_v8 }
 0x49b   : > { %5192 = vmatmul.msk.bf16.gmra.mxu2 %vm852_vm0, %v6887_v13  ;;  %8787 = vst [vmem:[#allocation46_spill] sm:$0xff] %v8236_v31  ;;  %v8790_v31 = vld [vmem:[#allocation21_spill] sm:$0xff] }
 0x49e   : > { %v3994_v56 = vpop.f32.mrf.mxu1 }
 0x4a1   : > { %4177 = vmatmul.bf16.gmra.mxu1 %v7235_v37  ;;  %v8243_v37 = vpop.f32.mrf.mxu0  ;;  %v8245_v32 = vpop.f32.mrf.mxu2 }
 0x4a2   : > { %8788 = vst [vmem:[#allocation47_spill] sm:$0xff] %v8245_v32 }
 0x4a6   : > { %5105 = vmatmul.msk.bf16.gmra.mxu3 %vm852_vm0, %v6768_v26  ;;  %4500 = vmatmul.bf16.gmra.mxu0 %v8082_v6  ;;  %v8247_v26 = vpop.f32.mrf.mxu3  ;;  %v3996_v32 = vpop.f32.mrf.mxu1 }
 0x4a7   : > { %8789 = vst [vmem:[#allocation48_spill] sm:$0xff] %v8247_v26 }
 0x4a9   : > { %v8254_v8 = vpop.f32.mrf.mxu2  ;;  %v8256_v19 = vpop.f32.mrf.mxu0 }
 0x4aa   : > { %8791 = vst [vmem:[#allocation21_spill] sm:$0xff] %v8254_v8 }
 0x4ab   : > { %5193 = vmatmul.msk.bf16.gmra.mxu2 %vm852_vm0, %v6982_v27 }
 0x4b1   : > { %4182 = vmatmul.bf16.gmra.mxu1 %v7314_v36  ;;  %v8258_v36 = vpop.f32.mrf.mxu3  ;;  %v8267_v54 = vpop.f32.mrf.mxu0 }
 0x4b2   : > { %8792 = vst [vmem:[#allocation49_spill] sm:$0xff] %v8258_v36  ;;  %v8796_v36 = vld [vmem:[#allocation22_spill] sm:$0xff] }
 0x4b6   : > { %4505 = vmatmul.bf16.gmra.mxu0 %v8141_v45  ;;  %5106 = vmatmul.msk.bf16.gmra.mxu3 %vm852_vm0, %v6887_v13  ;;  %v3564_v29 = vpop.permute.xlu2 %3563  ;;  %v8793_v45 = vpack.c.b16 %v8148_v25, %v8146_v28  ;;  %v8265_v13 = vpop.f32.mrf.mxu2 }
 0x4b7   : > { %8794 = vst [vmem:[#allocation50_spill] sm:$0xff] %v8265_v13 }
 0x4b8   : > { %v3725_v26 = vsel %vm852_vm0, %v8793_v45, %v3564_v29 }
 0x4b9   : > { %v8271_v8 = vpop.f32.mrf.mxu3 }
 0x4ba   : > { %8795 = vst [vmem:[#allocation51_spill] sm:$0xff] %v8271_v8 }
 0x4bb   : > { %5194 = vmatmul.msk.bf16.gmra.mxu2 %vm852_vm0, %v8790_v31 }
 0x4c1   : > { %4187 = vmatmul.bf16.gmra.mxu1 %v7415_v34  ;;  %v3999_v34 = vpop.f32.mrf.mxu1  ;;  %v4066_v10 = vpop.f32.mrf.mxu3 }
 0x4c6   : > { %5107 = vmatmul.msk.bf16.gmra.mxu3 %vm852_vm0, %v6982_v27  ;;  %4510 = vmatmul.bf16.gmra.mxu0 %v3725_v26 }
 0x4c9   : > { %v4001_v28 = vpop.f32.mrf.mxu1 }
 0x4cb   : > { %5195 = vmatmul.msk.bf16.gmra.mxu2 %vm852_vm0, %v8796_v36 }
 0x4ce   : > { %v8275_v38 = vpop.f32.mrf.mxu2 }
 0x4cf   : > { %8797 = vst [vmem:[#allocation22_spill] sm:$0xff] %v8275_v38 }
 0x4d1   : > { %4192 = vmatmul.bf16.gmra.mxu1 %v7524_v40 }
 0x4d6   : > { %v3977_v25 = vpop.f32.mrf.mxu2  ;;  %5108 = vmatmul.msk.bf16.gmra.mxu3 %vm852_vm0, %v8790_v31  ;;  %v3995_v31 = vadd.f32 %v3994_v56, %v8182_v52  ;;  %v3997_v52 = vadd.f32 %v3996_v32, %v8194_v1 }
 0x4d7   : > { %v8280_v29 = vadd.f32 %v4066_v10, %v3977_v25 }
 0x4d9   : > { %8798 = vst [vmem:[#allocation52_spill] sm:$0xff] %v8280_v29  ;;  %v4069_v27 = vpop.f32.mrf.mxu3  ;;  %v8298_v29 = vld [vmem:[%s8800_s12] ss:$0 sm:$0xff] }
 0x4db   : > { %5196 = vmatmul.msk.bf16.gmra.mxu2 %vm852_vm0, %v7432_v50 }
 0x4de   : > { %v3980_v26 = vpop.f32.mrf.mxu2  ;;  %v4158_v45 = vpop.f32.mrf.mxu1 }
 0x4df   : > { %v8284_v8 = vadd.f32 %v4069_v27, %v3980_v26  ;;  %v4159_v25 = vadd.f32 %v4158_v45, %v3995_v31 }
 0x4e1   : > { %8799 = vst [vmem:[#allocation53_spill] sm:$0xff] %v8284_v8  ;;  %v4071_v13 = vpop.f32.mrf.mxu3  ;;  %4197 = vmatmul.bf16.gmra.mxu1 %v7601_v11 }
 0x4e6   : > { %v3982_v38 = vpop.f32.mrf.mxu2  ;;  %v4160_v40 = vpop.f32.mrf.mxu1  ;;  %5109 = vmatmul.msk.bf16.gmra.mxu3 %vm852_vm0, %v8796_v36 }
 0x4e7   : > { %v8289_v9 = vadd.f32 %v4071_v13, %v3982_v38  ;;  %v4161_v13 = vadd.f32 %v4160_v40, %v3997_v52  ;;  %v4000_v40 = vadd.f32 %v3999_v34, %v8205_v47  ;;  %v4002_v34 = vadd.f32 %v4001_v28, %v8218_v12 }
 0x4e8   : > { %v4005_v12 = vadd.f32 %v7889_v7, %v8227_v20  ;;  %v4007_v7 = vadd.f32 %v7948_v18, %v8240_v62  ;;  %v4010_v18 = vadd.f32 %v7995_v46, %v8002_v35  ;;  %v4012_v35 = vadd.f32 %v8000_v59, %v8006_v15 }
 0x4e9   : > { %v4247_v10 = vpop.f32.mrf.mxu3  ;;  %v4015_v59 = vadd.f32 %v8004_v44, %v8011_v17  ;;  %v8803_v17 = vld [vmem:[#allocation26_spill] sm:$0xff] }
 0x4ea   : > { %v4248_v8 = vadd.f32 %v4247_v10, %v4159_v25 }
 0x4eb   : > { %5197 = vmatmul.msk.bf16.gmra.mxu2 %vm852_vm0, %v7504_v51 }
 0x4ee   : > { %v4163_v27 = vpop.f32.mrf.mxu1  ;;  %v4525_v26 = vpop.f32.mrf.mxu2 }
 0x4ef   : > { %v4526_v11 = vadd.f32 %v4525_v26, %v8187_v39 }
 0x4f1   : > { %v4605_v38 = vadd.f32 %v4526_v11, %v4248_v8  ;;  %4202 = vmatmul.bf16.gmra.mxu1 %v7799_v61  ;;  %v4249_v36 = vpop.f32.mrf.mxu3 }
 0x4f2   : > { %v4250_v61 = vadd.f32 %v4249_v36, %v4161_v13 }
 0x4f3   : > { %v4641_v56 = vadd.f32 %v8298_v29, %v4605_v38  ;;  %v8316_v38 = vpop.f32.mrf.mxu0 }
 0x4f5   : > { %v4673_v45 = vmax.f32 %v4641_v56, 0.0 }
 0x4f6   : > { %v4165_v31 = vpop.f32.mrf.mxu1  ;;  %5110 = vmatmul.msk.bf16.gmra.mxu3 %vm852_vm0, %v7432_v50  ;;  %v4527_v39 = vpop.f32.mrf.mxu2  ;;  %v4164_v50 = vadd.f32 %v4163_v27, %v4000_v40 }
 0x4f7   : > { %4705 = vst.msk [vmem:[%s8307_s11] sm:$0xff] %vm852_vm0, %v4673_v45  ;;  %v4528_v8 = vadd.f32 %v4527_v39, %v8200_v23  ;;  %v4166_v27 = vadd.f32 %v4165_v31, %v4002_v34 }
 0x4f9   : > { %v4606_v32 = vadd.f32 %v4528_v8, %v4250_v61  ;;  %v4252_v1 = vpop.f32.mrf.mxu3 }
 0x4fa   : > { %v4253_v36 = vadd.f32 %v4252_v1, %v4164_v50 }
 0x4fb   : > { %v4642_v10 = vadd.f32 %v8298_v29, %v4606_v32  ;;  %5198 = vmatmul.msk.bf16.gmra.mxu2 %vm852_vm0, %v7282_v3  ;;  %v8329_v8 = vpop.f32.mrf.mxu0 }
 0x4fd   : > { %v4674_v25 = vmax.f32 %v4642_v10, 0.0 }
 0x4fe   : > { %v4168_v26 = vpop.f32.mrf.mxu1  ;;  %v4530_v11 = vpop.f32.mrf.mxu2 }
 0x4ff   : > { %4706 = vst.msk [vmem:[%s8307_s11 + $0x8] sm:$0xff] %vm852_vm0, %v4674_v25  ;;  %v4531_v23 = vadd.f32 %v4530_v11, %v8207_v2  ;;  %v4169_v31 = vadd.f32 %v4168_v26, %v4005_v12 }
 0x501   : > { %v4607_v52 = vadd.f32 %v4531_v23, %v4253_v36  ;;  %4207 = vmatmul.bf16.gmra.mxu1 %v7812_v5  ;;  %v4254_v47 = vpop.f32.mrf.mxu3 }
 0x502   : > { %v4255_v61 = vadd.f32 %v4254_v47, %v4166_v27 }
 0x503   : > { %v4643_v56 = vadd.f32 %v8298_v29, %v4607_v52  ;;  %v8342_v20 = vpop.f32.mrf.mxu0 }
 0x505   : > { %v4675_v13 = vmax.f32 %v4643_v56, 0.0  ;;  %v8801_v56 = vld [vmem:[#allocation23_spill] sm:$0xff] }
 0x506   : > { %v4170_v45 = vpop.f32.mrf.mxu1  ;;  %5111 = vmatmul.msk.bf16.gmra.mxu3 %vm852_vm0, %v7504_v51  ;;  %v4532_v39 = vpop.f32.mrf.mxu2 }
 0x507   : > { %4707 = vst.msk [vmem:[%s8307_s11 + $0x10] sm:$0xff] %vm852_vm0, %v4675_v13  ;;  %v4533_v2 = vadd.f32 %v4532_v39, %v8220_v4  ;;  %v4171_v11 = vadd.f32 %v4170_v45, %v4007_v7 }
 0x509   : > { %v4608_v5 = vadd.f32 %v4533_v2, %v4255_v61  ;;  %v4257_v32 = vpop.f32.mrf.mxu3 }
 0x50a   : > { %v4258_v4 = vadd.f32 %v4257_v32, %v4169_v31 }
 0x50b   : > { %v4644_v28 = vadd.f32 %v8298_v29, %v4608_v5  ;;  %5199 = vmatmul.msk.bf16.gmra.mxu2 %vm852_vm0, %v7646_v55  ;;  %v8355_v27 = vpop.f32.mrf.mxu0 }
 0x50d   : > { %v4676_v51 = vmax.f32 %v4644_v28, 0.0 }
 0x50e   : > { %v4173_v1 = vpop.f32.mrf.mxu1  ;;  %v4535_v40 = vpop.f32.mrf.mxu2 }
 0x50f   : > { %4708 = vst.msk [vmem:[%s8307_s11 + $0x18] sm:$0xff] %vm852_vm0, %v4676_v51  ;;  %v4536_v10 = vadd.f32 %v4535_v40, %v8232_v58  ;;  %v4174_v13 = vadd.f32 %v4173_v1, %v4010_v18 }
 0x511   : > { %v4609_v50 = vadd.f32 %v4536_v10, %v4258_v4  ;;  %4212 = vmatmul.bf16.gmra.mxu1 %v7667_v48  ;;  %v4259_v25 = vpop.f32.mrf.mxu3  ;;  %v8802_v4 = vld [vmem:[#allocation24_spill] sm:$0xff] }
 0x512   : > { %v4260_v58 = vadd.f32 %v4259_v25, %v4171_v11 }
 0x513   : > { %v4645_v26 = vadd.f32 %v8298_v29, %v4609_v50  ;;  %v8366_v51 = vpop.f32.mrf.mxu0 }
 0x515   : > { %v4677_v36 = vmax.f32 %v4645_v26, 0.0 }
 0x516   : > { %v4175_v23 = vpop.f32.mrf.mxu1  ;;  %5112 = vmatmul.msk.bf16.gmra.mxu3 %vm852_vm0, %v7282_v3  ;;  %v4537_v52 = vpop.f32.mrf.mxu2 }
 0x517   : > { %4709 = vst.msk [vmem:[%s8307_s11 + $0x20] sm:$0xff] %vm852_vm0, %v4677_v36  ;;  %v4538_v48 = vadd.f32 %v4537_v52, %v8243_v37  ;;  %v4176_v32 = vadd.f32 %v4175_v23, %v4012_v35  ;;  %v8804_v36 = vld [vmem:[#allocation25_spill] sm:$0xff] }
 0x518   : > { %v4017_v23 = vadd.f32 %v8804_v36, %v8803_v17 }
 0x519   : > { %v4610_v47 = vadd.f32 %v4538_v48, %v4260_v58  ;;  %v4262_v34 = vpop.f32.mrf.mxu3 }
 0x51a   : > { %v4263_v37 = vadd.f32 %v4262_v34, %v4174_v13  ;;  %v8805_v13 = vld [vmem:[#allocation28_spill] sm:$0xff] }
 0x51b   : > { %v4646_v62 = vadd.f32 %v8298_v29, %v4610_v47  ;;  %5200 = vmatmul.msk.bf16.gmra.mxu2 %vm852_vm0, %v8801_v56  ;;  %v8379_v26 = vpop.f32.mrf.mxu0 }
 0x51d   : > { %v4678_v3 = vmax.f32 %v4646_v62, 0.0 }
 0x51e   : > { %v4178_v45 = vpop.f32.mrf.mxu1  ;;  %v4540_v39 = vpop.f32.mrf.mxu2 }
 0x51f   : > { %4710 = vst.msk [vmem:[%s8307_s11 + $0x28] sm:$0xff] %vm852_vm0, %v4678_v3  ;;  %v4541_v61 = vadd.f32 %v4540_v39, %v8256_v19  ;;  %v4179_v10 = vadd.f32 %v4178_v45, %v4015_v59  ;;  %v8806_v3 = vld [vmem:[#allocation27_spill] sm:$0xff] }
 0x520   : > { %v4020_v45 = vadd.f32 %v8806_v3, %v8805_v13 }
 0x521   : > { %v4611_v2 = vadd.f32 %v4541_v61, %v4263_v37  ;;  %4217 = vmatmul.bf16.gmra.mxu1 %v7835_v43  ;;  %v4264_v46 = vpop.f32.mrf.mxu3  ;;  %v8807_v61 = vld [vmem:[#allocation19_spill] sm:$0xff] }
 0x522   : > { %v4265_v19 = vadd.f32 %v4264_v46, %v4176_v32 }
 0x523   : > { %v4647_v5 = vadd.f32 %v8298_v29, %v4611_v2  ;;  %v4471_v39 = vpop.f32.mrf.mxu0 }
 0x525   : > { %v4679_v12 = vmax.f32 %v4647_v5, 0.0 }
 0x526   : > { %v4180_v28 = vpop.f32.mrf.mxu1  ;;  %5113 = vmatmul.msk.bf16.gmra.mxu3 %vm852_vm0, %v7646_v55  ;;  %v4542_v31 = vpop.f32.mrf.mxu2 }
 0x527   : > { %4711 = vst.msk [vmem:[%s8307_s11 + $0x30] sm:$0xff] %vm852_vm0, %v4679_v12  ;;  %v4543_v43 = vadd.f32 %v4542_v31, %v8267_v54  ;;  %v4181_v58 = vadd.f32 %v4180_v28, %v4017_v23  ;;  %v8808_v28 = vld [vmem:[#allocation31_spill] sm:$0xff]  ;;  %v8809_v31 = vld [vmem:[#allocation29_spill] sm:$0xff] }
 0x529   : > { %v4612_v1 = vadd.f32 %v4543_v43, %v4265_v19  ;;  %v4267_v40 = vpop.f32.mrf.mxu3  ;;  %v4022_v19 = vadd.f32 %v8809_v31, %v8808_v28 }
 0x52a   : > { %v4268_v7 = vadd.f32 %v4267_v40, %v4179_v10 }
 0x52b   : > { %v4648_v15 = vadd.f32 %v8298_v29, %v4612_v1  ;;  %5201 = vmatmul.msk.bf16.gmra.mxu2 %vm852_vm0, %v8802_v4  ;;  %v4473_v1 = vpop.f32.mrf.mxu0 }
 0x52d   : > { %v4680_v55 = vmax.f32 %v4648_v15, 0.0 }
 0x52e   : > { %v4183_v50 = vpop.f32.mrf.mxu1  ;;  %v4545_v25 = vpop.f32.mrf.mxu2 }
 0x52f   : > { %4712 = vst.msk [vmem:[%s8307_s11 + $0x38] sm:$0xff] %vm852_vm0, %v4680_v55  ;;  %v4546_v54 = vadd.f32 %v4545_v25, %v8316_v38  ;;  %v4184_v2 = vadd.f32 %v4183_v50, %v4020_v45  ;;  %v8810_v25 = vld [vmem:[#allocation32_spill] sm:$0xff] }
 0x531   : > { %v4613_v11 = vadd.f32 %v4546_v54, %v4268_v7  ;;  %4222 = vmatmul.bf16.gmra.mxu1 %v7862_v0  ;;  %v4269_v44 = vpop.f32.mrf.mxu3  ;;  %v8811_v7 = vld [vmem:[#allocation30_spill] sm:$0xff] }
 0x532   : > { %v4270_v38 = vadd.f32 %v4269_v44, %v4181_v58  ;;  %v4025_v54 = vadd.f32 %v8811_v7, %v8810_v25 }
 0x533   : > { %v4649_v52 = vadd.f32 %v8298_v29, %v4613_v11  ;;  %v4476_v23 = vpop.f32.mrf.mxu0 }
 0x535   : > { %v4681_v48 = vmax.f32 %v4649_v52, 0.0 }
 0x536   : > { %v4185_v47 = vpop.f32.mrf.mxu1  ;;  %5114 = vmatmul.msk.bf16.gmra.mxu3 %vm852_vm0, %v8801_v56  ;;  %v4547_v34 = vpop.f32.mrf.mxu2 }
 0x537   : > { %4713 = vst.msk [vmem:[%s8307_s11 + $0x40] sm:$0xff] %vm852_vm0, %v4681_v48  ;;  %v4548_v18 = vadd.f32 %v4547_v34, %v8329_v8  ;;  %v4186_v40 = vadd.f32 %v4185_v47, %v4022_v19  ;;  %v8812_v47 = vld [vmem:[#allocation34_spill] sm:$0xff]  ;;  %v8813_v34 = vld [vmem:[#allocation33_spill] sm:$0xff] }
 0x539   : > { %v4614_v0 = vadd.f32 %v4548_v18, %v4270_v38  ;;  %v4272_v62 = vpop.f32.mrf.mxu3  ;;  %v4027_v38 = vadd.f32 %v8813_v34, %v8812_v47 }
 0x53a   : > { %v4273_v5 = vadd.f32 %v4272_v62, %v4184_v2  ;;  %v8814_v2 = vld [vmem:[#allocation36_spill] sm:$0xff] }
 0x53b   : > { %v4650_v37 = vadd.f32 %v8298_v29, %v4614_v0  ;;  %5202 = vmatmul.msk.bf16.gmra.mxu2 %vm852_vm0, %v8807_v61 }
 0x53d   : > { %v4682_v46 = vmax.f32 %v4650_v37, 0.0 }
 0x53e   : > { %v4188_v56 = vpop.f32.mrf.mxu1  ;;  %v4550_v35 = vpop.f32.mrf.mxu2 }
 0x53f   : > { %4714 = vst.msk [vmem:[%s8307_s11 + $0x48] sm:$0xff] %vm852_vm0, %v4682_v46  ;;  %v4551_v8 = vadd.f32 %v4550_v35, %v8342_v20  ;;  %v4189_v44 = vadd.f32 %v4188_v56, %v4025_v54  ;;  %v8815_v46 = vld [vmem:[#allocation35_spill] sm:$0xff] }
 0x540   : > { %v4030_v56 = vadd.f32 %v8815_v46, %v8814_v2 }
 0x541   : > { %v4615_v32 = vadd.f32 %v4551_v8, %v4273_v5  ;;  %4227 = vmatmul.bf16.gmra.mxu1 %v7974_v57  ;;  %v4274_v12 = vpop.f32.mrf.mxu3  ;;  %v8816_v5 = vpack.c.b16 %v8155_v49, %v8150_v22 }
 0x542   : > { %v4275_v20 = vadd.f32 %v4274_v12, %v4186_v40 }
 0x543   : > { %v4651_v43 = vadd.f32 %v8298_v29, %v4615_v32 }
 0x545   : > { %v4683_v59 = vmax.f32 %v4651_v43, 0.0  ;;  %v8817_v43 = vld [vmem:[#allocation37_spill] sm:$0xff] }
 0x546   : > { %v4190_v15 = vpop.f32.mrf.mxu1  ;;  %5115 = vmatmul.msk.bf16.gmra.mxu3 %vm852_vm0, %v8802_v4  ;;  %v4552_v10 = vpop.f32.mrf.mxu2  ;;  %v4032_v40 = vadd.f32 %v8817_v43, %v8111_v16 }
 0x547   : > { %4715 = vst.msk [vmem:[%s8307_s11 + $0x50] sm:$0xff] %vm852_vm0, %v4683_v59  ;;  %v4553_v57 = vadd.f32 %v4552_v10, %v8355_v27  ;;  %v4191_v18 = vadd.f32 %v4190_v15, %v4027_v38 }
 0x549   : > { %v4616_v55 = vadd.f32 %v4553_v57, %v4275_v20  ;;  %v4277_v50 = vpop.f32.mrf.mxu3 }
 0x54a   : > { %v4278_v52 = vadd.f32 %v4277_v50, %v4189_v44 }
 0x54b   : > { %v4652_v11 = vadd.f32 %v8298_v29, %v4616_v55  ;;  %5203 = vmatmul.msk.bf16.gmra.mxu2 %vm852_vm0, %v8114_v41 }
 0x54d   : > { %v4684_v17 = vmax.f32 %v4652_v11, 0.0 }
 0x54e   : > { %v4193_v36 = vpop.f32.mrf.mxu1  ;;  %v4555_v4 = vpop.f32.mrf.mxu2 }
 0x54f   : > { %4716 = vst.msk [vmem:[%s8307_s11 + $0x58] sm:$0xff] %vm852_vm0, %v4684_v17  ;;  %v4556_v27 = vadd.f32 %v4555_v4, %v8366_v51 }
 0x551   : > { %v4617_v58 = vadd.f32 %v4556_v27, %v4278_v52  ;;  %4232 = vmatmul.bf16.gmra.mxu1 %v8082_v6  ;;  %v4279_v48 = vpop.f32.mrf.mxu3  ;;  %v4478_v6 = vpop.f32.mrf.mxu0 }
 0x552   : > { %v4280_v51 = vadd.f32 %v4279_v48, %v4191_v18 }
 0x553   : > { %v4653_v41 = vadd.f32 %v8298_v29, %v4617_v58 }
 0x555   : > { %v4685_v0 = vmax.f32 %v4653_v41, 0.0 }
 0x556   : > { %v4195_v62 = vpop.f32.mrf.mxu1  ;;  %5116 = vmatmul.msk.bf16.gmra.mxu3 %vm852_vm0, %v8807_v61  ;;  %v4557_v13 = vpop.f32.mrf.mxu2  ;;  %v4194_v61 = vadd.f32 %v4193_v36, %v4030_v56 }
 0x557   : > { %4717 = vst.msk [vmem:[%s8307_s11 + $0x60] sm:$0xff] %vm852_vm0, %v4685_v0  ;;  %v4558_v3 = vadd.f32 %v4557_v13, %v8379_v26  ;;  %v4196_v22 = vadd.f32 %v4195_v62, %v4032_v40 }
 0x559   : > { %v4618_v45 = vadd.f32 %v4558_v3, %v4280_v51  ;;  %v4282_v37 = vpop.f32.mrf.mxu3  ;;  %v4481_v59 = vpop.f32.mrf.mxu0 }
 0x55a   : > { %v4283_v26 = vadd.f32 %v4282_v37, %v4194_v61 }
 0x55b   : > { %v4654_v35 = vadd.f32 %v8298_v29, %v4618_v45  ;;  %5204 = vmatmul.msk.bf16.gmra.mxu2 %vm852_vm0, %v8816_v5 }
 0x55d   : > { %v4686_v8 = vmax.f32 %v4654_v35, 0.0 }
 0x55e   : > { %v4198_v32 = vpop.f32.mrf.mxu1  ;;  %v4560_v12 = vpop.f32.mrf.mxu2 }
 0x55f   : > { %4718 = vst.msk [vmem:[%s8307_s11 + $0x68] sm:$0xff] %vm852_vm0, %v4686_v8  ;;  %v4561_v28 = vadd.f32 %v4560_v12, %v4471_v39  ;;  %v8818_v39 = vld [vmem:[#allocation38_spill] sm:$0xff] }
 0x560   : > { %v4035_v7 = vadd.f32 %v8818_v39, %v8135_v33 }
 0x561   : > { %v4619_v31 = vadd.f32 %v4561_v28, %v4283_v26  ;;  %v4284_v19 = vpop.f32.mrf.mxu3  ;;  %v4483_v16 = vpop.f32.mrf.mxu0 }
 0x562   : > { %v4285_v57 = vadd.f32 %v4284_v19, %v4196_v22  ;;  %v4199_v11 = vadd.f32 %v4198_v32, %v4035_v7 }
 0x563   : > { %v4655_v15 = vadd.f32 %v8298_v29, %v4619_v31  ;;  %v4045_v31 = vadd.f32 %v8178_v30, %v8185_v21 }
 0x565   : > { %v4687_v49 = vmax.f32 %v4655_v15, 0.0 }
 0x566   : > { %v4200_v10 = vpop.f32.mrf.mxu1  ;;  %v4562_v20 = vpop.f32.mrf.mxu2 }
 0x567   : > { %4719 = vst.msk [vmem:[%s8307_s11 + $0x70] sm:$0xff] %vm852_vm0, %v4687_v49  ;;  %v4563_v55 = vadd.f32 %v4562_v20, %v4473_v1  ;;  %v4037_v1 = vadd.f32 %v8143_v60, %v8160_v42  ;;  %v8819_v20 = vld [vmem:[#allocation39_spill] sm:$0xff] }
 0x569   : > { %v4620_v50 = vadd.f32 %v4563_v55, %v4285_v57  ;;  %v4287_v25 = vpop.f32.mrf.mxu3  ;;  %v4201_v33 = vadd.f32 %v4200_v10, %v4037_v1  ;;  %v4486_v41 = vpop.f32.mrf.mxu0  ;;  %v8820_v57 = vld [vmem:[#allocation20_spill] sm:$0xff] }
 0x56a   : > { %v4288_v4 = vadd.f32 %v4287_v25, %v4199_v11  ;;  %v4047_v55 = vadd.f32 %v8820_v57, %v8819_v20 }
 0x56b   : > { %v4656_v54 = vadd.f32 %v8298_v29, %v4620_v50 }
 0x56d   : > { %v4688_v44 = vmax.f32 %v4656_v54, 0.0 }
 0x56e   : > { %v4203_v17 = vpop.f32.mrf.mxu1  ;;  %v4565_v36 = vpop.f32.mrf.mxu2 }
 0x56f   : > { %4720 = vst.msk [vmem:[%s8307_s11 + $0x78] sm:$0xff] %vm852_vm0, %v4688_v44  ;;  %v4566_v52 = vadd.f32 %v4565_v36, %v4476_v23  ;;  %v4040_v23 = vadd.f32 %v8162_v63, %v8168_v53  ;;  %v8822_v36 = vld [vmem:[#allocation40_spill] sm:$0xff] }
 0x571   : > { %v4621_v27 = vadd.f32 %v4566_v52, %v4288_v4  ;;  %v4289_v58 = vpop.f32.mrf.mxu3  ;;  %v4204_v60 = vadd.f32 %v4203_v17, %v4040_v23  ;;  %v4488_v46 = vpop.f32.mrf.mxu0  ;;  %v8821_v17 = vld [vmem:[#allocation41_spill] sm:$0xff] }
 0x572   : > { %v4290_v18 = vadd.f32 %v4289_v58, %v4201_v33  ;;  %v4050_v4 = vadd.f32 %v8822_v36, %v8821_v17  ;;  %v8831_v36 = vld [vmem:[#allocation50_spill] sm:$0xff] }
 0x573   : > { %v4657_v48 = vadd.f32 %v8298_v29, %v4621_v27 }
 0x575   : > { %v4689_v47 = vmax.f32 %v4657_v48, 0.0 }
 0x576   : > { %v4205_v34 = vpop.f32.mrf.mxu1  ;;  %v4567_v38 = vpop.f32.mrf.mxu2 }
 0x577   : > { %4721 = vst.msk [vmem:[%s8307_s11 + $0x80] sm:$0xff] %vm852_vm0, %v4689_v47  ;;  %v4568_v0 = vadd.f32 %v4567_v38, %v4478_v6  ;;  %v4042_v6 = vadd.f32 %v8170_v14, %v8176_v24 }
 0x579   : > { %v4622_v62 = vadd.f32 %v4568_v0, %v4290_v18  ;;  %v4292_v13 = vpop.f32.mrf.mxu3  ;;  %v4206_v63 = vadd.f32 %v4205_v34, %v4042_v6  ;;  %v4491_v19 = vpop.f32.mrf.mxu0  ;;  %v8823_v18 = vld [vmem:[#allocation43_spill] sm:$0xff]  ;;  %v8824_v0 = vld [vmem:[#allocation42_spill] sm:$0xff] }
 0x57a   : > { %v4293_v37 = vadd.f32 %v4292_v13, %v4204_v60 }
 0x57b   : > { %v4658_v51 = vadd.f32 %v8298_v29, %v4622_v62  ;;  %v4052_v62 = vadd.f32 %v8824_v0, %v8823_v18  ;;  %v8833_v0 = vld [vmem:[#allocation22_spill] sm:$0xff] }
 0x57d   : > { %v4690_v42 = vmax.f32 %v4658_v51, 0.0 }
 0x57e   : > { %v4208_v3 = vpop.f32.mrf.mxu1  ;;  %v4570_v45 = vpop.f32.mrf.mxu2 }
 0x57f   : > { %4722 = vst.msk [vmem:[%s8307_s11 + $0x88] sm:$0xff] %vm852_vm0, %v4690_v42  ;;  %v4571_v2 = vadd.f32 %v4570_v45, %v4481_v59  ;;  %v4209_v14 = vadd.f32 %v4208_v3, %v4045_v31  ;;  %v8827_v31 = vld [vmem:[#allocation47_spill] sm:$0xff] }
 0x581   : > { %v4623_v56 = vadd.f32 %v4571_v2, %v4293_v37  ;;  %v4294_v35 = vpop.f32.mrf.mxu3  ;;  %v4493_v30 = vpop.f32.mrf.mxu0 }
 0x582   : > { %v4295_v32 = vadd.f32 %v4294_v35, %v4206_v63  ;;  %v8826_v35 = vld [vmem:[#allocation44_spill] sm:$0xff] }
 0x583   : > { %v4659_v5 = vadd.f32 %v8298_v29, %v4623_v56  ;;  %v8825_v56 = vld [vmem:[#allocation45_spill] sm:$0xff] }
 0x584   : > { %v4055_v6 = vadd.f32 %v8826_v35, %v8825_v56 }
 0x585   : > { %v4691_v53 = vmax.f32 %v4659_v5, 0.0 }
 0x586   : > { %v4210_v61 = vpop.f32.mrf.mxu1  ;;  %v4572_v8 = vpop.f32.mrf.mxu2 }
 0x587   : > { %4723 = vst.msk [vmem:[%s8307_s11 + $0x90] sm:$0xff] %vm852_vm0, %v4691_v53  ;;  %v4573_v12 = vadd.f32 %v4572_v8, %v4483_v16  ;;  %v4211_v21 = vadd.f32 %v4210_v61, %v4047_v55  ;;  %v8829_v55 = vld [vmem:[#allocation21_spill] sm:$0xff] }
 0x589   : > { %v4624_v26 = vadd.f32 %v4573_v12, %v4295_v32  ;;  %v4297_v28 = vpop.f32.mrf.mxu3  ;;  %v4496_v34 = vpop.f32.mrf.mxu0 }
 0x58a   : > { %v4298_v15 = vadd.f32 %v4297_v28, %v4209_v14 }
 0x58b   : > { %v4660_v43 = vadd.f32 %v8298_v29, %v4624_v26 }
 0x58d   : > { %v4692_v24 = vmax.f32 %v4660_v43, 0.0 }
 0x58e   : > { %v4213_v40 = vpop.f32.mrf.mxu1  ;;  %v4575_v59 = vpop.f32.mrf.mxu2 }
 0x58f   : > { %4724 = vst.msk [vmem:[%s8307_s11 + $0x98] sm:$0xff] %vm852_vm0, %v4692_v24  ;;  %v4576_v22 = vadd.f32 %v4575_v59, %v4486_v41  ;;  %v4214_v27 = vadd.f32 %v4213_v40, %v4050_v4  ;;  %v8832_v4 = vld [vmem:[#allocation49_spill] sm:$0xff] }
 0x591   : > { %v4625_v49 = vadd.f32 %v4576_v22, %v4298_v15  ;;  %v4299_v10 = vpop.f32.mrf.mxu3 }
 0x592   : > { %v4300_v54 = vadd.f32 %v4299_v10, %v4211_v21 }
 0x593   : > { %v4661_v50 = vadd.f32 %v8298_v29, %v4625_v49 }
 0x595   : > { %v4693_v25 = vmax.f32 %v4661_v50, 0.0  ;;  %v8830_v50 = vld [vmem:[#allocation48_spill] sm:$0xff] }
 0x596   : > { %v4215_v39 = vpop.f32.mrf.mxu1  ;;  %v4577_v7 = vpop.f32.mrf.mxu2 }
 0x597   : > { %4725 = vst.msk [vmem:[%s8307_s11 + $0xa0] sm:$0xff] %vm852_vm0, %v4693_v25  ;;  %v4578_v16 = vadd.f32 %v4577_v7, %v4488_v46  ;;  %v4216_v23 = vadd.f32 %v4215_v39, %v4052_v62  ;;  %v4498_v46 = vpop.f32.mrf.mxu0  ;;  %v8834_v62 = vld [vmem:[#allocation51_spill] sm:$0xff] }
 0x599   : > { %v4626_v11 = vadd.f32 %v4578_v16, %v4300_v54  ;;  %v4302_v44 = vpop.f32.mrf.mxu3 }
 0x59a   : > { %v4303_v33 = vadd.f32 %v4302_v44, %v4214_v27 }
 0x59b   : > { %v4662_v52 = vadd.f32 %v8298_v29, %v4626_v11 }
 0x59d   : > { %v4694_v58 = vmax.f32 %v4662_v52, 0.0  ;;  %v4062_v52 = vadd.f32 %v8832_v4, %v8831_v36 }
 0x59e   : > { %v4218_v1 = vpop.f32.mrf.mxu1  ;;  %v4580_v48 = vpop.f32.mrf.mxu2 }
 0x59f   : > { %4726 = vst.msk [vmem:[%s8307_s11 + $0xa8] sm:$0xff] %vm852_vm0, %v4694_v58  ;;  %v4581_v47 = vadd.f32 %v4580_v48, %v4491_v19  ;;  %v4219_v63 = vadd.f32 %v4218_v1, %v4055_v6  ;;  %v8828_v19 = vld [vmem:[#allocation46_spill] sm:$0xff]  ;;  %v4501_v24 = vpop.f32.mrf.mxu0  ;;  %v8835_v6 = vld [vmem:[#allocation52_spill] sm:$0xff] }
 0x5a0   : > { %v4057_v43 = vadd.f32 %v8828_v19, %v8827_v31  ;;  %v8836_v19 = vld [vmem:[#allocation53_spill] sm:$0xff] }
 0x5a1   : > { %v4627_v38 = vadd.f32 %v4581_v47, %v4303_v33  ;;  %v4304_v41 = vpop.f32.mrf.mxu3 }
 0x5a2   : > { %v4305_v3 = vadd.f32 %v4304_v41, %v4216_v23 }
 0x5a3   : > { %v4663_v13 = vadd.f32 %v8298_v29, %v4627_v38 }
 0x5a5   : > { %v4695_v51 = vmax.f32 %v4663_v13, 0.0  ;;  %v4065_v13 = vadd.f32 %v8834_v62, %v8833_v0 }
 0x5a6   : > { %v4220_v60 = vpop.f32.mrf.mxu1  ;;  %v4582_v42 = vpop.f32.mrf.mxu2 }
 0x5a7   : > { %4727 = vst.msk [vmem:[%s8307_s11 + $0xb0] sm:$0xff] %vm852_vm0, %v4695_v51  ;;  %v4583_v45 = vadd.f32 %v4582_v42, %v4493_v30  ;;  %v4221_v40 = vadd.f32 %v4220_v60, %v4057_v43  ;;  %v4060_v30 = vadd.f32 %v8830_v50, %v8829_v55  ;;  %v4503_v7 = vpop.f32.mrf.mxu0 }
 0x5a9   : > { %v4628_v37 = vadd.f32 %v4583_v45, %v4305_v3  ;;  %v4307_v2 = vpop.f32.mrf.mxu3 }
 0x5aa   : > { %v4308_v8 = vadd.f32 %v4307_v2, %v4219_v63 }
 0x5ab   : > { %v4664_v5 = vadd.f32 %v8298_v29, %v4628_v37 }
 0x5ad   : > { %v4696_v53 = vmax.f32 %v4664_v5, 0.0 }
 0x5ae   : > { %v4585_v61 = vpop.f32.mrf.mxu2  ;;  %v4223_v12 = vpop.f32.mrf.mxu1 }
 0x5af   : > { %4728 = vst.msk [vmem:[%s8307_s11 + $0xb8] sm:$0xff] %vm852_vm0, %v4696_v53  ;;  %v4586_v32 = vadd.f32 %v4585_v61, %v4496_v34  ;;  %v4224_v25 = vadd.f32 %v4223_v12, %v4060_v30  ;;  %v4506_v38 = vpop.f32.mrf.mxu0 }
 0x5b1   : > { %v4629_v26 = vadd.f32 %v4586_v32, %v4308_v8  ;;  %v4309_v28 = vpop.f32.mrf.mxu3 }
 0x5b2   : > { %v4310_v22 = vadd.f32 %v4309_v28, %v4221_v40 }
 0x5b3   : > { %v4665_v14 = vadd.f32 %v8298_v29, %v4629_v26 }
 0x5b5   : > { %v4697_v59 = vmax.f32 %v4665_v14, 0.0 }
 0x5b6   : > { %v4587_v15 = vpop.f32.mrf.mxu2  ;;  %v4225_v57 = vpop.f32.mrf.mxu1 }
 0x5b7   : > { %4729 = vst.msk [vmem:[%s8307_s11 + $0xc0] sm:$0xff] %vm852_vm0, %v4697_v59  ;;  %v4588_v49 = vadd.f32 %v4587_v15, %v4498_v46  ;;  %v4226_v1 = vadd.f32 %v4225_v57, %v4062_v52  ;;  %v4508_v56 = vpop.f32.mrf.mxu0 }
 0x5b9   : > { %v4630_v10 = vadd.f32 %v4588_v49, %v4310_v22  ;;  %v4312_v20 = vpop.f32.mrf.mxu3 }
 0x5ba   : > { %v4313_v16 = vadd.f32 %v4312_v20, %v4224_v25 }
 0x5bb   : > { %v4666_v21 = vadd.f32 %v8298_v29, %v4630_v10 }
 0x5bd   : > { %v4698_v39 = vmax.f32 %v4666_v21, 0.0 }
 0x5be   : > { %v4590_v54 = vpop.f32.mrf.mxu2  ;;  %v4228_v58 = vpop.f32.mrf.mxu1 }
 0x5bf   : > { %4730 = vst.msk [vmem:[%s8307_s11 + $0xc8] sm:$0xff] %vm852_vm0, %v4698_v39  ;;  %v4591_v11 = vadd.f32 %v4590_v54, %v4501_v24  ;;  %v4229_v51 = vadd.f32 %v4228_v58, %v4065_v13  ;;  %v4511_v31 = vpop.f32.mrf.mxu0 }
 0x5c1   : > { %v4631_v44 = vadd.f32 %v4591_v11, %v4313_v16  ;;  %v4314_v17 = vpop.f32.mrf.mxu3 }
 0x5c2   : > { %v4315_v47 = vadd.f32 %v4314_v17, %v4226_v1 }
 0x5c3   : > { %v4667_v27 = vadd.f32 %v8298_v29, %v4631_v44 }
 0x5c5   : > { %v4699_v48 = vmax.f32 %v4667_v27, 0.0 }
 0x5c6   : > { %v4592_v33 = vpop.f32.mrf.mxu2  ;;  %v4230_v42 = vpop.f32.mrf.mxu1 }
 0x5c7   : > { %4731 = vst.msk [vmem:[%s8307_s11 + $0xd0] sm:$0xff] %vm852_vm0, %v4699_v48  ;;  %v4593_v34 = vadd.f32 %v4592_v33, %v4503_v7  ;;  %v4231_v5 = vadd.f32 %v4230_v42, %v8835_v6  ;;  %v4513_v55 = vpop.f32.mrf.mxu0 }
 0x5c9   : > { %v4632_v41 = vadd.f32 %v4593_v34, %v4315_v47  ;;  %v4317_v18 = vpop.f32.mrf.mxu3 }
 0x5ca   : > { %v4318_v45 = vadd.f32 %v4317_v18, %v4229_v51 }
 0x5cb   : > { %v4668_v23 = vadd.f32 %v8298_v29, %v4632_v41 }
 0x5cd   : > { %v4700_v60 = vmax.f32 %v4668_v23, 0.0 }
 0x5ce   : > { %v4595_v3 = vpop.f32.mrf.mxu2  ;;  %v4233_v32 = vpop.f32.mrf.mxu1 }
 0x5cf   : > { %4732 = vst.msk [vmem:[%s8307_s11 + $0xd8] sm:$0xff] %vm852_vm0, %v4700_v60  ;;  %v4596_v37 = vadd.f32 %v4595_v3, %v4506_v38  ;;  %v4234_v43 = vadd.f32 %v4233_v32, %v8836_v19 }
 0x5d1   : > { %v4633_v2 = vadd.f32 %v4596_v37, %v4318_v45  ;;  %v4319_v46 = vpop.f32.mrf.mxu3 }
 0x5d2   : > { %v4320_v61 = vadd.f32 %v4319_v46, %v4231_v5 }
 0x5d3   : > { %v4669_v35 = vadd.f32 %v8298_v29, %v4633_v2 }
 0x5d5   : > { %v4701_v63 = vmax.f32 %v4669_v35, 0.0 }
 0x5d6   : > { %v4597_v53 = vpop.f32.mrf.mxu2  ;;  %v4235_v22 = vpop.f32.mrf.mxu1 }
 0x5d7   : > { %4733 = vst.msk [vmem:[%s8307_s11 + $0xe0] sm:$0xff] %vm852_vm0, %v4701_v63  ;;  %v4598_v8 = vadd.f32 %v4597_v53, %v4508_v56  ;;  %v4236_v20 = vadd.f32 %v4235_v22, %v8289_v9 }
 0x5d9   : > { %v4634_v12 = vadd.f32 %v4598_v8, %v4320_v61  ;;  %v4322_v26 = vpop.f32.mrf.mxu3 }
 0x5da   : > { %v4323_v40 = vadd.f32 %v4322_v26, %v4234_v43 }
 0x5db   : > { %v4670_v28 = vadd.f32 %v8298_v29, %v4634_v12 }
 0x5dd   : > { %v4702_v14 = vmax.f32 %v4670_v28, 0.0 }
 0x5de   : > { %v4600_v24 = vpop.f32.mrf.mxu2 }
 0x5df   : > { %4734 = vst.msk [vmem:[%s8307_s11 + $0xe8] sm:$0xff] %vm852_vm0, %v4702_v14  ;;  %v4601_v59 = vadd.f32 %v4600_v24, %v4511_v31 }
 0x5e1   : > { %v4635_v15 = vadd.f32 %v4601_v59, %v4323_v40  ;;  %v4324_v10 = vpop.f32.mrf.mxu3 }
 0x5e2   : > { %v4325_v30 = vadd.f32 %v4324_v10, %v4236_v20 }
 0x5e3   : > { %v4671_v49 = vadd.f32 %v8298_v29, %v4635_v15 }
 0x5e5   : > { %v4703_v57 = vmax.f32 %v4671_v49, 0.0 }
 0x5e6   : > { %v4602_v50 = vpop.f32.mrf.mxu2 }
 0x5e7   : > { %4735 = vst.msk [vmem:[%s8307_s11 + $0xf0] sm:$0xff] %vm852_vm0, %v4703_v57  ;;  %v4603_v21 = vadd.f32 %v4602_v50, %v4513_v55 }
 0x5e9   : > { %v4636_v25 = vadd.f32 %v4603_v21, %v4325_v30 }
 0x5eb   : > { %v4672_v39 = vadd.f32 %v8298_v29, %v4636_v25 }
 0x5ed   : > { %v4704_v9 = vmax.f32 %v4672_v39, 0.0 }
 0x5ef   : > { %4736 = vst.msk [vmem:[%s8307_s11 + $0xf8] sm:$0xff] %vm852_vm0, %v4704_v9 }
 0x5f0   : > { %5707 = shalt.err (!%p5704_p0)
}
 0x5f1   : > { %s5772_s8 = smov 128   ;;  %s5773_s7 = smov 8  }
 0x5f2   : > { %5285 = dma.vmem_to_hbm [thread:$0]  (%p5887_p9), %s4754_s25, 4096, %s4756_s18, %s4738_s23, %s5772_s8, %s5772_s8, %s5773_s7  }
 0x5f3 PF: > { %s8840_s12 = sld [smem:[#allocation13_spill]]  ;;  %p5298_p1 = pnand %p4916_p12, %p5894_p11 }
 0x5f5   : > { %p5299_p2 = pneg %p5298_p1 }
 0x5f9   : > { %s4770_s13 = sand.u32 1, %s8840_s12  }
 0x5fa   : > { %s4771_s21 = scalar_lea.sflag [#allocation5], %s4770_s13 }
 0x5fb   : > { %5741 = dma.done.wait (%p5299_p2), %s4771_s21, 4096  }
 0x5fc   : > { %5743 = vsyncadd (%p5299_p2), %s4771_s21, 4294963200  ;;  %s31_s20 = sadd.s32 1, %s5766_s20   ;;  %s8842_s22 = sld [smem:[#allocation14_spill]] }
 0x5fd   : > { %p28_p3 = scmp.ge.s32.totalorder %s31_s20, 4   ;;  %s8843_s17 = sld [smem:[#allocation17_spill]] }
 0x5fe   : > { %s8844_s14 = sld [smem:[#allocation15_spill]]  ;;  %s8845_s15 = smov %s5750_s16 }
 0x5ff   : > { %s8847_s18 = smov %s5762_s19 }
 0x600   :  { %30 = sbr.rel (!%p28_p3) target bundleno = 13 (0xd), region = 134 }
 0x602   : > { %s8846_s16 = smov %s8842_s22 }
 0x604   : > { %s8848_s19 = smov %s8844_s14 }
 0x605   :  { %4777 = vsyncpa [#allocation4], 1 }
 0x606   :  { %4779 = vsyncpa [#allocation4 + $0x1], 1 }
 0x607   :  { %4780 = vsyncpa [#allocation7], 1 }
 0x608   :  { %4782 = vsyncpa [#allocation7 + $0x1], 1 }
 0x609   :  { %4783 = vsyncpa [#allocation5], 1 }
 0x60a   :  { %4785 = vsyncpa [#allocation5 + $0x1], 1 }

// kernel: tpu_custom_call.1
= control target key start
LH: loop header
LB: loop body
LE: loop exit
PB: predicated region body
PF: predicated region fallthrough
CT: control target
= control target key end

     0   :  { %s8557_s0 = inlined_call_operand.vmem [shape: f32[2,16,16,64], index: 0, kind: input, shape index: {}]   ;;  %s8558_s1 = inlined_call_operand.hbm [shape: f32[2,16,16,64], index: 1, kind: input, shape index: {}]   ;;  %s8559_s2 = inlined_call_operand.hbm [shape: f32[2,1,2,16,64], index: 2, kind: input, shape index: {}]   ;;  %s8560_s3 = inlined_call_operand.hbm [shape: f32[2,1,2,16,64], index: 3, kind: input, shape index: {}]   ;;  %s8561_s4 = inlined_call_operand.vmem [shape: bf16[128,16], index: 4, kind: input, shape index: {}]   ;;  %s8562_s5 = inlined_call_operand.vmem [shape: f32[1,16], index: 5, kind: input, shape index: {}]   ;;  %s8563_s6 = inlined_call_operand.vmem [shape: f32[1,16], index: 6, kind: input, shape index: {}]   ;;  %s8564_s7 = inlined_call_operand.<no memory space> [shape: f32[1,1], index: 7, kind: input, shape index: {}]   ;;  %s8565_s8 = inlined_call_operand.vmem [shape: bf16[3,192,64], index: 8, kind: input, shape index: {}]   ;;  %s8566_s9 = inlined_call_operand.vmem [shape: f32[1,64], index: 9, kind: input, shape index: {}]   ;;  %s8567_s10 = inlined_call_operand.hbm [shape: f32[2,16,16,64], index: 10, kind: output, shape index: {}]  }
   0x1   :  { %8613 = sst [smem:[#allocation54_spill]] %s8559_s2  ;;  %v15_v0 = vstv %s8564_s7 }
   0x2   :  { %8614 = sst [smem:[#allocation55_spill]] %s8565_s8  ;;  %16 = vst [vmem:[#allocation2] sm:$0x1] %v15_v0 }
   0x3   :  { %8615 = sst [smem:[#allocation56_spill]] %s8566_s9 }
   0x4   :  { %8616 = sst [smem:[#allocation57_spill]] %s8567_s10 }
   0x5   :  { %17 = vsyncpa [#allocation4], 0 }
   0x6   :  { %19 = vsyncpa [#allocation4 + $0x1], 0 }
   0x7   :  { %20 = vsyncpa [#allocation7], 0 }
   0x8   :  { %22 = vsyncpa [#allocation7 + $0x1], 0 }
   0x9   :  { %23 = vsyncpa [#allocation5], 0 }
   0xa   :  { %25 = vsyncpa [#allocation5 + $0x1], 0  ;;  %s5832_s15 = smov 0   ;;  %s5834_s16 = smov 0  }
   0xb   :  { %s5836_s17 = smov 0   ;;  %s5838_s18 = smov 0  }
   0xc   :  { %s5840_s19 = smov 0   ;;  %s5842_s20 = smov 0  }
   0xd LB: > { %8617 = sst [smem:[#allocation13_spill]] %s5746_s15  ;;  %s5863_s7 = sadd.s32 4294967295, %s5766_s20   ;;  %s5766_s20 = sphi %s5842_s20, %s31_s20   ;;  %s5762_s19 = sphi %s5840_s19, %s8848_s19   ;;  %s5758_s18 = sphi %s5838_s18, %s8847_s18   ;;  %s5754_s17 = sphi %s5836_s17, %s8843_s17   ;;  %s5750_s16 = sphi %s5834_s16, %s8846_s16   ;;  %s5746_s15 = sphi %s5832_s15, %s8845_s15  }
   0xe   : > { %8618 = sst [smem:[#allocation14_spill]] %s5754_s17  ;;  %s4914_s21 = sadd.s32 4294967294, %s5766_s20  }
   0xf   : > { %s43_s22 = sadd.s32 1, %s5762_s19  ;;  %s80_s23 = sadd.s32 1, %s5754_s17 }
  0x10   : > { %p45_p0 = scmp.ge.s32.totalorder %s43_s22, 2  ;;  %p87_p1 = scmp.ne.s32.totalorder %s5754_s17, %s5750_s16 }
  0x11   : > { %p88_p2 = scmp.eq.s32.totalorder %s5766_s20, 0  ;;  %p93_p3 = scmp.ne.s32.totalorder %s5750_s16, %s5746_s15 }
  0x12   : > { %s8850_s22 = smov (%p45_p0, %s43_s22), 0  ;;  %p94_p5 = scmp.eq.s32.totalorder %s5863_s7, 0 }
  0x13   : > { %8619 = sst [smem:[#allocation15_spill]] %s8850_s22  ;;  %p5875_p4 = por %p88_p2, %p87_p1 }
  0x14   : > { %s75_s25 = ssub.s32 %s5762_s19, %s8850_s22  ;;  %p301_p6 = scmp.eq.s32.totalorder %s5863_s7, 1 }
  0x15   : > { %p78_p7 = scmp.eq.s32.totalorder %s75_s25, 0  ;;  %p5883_p8 = por %p94_p5, %p93_p3 }
  0x16   : > { %p5887_p9 = por %p301_p6, %p87_p1  ;;  %p307_p10 = scmp.eq.s32.totalorder %s4914_s21, 1 }
  0x17   : > { %s5892_s28 = scalar_select %p78_p7, %s5754_s17, %s80_s23  }
  0x18   : > { %s8622_s27 = scalar_select %p5887_p9, 1, 0 }
  0x19   : > { %8624 = sst [smem:[#allocation17_spill]] %s5892_s28  ;;  %p5894_p11 = por %p307_p10, %p93_p3 }
  0x1a   : > { %8623 = sst [smem:[#allocation16_spill]] %s8622_s27  ;;  %p4916_p12 = scmp.ge.s32.totalorder %s5766_s20, 2 }
  0x1b   : > { %s8625_s29 = scalar_select %p5894_p11, 1, 0 }
  0x1c   : > { %p5301_p13 = scmp.lt.s32.totalorder %s5766_s20, 2  ;;  %s5901_s30 = sand.u32 1, %s5754_s17  }
  0x1d   : > { %8626 = sst [smem:[#allocation18_spill]] %s8625_s29  ;;  %s384_s12 = sand.u32 1, %s5766_s20  }
  0x1e   : > { %p5905_p0 = pnand %p5301_p13, %p5875_p4  ;;  %s4920_s13 = sshll.u32 %s5901_s30, 5 }
  0x1f   : > { %s5211_s14 = sshll.u32 %s5762_s19, 5  ;;  %s388_s21 = scalar_lea.vmem [#allocation6], %s4920_s13 }
  0x20   : > { %s398_s23 = sshll.u32 %s388_s21, 4  ;;  %s8628_s2 = sld [smem:[#allocation54_spill]]  ;;  %s399_s23 = int_to_ptr.vmem [resolvable:$true] %s398_s23 }
  0x21   : > { %s419_s15 = scalar_lea.hbm %s8560_s3, %s5211_s14  ;;  %s385_s27 = scalar_lea.sflag [#allocation7], %s384_s12 }
  0x22   : > { %s5768_s10 = smov 128   ;;  %s5769_s9 = smov 8  }
  0x23   : > { %s420_s21 = sshll.u32 %s419_s15, 4  ;;  %s412_s8 = scalar_lea.vmem [#allocation8], %s4920_s13  ;;  %s421_s21 = int_to_ptr.hbm [resolvable:$true] %s420_s21 }
  0x24   : > { %s422_s22 = sshll.u32 %s412_s8, 4  ;;  %p4926_p1 = scmp.ge.s32.totalorder %s5766_s20, 1  ;;  %s423_s22 = int_to_ptr.vmem [resolvable:$true] %s422_s22 }
  0x25   : > { %p430_p2 = scmp.lt.s32.totalorder %s5766_s20, 3  ;;  %s5210_s25 = sshll.u32 %s5762_s19, 8 }
  0x26   : > { %s395_s28 = scalar_lea.hbm %s8628_s2, %s5211_s14  ;;  %s371_s12 = scalar_lea.hbm %s8558_s1, %s5210_s25 }
  0x27   : > { %s396_s24 = sshll.u32 %s395_s28, 4  ;;  %p431_p3 = pnand %p4926_p1, %p430_p2  ;;  %s397_s24 = int_to_ptr.hbm [resolvable:$true] %s396_s24 }
  0x28   : > { %5293 = dma.hbm_to_vmem [thread:$0]  (!%p5905_p0), %s397_s24, 512, %s399_s23, %s385_s27, %s5768_s10, %s5768_s10, %s5769_s9  }
  0x29   : > { %s4917_s28 = sshll.u32 %s5901_s30, 8  ;;  %s372_s14 = sshll.u32 %s371_s12, 4  ;;  %s373_s14 = int_to_ptr.hbm [resolvable:$true] %s372_s14 }
  0x2a   : > { %s363_s2 = scalar_lea.vmem [#allocation3], %s4917_s28  ;;  %s360_s15 = scalar_lea.sflag [#allocation4], %s5901_s30 }
  0x2b   : > { %s374_s23 = sshll.u32 %s363_s2, 4  ;;  %434 = sbr.rel (%p431_p3) target bundleno = 1523 (0x5f3), region = 60  ;;  %s375_s23 = int_to_ptr.vmem [resolvable:$true] %s374_s23 }
  0x2c   : > { %5290 = dma.hbm_to_vmem [thread:$0]  (!%p5905_p0), %s373_s14, 4096, %s375_s23, %s360_s15, %s5768_s10, %s5768_s10, %s5769_s9  }
  0x2d   : > { %5296 = dma.hbm_to_vmem [thread:$0]  (!%p5905_p0), %s421_s21, 512, %s423_s22, %s385_s27, %s5768_s10, %s5768_s10, %s5769_s9  }
  0x30   : > { %s5933_s8 = sand.u32 1, %s5750_s16  }
  0x31   : > { %s4927_s13 = sshll.u32 %s5933_s8, 8  ;;  %s437_s24 = scalar_lea.sflag [#allocation4], %s5933_s8 }
  0x32   : > { %s5939_s28 = scalar_lea.vmem [#allocation3], %s4927_s13 }
  0x33   : > { %5733 = dma.done.wait (%p5883_p8), %s437_s24, 4096  }
  0x34   : > { %5735 = vsyncadd (%p5883_p8), %s437_s24, 4294963200  ;;  %s446_s2 = sand.u32 1, %s5863_s7   ;;  %s4928_s9 = sshll.u32 %s5933_s8, 5 }
  0x35   : > { %s447_s10 = scalar_lea.sflag [#allocation7], %s446_s2  ;;  %s5949_s27 = scalar_lea.vmem [#allocation6], %s4928_s9 }
  0x36   : > { %5737 = dma.done.wait (%p5883_p8), %s447_s10, 1024  }
  0x37   : > { %5739 = vsyncadd (%p5883_p8), %s447_s10, 4294966272  ;;  %v568_v1 = vld [vmem:[%s5939_s28 + $0x20] sm:$0xff]  ;;  %v569_v2 = vld [vmem:[%s5939_s28 + $0x28] sm:$0xff]  ;;  %s5770_s7 = smov 64   ;;  %s6021_s12 = scalar_lea.vmem [#allocation8], %s4928_s9  ;;  %vm852_vm0 = vcmask 523264  }
  0x38   : > { %v564_v3 = vld [vmem:[%s5939_s28] sm:$0xff]  ;;  %v632_v4 = vpack.c.bf16 %v568_v1, %v568_v1  ;;  %v633_v5 = vpack.c.bf16 %v569_v2, %v569_v2  ;;  %v565_v6 = vld [vmem:[%s5939_s28 + $0x8] sm:$0xff]  ;;  %v570_v13 = vld [vmem:[%s5939_s28 + $0x30] sm:$0xff]  ;;  %p519_p4 = scmp.lt.s32.totalorder %s5758_s18, 1  ;;  %vm1142_vm1 = vcmask 130048   ;;  %s8837_s17 = sld [smem:[#allocation57_spill]] }
  0x39   : > { %v628_v7 = vpack.c.bf16 %v564_v3, %v564_v3  ;;  %v572_v8 = vld [vmem:[%s5939_s28 + $0x40] sm:$0xff]  ;;  %v573_v9 = vld [vmem:[%s5939_s28 + $0x48] sm:$0xff]  ;;  %v629_v10 = vpack.c.bf16 %v565_v6, %v565_v6  ;;  %v571_v14 = vld [vmem:[%s5939_s28 + $0x38] sm:$0xff]  ;;  %v634_v19 = vpack.c.bf16 %v570_v13, %v570_v13  ;;  %s4738_s23 = scalar_lea.sflag [#allocation5], %s5933_s8 }
  0x3a   : > { %v636_v11 = vpack.c.bf16 %v572_v8, %v572_v8  ;;  %v637_v12 = vpack.c.bf16 %v573_v9, %v573_v9  ;;  %v574_v15 = vld [vmem:[%s5939_s28 + $0x50] sm:$0xff]  ;;  %v776_v16 = vunpack.c.l.b16 %v632_v4  ;;  %v777_v17 = vunpack.c.l.b16 %v633_v5  ;;  %v575_v20 = vld [vmem:[%s5939_s28 + $0x58] sm:$0xff]  ;;  %v580_v41 = vld [vmem:[%s5939_s28 + $0x80] sm:$0xff]  ;;  %s520_s30 = scalar_select %p519_p4, %s5758_s18, 1 }
  0x3b   : > { %v772_v18 = vunpack.c.l.b16 %v628_v7  ;;  %v773_v21 = vunpack.c.l.b16 %v629_v10  ;;  %v635_v24 = vpack.c.bf16 %v571_v14, %v571_v14  ;;  %v566_v25 = vld [vmem:[%s5939_s28 + $0x10] sm:$0xff]  ;;  %v638_v27 = vpack.c.bf16 %v574_v15, %v574_v15  ;;  %v567_v29 = vld [vmem:[%s5939_s28 + $0x18] sm:$0xff]  ;;  %v581_v42 = vld [vmem:[%s5939_s28 + $0x88] sm:$0xff] }
  0x3c   : > { %v780_v22 = vunpack.c.l.b16 %v636_v11  ;;  %v781_v23 = vunpack.c.l.b16 %v637_v12  ;;  %v806_v26 = vpack.c.b16 %v777_v17, %v776_v16  ;;  %v639_v28 = vpack.c.bf16 %v575_v20, %v575_v20  ;;  %v578_v37 = vld [vmem:[%s5939_s28 + $0x70] sm:$0xff]  ;;  %v579_v38 = vld [vmem:[%s5939_s28 + $0x78] sm:$0xff]  ;;  %v576_v47 = vld [vmem:[%s5939_s28 + $0x60] sm:$0xff]  ;;  %s5213_s11 = sshll.u32 %s520_s30, 8  ;;  %s8631_s30 = sld [smem:[#allocation55_spill]] }
  0x3d   : > { %v804_v30 = vpack.c.b16 %v773_v21, %v772_v18  ;;  %v778_v32 = vunpack.c.l.b16 %v634_v19  ;;  %v779_v33 = vunpack.c.l.b16 %v635_v24  ;;  %v630_v34 = vpack.c.bf16 %v566_v25, %v566_v25  ;;  %v577_v48 = vld [vmem:[%s5939_s28 + $0x68] sm:$0xff]  ;;  %v584_v57 = vld [vmem:[%s5939_s28 + $0xa0] sm:$0xff]  ;;  %v590_v61 = vld [vmem:[%s5939_s28 + $0xd0] sm:$0xff]  ;;  %s6053_s25 = scalar_lea.vmem %s8557_s0, %s5213_s11  ;;  %s8307_s11 = scalar_lea.vmem [#allocation9], %s4927_s13 }
  0x3e   : > { %v808_v31 = vpack.c.b16 %v781_v23, %v780_v22  ;;  %824 = vrot.lane.b32.xlu1 %v806_v26, %s5770_s7  ;;  %v782_v35 = vunpack.c.l.b16 %v638_v27  ;;  %v783_v36 = vunpack.c.l.b16 %v639_v28  ;;  %v631_v39 = vpack.c.bf16 %v567_v29, %v567_v29  ;;  %v585_v58 = vld [vmem:[%s5939_s28 + $0xa8] sm:$0xff]  ;;  %v591_v62 = vld [vmem:[%s5939_s28 + $0xd8] sm:$0xff]  ;;  %v582_v1 = vld [vmem:[%s5939_s28 + $0x90] sm:$0xff]  ;;  %s5258_s13 = sshll.u32 %s5758_s18, 8  ;;  %s8838_s29 = smov %s8837_s17 }
  0x3f   : > { %820 = vrot.lane.b32.xlu0 %v804_v30, %s5770_s7  ;;  %v774_v40 = vunpack.c.l.b16 %v630_v34  ;;  %v807_v44 = vpack.c.b16 %v779_v33, %v778_v32  ;;  %v642_v45 = vpack.c.bf16 %v578_v37, %v578_v37  ;;  %v643_v46 = vpack.c.bf16 %v579_v38, %v579_v38  ;;  %v583_v2 = vld [vmem:[%s5939_s28 + $0x98] sm:$0xff]  ;;  %v5994_v9 = vld [vmem:[%s8561_s4 + $0x30] sm:$0xff]  ;;  %v6002_v16 = vld [vmem:[%s8561_s4 + $0x28] sm:$0xff]  ;;  %s4752_s14 = scalar_lea.hbm %s8837_s17, %s5258_s13  ;;  %s5700_s10 = scalar_lea.hbm %s8838_s29, 512 }
  0x40   : > { %828 = vrot.lane.b32.xlu2 %v808_v31, %s5770_s7  ;;  %v775_v43 = vunpack.c.l.b16 %v631_v39  ;;  %v809_v49 = vpack.c.b16 %v783_v36, %v782_v35  ;;  %v644_v51 = vpack.c.bf16 %v580_v41, %v580_v41  ;;  %v645_v52 = vpack.c.bf16 %v581_v42, %v581_v42  ;;  %v5988_v3 = vld [vmem:[%s8561_s4 + $0x38] sm:$0xff]  ;;  %v592_v19 = vld [vmem:[%s5939_s28 + $0xe0] sm:$0xff]  ;;  %v593_v20 = vld [vmem:[%s5939_s28 + $0xe8] sm:$0xff]  ;;  %s4755_s18 = sshll.u32 %s4752_s14, 4  ;;  %s4756_s18 = int_to_ptr.hbm [resolvable:$true] %s4755_s18 }
  0x41   : > { %v640_v53 = vpack.c.bf16 %v576_v47, %v576_v47  ;;  %v641_v54 = vpack.c.bf16 %v577_v48, %v577_v48  ;;  %v786_v55 = vunpack.c.l.b16 %v642_v45  ;;  %v787_v56 = vunpack.c.l.b16 %v643_v46  ;;  %985 = vmatpush.bf16.msra.mxu0 %v5988_v3  ;;  %5259 = vmatpush.bf16.msra.mxu1 %v5988_v3  ;;  %v586_v23 = vld [vmem:[%s5939_s28 + $0xb0] sm:$0xff]  ;;  %v587_v24 = vld [vmem:[%s5939_s28 + $0xb8] sm:$0xff]  ;;  %v2143_v37 = vld [vmem:[%s6021_s12] sm:$0xff]  ;;  %s5694_s15 = sshra.s32 %s4756_s18, 4  ;;  %s5695_s15 = int_to_ptr.hbm [resolvable:$true] %s5694_s15 }
  0x42   : > { %v805_v50 = vpack.c.b16 %v775_v43, %v774_v40  ;;  %v788_v59 = vunpack.c.l.b16 %v644_v51  ;;  %v789_v60 = vunpack.c.l.b16 %v645_v52  ;;  %v648_v4 = vpack.c.bf16 %v584_v57, %v584_v57  ;;  %v5218_v28 = vld [vmem:[%s8561_s4 + $0x20] sm:$0xff]  ;;  %v2144_v38 = vld [vmem:[%s6021_s12 + $0x8] sm:$0xff]  ;;  %v594_v39 = vld [vmem:[%s5939_s28 + $0xf0] sm:$0xff]  ;;  %s5696_s24 = scalar_lea.hbm %s5695_s15, 256  ;;  %p5701_p8 = scmp.lt.s32.totalorder %s5695_s15, %s8838_s29 }
  0x43   : > { %v784_v63 = vunpack.c.l.b16 %v640_v53  ;;  %v785_v0 = vunpack.c.l.b16 %v641_v54  ;;  %v649_v5 = vpack.c.bf16 %v585_v58, %v585_v58  ;;  %v811_v6 = vpack.c.b16 %v787_v56, %v786_v55  ;;  %v595_v40 = vld [vmem:[%s5939_s28 + $0xf8] sm:$0xff]  ;;  %v5216_v54 = vld [vmem:[%s8561_s4 + $0x10] sm:$0xff]  ;;  %v5215_v55 = vld [vmem:[%s8561_s4 + $0x8] sm:$0xff]  ;;  %p5697_p5 = scmp.ne.s32.totalorder %s5695_s15, %s5696_s24  ;;  %p5702_p10 = scmp.lt.s32.totalorder %s5700_s10, %s5696_s24 }
  0x44   : > { %v654_v7 = vpack.c.bf16 %v590_v61, %v590_v61  ;;  %v655_v8 = vpack.c.bf16 %v591_v62, %v591_v62  ;;  %v812_v10 = vpack.c.b16 %v789_v60, %v788_v59  ;;  %v646_v12 = vpack.c.bf16 %v582_v1, %v582_v1  ;;  %v5217_v53 = vld [vmem:[%s8561_s4 + $0x18] sm:$0xff]  ;;  %v5214_v56 = vld [vmem:[%s8561_s4] sm:$0xff]  ;;  %v533_v60 = vld [vmem:[%s6053_s25 + $0x8] sm:$0xff] }
  0x45   : > { %v810_v11 = vpack.c.b16 %v785_v0, %v784_v63  ;;  %v647_v13 = vpack.c.bf16 %v583_v2, %v583_v2  ;;  %v792_v14 = vunpack.c.l.b16 %v648_v4  ;;  %v793_v15 = vunpack.c.l.b16 %v649_v5  ;;  %986 = vmatpush.bf16.msra.mxu0 %v5994_v9  ;;  %5260 = vmatpush.bf16.msra.mxu1 %v5994_v9  ;;  %v532_v59 = vld [vmem:[%s6053_s25] sm:$0xff]  ;;  %v558_v61 = vld [vmem:[%s6053_s25 + $0xd0] sm:$0xff]  ;;  %v559_v62 = vld [vmem:[%s6053_s25 + $0xd8] sm:$0xff]  ;;  %p5698_p6 = pnand %p5697_p5, %p5887_p9  ;;  %p5703_p13 = por %p5702_p10, %p5701_p8 }
  0x46   : > { %826 = vrot.lane.b32.xlu1 %v807_v44, %s5770_s7  ;;  %v798_v17 = vunpack.c.l.b16 %v654_v7  ;;  %v799_v18 = vunpack.c.l.b16 %v655_v8  ;;  %v790_v21 = vunpack.c.l.b16 %v646_v12  ;;  %v656_v26 = vpack.c.bf16 %v592_v19, %v592_v19 }
  0x47   : > { %822 = vrot.lane.b32.xlu0 %v805_v50, %s5770_s7  ;;  %v791_v22 = vunpack.c.l.b16 %v647_v13  ;;  %v814_v25 = vpack.c.b16 %v793_v15, %v792_v14  ;;  %v657_v27 = vpack.c.bf16 %v593_v20, %v593_v20  ;;  %v650_v31 = vpack.c.bf16 %v586_v23, %v586_v23  ;;  %v534_v13 = vld [vmem:[%s6053_s25 + $0x10] sm:$0xff]  ;;  %v535_v14 = vld [vmem:[%s6053_s25 + $0x18] sm:$0xff]  ;;  %p5699_p7 = pneg %p5698_p6 }
  0x48   : > { %830 = vrot.lane.b32.xlu2 %v809_v49, %s5770_s7  ;;  %v817_v29 = vpack.c.b16 %v799_v18, %v798_v17  ;;  %v651_v32 = vpack.c.bf16 %v587_v24, %v587_v24  ;;  %v800_v33 = vunpack.c.l.b16 %v656_v26  ;;  %v2151_v42 = vpack.c.bf16 %v2143_v37, %v2143_v37 }
  0x49   : > { %987 = vmatpush.bf16.msra.mxu0 %v6002_v16  ;;  %v813_v30 = vpack.c.b16 %v791_v22, %v790_v21  ;;  %5261 = vmatpush.bf16.msra.mxu1 %v6002_v16  ;;  %v801_v34 = vunpack.c.l.b16 %v657_v27  ;;  %v794_v35 = vunpack.c.l.b16 %v650_v31  ;;  %v2152_v43 = vpack.c.bf16 %v2144_v38, %v2144_v38  ;;  %v560_v27 = vld [vmem:[%s6053_s25 + $0xe0] sm:$0xff]  ;;  %p5704_p0 = pnand %p5703_p13, %p5699_p7 }
  0x4a   : > { %v795_v36 = vunpack.c.l.b16 %v651_v32  ;;  %v658_v45 = vpack.c.bf16 %v594_v39, %v594_v39  ;;  %v659_v46 = vpack.c.bf16 %v595_v40, %v595_v40  ;;  %v2169_v47 = vunpack.c.l.b16 %v2151_v42 }
  0x4b   : > { %v818_v41 = vpack.c.b16 %v801_v34, %v800_v33  ;;  %v2170_v48 = vunpack.c.l.b16 %v2152_v43  ;;  %v596_v63 = vpack.c.bf16 %v532_v59, %v532_v59  ;;  %v597_v0 = vpack.c.bf16 %v533_v60, %v533_v60 }
  0x4c   : > { %v815_v44 = vpack.c.b16 %v795_v36, %v794_v35  ;;  %v802_v49 = vunpack.c.l.b16 %v658_v45  ;;  %v803_v50 = vunpack.c.l.b16 %v659_v46  ;;  %v622_v1 = vpack.c.bf16 %v558_v61, %v558_v61  ;;  %v563_v45 = vld [vmem:[%s6053_s25 + $0xf8] sm:$0xff] }
  0x4d   : > { %988 = vmatpush.bf16.msra.mxu0 %v5218_v28  ;;  %5262 = vmatpush.bf16.msra.mxu1 %v5218_v28  ;;  %v2173_v51 = vpack.c.b16 %v2170_v48, %v2169_v47  ;;  %v623_v2 = vpack.c.bf16 %v559_v62, %v559_v62  ;;  %v692_v4 = vunpack.c.l.b16 %v596_v63  ;;  %v693_v5 = vunpack.c.l.b16 %v597_v0 }
  0x4e   : > { %834 = vrot.lane.b32.xlu1 %v811_v6, %s5770_s7  ;;  %v819_v52 = vpack.c.b16 %v803_v50, %v802_v49  ;;  %v718_v6 = vunpack.c.l.b16 %v622_v1  ;;  %v598_v17 = vpack.c.bf16 %v534_v13, %v534_v13  ;;  %v599_v18 = vpack.c.bf16 %v535_v14, %v535_v14  ;;  %v538_v49 = vld [vmem:[%s6053_s25 + $0x30] sm:$0xff]  ;;  %v539_v50 = vld [vmem:[%s6053_s25 + $0x38] sm:$0xff]  ;;  %v2139_v1 = vld [vmem:[%s5949_s27] sm:$0xff] }
  0x4f   : > { %832 = vrot.lane.b32.xlu0 %v810_v11, %s5770_s7  ;;  %v719_v7 = vunpack.c.l.b16 %v623_v2  ;;  %v724_v8 = vpack.c.b16 %v693_v5, %v692_v4  ;;  %v624_v31 = vpack.c.bf16 %v560_v27, %v560_v27  ;;  %v2140_v2 = vld [vmem:[%s5949_s27 + $0x8] sm:$0xff]  ;;  %v540_v5 = vld [vmem:[%s6053_s25 + $0x40] sm:$0xff] }
  0x50   : > { %836 = vrot.lane.b32.xlu2 %v812_v10, %s5770_s7  ;;  %v694_v20 = vunpack.c.l.b16 %v598_v17  ;;  %v695_v21 = vunpack.c.l.b16 %v599_v18  ;;  %v604_v13 = vpack.c.bf16 %v540_v5, %v540_v5  ;;  %v6120_v5 = vld [vmem:[%s8562_s5] ss:$0 sm:$0xff] }
  0x51   : > { %989 = vmatpush.bf16.msra.mxu0 %v5217_v53  ;;  %5263 = vmatpush.bf16.msra.mxu1 %v5217_v53  ;;  %v720_v36 = vunpack.c.l.b16 %v624_v31 }
  0x52   : > { %v725_v23 = vpack.c.b16 %v695_v21, %v694_v20  ;;  %v700_v20 = vunpack.c.l.b16 %v604_v13 }
  0x55   : > { %990 = vmatpush.bf16.msra.mxu0 %v5216_v54  ;;  %5264 = vmatpush.bf16.msra.mxu1 %v5216_v54 }
  0x56   : > { %840 = vrot.lane.b32.xlu1 %v814_v25, %s5770_s7 }
  0x57   : > { %838 = vrot.lane.b32.xlu0 %v813_v30, %s5770_s7  ;;  %v537_v30 = vld [vmem:[%s6053_s25 + $0x28] sm:$0xff] }
  0x58   : > { %846 = vrot.lane.b32.xlu2 %v817_v29, %s5770_s7  ;;  %v536_v29 = vld [vmem:[%s6053_s25 + $0x20] sm:$0xff]  ;;  %v601_v34 = vpack.c.bf16 %v537_v30, %v537_v30 }
  0x59   : > { %991 = vmatpush.bf16.msra.mxu0 %v5215_v55  ;;  %5265 = vmatpush.bf16.msra.mxu1 %v5215_v55  ;;  %v600_v33 = vpack.c.bf16 %v536_v29, %v536_v29  ;;  %v2146_v29 = vld [vmem:[%s6021_s12 + $0x18] sm:$0xff] }
  0x5a   : > { %v697_v40 = vunpack.c.l.b16 %v601_v34  ;;  %v2154_v31 = vpack.c.bf16 %v2146_v29, %v2146_v29  ;;  %v543_v34 = vld [vmem:[%s6053_s25 + $0x58] sm:$0xff] }
  0x5b   : > { %v696_v39 = vunpack.c.l.b16 %v600_v33  ;;  %v542_v33 = vld [vmem:[%s6053_s25 + $0x50] sm:$0xff] }
  0x5d   : > { %992 = vmatpush.bf16.msra.mxu0 %v5214_v56  ;;  %5266 = vmatpush.bf16.msra.mxu1 %v5214_v56  ;;  %v726_v42 = vpack.c.b16 %v697_v40, %v696_v39  ;;  %v606_v40 = vpack.c.bf16 %v542_v33, %v542_v33 }
  0x5e   : > { %848 = vrot.lane.b32.xlu1 %v818_v41, %s5770_s7 }
  0x5f   : > { %842 = vrot.lane.b32.xlu0 %v815_v44, %s5770_s7  ;;  %v562_v44 = vld [vmem:[%s6053_s25 + $0xf0] sm:$0xff] }
  0x61   : > { %2187 = vmatpush.bf16.msrb.mxu1 %v5988_v3 }
  0x65   : > { %2188 = vmatpush.bf16.msrb.mxu1 %v5994_v9  ;;  %v737_v9 = vpack.c.b16 %v719_v7, %v718_v6  ;;  %v541_v6 = vld [vmem:[%s6053_s25 + $0x48] sm:$0xff]  ;;  %v2147_v7 = vpack.c.bf16 %v2139_v1, %v2139_v1 }
  0x66   : > { %2175 = vrot.lane.b32.xlu1 %v2173_v51, %s5770_s7  ;;  %v626_v51 = vpack.c.bf16 %v562_v44, %v562_v44  ;;  %v605_v14 = vpack.c.bf16 %v541_v6, %v541_v6 }
  0x67   : > { %850 = vrot.lane.b32.xlu0 %v819_v52, %s5770_s7  ;;  %v627_v52 = vpack.c.bf16 %v563_v45, %v563_v45  ;;  %v2159_v17 = vunpack.c.l.b16 %v2147_v7  ;;  %v544_v45 = vld [vmem:[%s6053_s25 + $0x60] sm:$0xff] }
  0x68   : > { %v701_v21 = vunpack.c.l.b16 %v605_v14  ;;  %v550_v14 = vld [vmem:[%s6053_s25 + $0x90] sm:$0xff] }
  0x69   : > { %2189 = vmatpush.bf16.msrb.mxu1 %v6002_v16 }
  0x6d   : > { %2190 = vmatpush.bf16.msrb.mxu1 %v5218_v28  ;;  %v561_v28 = vld [vmem:[%s6053_s25 + $0xe8] sm:$0xff] }
  0x6e   : > { %v625_v32 = vpack.c.bf16 %v561_v28, %v561_v28  ;;  %v2145_v28 = vld [vmem:[%s6021_s12 + $0x10] sm:$0xff] }
  0x6f   : > { %v2153_v30 = vpack.c.bf16 %v2145_v28, %v2145_v28 }
  0x70   : > { %v721_v37 = vunpack.c.l.b16 %v625_v32 }
  0x71   : > { %2191 = vmatpush.bf16.msrb.mxu1 %v5217_v53  ;;  %v602_v53 = vpack.c.bf16 %v538_v49, %v538_v49 }
  0x72   : > { %v738_v41 = vpack.c.b16 %v721_v37, %v720_v36  ;;  %v2171_v36 = vunpack.c.l.b16 %v2153_v30  ;;  %v2172_v37 = vunpack.c.l.b16 %v2154_v31 }
  0x73   : > { %v698_v59 = vunpack.c.l.b16 %v602_v53 }
  0x74   : > { %v2174_v39 = vpack.c.b16 %v2172_v37, %v2171_v36 }
  0x75   : > { %2192 = vmatpush.bf16.msrb.mxu1 %v5216_v54  ;;  %v603_v54 = vpack.c.bf16 %v539_v50, %v539_v50 }
  0x77   : > { %v699_v60 = vunpack.c.l.b16 %v603_v54  ;;  %v546_v54 = vld [vmem:[%s6053_s25 + $0x70] sm:$0xff] }
  0x79   : > { %2193 = vmatpush.bf16.msrb.mxu1 %v5215_v55  ;;  %v722_v55 = vunpack.c.l.b16 %v626_v51  ;;  %v727_v63 = vpack.c.b16 %v699_v60, %v698_v59 }
  0x7d   : > { %2194 = vmatpush.bf16.msrb.mxu1 %v5214_v56  ;;  %v723_v56 = vunpack.c.l.b16 %v627_v52 }
  0x7f   : > { %v739_v61 = vpack.c.b16 %v723_v56, %v722_v55  ;;  %v547_v55 = vld [vmem:[%s6053_s25 + $0x78] sm:$0xff]  ;;  %v610_v56 = vpack.c.bf16 %v546_v54, %v546_v54 }
  0x80   : > { %v611_v59 = vpack.c.bf16 %v547_v55, %v547_v55 }
  0x81   : > { %v706_v60 = vunpack.c.l.b16 %v610_v56 }
  0x9a   : > { %v6048_v57 = vpop.permute.xlu2 %828 }
  0xa2   : > { %v6055_v58 = vpop.permute.xlu2 %830 }
  0xaa   : > { %v6061_v3 = vpop.permute.xlu2 %836 }
  0xb0   : > { %v825_v10 = vpop.permute.xlu1 %824 }
  0xb1   : > { %v821_v11 = vpop.permute.xlu0 %820  ;;  %v863_v47 = vsel %vm852_vm0, %v726_v42, %v825_v10  ;;  %v589_v10 = vld [vmem:[%s5939_s28 + $0xc8] sm:$0xff]  ;;  %v702_v42 = vunpack.c.l.b16 %v606_v40 }
  0xb2   : > { %v847_v12 = vpop.permute.xlu2 %846  ;;  %v855_v15 = vsel %vm852_vm0, %v724_v8, %v821_v11  ;;  %v2148_v8 = vpack.c.bf16 %v2140_v2, %v2140_v2 }
  0xb3   : > { %v907_v16 = vsel %vm852_vm0, %v737_v9, %v847_v12  ;;  %993 = vmatmul.bf16.vlgmr.msra.gmra.mxu0 %v855_v15  ;;  %v588_v9 = vld [vmem:[%s5939_s28 + $0xc0] sm:$0xff]  ;;  %v653_v12 = vpack.c.bf16 %v589_v10, %v589_v10  ;;  %v6127_v10 = vld [vmem:[%s8563_s6] ss:$0 sm:$0xff] }
  0xb4   : > { %1058 = vmatmul.bf16.vlgmr.msra.gmra.mxu1 %v907_v16  ;;  %v652_v11 = vpack.c.bf16 %v588_v9, %v588_v9  ;;  %v2160_v18 = vunpack.c.l.b16 %v2148_v8 }
  0xb5   : > { %v797_v16 = vunpack.c.l.b16 %v653_v12 }
  0xb6   : > { %v796_v15 = vunpack.c.l.b16 %v652_v11 }
  0xb8   : > { %v827_v19 = vpop.permute.xlu1 %826 }
  0xb9   : > { %v823_v22 = vpop.permute.xlu0 %822  ;;  %v867_v4 = vsel %vm852_vm0, %v727_v63, %v827_v19  ;;  %v816_v19 = vpack.c.b16 %v797_v16, %v796_v15  ;;  %v548_v63 = vld [vmem:[%s6053_s25 + $0x80] sm:$0xff]  ;;  %v551_v15 = vld [vmem:[%s6053_s25 + $0x98] sm:$0xff] }
  0xba   : > { %v859_v25 = vsel %vm852_vm0, %v725_v23, %v823_v22  ;;  %v2163_v22 = vpack.c.b16 %v2160_v18, %v2159_v17  ;;  %v612_v1 = vpack.c.bf16 %v548_v63, %v548_v63  ;;  %v614_v18 = vpack.c.bf16 %v550_v14, %v550_v14  ;;  %v554_v63 = vld [vmem:[%s6053_s25 + $0xb0] sm:$0xff] }
  0xbb   : > { %844 = vrot.lane.b32.xlu2 %v816_v19, %s5770_s7  ;;  %v615_v19 = vpack.c.bf16 %v551_v15, %v551_v15 }
  0xbd   : > { %v711_v28 = vunpack.c.l.b16 %v615_v19 }
  0xc0   : > { %v6067_v24 = vpop.permute.xlu1 %834 }
  0xc1   : > { %v6070_v26 = vpop.permute.xlu0 %832 }
  0xc3   : > { %998 = vmatmul.bf16.gmra.mxu0 %v859_v25  ;;  %v728_v25 = vpack.c.b16 %v701_v21, %v700_v20  ;;  %2177 = vrot.lane.b32.xlu2 %v2174_v39, %s5770_s7 }
  0xc5   : > { %v871_v32 = vsel %vm852_vm0, %v728_v25, %v6048_v57 }
  0xc8   : > { %v6076_v35 = vpop.permute.xlu1 %840 }
  0xc9   : > { %v6078_v38 = vpop.permute.xlu0 %838 }
  0xd0   : > { %v849_v43 = vpop.permute.xlu1 %848 }
  0xd1   : > { %v911_v46 = vsel %vm852_vm0, %v738_v41, %v849_v43  ;;  %v6084_v48 = vpop.permute.xlu0 %842  ;;  %v607_v41 = vpack.c.bf16 %v543_v34, %v543_v34 }
  0xd2   : > { %1063 = vmatmul.bf16.gmra.mxu1 %v911_v46  ;;  %v545_v46 = vld [vmem:[%s6053_s25 + $0x68] sm:$0xff] }
  0xd3   : > { %1003 = vmatmul.bf16.gmra.mxu0 %v863_v47  ;;  %v703_v43 = vunpack.c.l.b16 %v607_v41  ;;  %v608_v47 = vpack.c.bf16 %v544_v45, %v544_v45  ;;  %v609_v49 = vpack.c.bf16 %v545_v46, %v545_v46  ;;  %v552_v41 = vld [vmem:[%s6053_s25 + $0xa0] sm:$0xff] }
  0xd4   : > { %v616_v45 = vpack.c.bf16 %v552_v41, %v552_v41 }
  0xd5   : > { %v729_v44 = vpack.c.b16 %v703_v43, %v702_v42  ;;  %v704_v50 = vunpack.c.l.b16 %v608_v47  ;;  %v705_v51 = vunpack.c.l.b16 %v609_v49  ;;  %v553_v42 = vld [vmem:[%s6053_s25 + $0xa8] sm:$0xff] }
  0xd6   : > { %v617_v46 = vpack.c.bf16 %v553_v42, %v553_v42 }
  0xd7   : > { %v875_v57 = vsel %vm852_vm0, %v729_v44, %v6055_v58  ;;  %v730_v52 = vpack.c.b16 %v705_v51, %v704_v50 }
  0xd8   : > { %v2176_v23 = vpop.permute.xlu1 %2175  ;;  %v713_v50 = vunpack.c.l.b16 %v617_v46 }
  0xd9   : > { %v851_v62 = vpop.permute.xlu0 %850  ;;  %v2181_v27 = vsel %vm852_vm0, %v2163_v22, %v2176_v23  ;;  %v879_v53 = vsel %vm852_vm0, %v730_v52, %v6070_v26 }
  0xda   : > { %v915_v0 = vsel %vm852_vm0, %v739_v61, %v851_v62  ;;  %v707_v61 = vunpack.c.l.b16 %v611_v59 }
  0xdc   : > { %v731_v62 = vpack.c.b16 %v707_v61, %v706_v60 }
  0xde   : > { %v883_v58 = vsel %vm852_vm0, %v731_v62, %v6067_v24 }
  0xe2   : > { %1068 = vmatmul.bf16.gmra.mxu1 %v915_v0  ;;  %v549_v0 = vld [vmem:[%s6053_s25 + $0x88] sm:$0xff] }
  0xe3   : > { %1008 = vmatmul.bf16.gmra.mxu0 %v867_v4  ;;  %v613_v2 = vpack.c.bf16 %v549_v0, %v549_v0  ;;  %v708_v4 = vunpack.c.l.b16 %v612_v1  ;;  %v555_v0 = vld [vmem:[%s6053_s25 + $0xb8] sm:$0xff] }
  0xe4   : > { %v2141_v1 = vld [vmem:[%s5949_s27 + $0x10] sm:$0xff] }
  0xe5   : > { %v709_v26 = vunpack.c.l.b16 %v613_v2  ;;  %v2142_v2 = vld [vmem:[%s5949_s27 + $0x18] sm:$0xff] }
  0xe7   : > { %v732_v6 = vpack.c.b16 %v709_v26, %v708_v4  ;;  %v2149_v26 = vpack.c.bf16 %v2141_v1, %v2141_v1 }
  0xe9   : > { %v887_v11 = vsel %vm852_vm0, %v732_v6, %v6061_v3  ;;  %v2150_v6 = vpack.c.bf16 %v2142_v2, %v2142_v2 }
  0xf2   : > { %2195 = vmatmul.bf16.vlgmr.msrb.gmra.mxu1 %v2181_v27  ;;  %v710_v27 = vunpack.c.l.b16 %v614_v18 }
  0xf3   : > { %1013 = vmatmul.bf16.gmra.mxu0 %v871_v32 }
  0xf4   : > { %v733_v32 = vpack.c.b16 %v711_v28, %v710_v27 }
  0xf6   : > { %v891_v39 = vsel %vm852_vm0, %v733_v32, %v6078_v38  ;;  %v712_v38 = vunpack.c.l.b16 %v616_v45 }
 0x103   : > { %1018 = vmatmul.bf16.gmra.mxu0 %v875_v57 }
 0x113   : > { %1023 = vmatmul.bf16.gmra.mxu0 %v879_v53  ;;  %v734_v53 = vpack.c.b16 %v713_v50, %v712_v38 }
 0x115   : > { %v6154_v60 = vpop.permute.xlu2 %844 }
 0x11d   : > { %v2178_v18 = vpop.permute.xlu2 %2177 }
 0x123   : > { %1028 = vmatmul.bf16.gmra.mxu0 %v883_v58  ;;  %v895_v58 = vsel %vm852_vm0, %v734_v53, %v6076_v35 }
 0x130   : > { %v994_v7 = vpop.f32.mrf.mxu0 }
 0x131   : > { %v1059_v8 = vpop.f32.mrf.mxu1  ;;  %v995_v9 = vadd.f32 %v6120_v5, %v994_v7  ;;  %v618_v7 = vpack.c.bf16 %v554_v63, %v554_v63 }
 0x132   : > { %v1060_v24 = vadd.f32 %v6120_v5, %v1059_v8  ;;  %v619_v8 = vpack.c.bf16 %v555_v0, %v555_v0 }
 0x133   : > { %v1074_v12 = vmax.f32 %v995_v9, 0.0  ;;  %1033 = vmatmul.bf16.gmra.mxu0 %v887_v11  ;;  %v2161_v11 = vunpack.c.l.b16 %v2149_v26 }
 0x134   : > { %v1100_v13 = vmax.f32 %v1060_v24, 0.0 }
 0x135   : > { %v1110_v16 = vmul.f32 %v6127_v10, %v1074_v12  ;;  %v2162_v12 = vunpack.c.l.b16 %v2150_v6 }
 0x136   : > { %v1136_v17 = vmul.f32 %v6127_v10, %v1100_v13 }
 0x137   : > { %v1143_v20 = vsel %vm1142_vm1, %v1110_v16, 0.0  ;;  %v2164_v15 = vpack.c.b16 %v2162_v12, %v2161_v11 }
 0x138   : > { %v1221_v21 = vsel %vm1142_vm1, %v1136_v17, 0.0  ;;  %v996_v22 = vpop.f32.mrf.mxu0  ;;  %1144 = vadd.xlane.f32.xlu1 %v1143_v20  ;;  %v714_v17 = vunpack.c.l.b16 %v618_v7 }
 0x139   : > { %v1061_v23 = vpop.f32.mrf.mxu1  ;;  %1222 = vadd.xlane.f32.xlu0 %v1221_v21  ;;  %v997_v3 = vadd.f32 %v6120_v5, %v996_v22  ;;  %v715_v21 = vunpack.c.l.b16 %v619_v8  ;;  %v2185_v22 = vsel %vm852_vm0, %v2164_v15, %v2178_v18 }
 0x13a   : > { %v1062_v25 = vadd.f32 %v6120_v5, %v1061_v23  ;;  %2200 = vmatmul.bf16.gmra.mxu1 %v2185_v22 }
 0x13b   : > { %v1075_v29 = vmax.f32 %v997_v3, 0.0 }
 0x13c   : > { %v1101_v30 = vmax.f32 %v1062_v25, 0.0 }
 0x13d   : > { %v1111_v31 = vmul.f32 %v6127_v10, %v1075_v29  ;;  %v735_v29 = vpack.c.b16 %v715_v21, %v714_v17 }
 0x13e   : > { %v1137_v37 = vmul.f32 %v6127_v10, %v1101_v30 }
 0x13f   : > { %v1146_v33 = vsel %vm1142_vm1, %v1111_v31, 0.0 }
 0x140   : > { %v999_v34 = vpop.f32.mrf.mxu0  ;;  %1147 = vadd.xlane.f32.xlu2 %v1146_v33  ;;  %v1224_v44 = vsel %vm1142_vm1, %v1137_v37, 0.0  ;;  %v899_v37 = vsel %vm852_vm0, %v735_v29, %v6084_v48 }
 0x141   : > { %v1000_v36 = vadd.f32 %v6120_v5, %v999_v34  ;;  %v556_v34 = vld [vmem:[%s6053_s25 + $0xc0] sm:$0xff] }
 0x143   : > { %v1076_v40 = vmax.f32 %v1000_v36, 0.0  ;;  %1038 = vmatmul.bf16.gmra.mxu0 %v891_v39  ;;  %v557_v36 = vld [vmem:[%s6053_s25 + $0xc8] sm:$0xff] }
 0x144   : > { %v621_v41 = vpack.c.bf16 %v557_v36, %v557_v36 }
 0x145   : > { %v1112_v43 = vmul.f32 %v6127_v10, %v1076_v40  ;;  %v620_v40 = vpack.c.bf16 %v556_v34, %v556_v34 }
 0x147   : > { %v1149_v57 = vsel %vm1142_vm1, %v1112_v43, 0.0  ;;  %v716_v46 = vunpack.c.l.b16 %v620_v40 }
 0x148   : > { %v1001_v47 = vpop.f32.mrf.mxu0  ;;  %1150 = vadd.xlane.f32.xlu0 %v1149_v57  ;;  %1225 = vadd.xlane.f32.xlu2 %v1224_v44  ;;  %v717_v57 = vunpack.c.l.b16 %v621_v41 }
 0x149   : > { %v1002_v49 = vadd.f32 %v6120_v5, %v1001_v47 }
 0x14a   : > { %v736_v38 = vpack.c.b16 %v717_v57, %v716_v46 }
 0x14b   : > { %v1077_v51 = vmax.f32 %v1002_v49, 0.0 }
 0x14c   : > { %v903_v53 = vsel %vm852_vm0, %v736_v38, %v6154_v60 }
 0x14d   : > { %v1113_v52 = vmul.f32 %v6127_v10, %v1077_v51 }
 0x14f   : > { %v1064_v54 = vpop.f32.mrf.mxu1  ;;  %v1152_v55 = vsel %vm1142_vm1, %v1113_v52, 0.0 }
 0x150   : > { %v1004_v56 = vpop.f32.mrf.mxu0  ;;  %v1065_v59 = vadd.f32 %v6120_v5, %v1064_v54  ;;  %1153 = vadd.xlane.f32.xlu2 %v1152_v55 }
 0x151   : > { %v1005_v61 = vadd.f32 %v6120_v5, %v1004_v56 }
 0x152   : > { %v1102_v62 = vmax.f32 %v1065_v59, 0.0 }
 0x153   : > { %1043 = vmatmul.bf16.gmra.mxu0 %v895_v58  ;;  %v1078_v9 = vmax.f32 %v1005_v61, 0.0 }
 0x154   : > { %v1138_v4 = vmul.f32 %v6127_v10, %v1102_v62 }
 0x155   : > { %v1114_v20 = vmul.f32 %v6127_v10, %v1078_v9 }
 0x156   : > { %v1227_v24 = vsel %vm1142_vm1, %v1138_v4, 0.0 }
 0x157   : > { %v1066_v13 = vpop.f32.mrf.mxu1  ;;  %1228 = vadd.xlane.f32.xlu0 %v1227_v24  ;;  %v1155_v27 = vsel %vm1142_vm1, %v1114_v20, 0.0 }
 0x158   : > { %v1006_v14 = vpop.f32.mrf.mxu0  ;;  %v1067_v35 = vadd.f32 %v6120_v5, %v1066_v13 }
 0x159   : > { %v1007_v16 = vadd.f32 %v6120_v5, %v1006_v14 }
 0x15a   : > { %v1103_v19 = vmax.f32 %v1067_v35, 0.0 }
 0x15b   : > { %v1079_v23 = vmax.f32 %v1007_v16, 0.0 }
 0x15c   : > { %v1139_v3 = vmul.f32 %v6127_v10, %v1103_v19 }
 0x15d   : > { %v1115_v25 = vmul.f32 %v6127_v10, %v1079_v23 }
 0x15e   : > { %v1230_v28 = vsel %vm1142_vm1, %v1139_v3, 0.0 }
 0x15f   : > { %1156 = vadd.xlane.f32.xlu0 %v1155_v27  ;;  %v1158_v30 = vsel %vm1142_vm1, %v1115_v25, 0.0  ;;  %1231 = vadd.xlane.f32.xlu1 %v1230_v28  ;;  %v6174_v31 = vpop.f32.mrf.mxu1 }
 0x160   : > { %v1009_v32 = vpop.f32.mrf.mxu0  ;;  %1159 = vadd.xlane.f32.xlu2 %v1158_v30 }
 0x161   : > { %v1010_v33 = vadd.f32 %v6120_v5, %v1009_v32 }
 0x163   : > { %v1080_v39 = vmax.f32 %v1010_v33, 0.0  ;;  %1048 = vmatmul.bf16.gmra.mxu0 %v899_v37 }
 0x165   : > { %v1116_v42 = vmul.f32 %v6127_v10, %v1080_v39 }
 0x167   : > { %v1161_v43 = vsel %vm1142_vm1, %v1116_v42, 0.0  ;;  %v6183_v44 = vpop.f32.mrf.mxu1 }
 0x168   : > { %v1011_v45 = vpop.f32.mrf.mxu0  ;;  %1162 = vadd.xlane.f32.xlu2 %v1161_v43 }
 0x169   : > { %v1012_v47 = vadd.f32 %v6120_v5, %v1011_v45 }
 0x16b   : > { %v1081_v49 = vmax.f32 %v1012_v47, 0.0 }
 0x16d   : > { %v1117_v48 = vmul.f32 %v6127_v10, %v1081_v49 }
 0x16f   : > { %v1164_v50 = vsel %vm1142_vm1, %v1117_v48, 0.0  ;;  %v6188_v51 = vpop.f32.mrf.mxu1 }
 0x170   : > { %v1014_v52 = vpop.f32.mrf.mxu0  ;;  %1165 = vadd.xlane.f32.xlu0 %v1164_v50 }
 0x171   : > { %v1015_v54 = vadd.f32 %v6120_v5, %v1014_v52 }
 0x173   : > { %v1082_v55 = vmax.f32 %v1015_v54, 0.0  ;;  %1053 = vmatmul.bf16.gmra.mxu0 %v903_v53 }
 0x175   : > { %v1118_v56 = vmul.f32 %v6127_v10, %v1082_v55 }
 0x177   : > { %v1167_v59 = vsel %vm1142_vm1, %v1118_v56, 0.0  ;;  %v2198_v61 = vpop.f32.mrf.mxu1 }
 0x178   : > { %v1016_v62 = vpop.f32.mrf.mxu0  ;;  %1168 = vadd.xlane.f32.xlu1 %v1167_v59  ;;  %v2199_v58 = vadd.f32 %v6120_v5, %v2198_v61 }
 0x179   : > { %v1017_v63 = vadd.f32 %v6120_v5, %v1016_v62 }
 0x17a   : > { %v2207_v0 = vmax.f32 %v2199_v58, 0.0 }
 0x17b   : > { %v1083_v1 = vmax.f32 %v1017_v63, 0.0 }
 0x17c   : > { %v2211_v2 = vmul.f32 %v6127_v10, %v2207_v0 }
 0x17d   : > { %v1119_v60 = vmul.f32 %v6127_v10, %v1083_v1 }
 0x17e   : > { %v2217_v4 = vsel %vm1142_vm1, %v2211_v2, 0.0 }
 0x17f   : > { %v1170_v26 = vsel %vm1142_vm1, %v1119_v60, 0.0  ;;  %2218 = vadd.xlane.f32.xlu0 %v2217_v4  ;;  %v6243_v4 = vld [vmem:[#allocation2] ss:$0 sm:$0xff] }
 0x180   : > { %v1019_v6 = vpop.f32.mrf.mxu0  ;;  %1171 = vadd.xlane.f32.xlu2 %v1170_v26 }
 0x181   : > { %v1020_v7 = vadd.f32 %v6120_v5, %v1019_v6 }
 0x183   : > { %v1084_v8 = vmax.f32 %v1020_v7, 0.0 }
 0x185   : > { %v1120_v9 = vmul.f32 %v6127_v10, %v1084_v8 }
 0x187   : > { %v1173_v24 = vsel %vm1142_vm1, %v1120_v9, 0.0 }
 0x188   : > { %v1021_v11 = vpop.f32.mrf.mxu0  ;;  %1174 = vadd.xlane.f32.xlu1 %v1173_v24 }
 0x189   : > { %v1022_v12 = vadd.f32 %v6120_v5, %v1021_v11 }
 0x18b   : > { %v1085_v13 = vmax.f32 %v1022_v12, 0.0 }
 0x18d   : > { %v1121_v14 = vmul.f32 %v6127_v10, %v1085_v13  ;;  %v5771_v13 = vmov 0  }
 0x18e   : > { %5357 = vset.pattern.permute.xlu2 %v5771_v13  ;;  %5358 = vset.pattern.permute.xlu0 %v5771_v13 }
 0x18f   : > { %v1176_v35 = vsel %vm1142_vm1, %v1121_v14, 0.0  ;;  %5359 = vset.pattern.permute.xlu1 %v5771_v13 }
 0x190   : > { %v1024_v15 = vpop.f32.mrf.mxu0  ;;  %1177 = vadd.xlane.f32.xlu2 %v1176_v35 }
 0x191   : > { %v1025_v16 = vadd.f32 %v6120_v5, %v1024_v15 }
 0x193   : > { %v1086_v17 = vmax.f32 %v1025_v16, 0.0 }
 0x195   : > { %v1122_v18 = vmul.f32 %v6127_v10, %v1086_v17 }
 0x197   : > { %v1179_v19 = vsel %vm1142_vm1, %v1122_v18, 0.0 }
 0x198   : > { %v1026_v20 = vpop.f32.mrf.mxu0  ;;  %1180 = vadd.xlane.f32.xlu0 %v1179_v19 }
 0x199   : > { %v1027_v21 = vadd.f32 %v6120_v5, %v1026_v20 }
 0x19b   : > { %v1087_v22 = vmax.f32 %v1027_v21, 0.0 }
 0x19d   : > { %v1123_v23 = vmul.f32 %v6127_v10, %v1087_v22 }
 0x19f   : > { %v1182_v3 = vsel %vm1142_vm1, %v1123_v23, 0.0 }
 0x1a0   : > { %v1029_v25 = vpop.f32.mrf.mxu0  ;;  %1183 = vadd.xlane.f32.xlu1 %v1182_v3 }
 0x1a1   : > { %v1030_v27 = vadd.f32 %v6120_v5, %v1029_v25 }
 0x1a3   : > { %v1088_v28 = vmax.f32 %v1030_v27, 0.0 }
 0x1a5   : > { %v1124_v29 = vmul.f32 %v6127_v10, %v1088_v28 }
 0x1a7   : > { %v1185_v30 = vsel %vm1142_vm1, %v1124_v29, 0.0 }
 0x1a8   : > { %v1031_v32 = vpop.f32.mrf.mxu0  ;;  %1186 = vadd.xlane.f32.xlu0 %v1185_v30 }
 0x1a9   : > { %v1032_v33 = vadd.f32 %v6120_v5, %v1031_v32 }
 0x1ab   : > { %v1089_v34 = vmax.f32 %v1032_v33, 0.0  ;;  %v6251_v19 = vpop.xlane.xlu1 %1144 }
 0x1ac   : > { %v6224_v46 = vpop.xlane.xlu0 %1222 }
 0x1ad   : > { %v1125_v36 = vmul.f32 %v6127_v10, %v1089_v34 }
 0x1af   : > { %v1188_v37 = vsel %vm1142_vm1, %v1125_v36, 0.0 }
 0x1b0   : > { %v1034_v39 = vpop.f32.mrf.mxu0  ;;  %1189 = vadd.xlane.f32.xlu1 %v1188_v37 }
 0x1b1   : > { %v1035_v40 = vadd.f32 %v6120_v5, %v1034_v39 }
 0x1b3   : > { %v1090_v41 = vmax.f32 %v1035_v40, 0.0  ;;  %v6221_v43 = vpop.xlane.xlu2 %1147 }
 0x1b5   : > { %v1126_v42 = vmul.f32 %v6127_v10, %v1090_v41 }
 0x1b7   : > { %v1191_v45 = vsel %vm1142_vm1, %v1126_v42, 0.0 }
 0x1b8   : > { %v1036_v57 = vpop.f32.mrf.mxu0  ;;  %1192 = vadd.xlane.f32.xlu2 %v1191_v45 }
 0x1b9   : > { %v1037_v47 = vadd.f32 %v6120_v5, %v1036_v57 }
 0x1bb   : > { %v1091_v49 = vmax.f32 %v1037_v47, 0.0  ;;  %v6229_v52 = vpop.xlane.xlu2 %1225  ;;  %v6232_v54 = vpop.xlane.xlu0 %1150 }
 0x1bd   : > { %v1127_v38 = vmul.f32 %v6127_v10, %v1091_v49 }
 0x1bf   : > { %v1194_v48 = vsel %vm1142_vm1, %v1127_v38, 0.0 }
 0x1c0   : > { %v1039_v50 = vpop.f32.mrf.mxu0  ;;  %1195 = vadd.xlane.f32.xlu1 %v1194_v48 }
 0x1c1   : > { %v1040_v53 = vadd.f32 %v6120_v5, %v1039_v50 }
 0x1c3   : > { %v1092_v55 = vmax.f32 %v1040_v53, 0.0  ;;  %v6239_v63 = vpop.xlane.xlu2 %1153 }
 0x1c5   : > { %v1128_v56 = vmul.f32 %v6127_v10, %v1092_v55 }
 0x1c7   : > { %v1197_v59 = vsel %vm1142_vm1, %v1128_v56, 0.0 }
 0x1c8   : > { %v1041_v61 = vpop.f32.mrf.mxu0  ;;  %1198 = vadd.xlane.f32.xlu0 %v1197_v59 }
 0x1c9   : > { %v1042_v62 = vadd.f32 %v6120_v5, %v1041_v61 }
 0x1ca   : > { %v6237_v58 = vpop.xlane.xlu0 %1228 }
 0x1cb   : > { %v1093_v0 = vmax.f32 %v1042_v62, 0.0 }
 0x1cd   : > { %v1129_v1 = vmul.f32 %v6127_v10, %v1093_v0 }
 0x1cf   : > { %v1200_v2 = vsel %vm1142_vm1, %v1129_v1, 0.0 }
 0x1d0   : > { %v1044_v60 = vpop.f32.mrf.mxu0  ;;  %1201 = vadd.xlane.f32.xlu1 %v1200_v2 }
 0x1d1   : > { %v1045_v26 = vadd.f32 %v6120_v5, %v1044_v60 }
 0x1d2   : > { %v1157_v6 = vpop.xlane.xlu0 %1156  ;;  %v6259_v36 = vpop.xlane.xlu1 %1231 }
 0x1d3   : > { %v1094_v7 = vmax.f32 %v1045_v26, 0.0  ;;  %v1247_v8 = vadd.f32 %v6243_v4, %v1157_v6  ;;  %v1160_v9 = vpop.xlane.xlu2 %1159 }
 0x1d4   : > { %v1248_v24 = vadd.f32 %v6243_v4, %v1160_v9 }
 0x1d5   : > { %v1279_v11 = vsub.f32 0.0, %v1247_v8  ;;  %v1130_v12 = vmul.f32 %v6127_v10, %v1094_v7 }
 0x1d6   : > { %v1280_v14 = vsub.f32 0.0, %v1248_v24 }
 0x1d7   : > { %v1315_v35 = vmul.f32 1.442695, %v1279_v11  ;;  %v1203_v15 = vsel %vm1142_vm1, %v1130_v12, 0.0 }
 0x1d8   : > { %v1317_v16 = vmul.f32 1.442695, %v1280_v14  ;;  %v1046_v17 = vpop.f32.mrf.mxu0  ;;  %1204 = vadd.xlane.f32.xlu2 %v1203_v15 }
 0x1d9   : > { %5364 = vpow2.f32 %v1315_v35  ;;  %v1047_v18 = vadd.f32 %v6120_v5, %v1046_v17 }
 0x1da   : > { %5366 = vpow2.f32 %v1317_v16 }
 0x1db   : > { %v1095_v20 = vmax.f32 %v1047_v18, 0.0  ;;  %v1163_v21 = vpop.xlane.xlu2 %1162 }
 0x1dc   : > { %v1249_v22 = vadd.f32 %v6243_v4, %v1163_v21 }
 0x1dd   : > { %v1131_v23 = vmul.f32 %v6127_v10, %v1095_v20 }
 0x1de   : > { %v1281_v3 = vsub.f32 0.0, %v1249_v22 }
 0x1df   : > { %v5365_v25 = vpop.eup %5364  ;;  %v1206_v27 = vsel %vm1142_vm1, %v1131_v23, 0.0 }
 0x1e0   : > { %v1375_v28 = vadd.f32 1.0, %v5365_v25  ;;  %v1319_v29 = vmul.f32 1.442695, %v1281_v3  ;;  %v1049_v30 = vpop.f32.mrf.mxu0  ;;  %1207 = vadd.xlane.f32.xlu1 %v1206_v27  ;;  %v5367_v32 = vpop.eup %5366 }
 0x1e1   : > { %v1050_v33 = vadd.f32 %v6120_v5, %v1049_v30  ;;  %v6257_v34 = vadd.f32 1.0, %v5367_v32 }
 0x1e2   : > { %5368 = vrcp.f32 %v1375_v28  ;;  %v1472_v1 = vand.u32 2147483647, %v1375_v28  ;;  %v1474_v2 = vand.u32 2147483648, %v1375_v28  ;;  %vm1468_vm3 = vweird.f32 %v1375_v28 }
 0x1e3   : > { %5370 = vpow2.f32 %v1319_v29  ;;  %v1096_v37 = vmax.f32 %v1050_v33, 0.0  ;;  %v1166_v39 = vpop.xlane.xlu0 %1165  ;;  %v1489_v27 = vand.u32 2147483648, %v6257_v34  ;;  %vm1483_vm7 = vweird.f32 %v6257_v34 }
 0x1e4   : > { %5372 = vrcp.f32 %v6257_v34  ;;  %v1250_v40 = vadd.f32 %v6243_v4, %v1166_v39  ;;  %v1475_v13 = vor.u32 1.1754944e-38, %v1474_v2  ;;  %vm1473_vm5 = vcmp.eq.f32.partialorder %v1472_v1, 8.507059e+37 }
 0x1e5   : > { %v1132_v41 = vmul.f32 %v6127_v10, %v1096_v37  ;;  %v1487_v29 = vand.u32 2147483647, %v6257_v34 }
 0x1e6   : > { %v1282_v42 = vsub.f32 0.0, %v1250_v40 }
 0x1e7   : > { %v1209_v45 = vsel %vm1142_vm1, %v1132_v41, 0.0  ;;  %vm1488_vm9 = vcmp.eq.f32.partialorder %v1487_v29, 8.507059e+37 }
 0x1e8   : > { %v5369_v57 = vpop.eup %5368  ;;  %v1321_v47 = vmul.f32 1.442695, %v1282_v42  ;;  %v1051_v49 = vpop.f32.mrf.mxu0  ;;  %1210 = vadd.xlane.f32.xlu0 %v1209_v45  ;;  %v1490_v42 = vor.u32 1.1754944e-38, %v1489_v27 }
 0x1e9   : > { %v5371_v38 = vpop.eup %5370  ;;  %v1052_v48 = vadd.f32 %v6120_v5, %v1051_v49  ;;  %v1464_v50 = vmul.f32 %v5369_v57, %v1375_v28  ;;  %vm1469_vm2 = vweird.f32 %v5369_v57 }
 0x1ea   : > { %v6266_v53 = vpop.eup %5372  ;;  %v6268_v55 = vadd.f32 1.0, %v5371_v38  ;;  %5374 = vpow2.f32 %v1321_v47  ;;  %vm1470_vm4 = vmor %vm1468_vm3, %vm1469_vm2 }
 0x1eb   : > { %v1097_v56 = vmax.f32 %v1052_v48, 0.0  ;;  %v1169_v59 = vpop.xlane.xlu1 %1168  ;;  %v1465_v61 = vsub.f32 1.0, %v1464_v50  ;;  %v1479_v62 = vmul.f32 %v6266_v53, %v6257_v34  ;;  %vm1484_vm6 = vweird.f32 %v6266_v53 }
 0x1ec   : > { %5376 = vrcp.f32 %v6268_v55  ;;  %v1251_v0 = vadd.f32 %v6243_v4, %v1169_v59  ;;  %vm1485_vm8 = vmor %vm1483_vm7, %vm1484_vm6  ;;  %v1504_v38 = vand.u32 2147483648, %v6268_v55  ;;  %vm1498_vm11 = vweird.f32 %v6268_v55 }
 0x1ed   : > { %v1133_v60 = vmul.f32 %v6127_v10, %v1097_v56  ;;  %v1466_v26 = vmul.f32 %v5369_v57, %v1465_v61  ;;  %v1480_v6 = vsub.f32 1.0, %v1479_v62 }
 0x1ee   : > { %v1283_v7 = vsub.f32 0.0, %v1251_v0  ;;  %v1505_v2 = vor.u32 1.1754944e-38, %v1504_v38 }
 0x1ef   : > { %v1212_v8 = vsel %vm1142_vm1, %v1133_v60, 0.0  ;;  %v1467_v9 = vadd.f32 %v5369_v57, %v1466_v26  ;;  %v1481_v14 = vmul.f32 %v6266_v53, %v1480_v6 }
 0x1f0   : > { %v5375_v24 = vpop.eup %5374  ;;  %v1323_v11 = vmul.f32 1.442695, %v1283_v7  ;;  %v1054_v12 = vpop.f32.mrf.mxu0  ;;  %1213 = vadd.xlane.f32.xlu1 %v1212_v8 }
 0x1f1   : > { %v6277_v35 = vadd.f32 1.0, %v5375_v24  ;;  %v1055_v15 = vadd.f32 %v6120_v5, %v1054_v12  ;;  %v1471_v16 = vsel %vm1470_vm4, %v5369_v57, %v1467_v9  ;;  %v1482_v23 = vadd.f32 %v6266_v53, %v1481_v14 }
 0x1f2   : > { %v5377_v17 = vpop.eup %5376  ;;  %5378 = vpow2.f32 %v1323_v11  ;;  %v1476_v18 = vsel %vm1473_vm5, %v1475_v13, %v1471_v16  ;;  %v6301_v1 = vpop.xlane.xlu0 %2218 }
 0x1f3   : > { %v1098_v20 = vmax.f32 %v1055_v15, 0.0  ;;  %v1172_v21 = vpop.xlane.xlu2 %1171  ;;  %1937 = vperm.xlu2 %5357, %v1476_v18   ;;  %5380 = vrcp.f32 %v6277_v35  ;;  %v1494_v3 = vmul.f32 %v5377_v17, %v6268_v55  ;;  %v1486_v39 = vsel %vm1485_vm8, %v6266_v53, %v1482_v23 }
 0x1f4   : > { %v1252_v22 = vadd.f32 %v6243_v4, %v1172_v21  ;;  %v1491_v47 = vsel %vm1488_vm9, %v1490_v42, %v1486_v39  ;;  %vm1499_vm10 = vweird.f32 %v5377_v17  ;;  %v1502_v53 = vand.u32 2147483647, %v6268_v55 }
 0x1f5   : > { %v1134_v25 = vmul.f32 %v6127_v10, %v1098_v20  ;;  %v1495_v30 = vsub.f32 1.0, %v1494_v3  ;;  %vm1500_vm12 = vmor %vm1498_vm11, %vm1499_vm10  ;;  %vm1513_vm5 = vweird.f32 %v6277_v35 }
 0x1f6   : > { %v1284_v28 = vsub.f32 0.0, %v1252_v22  ;;  %vm1503_vm13 = vcmp.eq.f32.partialorder %v1502_v53, 8.507059e+37 }
 0x1f7   : > { %v1215_v32 = vsel %vm1142_vm1, %v1134_v25, 0.0  ;;  %v1496_v40 = vmul.f32 %v5377_v17, %v1495_v30 }
 0x1f8   : > { %v5379_v33 = vpop.eup %5378  ;;  %v1325_v37 = vmul.f32 1.442695, %v1284_v28  ;;  %1216 = vadd.xlane.f32.xlu1 %v1215_v32  ;;  %v1517_v28 = vand.u32 2147483647, %v6277_v35  ;;  %v1056_v29 = vpop.f32.mrf.mxu0 }
 0x1f9   : > { %v1379_v41 = vadd.f32 1.0, %v5379_v33  ;;  %v6291_v45 = vpop.eup %5380  ;;  %v1497_v49 = vadd.f32 %v5377_v17, %v1496_v40 }
 0x1fa   : > { %5382 = vpow2.f32 %v1325_v37  ;;  %v1509_v48 = vmul.f32 %v6291_v45, %v6277_v35  ;;  %vm1514_vm3 = vweird.f32 %v6291_v45  ;;  %vm1518_vm8 = vcmp.eq.f32.partialorder %v1517_v28, 8.507059e+37 }
 0x1fb   : > { %5384 = vrcp.f32 %v1379_v41  ;;  %v1175_v57 = vpop.xlane.xlu1 %1174  ;;  %v1501_v61 = vsel %vm1500_vm12, %v5377_v17, %v1497_v49  ;;  %v1534_v9 = vand.u32 2147483648, %v1379_v41  ;;  %v1532_v13 = vand.u32 2147483647, %v1379_v41  ;;  %vm1515_vm6 = vmor %vm1513_vm5, %vm1514_vm3 }
 0x1fc   : > { %v1253_v34 = vadd.f32 %v6243_v4, %v1175_v57  ;;  %1942 = vperm.xlu0 %5358, %v1491_v47   ;;  %v1510_v60 = vsub.f32 1.0, %v1509_v48  ;;  %v1506_v7 = vsel %vm1503_vm13, %v1505_v2, %v1501_v61  ;;  %vm1528_vm15 = vweird.f32 %v1379_v41 }
 0x1fd   : > { %v1519_v17 = vand.u32 2147483648, %v6277_v35  ;;  %v1535_v21 = vor.u32 1.1754944e-38, %v1534_v9  ;;  %vm1533_vm4 = vcmp.eq.f32.partialorder %v1532_v13, 8.507059e+37  ;;  %v1057_v57 = vadd.f32 %v6120_v5, %v1056_v29 }
 0x1fe   : > { %v1285_v50 = vsub.f32 0.0, %v1253_v34  ;;  %v1511_v24 = vmul.f32 %v6291_v45, %v1510_v60 }
 0x1ff   : > { %v1520_v37 = vor.u32 1.1754944e-38, %v1519_v17  ;;  %v1099_v53 = vmax.f32 %v1057_v57, 0.0 }
 0x200   : > { %v5383_v56 = vpop.eup %5382  ;;  %v1327_v59 = vmul.f32 1.442695, %v1285_v50  ;;  %v1512_v22 = vadd.f32 %v6291_v45, %v1511_v24 }
 0x201   : > { %v5385_v62 = vpop.eup %5384  ;;  %v6299_v0 = vadd.f32 1.0, %v5383_v56 }
 0x202   : > { %5386 = vpow2.f32 %v1327_v59  ;;  %v1524_v26 = vmul.f32 %v5385_v62, %v1379_v41  ;;  %vm1529_vm14 = vweird.f32 %v5385_v62  ;;  %v1516_v33 = vsel %vm1515_vm6, %v6291_v45, %v1512_v22 }
 0x203   : > { %5388 = vrcp.f32 %v6299_v0  ;;  %v1178_v6 = vpop.xlane.xlu2 %1177  ;;  %vm1530_vm2 = vmor %vm1528_vm15, %vm1529_vm14  ;;  %v1549_v39 = vand.u32 2147483648, %v6299_v0  ;;  %v1547_v42 = vand.u32 2147483647, %v6299_v0  ;;  %v1521_v34 = vsel %vm1518_vm8, %v1520_v37, %v1516_v33 }
 0x204   : > { %v1254_v55 = vadd.f32 %v6243_v4, %v1178_v6  ;;  %1947 = vperm.xlu0 %5358, %v1506_v7   ;;  %v1525_v8 = vsub.f32 1.0, %v1524_v26  ;;  %vm1543_vm9 = vweird.f32 %v6299_v0  ;;  %v1135_v7 = vmul.f32 %v6127_v10, %v1099_v53 }
 0x205   : > { %v1550_v45 = vor.u32 1.1754944e-38, %v1549_v39  ;;  %vm1548_vm11 = vcmp.eq.f32.partialorder %v1547_v42, 8.507059e+37 }
 0x206   : > { %v1286_v11 = vsub.f32 0.0, %v1254_v55  ;;  %v1526_v12 = vmul.f32 %v5385_v62, %v1525_v8 }
 0x208   : > { %v5387_v14 = vpop.eup %5386  ;;  %v1329_v15 = vmul.f32 1.442695, %v1286_v11  ;;  %v1527_v16 = vadd.f32 %v5385_v62, %v1526_v12 }
 0x209   : > { %v5389_v18 = vpop.eup %5388  ;;  %v6307_v20 = vadd.f32 1.0, %v5387_v14  ;;  %v1218_v14 = vsel %vm1142_vm1, %v1135_v7, 0.0 }
 0x20a   : > { %5390 = vpow2.f32 %v1329_v15  ;;  %v1531_v23 = vsel %vm1530_vm2, %v5385_v62, %v1527_v16  ;;  %v1539_v3 = vmul.f32 %v5389_v18, %v6299_v0  ;;  %vm1544_vm7 = vweird.f32 %v5389_v18 }
 0x20b   : > { %5392 = vrcp.f32 %v6307_v20  ;;  %v1181_v25 = vpop.xlane.xlu0 %1180  ;;  %v1536_v27 = vsel %vm1533_vm4, %v1535_v21, %v1531_v23  ;;  %vm1545_vm10 = vmor %vm1543_vm9, %vm1544_vm7  ;;  %v1564_v0 = vand.u32 2147483648, %v6307_v20  ;;  %v1562_v6 = vand.u32 2147483647, %v6307_v20 }
 0x20c   : > { %v1255_v30 = vadd.f32 %v6243_v4, %v1181_v25  ;;  %1957 = vperm.xlu0 %5358, %v1536_v27   ;;  %v1540_v32 = vsub.f32 1.0, %v1539_v3  ;;  %vm1558_vm13 = vweird.f32 %v6307_v20 }
 0x20d   : > { %v1565_v11 = vor.u32 1.1754944e-38, %v1564_v0  ;;  %vm1563_vm15 = vcmp.eq.f32.partialorder %v1562_v6, 8.507059e+37 }
 0x20e   : > { %v1287_v40 = vsub.f32 0.0, %v1255_v30  ;;  %v1541_v41 = vmul.f32 %v5389_v18, %v1540_v32 }
 0x210   : > { %v5391_v35 = vpop.eup %5390  ;;  %v1331_v47 = vmul.f32 1.442695, %v1287_v40  ;;  %v1542_v49 = vadd.f32 %v5389_v18, %v1541_v41 }
 0x211   : > { %v5393_v38 = vpop.eup %5392  ;;  %1952 = vperm.xlu1 %5359, %v1521_v34   ;;  %v6322_v56 = vadd.f32 1.0, %v5391_v35 }
 0x212   : > { %5394 = vpow2.f32 %v1331_v47  ;;  %v1546_v48 = vsel %vm1545_vm10, %v5389_v18, %v1542_v49  ;;  %v1554_v50 = vmul.f32 %v5393_v38, %v6307_v20  ;;  %vm1559_vm12 = vweird.f32 %v5393_v38 }
 0x213   : > { %v1184_v59 = vpop.xlane.xlu1 %1183  ;;  %v1551_v61 = vsel %vm1548_vm11, %v1550_v45, %v1546_v48  ;;  %5396 = vrcp.f32 %v6322_v56  ;;  %vm1560_vm14 = vmor %vm1558_vm13, %vm1559_vm12  ;;  %vm1573_vm6 = vweird.f32 %v6322_v56  ;;  %v1579_v53 = vand.u32 2147483648, %v6322_v56 }
 0x214   : > { %v1256_v62 = vadd.f32 %v6243_v4, %v1184_v59  ;;  %1962 = vperm.xlu0 %5358, %v1551_v61   ;;  %v1555_v2 = vsub.f32 1.0, %v1554_v50  ;;  %v1577_v50 = vand.u32 2147483647, %v6322_v56 }
 0x216   : > { %v1288_v60 = vsub.f32 0.0, %v1256_v62  ;;  %v1556_v26 = vmul.f32 %v5393_v38, %v1555_v2  ;;  %vm1578_vm13 = vcmp.eq.f32.partialorder %v1577_v50, 8.507059e+37  ;;  %v1245_v2 = vadd.f32 %v6243_v4, %v6232_v54 }
 0x218   : > { %v5395_v55 = vpop.eup %5394  ;;  %v1333_v8 = vmul.f32 1.442695, %v1288_v60  ;;  %v1557_v9 = vadd.f32 %v5393_v38, %v1556_v26 }
 0x219   : > { %v1383_v24 = vadd.f32 1.0, %v5395_v55  ;;  %v6331_v15 = vpop.eup %5396 }
 0x21a   : > { %5398 = vpow2.f32 %v1333_v8  ;;  %v1561_v12 = vsel %vm1560_vm14, %v5393_v38, %v1557_v9  ;;  %v1569_v16 = vmul.f32 %v6331_v15, %v6322_v56  ;;  %vm1574_vm7 = vweird.f32 %v6331_v15 }
 0x21b   : > { %5400 = vrcp.f32 %v1383_v24  ;;  %v1566_v13 = vsel %vm1563_vm15, %v1565_v11, %v1561_v12  ;;  %v1594_v25 = vand.u32 2147483648, %v1383_v24  ;;  %v1187_v27 = vpop.xlane.xlu0 %1186  ;;  %v1592_v30 = vand.u32 2147483647, %v1383_v24  ;;  %vm6344_vm9 = vmor %vm1573_vm6, %vm1574_vm7 }
 0x21c   : > { %1967 = vperm.xlu1 %5359, %v1566_v13   ;;  %1219 = vadd.xlane.f32.xlu2 %v1218_v14  ;;  %v1570_v3 = vsub.f32 1.0, %v1569_v16  ;;  %vm1588_vm3 = vweird.f32 %v1383_v24  ;;  %v1257_v40 = vadd.f32 %v6243_v4, %v1187_v27  ;;  %v1580_v8 = vor.u32 1.1754944e-38, %v1579_v53 }
 0x21d   : > { %v1595_v41 = vor.u32 1.1754944e-38, %v1594_v25  ;;  %vm1593_vm5 = vcmp.eq.f32.partialorder %v1592_v30, 8.507059e+37  ;;  %v1243_v12 = vadd.f32 %v6243_v4, %v6251_v19 }
 0x21e   : > { %v1571_v37 = vmul.f32 %v6331_v15, %v1570_v3  ;;  %v1289_v45 = vsub.f32 0.0, %v1257_v40 }
 0x21f   : > { %v1275_v14 = vsub.f32 0.0, %v1243_v12 }
 0x220   : > { %v5399_v10 = vpop.eup %5398  ;;  %v1572_v38 = vadd.f32 %v6331_v15, %v1571_v37  ;;  %v1335_v7 = vmul.f32 1.442695, %v1289_v45 }
 0x221   : > { %v5401_v17 = vpop.eup %5400  ;;  %v1384_v18 = vadd.f32 1.0, %v5399_v10  ;;  %v1072_v10 = vadd.f32 %v6120_v5, %v6183_v44 }
 0x222   : > { %v1584_v20 = vmul.f32 %v5401_v17, %v1383_v24  ;;  %vm1589_vm2 = vweird.f32 %v5401_v17  ;;  %v1576_v6 = vsel %vm6344_vm9, %v6331_v15, %v1572_v38 }
 0x223   : > { %5402 = vrcp.f32 %v1384_v18  ;;  %v1190_v21 = vpop.xlane.xlu1 %1189  ;;  %vm1590_vm4 = vmor %vm1588_vm3, %vm1589_vm2  ;;  %v1609_v48 = vand.u32 2147483648, %v1384_v18  ;;  %v1607_v62 = vand.u32 2147483647, %v1384_v18  ;;  %vm1603_vm10 = vweird.f32 %v1384_v18 }
 0x224   : > { %v1258_v22 = vadd.f32 %v6243_v4, %v1190_v21  ;;  %v1585_v23 = vsub.f32 1.0, %v1584_v20  ;;  %v1581_v11 = vsel %vm1578_vm13, %v1580_v8, %v1576_v6  ;;  %v1307_v20 = vmul.f32 1.442695, %v1275_v14  ;;  %v5509_v14 = vld [vmem:[%s8562_s5] ss:$0 sm:$0xff] }
 0x225   : > { %v1610_v56 = vor.u32 1.1754944e-38, %v1609_v48  ;;  %vm1608_vm12 = vcmp.eq.f32.partialorder %v1607_v62, 8.507059e+37 }
 0x226   : > { %v1290_v28 = vsub.f32 0.0, %v1258_v22  ;;  %v1586_v29 = vmul.f32 %v5401_v17, %v1585_v23  ;;  %v1105_v22 = vmax.f32 %v1072_v10, 0.0  ;;  %v1244_v23 = vadd.f32 %v6243_v4, %v6221_v43 }
 0x228   : > { %v1337_v32 = vmul.f32 1.442695, %v1290_v28  ;;  %v1587_v33 = vadd.f32 %v5401_v17, %v1586_v29  ;;  %v1276_v44 = vsub.f32 0.0, %v1244_v23 }
 0x229   : > { %v5403_v39 = vpop.eup %5402 }
 0x22a   : > { %5404 = vpow2.f32 %v1337_v32  ;;  %v1591_v42 = vsel %vm1590_vm4, %v5401_v17, %v1587_v33  ;;  %v1599_v57 = vmul.f32 %v5403_v39, %v1384_v18  ;;  %vm1604_vm8 = vweird.f32 %v5403_v39  ;;  %v6362_v32 = vld [vmem:[%s8563_s6] ss:$0 sm:$0xff] }
 0x22b   : > { %v1193_v35 = vpop.xlane.xlu2 %1192  ;;  %v1596_v47 = vsel %vm1593_vm5, %v1595_v41, %v1591_v42  ;;  %vm1605_vm11 = vmor %vm1603_vm10, %vm1604_vm8  ;;  %v1141_v43 = vmul.f32 %v6362_v32, %v1105_v22 }
 0x22c   : > { %v1259_v34 = vadd.f32 %v6243_v4, %v1193_v35  ;;  %1977 = vperm.xlu0 %5358, %v1596_v47   ;;  %v1600_v49 = vsub.f32 1.0, %v1599_v57 }
 0x22d   : > { %v1236_v35 = vsel %vm1142_vm1, %v1141_v43, 0.0 }
 0x22e   : > { %v1291_v59 = vsub.f32 0.0, %v1259_v34  ;;  %v1601_v61 = vmul.f32 %v5403_v39, %v1600_v49  ;;  %v1309_v49 = vmul.f32 1.442695, %v1276_v44 }
 0x230   : > { %v5405_v0 = vpop.eup %5404  ;;  %v1339_v60 = vmul.f32 1.442695, %v1291_v59  ;;  %v1602_v26 = vadd.f32 %v5403_v39, %v1601_v61 }
 0x231   : > { %v1386_v55 = vadd.f32 1.0, %v5405_v0 }
 0x232   : > { %5406 = vpow2.f32 %v1339_v60  ;;  %v1606_v9 = vsel %vm1605_vm11, %v5403_v39, %v1602_v26 }
 0x233   : > { %5408 = vrcp.f32 %v1386_v55  ;;  %v1611_v24 = vsel %vm1608_vm12, %v1610_v56, %v1606_v9  ;;  %v1639_v19 = vand.u32 2147483648, %v1386_v55  ;;  %v1637_v27 = vand.u32 2147483647, %v1386_v55  ;;  %v1196_v28 = vpop.xlane.xlu1 %1195 }
 0x234   : > { %1982 = vperm.xlu0 %5358, %v1611_v24   ;;  %1972 = vperm.xlu2 %5357, %v1581_v11   ;;  %5410 = vpow2.f32 %v1335_v7  ;;  %vm1633_vm15 = vweird.f32 %v1386_v55  ;;  %v1260_v40 = vadd.f32 %v6243_v4, %v1196_v28  ;;  %v1277_v9 = vsub.f32 0.0, %v1245_v2 }
 0x235   : > { %v1640_v30 = vor.u32 1.1754944e-38, %v1639_v19  ;;  %vm1638_vm3 = vcmp.eq.f32.partialorder %v1637_v27, 8.507059e+37 }
 0x236   : > { %v1292_v48 = vsub.f32 0.0, %v1260_v40  ;;  %v1311_v10 = vmul.f32 1.442695, %v1277_v9 }
 0x238   : > { %v5407_v13 = vpop.eup %5406  ;;  %v1341_v60 = vmul.f32 1.442695, %v1292_v48 }
 0x239   : > { %v5409_v15 = vpop.eup %5408  ;;  %v1387_v16 = vadd.f32 1.0, %v5407_v13 }
 0x23a   : > { %v1629_v17 = vmul.f32 %v5409_v15, %v1386_v55  ;;  %v5411_v18 = vpop.eup %5410  ;;  %vm1634_vm14 = vweird.f32 %v5409_v15 }
 0x23b   : > { %5412 = vrcp.f32 %v1387_v16  ;;  %v6357_v3 = vadd.f32 1.0, %v5411_v18  ;;  %vm1635_vm2 = vmor %vm1633_vm15, %vm1634_vm14  ;;  %v1199_v33 = vpop.xlane.xlu0 %1198  ;;  %v1654_v47 = vand.u32 2147483648, %v1387_v16  ;;  %v1652_v45 = vand.u32 2147483647, %v1387_v16 }
 0x23c   : > { %v1630_v21 = vsub.f32 1.0, %v1629_v17  ;;  %5414 = vpow2.f32 %v1307_v20  ;;  %v1261_v57 = vadd.f32 %v6243_v4, %v1199_v33  ;;  %vm1648_vm5 = vweird.f32 %v1387_v16 }
 0x23d   : > { %5416 = vrcp.f32 %v6357_v3  ;;  %v1655_v62 = vor.u32 1.1754944e-38, %v1654_v47  ;;  %vm1653_vm7 = vcmp.eq.f32.partialorder %v1652_v45, 8.507059e+37  ;;  %v1624_v33 = vand.u32 2147483648, %v6357_v3  ;;  %v5244_v47 = vld [vmem:[%s8631_s30 + $0xb0] sm:$0xff] }
 0x23e   : > { %v1631_v25 = vmul.f32 %v5409_v15, %v1630_v21  ;;  %v1293_v61 = vsub.f32 0.0, %v1261_v57  ;;  %5418 = vpow2.f32 %v1309_v49  ;;  %vm1618_vm9 = vweird.f32 %v6357_v3 }
 0x23f   : > { %v1622_v40 = vand.u32 2147483647, %v6357_v3  ;;  %v1625_v48 = vor.u32 1.1754944e-38, %v1624_v33 }
 0x240   : > { %v1632_v29 = vadd.f32 %v5409_v15, %v1631_v25  ;;  %v1343_v8 = vmul.f32 1.442695, %v1293_v61  ;;  %v2197_v25 = vadd.f32 %v5509_v14, %v6188_v51  ;;  %v1246_v51 = vadd.f32 %v6243_v4, %v6239_v63  ;;  %v5243_v61 = vld [vmem:[%s8631_s30 + $0xa8] sm:$0xff] }
 0x241   : > { %v5413_v5 = vpop.eup %5412  ;;  %vm1623_vm11 = vcmp.eq.f32.partialorder %v1622_v40, 8.507059e+37 }
 0x242   : > { %v1636_v37 = vsel %vm1635_vm2, %v5409_v15, %v1632_v29  ;;  %v1644_v39 = vmul.f32 %v5413_v5, %v1387_v16  ;;  %v5415_v34 = vpop.eup %5414  ;;  %vm1649_vm4 = vweird.f32 %v5413_v5  ;;  %v1070_v15 = vadd.f32 %v5509_v14, %v6174_v31  ;;  %v5245_v29 = vld [vmem:[%s8631_s30 + $0xb8] sm:$0xff] }
 0x243   : > { %v1641_v41 = vsel %vm1638_vm3, %v1640_v30, %v1636_v37  ;;  %v6369_v50 = vpop.eup %5416  ;;  %v6371_v59 = vadd.f32 1.0, %v5415_v34  ;;  %vm1650_vm6 = vmor %vm1648_vm5, %vm1649_vm4  ;;  %v1202_v26 = vpop.xlane.xlu1 %1201  ;;  %5275 = vmatpush.bf16.msra.mxu3 %v5245_v29 }
 0x244   : > { %1992 = vperm.xlu0 %5358, %v1641_v41   ;;  %v1645_v42 = vsub.f32 1.0, %v1644_v39  ;;  %v1614_v55 = vmul.f32 %v6369_v50, %v6357_v3  ;;  %v5419_v54 = vpop.eup %5418  ;;  %v1262_v13 = vadd.f32 %v6243_v4, %v1202_v26  ;;  %v1104_v19 = vmax.f32 %v1070_v15, 0.0 }
 0x245   : > { %5420 = vrcp.f32 %v6371_v59  ;;  %v6384_v16 = vadd.f32 1.0, %v5419_v54  ;;  %vm1619_vm8 = vweird.f32 %v6369_v50  ;;  %v2206_v41 = vmax.f32 %v2197_v25, 0.0 }
 0x246   : > { %1237 = vadd.xlane.f32.xlu1 %v1236_v35  ;;  %v1646_v38 = vmul.f32 %v5413_v5, %v1645_v42  ;;  %5422 = vpow2.f32 %v1341_v60  ;;  %v1615_v11 = vsub.f32 1.0, %v1614_v55  ;;  %v1294_v23 = vsub.f32 0.0, %v1262_v13  ;;  %vm6412_vm10 = vmor %vm1618_vm9, %vm1619_vm8 }
 0x247   : > { %5424 = vpow2.f32 %v1343_v8  ;;  %v1140_v3 = vmul.f32 %v6362_v32, %v1104_v19  ;;  %5276 = vmatpush.bf16.msra.mxu3 %v5244_v47  ;;  %v1414_v2 = vand.u32 2147483648, %v6371_v59  ;;  %v1429_v60 = vand.u32 2147483648, %v6384_v16  ;;  %v5511_v19 = vld [vmem:[%s6053_s25 + $0x20] sm:$0xff] }
 0x248   : > { %v1647_v53 = vadd.f32 %v5413_v5, %v1646_v38  ;;  %v1616_v18 = vmul.f32 %v6369_v50, %v1615_v11  ;;  %v1345_v37 = vmul.f32 1.442695, %v1294_v23  ;;  %v6426_v38 = vadd.f32 %v6243_v4, %v6224_v46  ;;  %v5510_v23 = vld [vmem:[%s5939_s28 + $0x20] sm:$0xff] }
 0x249   : > { %v6441_v55 = vsel %vm1142_vm1, %v1140_v3, 0.0  ;;  %vm1408_vm12 = vweird.f32 %v6371_v59  ;;  %v6456_v13 = vor.u32 1.1754944e-38, %v1414_v2  ;;  %v1887_v25 = vsub.f32 %v5511_v19, %v5510_v23 }
 0x24a   : > { %v1651_v0 = vsel %vm1650_vm6, %v5413_v5, %v1647_v53  ;;  %v1617_v31 = vadd.f32 %v6369_v50, %v1616_v18  ;;  %v5520_v18 = vld [vmem:[%s6053_s25 + $0x38] sm:$0xff] }
 0x24b   : > { %v1205_v6 = vpop.xlane.xlu2 %1204  ;;  %v1656_v7 = vsel %vm1653_vm7, %v1655_v62, %v1651_v0  ;;  %v6387_v20 = vpop.eup %5420  ;;  %5277 = vmatpush.bf16.msra.mxu3 %v5243_v61 }
 0x24c   : > { %v1263_v56 = vadd.f32 %v6243_v4, %v1205_v6  ;;  %1997 = vperm.xlu2 %5357, %v1656_v7   ;;  %v5423_v22 = vpop.eup %5422  ;;  %v1404_v5 = vmul.f32 %v6387_v20, %v6371_v59  ;;  %v1621_v35 = vsel %vm6412_vm10, %v6369_v50, %v1617_v31  ;;  %v1278_v50 = vsub.f32 0.0, %v1246_v51 }
 0x24d   : > { %v5425_v28 = vpop.eup %5424  ;;  %v6401_v30 = vadd.f32 1.0, %v5423_v22  ;;  %v1626_v46 = vsel %vm1623_vm11, %v1625_v48, %v1621_v35  ;;  %vm1409_vm13 = vweird.f32 %v6387_v20  ;;  %v2338_v48 = vlaneseq }
 0x24e   : > { %v1295_v24 = vsub.f32 0.0, %v1263_v56  ;;  %v6408_v42 = vadd.f32 1.0, %v5425_v28  ;;  %v1405_v34 = vsub.f32 1.0, %v1404_v5  ;;  %v6444_v56 = vmul.f32 %v6362_v32, %v2206_v41  ;;  %vm6481_vm15 = vmor %vm1408_vm12, %vm1409_vm13 }
 0x24f   : > { %v1313_v9 = vmul.f32 1.442695, %v1278_v50  ;;  %vm1663_vm6 = vweird.f32 %v6401_v30 }
 0x250   : > { %v1347_v12 = vmul.f32 1.442695, %v1295_v24  ;;  %v1406_v0 = vmul.f32 %v6387_v20, %v1405_v34  ;;  %vm1678_vm13 = vweird.f32 %v6408_v42 }
 0x252   : > { %5426 = vpow2.f32 %v1347_v12 }
 0x253   : > { %v1208_v17 = vpop.xlane.xlu1 %1207  ;;  %5428 = vpow2.f32 %v1311_v10  ;;  %v5242_v10 = vld [vmem:[%s8631_s30 + $0xa0] sm:$0xff]  ;;  %v1938_v29 = vpop.permute.xlu2 %1937 }
 0x254   : > { %v1264_v21 = vadd.f32 %v6243_v4, %v1208_v17  ;;  %5430 = vrcp.f32 %v6384_v16  ;;  %v6463_v17 = vadd.f32 %v6387_v20, %v1406_v0  ;;  %5278 = vmatpush.bf16.msra.mxu3 %v5242_v10  ;;  %v2079_v35 = vmul.f32 %v1938_v29, %v1887_v25  ;;  %v5512_v0 = vld [vmem:[%s5939_s28 + $0x28] sm:$0xff] }
 0x255   : > { %v6519_v25 = vshrl.u32 %v2338_v48, 7 }
 0x256   : > { %v1296_v27 = vsub.f32 0.0, %v1264_v21  ;;  %v6466_v21 = vor.u32 1.1754944e-38, %v1429_v60  ;;  %v5513_v60 = vld [vmem:[%s6053_s25 + $0x28] sm:$0xff] }
 0x257   : > { %vm2879_vm10 = vcmp.lt.s32.totalorder %v6519_v25, 1 }
 0x258   : > { %v5427_v44 = vpop.eup %5426  ;;  %v1349_v43 = vmul.f32 1.442695, %v1296_v27 }
 0x259   : > { %v6404_v39 = vadd.f32 1.0, %v5427_v44  ;;  %v5429_v49 = vpop.eup %5428 }
 0x25a   : > { %5432 = vpow2.f32 %v1349_v43  ;;  %v6430_v53 = vpop.eup %5430  ;;  %v6473_v31 = vadd.f32 1.0, %v5429_v49  ;;  %v6498_v49 = vadd.f32 %v6243_v4, %v6237_v58 }
 0x25b   : > { %5434 = vrcp.f32 %v6404_v39  ;;  %v1211_v57 = vpop.xlane.xlu0 %1210  ;;  %v1419_v11 = vmul.f32 %v6430_v53, %v6384_v16  ;;  %v1714_v5 = vand.u32 2147483648, %v6404_v39  ;;  %v1712_v33 = vand.u32 2147483647, %v6404_v39 }
 0x25c   : > { %5436 = vrcp.f32 %v6401_v30  ;;  %v1265_v45 = vadd.f32 %v6243_v4, %v1211_v57  ;;  %vm1708_vm2 = vweird.f32 %v6404_v39  ;;  %v2349_v57 = vadd.s32 80, %v6519_v25 }
 0x25d   : > { %5438 = vpow2.f32 %v1345_v37  ;;  %v1420_v44 = vsub.f32 1.0, %v1419_v11  ;;  %vm1713_vm4 = vcmp.eq.f32.partialorder %v1712_v33, 8.507059e+37  ;;  %v2346_v33 = vadd.s32 56, %v6519_v25  ;;  %v5522_v11 = vld [vmem:[%s6053_s25 + $0x48] sm:$0xff] }
 0x25e   : > { %5440 = vrcp.f32 %v6408_v42  ;;  %v1297_v62 = vsub.f32 0.0, %v1265_v45  ;;  %v1715_v45 = vor.u32 1.1754944e-38, %v1714_v5  ;;  %v1684_v5 = vand.u32 2147483648, %v6408_v42 }
 0x25f   : > { %1987 = vperm.xlu1 %5359, %v1626_v46   ;;  %v6501_v50 = vmul.f32 %v6430_v53, %v1420_v44 }
 0x260   : > { %v5433_v26 = vpop.eup %5432  ;;  %v1351_v7 = vmul.f32 1.442695, %v1297_v62 }
 0x261   : > { %v5435_v8 = vpop.eup %5434  ;;  %v6446_v24 = vadd.f32 1.0, %v5433_v26  ;;  %v1888_v26 = vsub.f32 %v5513_v60, %v5512_v0 }
 0x262   : > { %v6451_v54 = vpop.eup %5436  ;;  %v1704_v12 = vmul.f32 %v5435_v8, %v6404_v39  ;;  %vm1709_vm14 = vweird.f32 %v5435_v8 }
 0x263   : > { %v5439_v14 = vpop.eup %5438  ;;  %5442 = vrcp.f32 %v6446_v24  ;;  %v1214_v15 = vpop.xlane.xlu1 %1213  ;;  %v1659_v63 = vmul.f32 %v6451_v54, %v6401_v30  ;;  %vm1710_vm3 = vmor %vm1708_vm2, %vm1709_vm14  ;;  %vm1723_vm7 = vweird.f32 %v6446_v24  ;;  %vm1664_vm12 = vweird.f32 %v6451_v54 }
 0x264   : > { %v6468_v22 = vpop.eup %5440  ;;  %5444 = vpow2.f32 %v1351_v7  ;;  %v1266_v27 = vadd.f32 %v6243_v4, %v1214_v15  ;;  %v1705_v28 = vsub.f32 1.0, %v1704_v12  ;;  %v6485_v40 = vadd.f32 1.0, %v5439_v14 }
 0x265   : > { %5446 = vpow2.f32 %v1313_v9  ;;  %v1674_v41 = vmul.f32 %v6468_v22, %v6408_v42  ;;  %v1660_v4 = vsub.f32 1.0, %v1659_v63  ;;  %v6509_v7 = vadd.f32 %v5510_v23, %v2079_v35 }
 0x266   : > { %v1298_v51 = vsub.f32 0.0, %v1266_v27  ;;  %v1706_v43 = vmul.f32 %v5435_v8, %v1705_v28  ;;  %v1729_v12 = vand.u32 2147483648, %v6446_v24  ;;  %v1682_v14 = vand.u32 2147483647, %v6408_v42 }
 0x267   : > { %v1675_v58 = vsub.f32 1.0, %v1674_v41  ;;  %v1669_v15 = vand.u32 2147483648, %v6401_v30  ;;  %v1727_v23 = vand.u32 2147483647, %v6446_v24  ;;  %v1661_v44 = vmul.f32 %v6451_v54, %v1660_v4 }
 0x268   : > { %v1353_v3 = vmul.f32 1.442695, %v1298_v51  ;;  %v1707_v47 = vadd.f32 %v5435_v8, %v1706_v43  ;;  %v8577_v43 = vrot.slane %v6509_v7, 7  ;;  %v1730_v35 = vor.u32 1.1754944e-38, %v1729_v12 }
 0x269   : > { %v5443_v34 = vpop.eup %5442  ;;  %v1676_v29 = vmul.f32 %v6468_v22, %v1675_v58  ;;  %vm1728_vm9 = vcmp.eq.f32.partialorder %v1727_v23, 8.507059e+37  ;;  %vm1679_vm11 = vweird.f32 %v6468_v22  ;;  %vm6562_vm14 = vcmp.eq.f32.partialorder %v1682_v14, 8.507059e+37 }
 0x26a   : > { %v5445_v61 = vpop.eup %5444  ;;  %5448 = vpow2.f32 %v1353_v3  ;;  %v1711_v62 = vsel %vm1710_vm3, %v5435_v8, %v1707_v47  ;;  %v1719_v46 = vmul.f32 %v5443_v34, %v6446_v24  ;;  %vm1724_vm5 = vweird.f32 %v5443_v34  ;;  %v6536_v47 = vld [vmem:[#allocation2] ss:$0 sm:$0xff]  ;;  %vm6573_vm3 = vmor %vm1663_vm6, %vm1664_vm12 }
 0x26b   : > { %v6504_v2 = vpop.eup %5446  ;;  %v1716_v39 = vsel %vm1713_vm4, %v1715_v45, %v1711_v62  ;;  %5450 = vrcp.f32 %v6485_v40  ;;  %v6512_v8 = vadd.f32 1.0, %v5445_v61  ;;  %v1217_v27 = vpop.xlane.xlu1 %1216  ;;  %vm1725_vm8 = vmor %vm1723_vm7, %vm1724_vm5  ;;  %v5515_v62 = vld [vmem:[%s5939_s28 + $0x30] sm:$0xff]  ;;  %v1677_v60 = vadd.f32 %v6468_v22, %v1676_v29 }
 0x26c   : > { %2017 = vperm.xlu2 %5357, %v1716_v39   ;;  %v1720_v9 = vsub.f32 1.0, %v1719_v46  ;;  %v1267_v45 = vadd.f32 %v6536_v47, %v1217_v27  ;;  %v5516_v46 = vld [vmem:[%s6053_s25 + $0x30] sm:$0xff]  ;;  %v1685_v27 = vor.u32 1.1754944e-38, %v1684_v5  ;;  %vm3096_vm2 = vcmp.lt.s32.totalorder %v6519_v25, 7  ;;  %vm6581_vm4 = vmor %vm1678_vm13, %vm1679_vm11 }
 0x26d   : > { %5452 = vrcp.f32 %v6512_v8  ;;  %v1889_v39 = vsub.f32 %v5516_v46, %v5515_v62  ;;  %v2347_v42 = vadd.s32 64, %v6519_v25  ;;  %v8576_v14 = vrot.slane %v6509_v7, 1  ;;  %v5521_v5 = vld [vmem:[%s5939_s28 + $0x48] sm:$0xff] }
 0x26e   : > { %v1943_v10 = vpop.permute.xlu0 %1942  ;;  %1234 = vadd.xlane.f32.xlu0 %v6441_v55  ;;  %v1721_v19 = vmul.f32 %v5443_v34, %v1720_v9  ;;  %v1299_v9 = vsub.f32 0.0, %v1267_v45  ;;  %v1892_v45 = vsub.f32 %v5522_v11, %v5521_v5 }
 0x26f   : > { %v2080_v28 = vmul.f32 %v1943_v10, %v1888_v26  ;;  %v2428_v26 = vand.u32 15, %v2346_v33 }
 0x270   : > { %v5449_v51 = vpop.eup %5448  ;;  %v1722_v55 = vadd.f32 %v5443_v34, %v1721_v19 }
 0x271   : > { %v6529_v41 = vadd.f32 1.0, %v5449_v51  ;;  %v6531_v63 = vadd.f32 %v5512_v0, %v2080_v28  ;;  %v6534_v3 = vpop.eup %5450  ;;  %v6546_v0 = vadd.f32 %v6451_v54, %v1661_v44  ;;  %v3283_v44 = vpack.c.bf16 %v6509_v7, %v6509_v7 }
 0x272   : > { %v1726_v24 = vsel %vm1725_vm8, %v5443_v34, %v1722_v55  ;;  %v6549_v34 = vor.u32 1.1754944e-38, %v1669_v15  ;;  %v1689_v58 = vmul.f32 %v6534_v3, %v6485_v40  ;;  %vm6600_vm5 = vcmp.eq.s32.totalorder %v2428_v26, 15 }
 0x273   : > { %5454 = vrcp.f32 %v6529_v41  ;;  %v2850_v48 = vrot.slane %v6531_v63, 7  ;;  %v1731_v61 = vsel %vm1728_vm9, %v1730_v35, %v1726_v24  ;;  %v3067_v12 = vrot.slane %v6531_v63, 1  ;;  %v6566_v19 = vpop.eup %5452 }
 0x274   : > { %2022 = vperm.xlu2 %5357, %v1731_v61   ;;  %v3284_v51 = vpack.c.bf16 %v6531_v63, %v6531_v63  ;;  %v1681_v35 = vsel %vm6581_vm4, %v6468_v22, %v1677_v60  ;;  %v1690_v24 = vsub.f32 1.0, %v1689_v58  ;;  %v1355_v61 = vmul.f32 1.442695, %v1299_v9  ;;  %v5517_v58 = vld [vmem:[%s5939_s28 + $0x40] sm:$0xff] }
 0x275   : > { %v6558_v4 = vsel %vm2879_vm10, %v8577_v43, %v2850_v48  ;;  %v3125_v46 = vsel %vm3096_vm2, %v8576_v14, %v3067_v12  ;;  %v2348_v60 = vadd.s32 72, %v6519_v25  ;;  %v2435_v26 = vand.u32 15, %v2347_v42  ;;  %v5518_v9 = vld [vmem:[%s6053_s25 + $0x40] sm:$0xff] }
 0x276   : > { %v1948_v10 = vpop.permute.xlu0 %1947  ;;  %v6619_v14 = vunpack.c.l.b16 %v3284_v51  ;;  %v3319_v6 = vpack.c.bf16 %v3125_v46, %v3125_v46  ;;  %v6629_v15 = vunpack.c.l.b16 %v3283_v44  ;;  %5456 = vpow2.f32 %v1355_v61  ;;  %v5519_v44 = vld [vmem:[%s5939_s28 + $0x38] sm:$0xff] }
 0x277   : > { %v2081_v23 = vmul.f32 %v1948_v10, %v1889_v39  ;;  %v1891_v10 = vsub.f32 %v5518_v9, %v5517_v58  ;;  %v6635_v46 = vmul.f32 %v6534_v3, %v1690_v24  ;;  %vm6637_vm6 = vcmp.eq.s32.totalorder %v2435_v26, 0 }
 0x278   : > { %8644 = vst [vmem:[#allocation19_spill] sm:$0xff] %v6629_v15  ;;  %v1890_v61 = vsub.f32 %v5520_v18, %v5519_v44  ;;  %v1742_v24 = vand.u32 2147483647, %v6512_v8  ;;  %v1759_v18 = vand.u32 2147483648, %v6529_v41  ;;  %vm1753_vm9 = vweird.f32 %v6529_v41 }
 0x279   : > { %v6593_v55 = vpop.eup %5454  ;;  %v6595_v33 = vadd.f32 %v5515_v62, %v2081_v23  ;;  %v1734_v62 = vmul.f32 %v6566_v19, %v6512_v8  ;;  %v1686_v23 = vsel %vm6562_vm14, %v1685_v27, %v1681_v35  ;;  %vm1739_vm13 = vweird.f32 %v6566_v19 }
 0x27a   : > { %v1749_v63 = vmul.f32 %v6593_v55, %v6529_v41  ;;  %vm1754_vm7 = vweird.f32 %v6593_v55  ;;  %vm1738_vm14 = vweird.f32 %v6512_v8  ;;  %vm6719_vm4 = vcmp.eq.f32.partialorder %v1742_v24, 8.507059e+37 }
 0x27b   : > { %v8578_v39 = vrot.slane %v6595_v33, 7  ;;  %v8579_v22 = vrot.slane %v6595_v33, 1  ;;  %vm6669_vm11 = vmor %vm1753_vm9, %vm1754_vm7 }
 0x27c   : > { %v1750_v29 = vsub.f32 1.0, %v1749_v63  ;;  %v1735_v63 = vsub.f32 1.0, %v1734_v62  ;;  %v3607_v62 = vunpack.c.l.b16 %v3319_v6  ;;  %v3285_v6 = vpack.c.bf16 %v6595_v33, %v6595_v33  ;;  %vm6750_vm7 = vmor %vm1738_vm14, %vm1739_vm13 }
 0x27d   : > { %v3124_v43 = vsel %vm3096_vm2, %v3067_v12, %v8579_v22  ;;  %v2907_v42 = vsel %vm2879_vm10, %v2850_v48, %v8578_v39  ;;  %v2442_v12 = vand.u32 15, %v2348_v60  ;;  %v1757_v60 = vand.u32 2147483647, %v6529_v41 }
 0x27e   : > { %v1958_v27 = vpop.permute.xlu0 %1957  ;;  %v3212_v51 = vsel %vm6600_vm5, 0.0, %v3124_v43  ;;  %v1751_v35 = vmul.f32 %v6593_v55, %v1750_v29  ;;  %v1736_v11 = vmul.f32 %v6566_v19, %v1735_v63  ;;  %v2996_v63 = vsel %vm6637_vm6, 0.0, %v2907_v42 }
 0x27f   : > { %v3320_v9 = vpack.c.bf16 %v3212_v51, %v3212_v51  ;;  %v2083_v48 = vmul.f32 %v1958_v27, %v1891_v10  ;;  %vm6657_vm8 = vcmp.eq.s32.totalorder %v2442_v12, 15  ;;  %vm6673_vm12 = vcmp.eq.f32.partialorder %v1757_v60, 8.507059e+37 }
 0x280   : > { %v1752_v26 = vadd.f32 %v6593_v55, %v1751_v35  ;;  %v5457_v35 = vpop.eup %5456  ;;  %v6687_v60 = vadd.f32 %v6566_v19, %v1736_v11  ;;  %v3483_v39 = vunpack.c.l.b16 %v3285_v6  ;;  %v3249_v22 = vpack.c.bf16 %v2996_v63, %v2996_v63 }
 0x281   : > { %v3608_v29 = vunpack.c.l.b16 %v3320_v9  ;;  %v6662_v9 = vadd.f32 %v5517_v58, %v2083_v48  ;;  %v5524_v58 = vld [vmem:[%s6053_s25 + $0x50] sm:$0xff]  ;;  %v6690_v32 = vadd.f32 1.0, %v5457_v35  ;;  %v8654_v6 = vrot.slane %v6595_v33, 1 }
 0x282   : > { %2007 = vperm.xlu0 %5358, %v1686_v23   ;;  %v1760_v23 = vor.u32 1.1754944e-38, %v1759_v18  ;;  %v2449_v18 = vand.u32 15, %v2349_v57  ;;  %v8655_v35 = vrot.slane %v6595_v33, 7  ;;  %v6724_v51 = vunpack.c.l.b16 %v3249_v22 }
 0x283   : > { %v1953_v10 = vpop.permute.xlu1 %1952  ;;  %v6653_v27 = vpack.c.b16 %v3608_v29, %v3607_v62  ;;  %v5523_v29 = vld [vmem:[%s5939_s28 + $0x50] sm:$0xff]  ;;  %5458 = vrcp.f32 %v6690_v32  ;;  %v8672_v37 = vrot.slane %v6662_v9, 1 }
 0x284   : > { %v2082_v43 = vmul.f32 %v1953_v10, %v1890_v61  ;;  %v1893_v48 = vsub.f32 %v5524_v58, %v5523_v29  ;;  %v6680_v61 = vadd.s32 88, %v6519_v25  ;;  %v1756_v10 = vsel %vm6669_vm11, %v6593_v55, %v1752_v26 }
 0x285   : > { %8647 = vst [vmem:[#allocation20_spill] sm:$0xff] %v6653_v27  ;;  %5039 = vmatmul.msk.bf16.vlgmr.msra.gmra.mxu3 %vm852_vm0, %v6653_v27  ;;  %v8583_v27 = vrot.slane %v6662_v9, 1  ;;  %v1761_v55 = vsel %vm6673_vm12, %v1760_v23, %v1756_v10  ;;  %v3287_v26 = vpack.c.bf16 %v6662_v9, %v6662_v9  ;;  %vm2817_vm5 = vcmp.eq.s32.totalorder %v2449_v18, 0 }
 0x286   : > { %v2114_v41 = vadd.f32 %v5519_v44, %v2082_v43  ;;  %v1963_v42 = vpop.permute.xlu0 %1962  ;;  %vm1424_vm12 = vweird.f32 %v6430_v53 }
 0x287   : > { %v2084_v58 = vmul.f32 %v1963_v42, %v1892_v45 }
 0x288   : > { %v2852_v15 = vrot.slane %v2114_v41, 7  ;;  %v3069_v44 = vrot.slane %v2114_v41, 1  ;;  %v3286_v43 = vpack.c.bf16 %v2114_v41, %v2114_v41  ;;  %v2853_v41 = vrot.slane %v6662_v9, 7 }
 0x289   : > { %v6694_v62 = vadd.f32 %v5521_v5, %v2084_v58 }
 0x28a   : > { %2032 = vperm.xlu0 %5358, %v1761_v55   ;;  %v3484_v45 = vunpack.c.l.b16 %v3286_v43  ;;  %v3122_v11 = vsel %vm3096_vm2, %v3069_v44, %v8583_v27  ;;  %v3123_v5 = vsel %vm3096_vm2, %v8654_v6, %v3069_v44  ;;  %v2906_v23 = vsel %vm2879_vm10, %v8655_v35, %v2852_v15 }
 0x28b   : > { %v2854_v63 = vrot.slane %v6694_v62, 7  ;;  %v3288_v12 = vpack.c.bf16 %v6694_v62, %v6694_v62  ;;  %v3214_v57 = vsel %vm6657_vm8, 0.0, %v3122_v11  ;;  %v3321_v10 = vpack.c.bf16 %v3123_v5, %v3123_v5 }
 0x28c   : > { %v3515_v42 = vpack.c.b16 %v3484_v45, %v3483_v39  ;;  %v3322_v58 = vpack.c.bf16 %v3214_v57, %v3214_v57  ;;  %v3485_v44 = vunpack.c.l.b16 %v3287_v26  ;;  %v3250_v55 = vpack.c.bf16 %v2906_v23, %v2906_v23 }
 0x28d   : > { %v3486_v43 = vunpack.c.l.b16 %v3288_v12  ;;  %v3609_v35 = vunpack.c.l.b16 %v3321_v10  ;;  %v2904_v39 = vsel %vm2879_vm10, %v2853_v41, %v2854_v63  ;;  %v2905_v26 = vsel %vm2879_vm10, %v2852_v15, %v2853_v41 }
 0x28e   : > { %3537 = vrot.lane.b32.xlu2 %v3515_v42, %s5770_s7  ;;  %v1968_v6 = vpop.permute.xlu1 %1967  ;;  %v3610_v27 = vunpack.c.l.b16 %v3322_v58  ;;  %v6728_v5 = vunpack.c.l.b16 %v3250_v55  ;;  %v8658_v23 = vand.u32 2147483647, %v6371_v59  ;;  %v2456_v12 = vand.u32 15, %v6680_v61  ;;  %v6741_v42 = vpop.eup %5458  ;;  %v5525_v55 = vld [vmem:[%s5939_s28 + $0x58] sm:$0xff] }
 0x28f   : > { %v2085_v45 = vmul.f32 %v1968_v6, %v1893_v48  ;;  %v1220_v11 = vpop.xlane.xlu2 %1219  ;;  %v3516_v24 = vpack.c.b16 %v3486_v43, %v3485_v44  ;;  %v2998_v48 = vsel %vm2817_vm5, 0.0, %v2905_v26  ;;  %v2351_v57 = vadd.s32 96, %v6519_v25  ;;  %v5526_v6 = vld [vmem:[%s6053_s25 + $0x58] sm:$0xff] }
 0x290   : > { %v1268_v18 = vadd.f32 %v6536_v47, %v1220_v11  ;;  %vm6735_vm6 = vcmp.eq.f32.partialorder %v8658_v23, 8.507059e+37  ;;  %v3425_v15 = vpack.c.b16 %v6728_v5, %v6724_v51  ;;  %v3251_v61 = vpack.c.bf16 %v2998_v48, %v2998_v48 }
 0x291   : > { %v6743_v10 = vadd.f32 %v5523_v29, %v2085_v45  ;;  %3539 = vrot.lane.b32.xlu1 %v3516_v24, %s5770_s7  ;;  %v3252_v41 = vpack.c.bf16 %v2904_v39, %v2904_v39  ;;  %v1741_v29 = vsel %vm6750_vm7, %v6566_v19, %v6687_v60  ;;  %v8663_v44 = vand.u32 2147483648, %v6512_v8 }
 0x292   : > { %v1300_v58 = vsub.f32 0.0, %v1268_v18  ;;  %v1894_v45 = vsub.f32 %v5526_v6, %v5525_v55  ;;  %vm1423_vm8 = vweird.f32 %v6384_v16  ;;  %v3071_v11 = vrot.slane %v6694_v62, 1 }
 0x293   : > { %v1745_v43 = vor.u32 1.1754944e-38, %v8663_v44  ;;  %v2855_v24 = vrot.slane %v6743_v10, 7  ;;  %v3072_v39 = vrot.slane %v6743_v10, 1  ;;  %v6768_v26 = vpack.c.b16 %v3610_v27, %v3609_v35 }
 0x294   : > { %v1357_v18 = vmul.f32 1.442695, %v1300_v58  ;;  %v6770_v23 = vunpack.c.l.b16 %v3251_v61  ;;  %v6772_v19 = vunpack.c.l.b16 %v3252_v41  ;;  %v2463_v8 = vand.u32 15, %v2351_v57 }
 0x295   : > { %5040 = vmatmul.msk.bf16.gmra.mxu3 %vm852_vm0, %v6768_v26  ;;  %v1746_v60 = vsel %vm6719_vm4, %v1745_v43, %v1741_v29  ;;  %vm3035_vm9 = vcmp.eq.s32.totalorder %v2456_v12, 15  ;;  %v3120_v62 = vsel %vm3096_vm2, %v3071_v11, %v3072_v39  ;;  %v2903_v27 = vsel %vm2879_vm10, %v2854_v63, %v2855_v24  ;;  %v5528_v43 = vld [vmem:[%s6053_s25 + $0x60] sm:$0xff] }
 0x296   : > { %5460 = vpow2.f32 %v1357_v18  ;;  %2027 = vperm.xlu2 %5357, %v1746_v60   ;;  %v8664_v35 = vand.u32 2147483647, %v6401_v30  ;;  %v3426_v33 = vpack.c.b16 %v6772_v19, %v6770_v23  ;;  %v6791_v12 = vadd.f32 1.0, %v6504_v2 }
 0x297   : > { %5462 = vrcp.f32 %v6473_v31  ;;  %v1973_v48 = vpop.permute.xlu2 %1972  ;;  %v8665_v63 = vsel %vm6573_vm3, %v6451_v54, %v6546_v0  ;;  %v1422_v30 = vadd.f32 %v6430_v53, %v6501_v50  ;;  %v8666_v59 = vand.u32 2147483647, %v6384_v16 }
 0x298   : > { %vm1668_vm11 = vcmp.eq.f32.partialorder %v8664_v35, 8.507059e+37  ;;  %v2086_v2 = vmul.f32 %v1973_v48, %v1894_v45  ;;  %v3216_v41 = vsel %vm3035_vm9, 0.0, %v3120_v62  ;;  %v1764_v28 = vmul.f32 %v6741_v42, %v6690_v32 }
 0x299   : > { %v1671_v57 = vsel %vm1668_vm11, %v6549_v34, %v8665_v63  ;;  %vm6803_vm13 = vcmp.eq.f32.partialorder %v8666_v59, 8.507059e+37  ;;  %vm6809_vm14 = vcmp.eq.s32.totalorder %v2463_v8, 0  ;;  %v1303_v0 = vsub.f32 0.0, %v6498_v49 }
 0x29a   : > { %2002 = vperm.xlu1 %5359, %v1671_v57   ;;  %v8671_v50 = vsel %vm6481_vm15, %v6387_v20, %v6463_v17  ;;  %v1692_v58 = vadd.f32 %v6534_v3, %v6635_v46  ;;  %vm1694_vm3 = vweird.f32 %v6534_v3  ;;  %v6825_v29 = vadd.f32 %v5525_v55, %v2086_v2  ;;  %v5527_v17 = vld [vmem:[%s5939_s28 + $0x60] sm:$0xff]  ;;  %vm6840_vm15 = vmor %vm1423_vm8, %vm1424_vm12 }
 0x29b   : > { %v1416_v34 = vsel %vm6735_vm6, %v6456_v13, %v8671_v50  ;;  %vm1693_vm4 = vweird.f32 %v6485_v40  ;;  %v1699_v44 = vand.u32 2147483648, %v6485_v40  ;;  %v3121_v20 = vsel %vm3096_vm2, %v8672_v37, %v3071_v11 }
 0x29c   : > { %v1895_v22 = vsub.f32 %v5528_v43, %v5527_v17  ;;  %v1697_v13 = vand.u32 2147483647, %v6485_v40  ;;  %v3324_v6 = vpack.c.bf16 %v3216_v41, %v3216_v41  ;;  %v3000_v9 = vsel %vm6809_vm14, 0.0, %v2903_v27  ;;  %v5461_v55 = vpop.eup %5460  ;;  %vm6850_vm5 = vmor %vm1693_vm4, %vm1694_vm3 }
 0x29d   : > { %5464 = vrcp.f32 %v6791_v12  ;;  %v2856_v45 = vrot.slane %v6825_v29, 7  ;;  %v1426_v16 = vsel %vm6840_vm15, %v6430_v53, %v1422_v30  ;;  %v1765_v11 = vsub.f32 1.0, %v1764_v28  ;;  %v6857_v18 = vpop.eup %5462 }
 0x29e   : > { %v6859_v8 = vadd.f32 1.0, %v5461_v55  ;;  %v1696_v60 = vsel %vm6850_vm5, %v6534_v3, %v1692_v58  ;;  %v3323_v62 = vpack.c.bf16 %v3121_v20, %v3121_v20  ;;  %v2352_v27 = vadd.s32 104, %v6519_v25  ;;  %v1978_v35 = vpop.permute.xlu0 %1977  ;;  %1917 = vperm.xlu2 %5357, %v1416_v34   ;;  %v5529_v58 = vld [vmem:[%s5939_s28 + $0x68] sm:$0xff] }
 0x29f   : > { %v1700_v48 = vor.u32 1.1754944e-38, %v1699_v44  ;;  %v2902_v63 = vsel %vm2879_vm10, %v2855_v24, %v2856_v45  ;;  %v3253_v57 = vpack.c.bf16 %v3000_v9, %v3000_v9  ;;  %v2353_v53 = vadd.s32 112, %v6519_v25  ;;  %v5530_v44 = vld [vmem:[%s6053_s25 + $0x68] sm:$0xff] }
 0x2a0   : > { %5466 = vrcp.f32 %v6859_v8  ;;  %v2087_v30 = vmul.f32 %v1978_v35, %v1895_v22  ;;  %vm1698_vm6 = vcmp.eq.f32.partialorder %v1697_v13, 8.507059e+37  ;;  %v3612_v59 = vunpack.c.l.b16 %v3324_v6 }
 0x2a1   : > { %v1701_v3 = vsel %vm1698_vm6, %v1700_v48, %v1696_v60  ;;  %v1431_v2 = vsel %vm6803_vm13, %v6466_v21, %v1426_v16  ;;  %v1766_v41 = vmul.f32 %v6741_v42, %v1765_v11  ;;  %v3254_v28 = vpack.c.bf16 %v2902_v63, %v2902_v63 }
 0x2a2   : > { %v6873_v54 = vadd.f32 %v5527_v17, %v2087_v30  ;;  %2012 = vperm.xlu1 %5359, %v1701_v3   ;;  %v3611_v24 = vunpack.c.l.b16 %v3323_v62  ;;  %vm1768_vm7 = vweird.f32 %v6690_v32  ;;  %v2470_v50 = vand.u32 15, %v2352_v27 }
 0x2a3   : > { %v6876_v34 = vpop.eup %5464  ;;  %v1896_v37 = vsub.f32 %v5530_v44, %v5529_v58  ;;  %v6880_v20 = vunpack.c.l.b16 %v3253_v57  ;;  %v6882_v43 = vunpack.c.l.b16 %v3254_v28  ;;  %v2477_v21 = vand.u32 15, %v2353_v53 }
 0x2a4   : > { %v3073_v61 = vrot.slane %v6825_v29, 1  ;;  %v2857_v17 = vrot.slane %v6873_v54, 7  ;;  %v3074_v22 = vrot.slane %v6873_v54, 1  ;;  %v6887_v13 = vpack.c.b16 %v3612_v59, %v3611_v24 }
 0x2a5   : > { %v1767_v6 = vadd.f32 %v6741_v42, %v1766_v41  ;;  %vm1769_vm8 = vweird.f32 %v6741_v42  ;;  %v1772_v46 = vand.u32 2147483647, %v6690_v32  ;;  %v1774_v40 = vand.u32 2147483648, %v6690_v32 }
 0x2a6   : > { %v5467_v55 = vpop.eup %5466  ;;  %5041 = vmatmul.msk.bf16.gmra.mxu3 %vm852_vm0, %v6887_v13  ;;  %vm6897_vm9 = vcmp.eq.s32.totalorder %v2470_v50, 15  ;;  %v3118_v11 = vsel %vm3096_vm2, %v3073_v61, %v3074_v22  ;;  %v2901_v60 = vsel %vm2879_vm10, %v2856_v45, %v2857_v17  ;;  %v8679_v62 = vsub.f32 0.0, %v6426_v38  ;;  %v1983_v48 = vpop.permute.xlu0 %1982  ;;  %1922 = vperm.xlu2 %5357, %v1431_v2   ;;  %vm6920_vm12 = vmor %vm1768_vm7, %vm1769_vm8 }
 0x2a7   : > { %v6911_v35 = vadd.f32 %v6536_v47, %v6229_v52  ;;  %v1779_v63 = vmul.f32 %v5467_v55, %v6859_v8  ;;  %vm2821_vm11 = vcmp.eq.s32.totalorder %v2477_v21, 0  ;;  %v1363_v57 = vmul.f32 1.442695, %v1303_v0 }
 0x2a8   : > { %v1359_v27 = vmul.f32 1.442695, %v8679_v62  ;;  %v2088_v53 = vmul.f32 %v1983_v48, %v1896_v37  ;;  %v1449_v52 = vmul.f32 %v6876_v34, %v6791_v12  ;;  %v6928_v45 = vmul.f32 %v6857_v18, %v6473_v31  ;;  %v5531_v62 = vld [vmem:[%s5939_s28 + $0x80] sm:$0xff] }
 0x2a9   : > { %v1771_v49 = vsel %vm6920_vm12, %v6741_v42, %v1767_v6  ;;  %vm1773_vm13 = vcmp.eq.f32.partialorder %v1772_v46, 8.507059e+37  ;;  %v1780_v0 = vsub.f32 1.0, %v1779_v63  ;;  %v3218_v32 = vsel %vm6897_vm9, 0.0, %v3118_v11  ;;  %v5532_v48 = vld [vmem:[%s6053_s25 + $0x80] sm:$0xff] }
 0x2aa   : > { %v6935_v30 = vadd.f32 %v5529_v58, %v2088_v53  ;;  %v1775_v59 = vor.u32 1.1754944e-38, %v1774_v40  ;;  %v1789_v3 = vand.u32 2147483648, %v6859_v8  ;;  %v3002_v2 = vsel %vm2821_vm11, 0.0, %v2901_v60  ;;  %v5241_v58 = vld [vmem:[%s8631_s30 + $0x98] sm:$0xff] }
 0x2ab   : > { %v1781_v41 = vmul.f32 %v5467_v55, %v1780_v0  ;;  %vm1784_vm14 = vweird.f32 %v5467_v55  ;;  %v1787_v28 = vand.u32 2147483647, %v6859_v8  ;;  %v3119_v42 = vsel %vm3096_vm2, %v3072_v39, %v3073_v61  ;;  %5267 = vmatpush.bf16.msra.mxu2 %v5241_v58  ;;  %3896 = vmatpush.bf16.msra.mxu1 %v5241_v58 }
 0x2ac   : > { %v2858_v24 = vrot.slane %v6935_v30, 7  ;;  %v1776_v50 = vsel %vm1773_vm13, %v1775_v59, %v1771_v49  ;;  %v3326_v44 = vpack.c.bf16 %v3218_v32, %v3218_v32  ;;  %v1450_v37 = vsub.f32 1.0, %v1449_v52  ;;  %v1998_v52 = vpop.permute.xlu2 %1997 }
 0x2ad   : > { %v1782_v21 = vadd.f32 %v5467_v55, %v1781_v41  ;;  %vm1783_vm3 = vweird.f32 %v6859_v8  ;;  %v3290_v6 = vpack.c.bf16 %v6825_v29, %v6825_v29  ;;  %v3255_v46 = vpack.c.bf16 %v3002_v2, %v3002_v2 }
 0x2ae   : > { %vm6950_vm4 = vmor %vm1783_vm3, %vm1784_vm14  ;;  %v1790_v61 = vor.u32 1.1754944e-38, %v1789_v3  ;;  %v3325_v40 = vpack.c.bf16 %v3119_v42, %v3119_v42  ;;  %v3289_v16 = vpack.c.bf16 %v6743_v10, %v6743_v10  ;;  %v2900_v8 = vsel %vm2879_vm10, %v2857_v17, %v2858_v24  ;;  %2037 = vperm.xlu2 %5357, %v1776_v50  }
 0x2af   : > { %v1786_v29 = vsel %vm6950_vm4, %v5467_v55, %v1782_v21  ;;  %vm1788_vm15 = vcmp.eq.f32.partialorder %v1787_v28, 8.507059e+37  ;;  %v3292_v11 = vpack.c.bf16 %v6935_v30, %v6935_v30  ;;  %v3256_v60 = vpack.c.bf16 %v2900_v8, %v2900_v8  ;;  %v5240_v28 = vld [vmem:[%s8631_s30 + $0x90] sm:$0xff] }
 0x2b0   : > { %v1899_v63 = vsub.f32 %v5532_v48, %v5531_v62  ;;  %v1791_v10 = vsel %vm1788_vm15, %v1790_v61, %v1786_v29  ;;  %v3614_v53 = vunpack.c.l.b16 %v3326_v44  ;;  %v1435_v38 = vsub.f32 1.0, %v6928_v45  ;;  %v5534_v44 = vld [vmem:[%s6053_s25 + $0x78] sm:$0xff]  ;;  %5268 = vmatpush.bf16.msra.mxu2 %v5240_v28  ;;  %3897 = vmatpush.bf16.msra.mxu1 %v5240_v28  ;;  %v5239_v61 = vld [vmem:[%s8631_s30 + $0x88] sm:$0xff]  ;;  %v5238_v48 = vld [vmem:[%s8631_s30 + $0x80] sm:$0xff] }
 0x2b1   : > { %2042 = vperm.xlu1 %5359, %v1791_v10   ;;  %v3488_v17 = vunpack.c.l.b16 %v3290_v6  ;;  %v3291_v49 = vpack.c.bf16 %v6873_v54, %v6873_v54  ;;  %v6969_v55 = vunpack.c.l.b16 %v3255_v46  ;;  %v6971_v0 = vunpack.c.l.b16 %v3256_v60 }
 0x2b2   : > { %5468 = vpow2.f32 %v1359_v27  ;;  %v1302_v32 = vsub.f32 0.0, %v6911_v35  ;;  %v2214_v59 = vsel %vm1142_vm1, %v6444_v56, 0.0  ;;  %v3613_v3 = vunpack.c.l.b16 %v3325_v40  ;;  %v5533_v35 = vld [vmem:[%s5939_s28 + $0x78] sm:$0xff] }
 0x2b3   : > { %v3487_v45 = vunpack.c.l.b16 %v3289_v16  ;;  %v3490_v2 = vunpack.c.l.b16 %v3292_v11  ;;  %v1451_v41 = vmul.f32 %v6876_v34, %v1450_v37  ;;  %5470 = vpow2.f32 %v1363_v57 }
 0x2b4   : > { %v2091_v50 = vmul.f32 %v1998_v52, %v1899_v63  ;;  %v6982_v27 = vpack.c.b16 %v3614_v53, %v3613_v3  ;;  %v1898_v58 = vsub.f32 %v5534_v44, %v5533_v35  ;;  %2215 = vadd.xlane.f32.xlu0 %v2214_v59  ;;  %v3489_v21 = vunpack.c.l.b16 %v3291_v49  ;;  %5269 = vmatpush.bf16.msra.mxu2 %v5239_v61  ;;  %v5539_v59 = vld [vmem:[%s5939_s28 + $0x70] sm:$0xff] }
 0x2b5   : > { %v3517_v56 = vpack.c.b16 %v3488_v17, %v3487_v45  ;;  %v1436_v6 = vmul.f32 %v6857_v18, %v1435_v38  ;;  %v1361_v37 = vmul.f32 1.442695, %v1302_v32  ;;  %v1452_v39 = vadd.f32 %v6876_v34, %v1451_v41  ;;  %3898 = vmatpush.bf16.msra.mxu1 %v5239_v61 }
 0x2b6   : > { %5042 = vmatmul.msk.bf16.gmra.mxu3 %vm852_vm0, %v6982_v27  ;;  %v1993_v46 = vpop.permute.xlu0 %1992  ;;  %v3518_v57 = vpack.c.b16 %v3490_v2, %v3489_v21  ;;  %vm1454_vm5 = vweird.f32 %v6876_v34  ;;  %v6995_v16 = vadd.f32 %v5531_v62, %v2091_v50  ;;  %v1459_v29 = vand.u32 2147483648, %v6791_v12  ;;  %v5535_v21 = vld [vmem:[%s5939_s28 + $0xa0] sm:$0xff] }
 0x2b7   : > { %3541 = vrot.lane.b32.xlu2 %v3517_v56, %s5770_s7  ;;  %v2090_v8 = vmul.f32 %v1993_v46, %v1898_v58  ;;  %vm1453_vm6 = vweird.f32 %v6791_v12  ;;  %v1457_v11 = vand.u32 2147483647, %v6791_v12  ;;  %v1437_v60 = vadd.f32 %v6857_v18, %v1436_v6  ;;  %v5536_v6 = vld [vmem:[%s6053_s25 + $0xa0] sm:$0xff] }
 0x2b8   : > { %v5469_v40 = vpop.eup %5468  ;;  %vm1439_vm7 = vweird.f32 %v6857_v18  ;;  %5472 = vpow2.f32 %v1361_v37  ;;  %vm7010_vm8 = vmor %vm1453_vm6, %vm1454_vm5  ;;  %v1444_v12 = vand.u32 2147483648, %v6473_v31  ;;  %vm1438_vm9 = vweird.f32 %v6473_v31  ;;  %5270 = vmatpush.bf16.msra.mxu2 %v5238_v48 }
 0x2b9   : > { %3543 = vrot.lane.b32.xlu1 %v3518_v57, %s5770_s7  ;;  %v5471_v62 = vpop.eup %5470  ;;  %v7006_v63 = vadd.f32 %v5533_v35, %v2090_v8  ;;  %v7015_v53 = vadd.f32 1.0, %v5469_v40  ;;  %v1456_v38 = vsel %vm7010_vm8, %v6876_v34, %v1452_v39  ;;  %v1442_v52 = vand.u32 2147483647, %v6473_v31  ;;  %vm7026_vm11 = vmor %vm1438_vm9, %vm1439_vm7  ;;  %v5237_v31 = vld [vmem:[%s8631_s30 + $0x78] sm:$0xff]  ;;  %3899 = vmatpush.bf16.msra.mxu1 %v5238_v48  ;;  %v5235_v39 = vld [vmem:[%s8631_s30 + $0x68] sm:$0xff]  ;;  %v7067_v40 = vpop.xlane.xlu1 %1237 }
 0x2ba   : > { %v8586_v17 = vrot.slane %v6995_v16, 7  ;;  %v1460_v32 = vor.u32 1.1754944e-38, %v1459_v29  ;;  %v7030_v3 = vadd.f32 1.0, %v5471_v62  ;;  %vm1458_vm12 = vcmp.eq.f32.partialorder %v1457_v11, 8.507059e+37  ;;  %v5234_v11 = vld [vmem:[%s8631_s30 + $0x60] sm:$0xff]  ;;  %v5538_v48 = vld [vmem:[%s6053_s25 + $0xa8] sm:$0xff] }
 0x2bb   : > { %v2860_v49 = vrot.slane %v7006_v63, 7  ;;  %v1441_v34 = vsel %vm7026_vm11, %v6857_v18, %v1437_v60  ;;  %v2227_v45 = vadd.f32 %v6536_v47, %v6301_v1  ;;  %v1445_v41 = vor.u32 1.1754944e-38, %v1444_v12  ;;  %v5236_v1 = vld [vmem:[%s8631_s30 + $0x70] sm:$0xff] }
 0x2bc   : > { %v1461_v2 = vsel %vm1458_vm12, %v1460_v32, %v1456_v38  ;;  %5474 = vrcp.f32 %v7015_v53  ;;  %vm1443_vm13 = vcmp.eq.f32.partialorder %v1442_v52, 8.507059e+37  ;;  %5271 = vmatpush.bf16.msra.mxu2 %v5237_v31  ;;  %v1903_v37 = vsub.f32 %v5536_v6, %v5535_v21  ;;  %v5537_v60 = vld [vmem:[%s5939_s28 + $0xa8] sm:$0xff] }
 0x2bd   : > { %v7046_v28 = vsel %vm2879_vm10, %v2860_v49, %v8586_v17  ;;  %v1446_v50 = vsel %vm1443_vm13, %v1445_v41, %v1441_v34  ;;  %5476 = vrcp.f32 %v7030_v3  ;;  %v2231_v35 = vsub.f32 0.0, %v2227_v45  ;;  %3900 = vmatpush.bf16.msra.mxu1 %v5237_v31  ;;  %v5540_v34 = vld [vmem:[%s6053_s25 + $0x70] sm:$0xff]  ;;  %v5541_v41 = vld [vmem:[%s8631_s30 + $0xb8] sm:$0xff] }
 0x2be   : > { %v5473_v18 = vpop.eup %5472  ;;  %v1904_v62 = vsub.f32 %v5538_v48, %v5537_v60  ;;  %v1897_v31 = vsub.f32 %v5540_v34, %v5539_v59  ;;  %v2354_v45 = vadd.s32 120, %v6519_v25  ;;  %vm1828_vm14 = vweird.f32 %v7030_v3 }
 0x2bf   : > { %1932 = vperm.xlu2 %5357, %v1461_v2   ;;  %v7053_v44 = vadd.f32 1.0, %v5473_v18  ;;  %v2236_v56 = vmul.f32 1.442695, %v2231_v35  ;;  %v1802_v2 = vand.u32 2147483647, %v7015_v53  ;;  %v1804_v35 = vand.u32 2147483648, %v7015_v53 }
 0x2c0   : > { %5272 = vmatpush.bf16.msra.mxu2 %v5236_v1  ;;  %v1832_v6 = vand.u32 2147483647, %v7030_v3  ;;  %vm1798_vm3 = vweird.f32 %v7015_v53  ;;  %v3295_v19 = vpack.c.bf16 %v6995_v16, %v6995_v16 }
 0x2c1   : > { %1927 = vperm.xlu1 %5359, %v1446_v50   ;;  %3901 = vmatpush.bf16.msra.mxu1 %v5236_v1  ;;  %5478 = vrcp.f32 %v7053_v44  ;;  %vm1803_vm11 = vcmp.eq.f32.partialorder %v1802_v2, 8.507059e+37  ;;  %vm1813_vm13 = vweird.f32 %v7053_v44 }
 0x2c2   : > { %v7055_v58 = vpop.eup %5474  ;;  %5480 = vpow2.f32 %v2236_v56  ;;  %vm1833_vm9 = vcmp.eq.f32.partialorder %v1832_v6, 8.507059e+37  ;;  %v3078_v6 = vrot.slane %v6995_v16, 1 }
 0x2c3   : > { %v7059_v46 = vpop.eup %5476  ;;  %v1794_v61 = vmul.f32 %v7055_v58, %v7015_v53  ;;  %vm1799_vm4 = vweird.f32 %v7055_v58 }
 0x2c4   : > { %5273 = vmatpush.bf16.msra.mxu2 %v5235_v39  ;;  %v1824_v29 = vmul.f32 %v7059_v46, %v7030_v3  ;;  %vm1829_vm5 = vweird.f32 %v7059_v46  ;;  %vm7184_vm8 = vmor %vm1798_vm3, %vm1799_vm4 }
 0x2c5   : > { %3902 = vmatpush.bf16.msra.mxu1 %v5235_v39  ;;  %v1795_v10 = vsub.f32 1.0, %v1794_v61  ;;  %vm7164_vm7 = vmor %vm1828_vm14, %vm1829_vm5 }
 0x2c6   : > { %v2018_v57 = vpop.permute.xlu2 %2017  ;;  %v1825_v52 = vsub.f32 1.0, %v1824_v29  ;;  %v1834_v29 = vand.u32 2147483648, %v7030_v3 }
 0x2c7   : > { %v2095_v8 = vmul.f32 %v2018_v57, %v1903_v37  ;;  %v7076_v12 = vpop.eup %5478  ;;  %v1796_v1 = vmul.f32 %v7055_v58, %v1795_v10  ;;  %v2355_v37 = vadd.s32 128, %v6519_v25  ;;  %v2484_v10 = vand.u32 15, %v2354_v45 }
 0x2c8   : > { %5274 = vmatpush.bf16.msra.mxu2 %v5234_v11  ;;  %v5481_v18 = vpop.eup %5480  ;;  %v7091_v56 = vmul.f32 %v7076_v12, %v7053_v44  ;;  %vm1814_vm14 = vweird.f32 %v7076_v12 }
 0x2c9   : > { %v7078_v38 = vadd.f32 %v5535_v21, %v2095_v8  ;;  %3903 = vmatpush.bf16.msra.mxu1 %v5234_v11  ;;  %v3075_v21 = vrot.slane %v6935_v30, 1  ;;  %v1826_v8 = vmul.f32 %v7059_v46, %v1825_v52  ;;  %v7105_v11 = vadd.f32 1.0, %v5481_v18  ;;  %vm1815_vm3 = vmor %vm1813_vm13, %vm1814_vm14 }
 0x2ca   : > { %vm3039_vm15 = vcmp.eq.s32.totalorder %v2484_v10, 15 }
 0x2cb   : > { %v3299_v61 = vpack.c.bf16 %v7078_v38, %v7078_v38  ;;  %v8584_v48 = vrot.slane %v7078_v38, 7  ;;  %v3117_v45 = vsel %vm3096_vm2, %v3074_v22, %v3075_v21  ;;  %5482 = vrcp.f32 %v7105_v11 }
 0x2cc   : > { %v2270_v5 = vand.u32 2147483647, %v7105_v11 }
 0x2cd   : > { %3989 = vmatpush.bf16.msrb.mxu1 %v5541_v41 }
 0x2ce   : > { %v2023_v32 = vpop.permute.xlu2 %2022 }
 0x2cf   : > { %v2096_v50 = vmul.f32 %v2023_v32, %v1904_v62  ;;  %v8585_v32 = vrot.slane %v7078_v38, 1 }
 0x2d1   : > { %v7097_v57 = vadd.f32 %v5537_v60, %v2096_v50  ;;  %v1988_v39 = vpop.permute.xlu1 %1987  ;;  %v5542_v60 = vld [vmem:[%s8631_s30 + $0xb0] sm:$0xff]  ;;  %v2491_v50 = vand.u32 15, %v2355_v37 }
 0x2d2   : > { %v2089_v62 = vmul.f32 %v1988_v39, %v1897_v31  ;;  %3990 = vmatpush.bf16.msrb.mxu1 %v5542_v60  ;;  %v3294_v31 = vpack.c.bf16 %v7006_v63, %v7006_v63  ;;  %v3497_v39 = vunpack.c.l.b16 %v3299_v61  ;;  %v5543_v61 = vld [vmem:[%s8631_s30 + $0xa8] sm:$0xff] }
 0x2d3   : > { %v2866_v52 = vrot.slane %v7097_v57, 7  ;;  %v3083_v34 = vrot.slane %v7097_v57, 1  ;;  %v3300_v41 = vpack.c.bf16 %v7097_v57, %v7097_v57  ;;  %vm7151_vm6 = vcmp.eq.s32.totalorder %v2491_v50, 0  ;;  %v5544_v50 = vld [vmem:[%s8631_s30 + $0xa0] sm:$0xff] }
 0x2d4   : > { %v7116_v18 = vadd.f32 %v5539_v59, %v2089_v62 }
 0x2d5   : > { %v3498_v60 = vunpack.c.l.b16 %v3300_v41  ;;  %v7130_v42 = vsel %vm3096_vm2, %v8585_v32, %v3083_v34  ;;  %v7138_v54 = vsel %vm2879_vm10, %v8584_v48, %v2866_v52  ;;  %v3327_v41 = vpack.c.bf16 %v3117_v45, %v3117_v45 }
 0x2d6   : > { %v2859_v22 = vrot.slane %v7116_v18, 7  ;;  %v3076_v59 = vrot.slane %v7116_v18, 1  ;;  %v3293_v37 = vpack.c.bf16 %v7116_v18, %v7116_v18  ;;  %3991 = vmatpush.bf16.msrb.mxu1 %v5543_v61  ;;  %v3492_v32 = vunpack.c.l.b16 %v3294_v31 }
 0x2d7   : > { %v3522_v62 = vpack.c.b16 %v3498_v60, %v3497_v39  ;;  %v1827_v18 = vadd.f32 %v7059_v46, %v1826_v8  ;;  %v2356_v61 = vadd.s32 136, %v6519_v25  ;;  %v3615_v30 = vunpack.c.l.b16 %v3327_v41 }
 0x2d8   : > { %v3491_v48 = vunpack.c.l.b16 %v3293_v37  ;;  %v3116_v9 = vsel %vm3096_vm2, %v3075_v21, %v3076_v59  ;;  %v2898_v45 = vsel %vm2879_vm10, %v2859_v22, %v2860_v49  ;;  %v1835_v49 = vor.u32 1.1754944e-38, %v1834_v29 }
 0x2d9   : > { %3551 = vrot.lane.b32.xlu0 %v3522_v62, %s5770_s7  ;;  %v3220_v10 = vsel %vm3039_vm15, 0.0, %v3116_v9  ;;  %v2899_v9 = vsel %vm2879_vm10, %v2858_v24, %v2859_v22  ;;  %v3258_v8 = vpack.c.bf16 %v2898_v45, %v2898_v45  ;;  %v1831_v17 = vsel %vm7164_vm7, %v7059_v46, %v1827_v18 }
 0x2da   : > { %v3519_v31 = vpack.c.b16 %v3492_v32, %v3491_v48  ;;  %v3328_v39 = vpack.c.bf16 %v3220_v10, %v3220_v10  ;;  %3992 = vmatpush.bf16.msrb.mxu1 %v5544_v50  ;;  %v1797_v48 = vadd.f32 %v7055_v58, %v1796_v1  ;;  %v1810_v32 = vsub.f32 1.0, %v7091_v56  ;;  %v7190_v1 = vpop.eup %5482 }
 0x2db   : > { %v3004_v60 = vsel %vm7151_vm6, 0.0, %v2899_v9  ;;  %v7188_v22 = vunpack.c.l.b16 %v3258_v8  ;;  %v3077_v56 = vrot.slane %v7006_v63, 1  ;;  %v2498_v41 = vand.u32 15, %v2356_v61 }
 0x2dc   : > { %3545 = vrot.lane.b32.xlu2 %v3519_v31, %s5770_s7  ;;  %v3616_v37 = vunpack.c.l.b16 %v3328_v39  ;;  %v3257_v29 = vpack.c.bf16 %v3004_v60, %v3004_v60  ;;  %v1801_v45 = vsel %vm7184_vm8, %v7055_v58, %v1797_v48  ;;  %v1805_v46 = vor.u32 1.1754944e-38, %v1804_v35  ;;  %v5562_v58 = vld [vmem:[%s5939_s28 + $0x18] sm:$0xff] }
 0x2dd   : > { %v1811_v3 = vmul.f32 %v7076_v12, %v1810_v32  ;;  %v1836_v63 = vsel %vm1833_vm9, %v1835_v49, %v1831_v17  ;;  %v2262_v18 = vmul.f32 %v7190_v1, %v7105_v11  ;;  %vm3041_vm12 = vcmp.eq.s32.totalorder %v2498_v41, 15 }
 0x2de   : > { %v7198_v62 = vpack.c.b16 %v3616_v37, %v3615_v30  ;;  %v7200_v10 = vunpack.c.l.b16 %v3257_v29  ;;  %v3114_v53 = vsel %vm3096_vm2, %v3077_v56, %v3078_v6  ;;  %v1806_v35 = vsel %vm1803_vm11, %v1805_v46, %v1801_v45 }
 0x2df   : > { %v3115_v31 = vsel %vm3096_vm2, %v3076_v59, %v3077_v56  ;;  %v1812_v21 = vadd.f32 %v7076_v12, %v1811_v3  ;;  %v2263_v9 = vsub.f32 1.0, %v2262_v18  ;;  %v1819_v8 = vand.u32 2147483648, %v7053_v44  ;;  %v5546_v56 = vld [vmem:[%s6053_s25 + $0xb0] sm:$0xff] }
 0x2e0   : > { %8694 = vst [vmem:[#allocation21_spill] sm:$0xff] %v7198_v62  ;;  %5043 = vmatmul.msk.bf16.gmra.mxu3 %vm852_vm0, %v7198_v62  ;;  %v3222_v50 = vsel %vm3041_vm12, 0.0, %v3114_v53  ;;  %v3329_v48 = vpack.c.bf16 %v3115_v31, %v3115_v31  ;;  %vm2266_vm15 = vweird.f32 %v7105_v11  ;;  %vm2267_vm5 = vweird.f32 %v7190_v1 }
 0x2e1   : > { %v1235_v61 = vpop.xlane.xlu0 %1234  ;;  %2057 = vperm.xlu0 %5358, %v1836_v63   ;;  %v1816_v60 = vsel %vm1815_vm3, %v7076_v12, %v1812_v21  ;;  %v3330_v30 = vpack.c.bf16 %v3222_v50, %v3222_v50  ;;  %v2264_v59 = vmul.f32 %v7190_v1, %v2263_v9  ;;  %v2272_v29 = vand.u32 2147483648, %v7105_v11  ;;  %vm2268_vm6 = vmor %vm2266_vm15, %vm2267_vm5 }
 0x2e2   : > { %v1273_v2 = vadd.f32 %v6536_v47, %v1235_v61  ;;  %v1817_v47 = vand.u32 2147483647, %v7053_v44  ;;  %v1820_v44 = vor.u32 1.1754944e-38, %v1819_v8  ;;  %v3617_v24 = vunpack.c.l.b16 %v3329_v48 }
 0x2e3   : > { %v3618_v17 = vunpack.c.l.b16 %v3330_v30  ;;  %v2265_v51 = vadd.f32 %v7190_v1, %v2264_v59  ;;  %v2362_v45 = vadd.s32 184, %v6519_v25  ;;  %v2273_v3 = vor.u32 1.1754944e-38, %v2272_v29  ;;  %v5547_v30 = vld [vmem:[%s5939_s28] sm:$0xff] }
 0x2e4   : > { %v1305_v39 = vsub.f32 0.0, %v1273_v2  ;;  %2047 = vperm.xlu2 %5357, %v1806_v35   ;;  %vm1818_vm4 = vcmp.eq.f32.partialorder %v1817_v47, 8.507059e+37  ;;  %vm2271_vm7 = vcmp.eq.f32.partialorder %v2270_v5, 8.507059e+37  ;;  %v2363_v21 = vadd.s32 192, %v6519_v25  ;;  %v5548_v59 = vld [vmem:[%s6053_s25] sm:$0xff] }
 0x2e5   : > { %v1821_v12 = vsel %vm1818_vm4, %v1820_v44, %v1816_v60  ;;  %v7246_v46 = vpack.c.b16 %v3618_v17, %v3617_v24  ;;  %v2269_v61 = vsel %vm2268_vm6, %v7190_v1, %v2265_v51  ;;  %v2540_v53 = vand.u32 15, %v2362_v45  ;;  %v5549_v24 = vld [vmem:[%s5939_s28 + $0xb8] sm:$0xff] }
 0x2e6   : > { %v1367_v49 = vmul.f32 1.442695, %v1305_v39  ;;  %v2274_v31 = vsel %vm2271_vm7, %v2273_v3, %v2269_v61  ;;  %v2357_v8 = vadd.s32 144, %v6519_v25  ;;  %v2547_v60 = vand.u32 15, %v2363_v21 }
 0x2e7   : > { %8695 = vst [vmem:[#allocation22_spill] sm:$0xff] %v7246_v46  ;;  %vm3047_vm8 = vcmp.eq.s32.totalorder %v2540_v53, 15  ;;  %v1883_v44 = vsub.f32 %v5548_v59, %v5547_v30 }
 0x2e8   : > { %v3538_v32 = vpop.permute.xlu2 %3537  ;;  %5484 = vpow2.f32 %v1367_v49  ;;  %v2505_v17 = vand.u32 15, %v2357_v8  ;;  %vm2831_vm9 = vcmp.eq.s32.totalorder %v2547_v60, 0 }
 0x2e9   : > { %v7235_v37 = vsel %vm852_vm0, %v3425_v15, %v3538_v32  ;;  %v5545_v15 = vld [vmem:[%s5939_s28 + $0xb0] sm:$0xff]  ;;  %v3335_v32 = vpack.c.bf16 %v7130_v42, %v7130_v42  ;;  %v5551_v42 = vld [vmem:[%s5939_s28 + $0x8] sm:$0xff] }
 0x2ea   : > { %3919 = vmatmul.bf16.vlgmr.msra.gmra.mxu2 %v7235_v37  ;;  %v1905_v41 = vsub.f32 %v5546_v56, %v5545_v15  ;;  %vm2825_vm11 = vcmp.eq.s32.totalorder %v2505_v17, 0  ;;  %v5556_v17 = vld [vmem:[%s5939_s28 + $0xc0] sm:$0xff] }
 0x2eb   : > { %v3623_v51 = vunpack.c.l.b16 %v3335_v32  ;;  %v5555_v32 = vld [vmem:[%s6053_s25 + $0x90] sm:$0xff] }
 0x2ec   : > { %2052 = vperm.xlu2 %5357, %v1821_v12  }
 0x2ee   : > { %v5485_v63 = vpop.eup %5484 }
 0x2ef   : > { %v7251_v11 = vadd.f32 1.0, %v5485_v63 }
 0x2f0   : > { %v2028_v18 = vpop.permute.xlu2 %2027  ;;  %5044 = vmatmul.msk.bf16.gmra.mxu3 %vm852_vm0, %v7246_v46 }
 0x2f1   : > { %v2097_v2 = vmul.f32 %v2028_v18, %v1905_v41  ;;  %5486 = vrcp.f32 %v7251_v11  ;;  %v5552_v41 = vld [vmem:[%s6053_s25 + $0x8] sm:$0xff]  ;;  %vm1858_vm12 = vweird.f32 %v7251_v11 }
 0x2f2   : > { %v1884_v45 = vsub.f32 %v5552_v41, %v5551_v42 }
 0x2f3   : > { %v7253_v35 = vadd.f32 %v5545_v15, %v2097_v2 }
 0x2f4   : > { %v7255_v39 = vpop.permute.xlu0 %2007  ;;  %2317 = vperm.xlu2 %5357, %v2274_v31  }
 0x2f5   : > { %v2867_v9 = vrot.slane %v7253_v35, 7  ;;  %v8589_v1 = vrot.slane %v7253_v35, 1  ;;  %v3301_v18 = vpack.c.bf16 %v7253_v35, %v7253_v35 }
 0x2f7   : > { %v3108_v47 = vsel %vm3096_vm2, %v3083_v34, %v8589_v1  ;;  %v2891_v50 = vsel %vm2879_vm10, %v2866_v52, %v2867_v9  ;;  %v5550_v34 = vld [vmem:[%s6053_s25 + $0xb8] sm:$0xff]  ;;  %v7278_v52 = vpop.eup %5486 }
 0x2f8   : > { %v1918_v49 = vpop.permute.xlu2 %1917  ;;  %v3228_v48 = vsel %vm3047_vm8, 0.0, %v3108_v47  ;;  %v1906_v12 = vsub.f32 %v5550_v34, %v5549_v24  ;;  %v3012_v61 = vsel %vm2831_vm9, 0.0, %v2891_v50  ;;  %v1854_v53 = vmul.f32 %v7278_v52, %v7251_v11  ;;  %v5554_v50 = vld [vmem:[%s5939_s28 + $0x90] sm:$0xff] }
 0x2f9   : > { %v3336_v29 = vpack.c.bf16 %v3228_v48, %v3228_v48  ;;  %v2075_v15 = vmul.f32 %v1918_v49, %v1883_v44  ;;  %v7295_v49 = vld [vmem:[#allocation2] ss:$0 sm:$0xff]  ;;  %v1901_v60 = vsub.f32 %v5555_v32, %v5554_v50  ;;  %v3265_v59 = vpack.c.bf16 %v3012_v61, %v3012_v61 }
 0x2fa   : > { %v7299_v48 = vadd.f32 %v7295_v49, %v6259_v36  ;;  %v3499_v34 = vunpack.c.l.b16 %v3301_v18  ;;  %v2358_v32 = vadd.s32 152, %v6519_v25  ;;  %vm1859_vm13 = vweird.f32 %v7278_v52 }
 0x2fb   : > { %v3624_v5 = vunpack.c.l.b16 %v3336_v29  ;;  %v7290_v31 = vadd.f32 %v5547_v30, %v2075_v15  ;;  %v3006_v30 = vsel %vm2825_vm11, 0.0, %v7046_v28  ;;  %vm7386_vm3 = vmor %vm1858_vm12, %vm1859_vm13 }
 0x2fc   : > { %v2033_v57 = vpop.permute.xlu0 %2032 }
 0x2fd   : > { %v2098_v56 = vmul.f32 %v2033_v57, %v1906_v12  ;;  %v7282_v3 = vpack.c.b16 %v3624_v5, %v3623_v51  ;;  %v5557_v57 = vld [vmem:[%s6053_s25 + $0xc0] sm:$0xff]  ;;  %v1855_v51 = vsub.f32 1.0, %v1854_v53  ;;  %v8587_v15 = vrot.slane %v7290_v31, 7 }
 0x2fe   : > { %v1907_v28 = vsub.f32 %v5557_v57, %v5556_v17  ;;  %v3279_v18 = vpack.c.bf16 %v7290_v31, %v7290_v31  ;;  %v1864_v57 = vand.u32 2147483648, %v7251_v11 }
 0x2ff   : > { %v7284_v63 = vadd.f32 %v5549_v24, %v2098_v56 }
 0x300   : > { %v1923_v2 = vpop.permute.xlu2 %1922 }
 0x301   : > { %v2868_v21 = vrot.slane %v7284_v63, 7  ;;  %v2076_v47 = vmul.f32 %v1923_v2, %v1884_v45  ;;  %v3302_v8 = vpack.c.bf16 %v7284_v63, %v7284_v63  ;;  %v2093_v45 = vmul.f32 %v7255_v39, %v1901_v60 }
 0x302   : > { %v3477_v60 = vunpack.c.l.b16 %v3279_v18  ;;  %v1865_v18 = vor.u32 1.1754944e-38, %v1864_v57 }
 0x303   : > { %v7304_v44 = vadd.f32 %v5551_v42, %v2076_v47  ;;  %v3540_v24 = vpop.permute.xlu1 %3539  ;;  %v3500_v12 = vunpack.c.l.b16 %v3302_v8  ;;  %v2890_v29 = vsel %vm2879_vm10, %v2867_v9, %v2868_v21  ;;  %v7325_v42 = vunpack.c.l.b16 %v3265_v59  ;;  %v5558_v47 = vld [vmem:[%s5939_s28 + $0x88] sm:$0xff] }
 0x304   : > { %v7314_v36 = vsel %vm852_vm0, %v3426_v33, %v3540_v24  ;;  %v3266_v5 = vpack.c.bf16 %v2890_v29, %v2890_v29  ;;  %v3259_v33 = vpack.c.bf16 %v3006_v30, %v3006_v30  ;;  %v5559_v8 = vld [vmem:[%s6053_s25 + $0x88] sm:$0xff]  ;;  %v1856_v24 = vmul.f32 %v7278_v52, %v1855_v51 }
 0x305   : > { %v8588_v56 = vrot.slane %v7304_v44, 7  ;;  %3924 = vmatmul.bf16.gmra.mxu2 %v7314_v36  ;;  %v3523_v9 = vpack.c.b16 %v3500_v12, %v3499_v34  ;;  %v3280_v23 = vpack.c.bf16 %v7304_v44, %v7304_v44  ;;  %v1900_v39 = vsub.f32 %v5559_v8, %v5558_v47 }
 0x306   : > { %v7327_v41 = vunpack.c.l.b16 %v3266_v5  ;;  %v2359_v34 = vadd.s32 160, %v6519_v25  ;;  %v3493_v12 = vunpack.c.l.b16 %v3295_v19  ;;  %v1862_v29 = vand.u32 2147483647, %v7251_v11 }
 0x307   : > { %3553 = vrot.lane.b32.xlu0 %v3523_v9, %s5770_s7  ;;  %v7339_v61 = vsel %vm2879_vm10, %v8587_v15, %v8588_v56  ;;  %v3478_v59 = vunpack.c.l.b16 %v3280_v23  ;;  %v7351_v5 = vunpack.c.l.b16 %v3259_v33  ;;  %v7353_v9 = vadd.f32 %v5554_v50, %v2093_v45  ;;  %v5561_v23 = vld [vmem:[%s6053_s25 + $0x98] sm:$0xff] }
 0x308   : > { %v2038_v53 = vpop.permute.xlu2 %2037  ;;  %v2512_v19 = vand.u32 15, %v2358_v32  ;;  %v1857_v50 = vadd.f32 %v7278_v52, %v1856_v24  ;;  %vm7363_vm14 = vcmp.eq.f32.partialorder %v1862_v29, 8.507059e+37 }
 0x309   : > { %v2099_v30 = vmul.f32 %v2038_v53, %v1907_v28  ;;  %v5560_v28 = vld [vmem:[%s5939_s28 + $0x98] sm:$0xff]  ;;  %v3512_v56 = vpack.c.b16 %v3478_v59, %v3477_v60  ;;  %v8591_v1 = vrot.slane %v7353_v9, 1  ;;  %v3297_v32 = vpack.c.bf16 %v7353_v9, %v7353_v9 }
 0x30a   : > { %v1902_v51 = vsub.f32 %v5561_v23, %v5560_v28  ;;  %v5563_v23 = vld [vmem:[%s6053_s25 + $0x18] sm:$0xff]  ;;  %vm3043_vm4 = vcmp.eq.s32.totalorder %v2512_v19, 15  ;;  %v1861_v29 = vsel %vm7386_vm3, %v7278_v52, %v1857_v50  ;;  %v8702_v52 = vrot.slane %v6995_v16, 7 }
 0x30b   : > { %v7355_v8 = vadd.f32 %v5556_v17, %v2099_v30  ;;  %v2519_v17 = vand.u32 15, %v2359_v34 }
 0x30c   : > { %v2003_v15 = vpop.permute.xlu1 %2002 }
 0x30d   : > { %v2092_v53 = vmul.f32 %v2003_v15, %v1900_v39  ;;  %v8590_v33 = vrot.slane %v7355_v8, 7  ;;  %v1886_v15 = vsub.f32 %v5563_v23, %v5562_v58  ;;  %v2863_v39 = vrot.slane %v7353_v9, 7 }
 0x30e   : > { %vm7394_vm15 = vcmp.eq.s32.totalorder %v2519_v17, 0  ;;  %v8703_v23 = vpack.c.b16 %v6882_v43, %v6880_v20  ;;  %v2345_v20 = vadd.s32 48, %v6519_v25  ;;  %v8704_v43 = vsub.f32 0.0, %v7299_v48 }
 0x30f   : > { %v2124_v45 = vadd.f32 %v5558_v47, %v2092_v53  ;;  %3531 = vrot.lane.b32.xlu0 %v3512_v56, %s5770_s7  ;;  %v7380_v47 = vsel %vm2879_vm10, %v2868_v21, %v8590_v33  ;;  %v2360_v21 = vadd.s32 168, %v6519_v25  ;;  %v2361_v53 = vadd.s32 176, %v6519_v25 }
 0x310   : > { %v2421_v30 = vand.u32 15, %v2345_v20 }
 0x311   : > { %v2862_v60 = vrot.slane %v2124_v45, 7  ;;  %v3079_v59 = vrot.slane %v2124_v45, 1  ;;  %v3542_v24 = vpop.permute.xlu2 %3541  ;;  %v3296_v34 = vpack.c.bf16 %v2124_v45, %v2124_v45 }
 0x312   : > { %vm7462_vm7 = vcmp.eq.s32.totalorder %v2421_v30, 0 }
 0x313   : > { %v3494_v45 = vunpack.c.l.b16 %v3296_v34  ;;  %v3112_v11 = vsel %vm3096_vm2, %v3079_v59, %v8591_v1  ;;  %v3113_v19 = vsel %vm3096_vm2, %v3078_v6, %v3079_v59  ;;  %v2896_v50 = vsel %vm2879_vm10, %v8702_v52, %v2862_v60 }
 0x314   : > { %v2013_v17 = vpop.permute.xlu1 %2012  ;;  %v7415_v34 = vsel %vm852_vm0, %v8703_v23, %v3542_v24  ;;  %v3224_v56 = vsel %vm3043_vm4, 0.0, %v3112_v11  ;;  %v3331_v33 = vpack.c.bf16 %v3113_v19, %v3113_v19  ;;  %v3260_v1 = vpack.c.bf16 %v2896_v50, %v2896_v50 }
 0x315   : > { %v2094_v2 = vmul.f32 %v2013_v17, %v1902_v51  ;;  %v3520_v46 = vpack.c.b16 %v3494_v45, %v3493_v12  ;;  %v3332_v62 = vpack.c.bf16 %v3224_v56, %v3224_v56  ;;  %v2895_v6 = vsel %vm2879_vm10, %v2862_v60, %v2863_v39  ;;  %3929 = vmatmul.bf16.gmra.mxu2 %v7415_v34 }
 0x316   : > { %v3619_v16 = vunpack.c.l.b16 %v3331_v33  ;;  %v2526_v59 = vand.u32 15, %v2360_v21  ;;  %v7420_v52 = vunpack.c.l.b16 %v3260_v1  ;;  %v1365_v24 = vmul.f32 1.442695, %v8704_v43 }
 0x317   : > { %v2126_v11 = vadd.f32 %v5560_v28, %v2094_v2  ;;  %3547 = vrot.lane.b32.xlu1 %v3520_v46, %s5770_s7  ;;  %v1866_v12 = vsel %vm7363_vm14, %v1865_v18, %v1861_v29  ;;  %v3620_v51 = vunpack.c.l.b16 %v3332_v62  ;;  %v3495_v60 = vunpack.c.l.b16 %v3297_v32 }
 0x318   : > { %2067 = vperm.xlu0 %5358, %v1866_v12   ;;  %v3008_v1 = vsel %vm7394_vm15, 0.0, %v2895_v6  ;;  %v2533_v21 = vand.u32 15, %v2361_v53  ;;  %vm7434_vm5 = vcmp.eq.s32.totalorder %v2526_v59, 15  ;;  %v2365_v62 = vadd.s32 208, %v6519_v25 }
 0x319   : > { %v2864_v45 = vrot.slane %v2126_v11, 7  ;;  %v3081_v19 = vrot.slane %v2126_v11, 1  ;;  %v1933_v48 = vpop.permute.xlu2 %1932  ;;  %v7432_v50 = vpack.c.b16 %v3620_v51, %v3619_v16  ;;  %v3298_v2 = vpack.c.bf16 %v2126_v11, %v2126_v11  ;;  %v5565_v51 = vld [vmem:[%s6053_s25 + $0xc8] sm:$0xff] }
 0x31a   : > { %v2078_v46 = vmul.f32 %v1933_v48, %v1886_v15  ;;  %v8707_v32 = vrot.slane %v7078_v38, 1  ;;  %v3261_v15 = vpack.c.bf16 %v3008_v1, %v3008_v1  ;;  %5488 = vpow2.f32 %v1365_v24 }
 0x31b   : > { %5045 = vmatmul.msk.bf16.gmra.mxu3 %vm852_vm0, %v7432_v50  ;;  %v3496_v18 = vunpack.c.l.b16 %v3298_v2  ;;  %v2894_v57 = vsel %vm2879_vm10, %v2863_v39, %v2864_v45  ;;  %vm2829_vm6 = vcmp.eq.s32.totalorder %v2533_v21, 0  ;;  %v8708_v56 = vrot.slane %v7078_v38, 7  ;;  %v2201_v38 = vpop.f32.mrf.mxu1 }
 0x31c   : > { %v3110_v29 = vsel %vm3096_vm2, %v3081_v19, %v8707_v32  ;;  %v7447_v53 = vadd.f32 %v5562_v58, %v2078_v46  ;;  %v3262_v23 = vpack.c.bf16 %v2894_v57, %v2894_v57  ;;  %v3264_v16 = vpack.c.bf16 %v7138_v54, %v7138_v54 }
 0x31d   : > { %v3521_v17 = vpack.c.b16 %v3496_v18, %v3495_v60  ;;  %v2893_v6 = vsel %vm2879_vm10, %v2864_v45, %v8708_v56  ;;  %v8709_v39 = vrot.slane %v7353_v9, 1  ;;  %v3226_v20 = vsel %vm7434_vm5, 0.0, %v3110_v29  ;;  %v5564_v9 = vld [vmem:[%s5939_s28 + $0xc8] sm:$0xff] }
 0x31e   : > { %v8598_v59 = vrot.slane %v7447_v53, 7  ;;  %v7467_v24 = vunpack.c.l.b16 %v3261_v15  ;;  %v7469_v54 = vunpack.c.l.b16 %v3262_v23  ;;  %v3010_v11 = vsel %vm2829_vm6, 0.0, %v2893_v6 }
 0x31f   : > { %v3111_v58 = vsel %vm3096_vm2, %v8709_v39, %v3081_v19  ;;  %3549 = vrot.lane.b32.xlu2 %v3521_v17, %s5770_s7  ;;  %v2561_v12 = vand.u32 15, %v2365_v62  ;;  %v1908_v60 = vsub.f32 %v5565_v51, %v5564_v9  ;;  %v3263_v1 = vpack.c.bf16 %v3010_v11, %v3010_v11 }
 0x320   : > { %v8712_v21 = vrot.slane %v6509_v7, 7  ;;  %v3248_v19 = vpack.c.bf16 %v6558_v4, %v6558_v4  ;;  %v3333_v48 = vpack.c.bf16 %v3111_v58, %v3111_v58  ;;  %v3334_v2 = vpack.c.bf16 %v3226_v20, %v3226_v20  ;;  %v5489_v62 = vpop.eup %5488 }
 0x321   : > { %v7485_v30 = vunpack.c.l.b16 %v3263_v1  ;;  %v7487_v18 = vunpack.c.l.b16 %v3264_v16  ;;  %vm2833_vm8 = vcmp.eq.s32.totalorder %v2561_v12, 0  ;;  %v7500_v58 = vadd.f32 1.0, %v5489_v62 }
 0x322   : > { %v2909_v45 = vsel %vm2879_vm10, %v8598_v59, %v8712_v21  ;;  %v7493_v17 = vunpack.c.l.b16 %v3248_v19  ;;  %v3621_v23 = vunpack.c.l.b16 %v3333_v48  ;;  %v3622_v56 = vunpack.c.l.b16 %v3334_v2 }
 0x323   : > { %v2994_v28 = vsel %vm7462_vm7, 0.0, %v2909_v45  ;;  %v2043_v29 = vpop.permute.xlu1 %2042  ;;  %v3014_v39 = vsel %vm2833_vm8, 0.0, %v7380_v47  ;;  %v2203_v11 = vpop.f32.mrf.mxu1  ;;  %v1274_v47 = vadd.f32 %v7295_v49, %v7067_v40  ;;  %v8713_v21 = vrot.slane %v7355_v8, 7 }
 0x324   : > { %v3247_v32 = vpack.c.bf16 %v2994_v28, %v2994_v28  ;;  %v2100_v57 = vmul.f32 %v2043_v29, %v1908_v60  ;;  %v7504_v51 = vpack.c.b16 %v3622_v56, %v3621_v23  ;;  %v3267_v60 = vpack.c.bf16 %v3014_v39, %v3014_v39 }
 0x325   : > { %5490 = vrcp.f32 %v7500_v58  ;;  %v1306_v56 = vsub.f32 0.0, %v1274_v47  ;;  %v3063_v39 = vrot.slane %v7304_v44, 1  ;;  %v8715_v4 = vrot.slane %v6509_v7, 1 }
 0x326   : > { %v7491_v15 = vunpack.c.l.b16 %v3247_v32  ;;  %v7495_v6 = vadd.f32 %v5564_v9, %v2100_v57  ;;  %v5566_v9 = vld [vmem:[%s8562_s5] ss:$0 sm:$0xff]  ;;  %v7527_v32 = vunpack.c.l.b16 %v3267_v60  ;;  %v2344_v57 = vadd.s32 40, %v6519_v25  ;;  %v5567_v60 = vld [vmem:[%s5939_s28 + $0x10] sm:$0xff] }
 0x327   : > { %v2216_v43 = vpop.xlane.xlu0 %2215  ;;  %v2202_v1 = vadd.f32 %v5566_v9, %v2201_v38  ;;  %v2204_v28 = vadd.f32 %v5566_v9, %v2203_v11  ;;  %v8714_v38 = vpack.c.b16 %v6971_v0, %v6969_v55  ;;  %v2342_v55 = vadd.s32 24, %v6519_v25  ;;  %v5568_v9 = vld [vmem:[%s6053_s25 + $0x10] sm:$0xff] }
 0x328   : > { %v8597_v20 = vrot.slane %v7495_v6, 7  ;;  %v2226_v12 = vadd.f32 %v7295_v49, %v2216_v43  ;;  %v2364_v0 = vadd.s32 200, %v6519_v25  ;;  %v2414_v47 = vand.u32 15, %v2344_v57 }
 0x329   : > { %v2208_v23 = vmax.f32 %v2202_v1, 0.0  ;;  %v2209_v11 = vmax.f32 %v2204_v28, 0.0  ;;  %v3065_v1 = vrot.slane %v7447_v53, 1  ;;  %v3085_v43 = vrot.slane %v7284_v63, 1 }
 0x32a   : > { %v2888_v45 = vsel %vm2879_vm10, %v8713_v21, %v8597_v20  ;;  %v2230_v19 = vsub.f32 0.0, %v2226_v12  ;;  %v8596_v12 = vrot.slane %v7290_v31, 1  ;;  %v1885_v21 = vsub.f32 %v5568_v9, %v5567_v60  ;;  %v5571_v20 = vld [vmem:[%s6053_s25 + $0xd0] sm:$0xff] }
 0x32b   : > { %5046 = vmatmul.msk.bf16.gmra.mxu3 %vm852_vm0, %v7504_v51  ;;  %v3544_v48 = vpop.permute.xlu1 %3543  ;;  %v3268_v2 = vpack.c.bf16 %v2888_v45, %v2888_v45  ;;  %v7540_v45 = vpop.eup %5490  ;;  %v2554_v16 = vand.u32 15, %v2364_v0  ;;  %vm3029_vm9 = vcmp.eq.s32.totalorder %v2414_v47, 15  ;;  %v3282_v47 = vpack.c.bf16 %v7447_v53, %v7447_v53 }
 0x32c   : > { %v7524_v40 = vsel %vm852_vm0, %v8714_v38, %v3544_v48  ;;  %v2234_v62 = vmul.f32 1.442695, %v2230_v19  ;;  %v1369_v19 = vmul.f32 1.442695, %v1306_v56  ;;  %v3129_v48 = vsel %vm3096_vm2, %v8596_v12, %v3063_v39 }
 0x32d   : > { %3934 = vmatmul.bf16.gmra.mxu2 %v7524_v40  ;;  %v7529_v29 = vunpack.c.l.b16 %v3268_v2  ;;  %v2343_v2 = vadd.s32 32, %v6519_v25  ;;  %v2400_v38 = vand.u32 15, %v2342_v55  ;;  %v7556_v56 = vmul.f32 %v7540_v45, %v7500_v58 }
 0x32e   : > { %5492 = vpow2.f32 %v2234_v62  ;;  %v5569_v62 = vld [vmem:[%s8563_s6] ss:$0 sm:$0xff]  ;;  %v3315_v33 = vpack.c.bf16 %v3129_v48, %v3129_v48  ;;  %v8599_v55 = vrot.slane %v7355_v8, 1  ;;  %vm7572_vm12 = vcmp.eq.s32.totalorder %v2554_v16, 15 }
 0x32f   : > { %v2212_v9 = vmul.f32 %v5569_v62, %v2208_v23  ;;  %v7552_v57 = vmul.f32 %v5569_v62, %v2209_v11  ;;  %v3126_v23 = vsel %vm3096_vm2, %v3065_v1, %v8715_v4  ;;  %5494 = vpow2.f32 %v1369_v19 }
 0x330   : > { %v2407_v11 = vand.u32 15, %v2343_v2  ;;  %vm7565_vm11 = vcmp.eq.s32.totalorder %v2400_v38, 15  ;;  %v3106_v2 = vsel %vm3096_vm2, %v3085_v43, %v8599_v55  ;;  %v8720_v38 = vrot.slane %v7253_v35, 1 }
 0x331   : > { %v2220_v7 = vsel %vm1142_vm1, %v2212_v9, 0.0  ;;  %v5570_v9 = vld [vmem:[%s5939_s28 + $0xd0] sm:$0xff]  ;;  %vm1843_vm6 = vweird.f32 %v7500_v58  ;;  %vm1844_vm7 = vweird.f32 %v7540_v45 }
 0x332   : > { %v3107_v16 = vsel %vm3096_vm2, %v8720_v38, %v3085_v43  ;;  %v1909_v59 = vsub.f32 %v5571_v20, %v5570_v9  ;;  %vm2811_vm13 = vcmp.eq.s32.totalorder %v2407_v11, 0  ;;  %v3480_v43 = vunpack.c.l.b16 %v3282_v47  ;;  %vm7696_vm8 = vmor %vm1843_vm6, %vm1844_vm7 }
 0x333   : > { %v1928_v28 = vpop.permute.xlu1 %1927  ;;  %v8722_v20 = vpack.c.b16 %v7188_v22, %v7200_v10  ;;  %v3230_v47 = vsel %vm7572_vm12, 0.0, %v3106_v2 }
 0x334   : > { %v2077_v46 = vmul.f32 %v1928_v28, %v1885_v21  ;;  %v5493_v12 = vpop.eup %5492  ;;  %v2367_v28 = vadd.s32 224, %v6519_v25 }
 0x335   : > { %v7563_v0 = vadd.f32 1.0, %v5493_v12  ;;  %v3210_v12 = vsel %vm3029_vm9, 0.0, %v3126_v23  ;;  %v5495_v55 = vpop.eup %5494 }
 0x336   : > { %v2109_v63 = vadd.f32 %v5567_v60, %v2077_v46  ;;  %v3546_v48 = vpop.permute.xlu2 %3545  ;;  %v3603_v60 = vunpack.c.l.b16 %v3315_v33  ;;  %v8721_v33 = vrot.slane %v7447_v53, 7  ;;  %v3318_v38 = vpack.c.bf16 %v3210_v12, %v3210_v12 }
 0x337   : > { %5496 = vrcp.f32 %v7563_v0  ;;  %v7601_v11 = vsel %vm852_vm0, %v8722_v20, %v3546_v48  ;;  %v8723_v53 = vrot.slane %v7304_v44, 7  ;;  %v7614_v20 = vadd.f32 1.0, %v5495_v55 }
 0x338   : > { %v2847_v46 = vrot.slane %v2109_v63, 7  ;;  %v3064_v4 = vrot.slane %v2109_v63, 1  ;;  %v3281_v19 = vpack.c.bf16 %v2109_v63, %v2109_v63  ;;  %v3606_v2 = vunpack.c.l.b16 %v3318_v38 }
 0x339   : > { %v3337_v55 = vpack.c.bf16 %v3107_v16, %v3107_v16  ;;  %v5572_v16 = vld [vmem:[%s5939_s28 + $0xd8] sm:$0xff]  ;;  %5498 = vrcp.f32 %v7614_v20  ;;  %vm2251_vm3 = vweird.f32 %v7563_v0 }
 0x33a   : > { %v3128_v62 = vsel %vm3096_vm2, %v3063_v39, %v3064_v4  ;;  %v2910_v23 = vsel %vm2879_vm10, %v2847_v46, %v8721_v33  ;;  %v3479_v35 = vunpack.c.l.b16 %v3281_v19  ;;  %v2911_v21 = vsel %vm2879_vm10, %v8723_v53, %v2847_v46 }
 0x33b   : > { %v3208_v63 = vsel %vm7565_vm11, 0.0, %v3128_v62  ;;  %5047 = vmatmul.msk.bf16.gmra.mxu3 %vm852_vm0, %v7282_v3  ;;  %v3246_v62 = vpack.c.bf16 %v2910_v23, %v2910_v23  ;;  %v2992_v12 = vsel %vm2811_vm13, 0.0, %v2911_v21  ;;  %v3127_v19 = vsel %vm3096_vm2, %v3064_v4, %v3065_v1 }
 0x33c   : > { %v3316_v39 = vpack.c.bf16 %v3208_v63, %v3208_v63  ;;  %v3513_v33 = vpack.c.b16 %v3480_v43, %v3479_v35  ;;  %v3245_v48 = vpack.c.bf16 %v2992_v12, %v2992_v12  ;;  %v3317_v44 = vpack.c.bf16 %v3127_v19, %v3127_v19 }
 0x33d   : > { %3939 = vmatmul.bf16.gmra.mxu2 %v7601_v11  ;;  %v5497_v22 = vpop.eup %5496  ;;  %v7612_v63 = vunpack.c.l.b16 %v3246_v62  ;;  %v3338_v53 = vpack.c.bf16 %v3230_v47, %v3230_v47  ;;  %v2366_v21 = vadd.s32 216, %v6519_v25  ;;  %v2255_v12 = vand.u32 2147483647, %v7563_v0  ;;  %v5573_v47 = vld [vmem:[%s6053_s25 + $0xd8] sm:$0xff] }
 0x33e   : > { %v3604_v10 = vunpack.c.l.b16 %v3316_v39  ;;  %v2048_v46 = vpop.permute.xlu2 %2047  ;;  %3533 = vrot.lane.b32.xlu0 %v3513_v33, %s5770_s7  ;;  %v2247_v23 = vmul.f32 %v5497_v22, %v7563_v0  ;;  %v7619_v43 = vunpack.c.l.b16 %v3245_v48  ;;  %v3605_v4 = vunpack.c.l.b16 %v3317_v44 }
 0x33f   : > { %v2101_v35 = vmul.f32 %v2048_v46, %v1909_v59  ;;  %v2257_v33 = vand.u32 2147483648, %v7563_v0  ;;  %vm2252_vm14 = vweird.f32 %v5497_v22  ;;  %v2575_v19 = vand.u32 15, %v2367_v28 }
 0x340   : > { %v7621_v1 = vpack.c.b16 %v3604_v10, %v3603_v60  ;;  %v2248_v39 = vsub.f32 1.0, %v2247_v23  ;;  %v7629_v38 = vpack.c.b16 %v3606_v2, %v3605_v4  ;;  %v1910_v10 = vsub.f32 %v5573_v47, %v5572_v16  ;;  %vm2253_vm4 = vmor %vm2251_vm3, %vm2252_vm14 }
 0x341   : > { %2221 = vadd.xlane.f32.xlu1 %v2220_v7  ;;  %v7624_v62 = vadd.f32 %v5570_v9, %v2101_v35  ;;  %v2223_v9 = vsel %vm1142_vm1, %v7552_v57, 0.0  ;;  %v1840_v48 = vsub.f32 1.0, %v7556_v56  ;;  %v3626_v46 = vunpack.c.l.b16 %v3338_v53 }
 0x342   : > { %v2249_v60 = vmul.f32 %v5497_v22, %v2248_v39  ;;  %v2258_v23 = vor.u32 1.1754944e-38, %v2257_v33  ;;  %v3625_v2 = vunpack.c.l.b16 %v3337_v55  ;;  %v2568_v28 = vand.u32 15, %v2366_v21 }
 0x343   : > { %v2871_v7 = vrot.slane %v7624_v62, 7  ;;  %v8724_v35 = vrot.slane %v7495_v6, 7  ;;  %v8600_v39 = vrot.slane %v7624_v62, 1  ;;  %vm2256_vm1 = vcmp.eq.f32.partialorder %v2255_v12, 8.507059e+37 }
 0x344   : > { %v2250_v44 = vadd.f32 %v5497_v22, %v2249_v60  ;;  %vm2835_vm15 = vcmp.eq.s32.totalorder %v2575_v19, 0  ;;  %v3087_v53 = vrot.slane %v7495_v6, 1  ;;  %v7646_v55 = vpack.c.b16 %v3626_v46, %v3625_v2  ;;  %v7650_v60 = vpop.eup %5498 }
 0x345   : > { %v2887_v4 = vsel %vm2879_vm10, %v8724_v35, %v2871_v7  ;;  %vm3051_vm5 = vcmp.eq.s32.totalorder %v2568_v28, 15  ;;  %v2341_v46 = vadd.s32 16, %v6519_v25  ;;  %v1869_v35 = vmul.f32 %v7650_v60, %v7614_v20 }
 0x346   : > { %v2053_v57 = vpop.permute.xlu2 %2052  ;;  %v2254_v47 = vsel %vm2253_vm4, %v5497_v22, %v2250_v44  ;;  %v3016_v33 = vsel %vm2835_vm15, 0.0, %v2887_v4  ;;  %v1841_v22 = vmul.f32 %v7540_v45, %v1840_v48  ;;  %v3104_v12 = vsel %vm3096_vm2, %v3087_v53, %v8600_v39 }
 0x347   : > { %v2102_v56 = vmul.f32 %v2053_v57, %v1910_v10  ;;  %v2259_v0 = vsel %vm2256_vm1, %v2258_v23, %v2254_v47  ;;  %v8725_v23 = vpack.c.b16 %v7487_v18, %v7485_v30  ;;  %v3269_v2 = vpack.c.bf16 %v3016_v33, %v3016_v33 }
 0x348   : > { %2224 = vadd.xlane.f32.xlu2 %v2223_v9  ;;  %2312 = vperm.xlu0 %5358, %v2259_v0   ;;  %v5574_v9 = vld [vmem:[%s6021_s12 + $0x8] sm:$0xff]  ;;  %v3232_v28 = vsel %vm3051_vm5, 0.0, %v3104_v12  ;;  %v1842_v30 = vadd.f32 %v7540_v45, %v1841_v22  ;;  %v1847_v18 = vand.u32 2147483647, %v7500_v58  ;;  %v1849_v0 = vand.u32 2147483648, %v7500_v58 }
 0x349   : > { %v7648_v21 = vadd.f32 %v5572_v16, %v2102_v56  ;;  %v5575_v16 = vld [vmem:[%s5949_s27 + $0x8] sm:$0xff]  ;;  %v8726_v33 = vrot.slane %v7355_v8, 1  ;;  %v3340_v59 = vpack.c.bf16 %v3232_v28, %v3232_v28  ;;  %v7686_v39 = vunpack.c.l.b16 %v3269_v2 }
 0x34a   : > { %v2307_v44 = vsub.f32 %v5575_v16, %v5574_v9  ;;  %v5576_v16 = vld [vmem:[%s5939_s28 + $0xe0] sm:$0xff]  ;;  %vm1848_vm11 = vcmp.eq.f32.partialorder %v1847_v18, 8.507059e+37  ;;  %v1850_v58 = vor.u32 1.1754944e-38, %v1849_v0  ;;  %vm1874_vm12 = vweird.f32 %v7650_v60 }
 0x34b   : > { %5048 = vmatmul.msk.bf16.gmra.mxu3 %vm852_vm0, %v7646_v55  ;;  %v8601_v19 = vrot.slane %v7648_v21, 7  ;;  %v3552_v10 = vpop.permute.xlu0 %3551  ;;  %v3105_v12 = vsel %vm3096_vm2, %v8726_v33, %v3087_v53  ;;  %vm1873_vm14 = vweird.f32 %v7614_v20 }
 0x34c   : > { %v7667_v48 = vsel %vm852_vm0, %v8725_v23, %v3552_v10  ;;  %v2393_v10 = vand.u32 15, %v2341_v46  ;;  %v5577_v23 = vld [vmem:[%s6053_s25 + $0xe0] sm:$0xff]  ;;  %v3339_v53 = vpack.c.bf16 %v3105_v12, %v3105_v12  ;;  %v2368_v46 = vadd.s32 232, %v6519_v25  ;;  %vm1875_vm3 = vmor %vm1873_vm14, %vm1874_vm12 }
 0x34d   : > { %v2886_v4 = vsel %vm2879_vm10, %v2871_v7, %v8601_v19  ;;  %v1911_v7 = vsub.f32 %v5577_v23, %v5576_v16  ;;  %v8729_v12 = vrot.slane %v7290_v31, 7 }
 0x34e   : > { %v2318_v57 = vpop.permute.xlu2 %2317  ;;  %v3270_v47 = vpack.c.bf16 %v2886_v4, %v2886_v4  ;;  %v1870_v4 = vsub.f32 1.0, %v1869_v35  ;;  %vm2809_vm9 = vcmp.eq.s32.totalorder %v2393_v10, 0  ;;  %v3627_v18 = vunpack.c.l.b16 %v3339_v53 }
 0x34f   : > { %v2331_v56 = vmul.f32 %v2318_v57, %v2307_v44  ;;  %v2582_v0 = vand.u32 15, %v2368_v46 }
 0x350   : > { %v7688_v22 = vunpack.c.l.b16 %v3270_v47  ;;  %v3628_v47 = vunpack.c.l.b16 %v3340_v59  ;;  %v1871_v33 = vmul.f32 %v7650_v60, %v1870_v4  ;;  %v3089_v4 = vrot.slane %v7648_v21, 1 }
 0x351   : > { %v7690_v19 = vadd.f32 %v5574_v9, %v2331_v56  ;;  %v1846_v9 = vsel %vm7696_vm8, %v7540_v45, %v1842_v30  ;;  %v3304_v56 = vpack.c.bf16 %v7495_v6, %v7495_v6  ;;  %v3244_v45 = vpack.c.bf16 %v7339_v61, %v7339_v61 }
 0x352   : > { %v1851_v10 = vsel %vm1848_vm11, %v1850_v58, %v1846_v9  ;;  %v3303_v6 = vpack.c.bf16 %v7355_v8, %v7355_v8  ;;  %v1879_v8 = vand.u32 2147483648, %v7614_v20  ;;  %vm3053_vm13 = vcmp.eq.s32.totalorder %v2582_v0, 15 }
 0x353   : > { %v8602_v28 = vrot.slane %v7690_v19, 7  ;;  %v2058_v57 = vpop.permute.xlu0 %2057  ;;  %v3502_v61 = vunpack.c.l.b16 %v3304_v56  ;;  %v3388_v46 = vunpack.c.l.b16 %v3244_v45  ;;  %v1877_v56 = vand.u32 2147483647, %v7614_v20 }
 0x354   : > { %v2103_v35 = vmul.f32 %v2058_v57, %v1911_v7  ;;  %v1880_v0 = vor.u32 1.1754944e-38, %v1879_v8 }
 0x355   : > { %v2913_v23 = vsel %vm2879_vm10, %v8602_v28, %v8729_v12  ;;  %v7726_v12 = vpack.c.b16 %v3628_v47, %v3627_v18  ;;  %v3501_v47 = vunpack.c.l.b16 %v3303_v6  ;;  %vm1878_vm4 = vcmp.eq.f32.partialorder %v1877_v56, 8.507059e+37  ;;  %v5252_v56 = vld [vmem:[%s8631_s30 + $0xf0] sm:$0xff]  ;;  %v5231_v28 = vld [vmem:[%s8631_s30 + $0x48] sm:$0xff] }
 0x356   : > { %v7718_v30 = vadd.f32 %v5576_v16, %v2103_v35  ;;  %v2990_v59 = vsel %vm2809_vm9, 0.0, %v2913_v23  ;;  %v1872_v16 = vadd.f32 %v7650_v60, %v1871_v33  ;;  %v8731_v35 = vrot.slane %v7648_v21, 7 }
 0x357   : > { %v3243_v7 = vpack.c.bf16 %v2990_v59, %v2990_v59  ;;  %8730 = vst [vmem:[#allocation23_spill] sm:$0xff] %v7726_v12  ;;  %v3524_v23 = vpack.c.b16 %v3502_v61, %v3501_v47  ;;  %v3306_v59 = vpack.c.bf16 %v7648_v21, %v7648_v21  ;;  %v3305_v61 = vpack.c.bf16 %v7624_v62, %v7624_v62  ;;  %v5233_v21 = vld [vmem:[%s8631_s30 + $0x58] sm:$0xff] }
 0x358   : > { %v8603_v44 = vrot.slane %v7718_v30, 7  ;;  %v3090_v57 = vrot.slane %v7718_v30, 1  ;;  %v1876_v45 = vsel %vm1875_vm3, %v7650_v60, %v1872_v16  ;;  %4242 = vmatpush.bf16.msrb.mxu3 %v5233_v21  ;;  %v5253_v47 = vld [vmem:[%s8631_s30 + $0xf8] sm:$0xff] }
 0x359   : > { %v3387_v53 = vunpack.c.l.b16 %v3243_v7  ;;  %v1881_v6 = vsel %vm1878_vm4, %v1880_v0, %v1876_v45  ;;  %v3504_v16 = vunpack.c.l.b16 %v3306_v59  ;;  %4427 = vmatpush.bf16.msrb.mxu0 %v5253_v47  ;;  %v5257_v45 = vld [vmem:[%s8631_s30 + $0x118] sm:$0xff] }
 0x35a   : > { %2062 = vperm.xlu1 %5359, %v1851_v10   ;;  %v3102_v9 = vsel %vm3096_vm2, %v3089_v4, %v3090_v57  ;;  %v7742_v58 = vsel %vm2879_vm10, %v8731_v35, %v8603_v44  ;;  %v8732_v10 = vrot.slane %v7624_v62, 1  ;;  %v8734_v62 = vld [vmem:[#allocation19_spill] sm:$0xff]  ;;  %4520 = vmatpush.bf16.msrb.mxu2 %v5257_v45  ;;  %v5249_v59 = vld [vmem:[%s8631_s30 + $0xd8] sm:$0xff]  ;;  %v2369_v45 = vadd.s32 240, %v6519_v25 }
 0x35b   : > { %5049 = vmatmul.msk.bf16.gmra.mxu3 %vm852_vm0, %v7726_v12  ;;  %v3422_v33 = vpack.c.b16 %v3388_v46, %v3387_v53  ;;  %v3234_v18 = vsel %vm3053_vm13, 0.0, %v3102_v9  ;;  %v3503_v46 = vunpack.c.l.b16 %v3305_v61 }
 0x35c   : > { %v3103_v20 = vsel %vm3096_vm2, %v8732_v10, %v3089_v4  ;;  %v3342_v7 = vpack.c.bf16 %v3234_v18, %v3234_v18  ;;  %v8735_v4 = vpack.c.b16 %v6619_v14, %v8734_v62  ;;  %v5251_v14 = vld [vmem:[%s8631_s30 + $0xe8] sm:$0xff]  ;;  %v5250_v18 = vld [vmem:[%s8631_s30 + $0xe0] sm:$0xff] }
 0x35d   : > { %v3341_v60 = vpack.c.bf16 %v3103_v20, %v3103_v20  ;;  %v3525_v9 = vpack.c.b16 %v3504_v16, %v3503_v46  ;;  %4428 = vmatpush.bf16.msrb.mxu0 %v5252_v56  ;;  %v5248_v20 = vld [vmem:[%s8631_s30 + $0xd0] sm:$0xff] }
 0x35e   : > { %v3630_v53 = vunpack.c.l.b16 %v3342_v7  ;;  %v8736_v7 = vpack.c.b16 %v7420_v52, %v7351_v5  ;;  %v5232_v46 = vld [vmem:[%s8631_s30 + $0x50] sm:$0xff] }
 0x35f   : > { %v3629_v8 = vunpack.c.l.b16 %v3341_v60  ;;  %v5246_v60 = vld [vmem:[%s8631_s30 + $0xc0] sm:$0xff]  ;;  %4243 = vmatpush.bf16.msrb.mxu3 %v5232_v46 }
 0x360   : > { %3555 = vrot.lane.b32.xlu2 %v3524_v23, %s5770_s7 }
 0x361   : > { %v7758_v35 = vpack.c.b16 %v3630_v53, %v3629_v8  ;;  %4429 = vmatpush.bf16.msrb.mxu0 %v5251_v14  ;;  %v8737_v53 = vpack.c.b16 %v7469_v54, %v7467_v24  ;;  %v8738_v24 = vpack.c.b16 %v7612_v63, %v7619_v43  ;;  %v8739_v63 = vpack.c.b16 %v7327_v41, %v7325_v42  ;;  %v5581_v42 = vld [vmem:[%s6053_s25 + $0xf0] sm:$0xff] }
 0x362   : > { %2072 = vperm.xlu1 %5359, %v1881_v6  }
 0x363   : > { %8733 = vst [vmem:[#allocation24_spill] sm:$0xff] %v7758_v35  ;;  %4244 = vmatpush.bf16.msrb.mxu3 %v5231_v28 }
 0x365   : > { %4430 = vmatpush.bf16.msrb.mxu0 %v5250_v18 }
 0x369   : > { %4431 = vmatpush.bf16.msrb.mxu0 %v5249_v59 }
 0x36a   : > { %3557 = vrot.lane.b32.xlu1 %v3525_v9, %s5770_s7  ;;  %v5256_v9 = vld [vmem:[%s8631_s30 + $0x110] sm:$0xff] }
 0x36b   : > { %5050 = vmatmul.msk.bf16.gmra.mxu3 %vm852_vm0, %v7758_v35  ;;  %4521 = vmatpush.bf16.msrb.mxu2 %v5256_v9  ;;  %v3278_v9 = vpack.c.bf16 %v7690_v19, %v7690_v19 }
 0x36d   : > { %4432 = vmatpush.bf16.msrb.mxu0 %v5248_v20  ;;  %v5578_v20 = vld [vmem:[%s6021_s12] sm:$0xff] }
 0x372   : > { %3535 = vrot.lane.b32.xlu1 %v8735_v4, %s5770_s7 }
 0x379   : > { %v3554_v23 = vpop.permute.xlu0 %3553  ;;  %v3550_v16 = vpop.permute.xlu2 %3549 }
 0x37a   : > { %v7812_v5 = vsel %vm852_vm0, %v8737_v53, %v3550_v16  ;;  %v7835_v43 = vsel %vm852_vm0, %v8739_v63, %v3554_v23 }
 0x381   : > { %v3532_v0 = vpop.permute.xlu0 %3531 }
 0x382   : > { %v7789_v10 = vsel %vm852_vm0, %v3422_v33, %v3532_v0  ;;  %v5247_v33 = vld [vmem:[%s8631_s30 + $0xc8] sm:$0xff]  ;;  %v2589_v0 = vand.u32 15, %v2369_v45 }
 0x383   : > { %3904 = vmatmul.bf16.vlgmr.msra.gmra.mxu1 %v7789_v10  ;;  %4433 = vmatpush.bf16.msrb.mxu0 %v5247_v33 }
 0x384   : > { %vm2837_vm1 = vcmp.eq.s32.totalorder %v2589_v0, 0 }
 0x387   : > { %4434 = vmatpush.bf16.msrb.mxu0 %v5246_v60  ;;  %v5580_v60 = vld [vmem:[%s5939_s28 + $0xf0] sm:$0xff] }
 0x388   : > { %v1913_v41 = vsub.f32 %v5581_v42, %v5580_v60 }
 0x389   : > { %v3548_v6 = vpop.permute.xlu1 %3547 }
 0x38a   : > { %v7799_v61 = vsel %vm852_vm0, %v8736_v7, %v3548_v6  ;;  %v2068_v52 = vpop.permute.xlu0 %2067  ;;  %v5579_v6 = vld [vmem:[%s5949_s27] sm:$0xff] }
 0x38b   : > { %3944 = vmatmul.bf16.gmra.mxu2 %v7799_v61  ;;  %v2306_v7 = vsub.f32 %v5579_v6, %v5578_v20  ;;  %v2105_v46 = vmul.f32 %v2068_v52, %v1913_v41  ;;  %v5583_v52 = vld [vmem:[%s6053_s25 + $0xe8] sm:$0xff]  ;;  %v7867_v6 = vunpack.c.l.b16 %v3278_v9 }
 0x39b   : > { %3949 = vmatmul.bf16.gmra.mxu2 %v7812_v5 }
 0x3ab   : > { %3954 = vmatmul.bf16.gmra.mxu2 %v7667_v48 }
 0x3b0   : > { %v3534_v8 = vpop.permute.xlu0 %3533 }
 0x3b1   : > { %v7826_v54 = vsel %vm852_vm0, %v8738_v24, %v3534_v8 }
 0x3b2   : > { %3909 = vmatmul.bf16.gmra.mxu1 %v7826_v54  ;;  %4435 = vmatmul.bf16.vlgmr.msrb.gmra.mxu0 %v7826_v54 }
 0x3b4   : > { %v2222_v21 = vpop.xlane.xlu1 %2221 }
 0x3b5   : > { %v2228_v62 = vadd.f32 %v7295_v49, %v2222_v21 }
 0x3b7   : > { %v2232_v4 = vsub.f32 0.0, %v2228_v62  ;;  %v3307_v62 = vpack.c.bf16 %v7718_v30, %v7718_v30 }
 0x3b9   : > { %v2238_v47 = vmul.f32 1.442695, %v2232_v4  ;;  %v2370_v4 = vadd.s32 248, %v6519_v25 }
 0x3ba   : > { %v2313_v23 = vpop.permute.xlu0 %2312 }
 0x3bb   : > { %5500 = vpow2.f32 %v2238_v47  ;;  %v2225_v56 = vpop.xlane.xlu2 %2224  ;;  %3959 = vmatmul.bf16.gmra.mxu2 %v7835_v43  ;;  %v2330_v53 = vmul.f32 %v2313_v23, %v2306_v7  ;;  %v7852_v47 = vadd.f32 %v5580_v60, %v2105_v46  ;;  %v3505_v60 = vunpack.c.l.b16 %v3307_v62  ;;  %v5585_v62 = vld [vmem:[%s6053_s25 + $0xf8] sm:$0xff]  ;;  %s4753_s25 = sshll.u32 %s8307_s11, 4  ;;  %s4754_s25 = int_to_ptr.vmem [resolvable:$true] %s4753_s25 }
 0x3bc   : > { %v2229_v14 = vadd.f32 %v7295_v49, %v2225_v56  ;;  %v3018_v49 = vsel %vm2837_vm1, 0.0, %v7742_v58  ;;  %v5582_v56 = vld [vmem:[%s5939_s28 + $0xe8] sm:$0xff]  ;;  %v2596_v42 = vand.u32 15, %v2370_v4 }
 0x3bd   : > { %v7847_v21 = vadd.f32 %v5578_v20, %v2330_v53  ;;  %v1912_v45 = vsub.f32 %v5583_v52, %v5582_v56  ;;  %v3271_v58 = vpack.c.bf16 %v3018_v49, %v3018_v49  ;;  %v8604_v46 = vrot.slane %v7852_v47, 1  ;;  %v5584_v52 = vld [vmem:[%s5939_s28 + $0xf8] sm:$0xff] }
 0x3be   : > { %v2233_v18 = vsub.f32 0.0, %v2229_v14  ;;  %v1914_v4 = vsub.f32 %v5585_v62, %v5584_v52  ;;  %vm7883_vm7 = vcmp.eq.s32.totalorder %v2596_v42, 15 }
 0x3bf   : > { %v7872_v53 = vunpack.c.l.b16 %v3271_v58 }
 0x3c0   : > { %v2240_v59 = vmul.f32 1.442695, %v2233_v18  ;;  %v8740_v18 = vpack.c.b16 %v7529_v29, %v7527_v32  ;;  %v3277_v32 = vpack.c.bf16 %v7847_v21, %v7847_v21 }
 0x3c1   : > { %v5501_v33 = vpop.eup %5500 }
 0x3c2   : > { %v2244_v16 = vadd.f32 1.0, %v5501_v33  ;;  %5502 = vpow2.f32 %v2240_v59  ;;  %v2371_v59 = vadd.s32 256, %v6519_v25  ;;  %v3475_v58 = vunpack.c.l.b16 %v3277_v32 }
 0x3c3   : > { %v3556_v8 = vpop.permute.xlu2 %3555 }
 0x3c4   : > { %5504 = vrcp.f32 %v2244_v16  ;;  %v7862_v0 = vsel %vm852_vm0, %v8740_v18, %v3556_v8  ;;  %v2285_v33 = vand.u32 2147483647, %v2244_v16  ;;  %v2287_v49 = vand.u32 2147483648, %v2244_v16 }
 0x3c5   : > { %v3309_v8 = vpack.c.bf16 %v7852_v47, %v7852_v47  ;;  %v2603_v9 = vand.u32 15, %v2371_v59  ;;  %vm2281_vm5 = vweird.f32 %v2244_v16 }
 0x3c6   : > { %vm7879_vm6 = vcmp.eq.f32.partialorder %v2285_v33, 8.507059e+37  ;;  %v3511_v33 = vpack.c.b16 %v7867_v6, %v3475_v58 }
 0x3c7   : > { %vm7894_vm11 = vcmp.eq.s32.totalorder %v2603_v9, 0 }
 0x3c8   : > { %v5503_v24 = vpop.eup %5502 }
 0x3c9   : > { %v7854_v63 = vadd.f32 1.0, %v5503_v24 }
 0x3ca   : > { %v5505_v14 = vpop.eup %5504 }
 0x3cb   : > { %5506 = vrcp.f32 %v7854_v63  ;;  %3964 = vmatmul.bf16.gmra.mxu2 %v7862_v0  ;;  %v2277_v20 = vmul.f32 %v5505_v14, %v2244_v16  ;;  %vm2282_vm15 = vweird.f32 %v5505_v14  ;;  %vm2296_vm9 = vweird.f32 %v7854_v63 }
 0x3cc   : > { %v2063_v7 = vpop.permute.xlu1 %2062  ;;  %vm2283_vm8 = vmor %vm2281_vm5, %vm2282_vm15 }
 0x3cd   : > { %v2104_v41 = vmul.f32 %v2063_v7, %v1912_v45  ;;  %v2278_v23 = vsub.f32 1.0, %v2277_v20  ;;  %v7889_v7 = vpop.f32.mrf.mxu3 }
 0x3cf   : > { %v2136_v24 = vadd.f32 %v5582_v56, %v2104_v41  ;;  %v2279_v18 = vmul.f32 %v5505_v14, %v2278_v23  ;;  %v2288_v23 = vor.u32 1.1754944e-38, %v2287_v49 }
 0x3d1   : > { %v7887_v20 = vpop.eup %5506  ;;  %v2874_v56 = vrot.slane %v2136_v24, 7  ;;  %v3091_v59 = vrot.slane %v2136_v24, 1  ;;  %v2280_v41 = vadd.f32 %v5505_v14, %v2279_v18  ;;  %v3308_v62 = vpack.c.bf16 %v2136_v24, %v2136_v24 }
 0x3d2   : > { %v2292_v16 = vmul.f32 %v7887_v20, %v7854_v63  ;;  %vm2297_vm12 = vweird.f32 %v7887_v20 }
 0x3d3   : > { %v2284_v42 = vsel %vm2283_vm8, %v5505_v14, %v2280_v41  ;;  %v3506_v32 = vunpack.c.l.b16 %v3308_v62  ;;  %v3100_v2 = vsel %vm3096_vm2, %v3091_v59, %v8604_v46  ;;  %v3101_v49 = vsel %vm3096_vm2, %v3090_v57, %v3091_v59  ;;  %vm7942_vm13 = vmor %vm2296_vm9, %vm2297_vm12 }
 0x3d4   : > { %v2073_v24 = vpop.permute.xlu1 %2072  ;;  %v2289_v18 = vsel %vm7879_vm6, %v2288_v23, %v2284_v42  ;;  %v3236_v9 = vsel %vm7883_vm7, 0.0, %v3100_v2  ;;  %v3343_v29 = vpack.c.bf16 %v3101_v49, %v3101_v49  ;;  %v2293_v14 = vsub.f32 1.0, %v2292_v16  ;;  %v5230_v42 = vld [vmem:[%s8631_s30 + $0x40] sm:$0xff] }
 0x3d5   : > { %v2106_v41 = vmul.f32 %v2073_v24, %v1914_v4  ;;  %2322 = vperm.xlu1 %5359, %v2289_v18   ;;  %v3526_v62 = vpack.c.b16 %v3506_v32, %v3505_v60  ;;  %v3344_v44 = vpack.c.bf16 %v3236_v9, %v3236_v9  ;;  %v8747_v46 = vrot.slane %v7718_v30, 7  ;;  %v7948_v18 = vpop.f32.mrf.mxu3  ;;  %4245 = vmatpush.bf16.msrb.mxu3 %v5230_v42  ;;  %v5223_v42 = vld [vmem:[%s8631_s30 + $0x8] sm:$0xff] }
 0x3d6   : > { %v3631_v12 = vunpack.c.l.b16 %v3343_v29  ;;  %v2294_v57 = vmul.f32 %v7887_v20, %v2293_v14  ;;  %v8748_v2 = vrot.slane %v7852_v47, 7  ;;  %v2300_v59 = vand.u32 2147483647, %v7854_v63 }
 0x3d7   : > { %v2884_v35 = vsel %vm2879_vm10, %v8747_v46, %v2874_v56  ;;  %v7922_v60 = vadd.f32 %v5584_v52, %v2106_v41  ;;  %3559 = vrot.lane.b32.xlu0 %v3526_v62, %s5770_s7  ;;  %v3632_v30 = vunpack.c.l.b16 %v3344_v44  ;;  %v3507_v32 = vunpack.c.l.b16 %v3309_v8 }
 0x3d8   : > { %v3272_v45 = vpack.c.bf16 %v2884_v35, %v2884_v35  ;;  %v2883_v4 = vsel %vm2879_vm10, %v2874_v56, %v8748_v2  ;;  %v2295_v46 = vadd.f32 %v7887_v20, %v2294_v57  ;;  %v2302_v35 = vand.u32 2147483648, %v7854_v63 }
 0x3d9   : > { %v3020_v29 = vsel %vm7894_vm11, 0.0, %v2883_v4  ;;  %v8609_v52 = vrot.slane %v7922_v60, 7  ;;  %v8610_v56 = vrot.slane %v7922_v60, 1  ;;  %v7935_v16 = vpack.c.b16 %v3632_v30, %v3631_v12 }
 0x3da   : > { %v7931_v23 = vunpack.c.l.b16 %v3272_v45  ;;  %v3310_v44 = vpack.c.bf16 %v7922_v60, %v7922_v60  ;;  %v3273_v24 = vpack.c.bf16 %v3020_v29, %v3020_v29  ;;  %v2299_v12 = vsel %vm7942_vm13, %v7887_v20, %v2295_v46 }
 0x3db   : > { %8749 = vst [vmem:[#allocation19_spill] sm:$0xff] %v7935_v16  ;;  %5051 = vmatmul.msk.bf16.gmra.mxu3 %vm852_vm0, %v7935_v16  ;;  %v8752_v63 = vrot.slane %v7852_v47, 1  ;;  %v8753_v58 = vmov %v8748_v2  ;;  %v2303_v41 = vor.u32 1.1754944e-38, %v2302_v35  ;;  %v8754_v20 = vpack.c.b16 %v7688_v22, %v7686_v39  ;;  %v5255_v39 = vld [vmem:[%s8631_s30 + $0x108] sm:$0xff]  ;;  %v8002_v35 = vpop.f32.mrf.mxu2 }
 0x3dc   : > { %v3508_v6 = vunpack.c.l.b16 %v3310_v44  ;;  %v2882_v9 = vsel %vm2879_vm10, %v8753_v58, %v8609_v52  ;;  %v3558_v14 = vpop.permute.xlu1 %3557  ;;  %vm2301_vm14 = vcmp.eq.f32.partialorder %v2300_v59, 8.507059e+37  ;;  %v7977_v47 = vunpack.c.l.b16 %v3273_v24  ;;  %4522 = vmatpush.bf16.msrb.mxu2 %v5255_v39  ;;  %v5225_v39 = vld [vmem:[%s8631_s30 + $0x18] sm:$0xff] }
 0x3dd   : > { %v7961_v8 = vsel %vm3096_vm2, %v8752_v63, %v8610_v56  ;;  %v3274_v62 = vpack.c.bf16 %v2882_v9, %v2882_v9  ;;  %3529 = vrot.lane.b32.xlu1 %v3511_v33, %s5770_s7  ;;  %v7974_v57 = vsel %vm852_vm0, %v8754_v20, %v3558_v14  ;;  %v2304_v45 = vsel %vm2301_vm14, %v2303_v41, %v2299_v12  ;;  %v7995_v46 = vpop.f32.mrf.mxu3  ;;  %v5228_v9 = vld [vmem:[%s8631_s30 + $0x30] sm:$0xff]  ;;  %v5226_v20 = vld [vmem:[%s8631_s30 + $0x20] sm:$0xff] }
 0x3de   : > { %v3527_v28 = vpack.c.b16 %v3508_v6, %v3507_v32  ;;  %3969 = vmatmul.bf16.gmra.mxu2 %v7974_v57  ;;  %v8755_v30 = vpack.c.b16 %v7493_v17, %v7491_v15  ;;  %v5254_v32 = vld [vmem:[%s8631_s30 + $0x100] sm:$0xff]  ;;  %v5229_v6 = vld [vmem:[%s8631_s30 + $0x38] sm:$0xff]  ;;  %v2340_v4 = vadd.s32 8, %v6519_v25 }
 0x3df   : > { %v7979_v2 = vunpack.c.l.b16 %v3274_v62  ;;  %2327 = vperm.xlu0 %5358, %v2304_v45   ;;  %4149 = vmatpush.bf16.msra.mxu1 %v5229_v6  ;;  %v5227_v62 = vld [vmem:[%s8631_s30 + $0x28] sm:$0xff]  ;;  %v5222_v6 = vld [vmem:[%s8631_s30] sm:$0xff] }
 0x3e0   : > { %3561 = vrot.lane.b32.xlu2 %v3527_v28, %s5770_s7  ;;  %4523 = vmatpush.bf16.msrb.mxu2 %v5254_v32 }
 0x3e3   : > { %v8006_v15 = vpop.f32.mrf.mxu2  ;;  %4150 = vmatpush.bf16.msra.mxu1 %v5228_v9  ;;  %v5586_v9 = vld [vmem:[%s6021_s12 + $0x10] sm:$0xff] }
 0x3e4   : > { %v3536_v22 = vpop.permute.xlu1 %3535 }
 0x3e5   : > { %v7991_v29 = vsel %vm852_vm0, %v8755_v30, %v3536_v22  ;;  %v8000_v59 = vpop.f32.mrf.mxu3  ;;  %v5224_v22 = vld [vmem:[%s8631_s30 + $0x10] sm:$0xff] }
 0x3e6   : > { %3914 = vmatmul.bf16.gmra.mxu1 %v7991_v29  ;;  %4440 = vmatmul.bf16.gmra.mxu0 %v7991_v29 }
 0x3e7   : > { %4151 = vmatpush.bf16.msra.mxu1 %v5227_v62  ;;  %v5587_v62 = vld [vmem:[%s5949_s27 + $0x10] sm:$0xff] }
 0x3eb   : > { %v8011_v17 = vpop.f32.mrf.mxu2  ;;  %4152 = vmatpush.bf16.msra.mxu1 %v5226_v20  ;;  %v2308_v20 = vsub.f32 %v5587_v62, %v5586_v9 }
 0x3ed   : > { %v8004_v44 = vpop.f32.mrf.mxu3 }
 0x3ef   : > { %4153 = vmatpush.bf16.msra.mxu1 %v5225_v39  ;;  %v2372_v39 = vadd.s32 264, %v6519_v25 }
 0x3f1   : > { %v2610_v56 = vand.u32 15, %v2372_v39 }
 0x3f3   : > { %v8022_v24 = vpop.f32.mrf.mxu2  ;;  %4154 = vmatpush.bf16.msra.mxu1 %v5224_v22  ;;  %vm3057_vm3 = vcmp.eq.s32.totalorder %v2610_v56, 15 }
 0x3f4   : > { %8757 = vst [vmem:[#allocation26_spill] sm:$0xff] %v8022_v24 }
 0x3f5   : > { %v8013_v33 = vpop.f32.mrf.mxu3 }
 0x3f6   : > { %5037 = vmatmul.msk.bf16.vlgmr.msrb.gmra.mxu1 %vm852_vm0, %v7621_v1  ;;  %4445 = vmatmul.bf16.gmra.mxu0 %v7235_v37  ;;  %8756 = vst [vmem:[#allocation25_spill] sm:$0xff] %v8013_v33 }
 0x3f7   : > { %4155 = vmatpush.bf16.msra.mxu1 %v5223_v42 }
 0x3fb   : > { %v8029_v63 = vpop.f32.mrf.mxu2  ;;  %4156 = vmatpush.bf16.msra.mxu1 %v5222_v6 }
 0x3fc   : > { %8759 = vst [vmem:[#allocation28_spill] sm:$0xff] %v8029_v63 }
 0x3fd   : > { %v8024_v12 = vpop.f32.mrf.mxu3 }
 0x3fe   : > { %8758 = vst [vmem:[#allocation27_spill] sm:$0xff] %v8024_v12 }
 0x403   : > { %v8039_v41 = vpop.f32.mrf.mxu2 }
 0x404   : > { %8762 = vst [vmem:[#allocation31_spill] sm:$0xff] %v8039_v41 }
 0x405   : > { %v8031_v58 = vpop.f32.mrf.mxu3 }
 0x406   : > { %5038 = vmatmul.msk.bf16.gmra.mxu1 %vm852_vm0, %v7629_v38  ;;  %4450 = vmatmul.bf16.gmra.mxu0 %v7314_v36  ;;  %8760 = vst [vmem:[#allocation29_spill] sm:$0xff] %v8031_v58 }
 0x40b   : > { %v8047_v28 = vpop.f32.mrf.mxu2 }
 0x40c   : > { %8763 = vst [vmem:[#allocation32_spill] sm:$0xff] %v8047_v28 }
 0x40d   : > { %v8037_v14 = vpop.f32.mrf.mxu3 }
 0x40e   : > { %8761 = vst [vmem:[#allocation30_spill] sm:$0xff] %v8037_v14  ;;  %v2386_v14 = vand.u32 15, %v2340_v4  ;;  %v2374_v4 = vadd.s32 280, %v6519_v25 }
 0x410   : > { %vm8095_vm4 = vcmp.eq.s32.totalorder %v2386_v14, 15 }
 0x413   : > { %v8058_v30 = vpop.f32.mrf.mxu2 }
 0x414   : > { %8765 = vst [vmem:[#allocation34_spill] sm:$0xff] %v8058_v30  ;;  %v8769_v30 = vpack.c.b16 %v7931_v23, %v7872_v53  ;;  %v3345_v23 = vpack.c.bf16 %v7961_v8, %v7961_v8 }
 0x415   : > { %v8049_v45 = vpop.f32.mrf.mxu3 }
 0x416   : > { %4455 = vmatmul.bf16.gmra.mxu0 %v7415_v34  ;;  %8764 = vst [vmem:[#allocation33_spill] sm:$0xff] %v8049_v45  ;;  %v2373_v45 = vadd.s32 272, %v6519_v25 }
 0x41b   : > { %v8073_v52 = vpop.f32.mrf.mxu2 }
 0x41c   : > { %8767 = vst [vmem:[#allocation36_spill] sm:$0xff] %v8073_v52  ;;  %v5589_v52 = vld [vmem:[%s5949_s27 + $0x18] sm:$0xff] }
 0x41d   : > { %v8063_v32 = vpop.f32.mrf.mxu3 }
 0x41e   : > { %8766 = vst [vmem:[#allocation35_spill] sm:$0xff] %v8063_v32 }
 0x423   : > { %v8111_v16 = vpop.f32.mrf.mxu2 }
 0x425   : > { %v8075_v49 = vpop.f32.mrf.mxu3 }
 0x426   : > { %4460 = vmatmul.bf16.gmra.mxu0 %v7524_v40  ;;  %8768 = vst [vmem:[#allocation37_spill] sm:$0xff] %v8075_v49  ;;  %v5588_v49 = vld [vmem:[%s6021_s12 + $0x18] sm:$0xff]  ;;  %s8800_s12 = sld [smem:[#allocation56_spill]] }
 0x427   : > { %v2309_v58 = vsub.f32 %v5589_v52, %v5588_v49  ;;  %v8773_v52 = vrot.slane %v7290_v31, 1  ;;  %v2379_v31 = vand.u32 15, %v6519_v25 }
 0x429   : > { %vm2807_vm15 = vcmp.eq.s32.totalorder %v2379_v31, 0  ;;  %v8777_v31 = vpack.c.b16 %v7979_v2, %v7977_v47 }
 0x42d   : > { %v8104_v41 = vpop.f32.mrf.mxu3 }
 0x42e   : > { %8774 = vst [vmem:[#allocation38_spill] sm:$0xff] %v8104_v41 }
 0x436   : > { %4465 = vmatmul.bf16.gmra.mxu0 %v7601_v11 }
 0x446   : > { %4470 = vmatmul.bf16.gmra.mxu0 %v7799_v61 }
 0x447   : > { %v2323_v22 = vpop.permute.xlu1 %2322 }
 0x448   : > { %v2332_v42 = vmul.f32 %v2323_v22, %v2308_v20  ;;  %v3061_v20 = vrot.slane %v7690_v19, 1  ;;  %v2617_v22 = vand.u32 15, %v2373_v45  ;;  %v2843_v45 = vrot.slane %v7847_v21, 7 }
 0x449   : > { %v3560_v32 = vpop.permute.xlu0 %3559 }
 0x44a   : > { %v2336_v62 = vadd.f32 %v5586_v9, %v2332_v42  ;;  %v8082_v6 = vsel %vm852_vm0, %v8769_v30, %v3560_v32  ;;  %v8770_v9 = vrot.slane %v7922_v60, 1  ;;  %v3130_v42 = vsel %vm3096_vm2, %v3061_v20, %v8773_v52 }
 0x44b   : > { %3974 = vmatmul.bf16.gmra.mxu2 %v8082_v6  ;;  %vm2841_vm1 = vcmp.eq.s32.totalorder %v2617_v22, 0  ;;  %v2624_v52 = vand.u32 15, %v2374_v4 }
 0x44c   : > { %v3094_v28 = vrot.slane %v2336_v62, 1  ;;  %v2877_v39 = vrot.slane %v2336_v62, 7  ;;  %v3311_v33 = vpack.c.bf16 %v2336_v62, %v2336_v62 }
 0x44d   : > { %vm3059_vm5 = vcmp.eq.s32.totalorder %v2624_v52, 15 }
 0x44e   : > { %v3098_v53 = vsel %vm3096_vm2, %v8770_v9, %v3094_v28  ;;  %v3060_v9 = vrot.slane %v7847_v21, 1  ;;  %v8776_v21 = vrot.slane %v7690_v19, 7  ;;  %v3562_v19 = vpop.permute.xlu2 %3561 }
 0x44f   : > { %v3238_v30 = vsel %vm3057_vm3, 0.0, %v3098_v53  ;;  %v8775_v53 = vrot.slane %v7922_v60, 7 }
 0x450   : > { %v3346_v32 = vpack.c.bf16 %v3238_v30, %v3238_v30  ;;  %v3633_v30 = vunpack.c.l.b16 %v3345_v23  ;;  %v2914_v60 = vsel %vm2879_vm10, %v2843_v45, %v8776_v21 }
 0x451   : > { %v2328_v8 = vpop.permute.xlu0 %2327  ;;  %v2881_v14 = vsel %vm2879_vm10, %v8775_v53, %v2877_v39  ;;  %v3206_v53 = vsel %vm8095_vm4, 0.0, %v3130_v42 }
 0x452   : > { %v2333_v12 = vmul.f32 %v2328_v8, %v2309_v58  ;;  %v3634_v63 = vunpack.c.l.b16 %v3346_v32  ;;  %v3022_v22 = vsel %vm2841_vm1, 0.0, %v2881_v14  ;;  %v3131_v58 = vsel %vm3096_vm2, %v3060_v9, %v3061_v20 }
 0x453   : > { %v3275_v62 = vpack.c.bf16 %v3022_v22, %v3022_v22 }
 0x454   : > { %v2337_v24 = vadd.f32 %v5588_v49, %v2333_v12  ;;  %v8114_v41 = vpack.c.b16 %v3634_v63, %v3633_v30  ;;  %v3509_v12 = vunpack.c.l.b16 %v3311_v33  ;;  %v3242_v63 = vpack.c.bf16 %v2914_v60, %v2914_v60  ;;  %v8135_v33 = vpop.f32.mrf.mxu2  ;;  %v8143_v60 = vpop.f32.mrf.mxu3 }
 0x456   : > { %v2878_v23 = vrot.slane %v2337_v24, 7  ;;  %v3095_v32 = vrot.slane %v2337_v24, 1  ;;  %5052 = vmatmul.msk.bf16.gmra.mxu3 %vm852_vm0, %v8114_v41  ;;  %4475 = vmatmul.bf16.gmra.mxu0 %v7812_v5  ;;  %v3312_v49 = vpack.c.bf16 %v2337_v24, %v2337_v24  ;;  %v3386_v2 = vunpack.c.l.b16 %v3242_v63 }
 0x458   : > { %v2915_v4 = vsel %vm2879_vm10, %v2878_v23, %v2843_v45  ;;  %v3510_v56 = vunpack.c.l.b16 %v3312_v49  ;;  %v2880_v20 = vsel %vm2879_vm10, %v2877_v39, %v2878_v23  ;;  %v3097_v42 = vsel %vm3096_vm2, %v3094_v28, %v3095_v32 }
 0x459   : > { %v2988_v8 = vsel %vm2807_vm15, 0.0, %v2915_v4  ;;  %v3276_v14 = vpack.c.bf16 %v2880_v20, %v2880_v20  ;;  %v3132_v24 = vsel %vm3096_vm2, %v3095_v32, %v3060_v9  ;;  %v3347_v30 = vpack.c.bf16 %v3097_v42, %v3097_v42  ;;  %v3530_v4 = vpop.permute.xlu1 %3529 }
 0x45a   : > { %v8141_v45 = vsel %vm852_vm0, %v8777_v31, %v3562_v19  ;;  %v3528_v52 = vpack.c.b16 %v3510_v56, %v3509_v12  ;;  %v3241_v21 = vpack.c.bf16 %v2988_v8, %v2988_v8  ;;  %v3240_v39 = vsel %vm3059_vm5, 0.0, %v3132_v24  ;;  %v8778_v31 = vld [vmem:[#allocation20_spill] sm:$0xff] }
 0x45b   : > { %3979 = vmatmul.bf16.gmra.mxu2 %v8141_v45  ;;  %v8146_v28 = vunpack.c.l.b16 %v3275_v62  ;;  %v8148_v25 = vunpack.c.l.b16 %v3276_v14  ;;  %v3348_v9 = vpack.c.bf16 %v3240_v39, %v3240_v39  ;;  %v8150_v22 = vunpack.c.l.b16 %v3347_v30  ;;  %v8187_v39 = vpop.f32.mrf.mxu0 }
 0x45c   : > { %v3313_v23 = vpack.c.bf16 %v3131_v58, %v3131_v58  ;;  %3563 = vrot.lane.b32.xlu2 %v3528_v52, %s5770_s7  ;;  %v3385_v47 = vunpack.c.l.b16 %v3241_v21  ;;  %v3314_v19 = vpack.c.bf16 %v3206_v53, %v3206_v53  ;;  %v8160_v42 = vpop.f32.mrf.mxu2  ;;  %v8162_v63 = vpop.f32.mrf.mxu3 }
 0x45d   : > { %v8155_v49 = vunpack.c.l.b16 %v3348_v9  ;;  %v8182_v52 = vpop.f32.mrf.mxu1 }
 0x45e   : > { %v3421_v12 = vpack.c.b16 %v3386_v2, %v3385_v47  ;;  %v3601_v56 = vunpack.c.l.b16 %v3313_v23  ;;  %v3602_v58 = vunpack.c.l.b16 %v3314_v19 }
 0x460   : > { %v3657_v20 = vsel %vm852_vm0, %v3421_v12, %v3530_v4  ;;  %v3637_v8 = vpack.c.b16 %v3602_v58, %v3601_v56 }
 0x461   : > { %4157 = vmatmul.bf16.vlgmr.msra.gmra.mxu1 %v3657_v20 }
 0x463   : > { %v8200_v23 = vpop.f32.mrf.mxu0 }
 0x464   : > { %v8168_v53 = vpop.f32.mrf.mxu2  ;;  %v8170_v14 = vpop.f32.mrf.mxu3 }
 0x466   : > { %5101 = vmatmul.msk.bf16.vlgmr.msrb.gmra.mxu3 %vm852_vm0, %v3637_v8  ;;  %4480 = vmatmul.bf16.gmra.mxu0 %v7667_v48 }
 0x46b   : > { %5189 = vmatmul.msk.bf16.vlgmr.msrb.gmra.mxu2 %vm852_vm0, %v7629_v38  ;;  %v8207_v2 = vpop.f32.mrf.mxu0 }
 0x46c   : > { %v8176_v24 = vpop.f32.mrf.mxu2  ;;  %v8178_v30 = vpop.f32.mrf.mxu3 }
 0x471   : > { %4162 = vmatmul.bf16.gmra.mxu1 %v7789_v10 }
 0x473   : > { %v8220_v4 = vpop.f32.mrf.mxu0 }
 0x474   : > { %v8185_v21 = vpop.f32.mrf.mxu2  ;;  %v8189_v10 = vpop.f32.mrf.mxu3 }
 0x475   : > { %8779 = vst [vmem:[#allocation20_spill] sm:$0xff] %v8189_v10 }
 0x476   : > { %5102 = vmatmul.msk.bf16.gmra.mxu3 %vm852_vm0, %v7621_v1  ;;  %4485 = vmatmul.bf16.gmra.mxu0 %v7835_v43  ;;  %v8194_v1 = vpop.f32.mrf.mxu1 }
 0x47b   : > { %5190 = vmatmul.msk.bf16.gmra.mxu2 %vm852_vm0, %v8778_v31  ;;  %v8232_v58 = vpop.f32.mrf.mxu0 }
 0x47c   : > { %v8198_v9 = vpop.f32.mrf.mxu2 }
 0x47d   : > { %8780 = vst [vmem:[#allocation39_spill] sm:$0xff] %v8198_v9 }
 0x47e   : > { %v8205_v47 = vpop.f32.mrf.mxu1 }
 0x481   : > { %4167 = vmatmul.bf16.gmra.mxu1 %v7826_v54  ;;  %v8202_v54 = vpop.f32.mrf.mxu3 }
 0x482   : > { %8781 = vst [vmem:[#allocation40_spill] sm:$0xff] %v8202_v54 }
 0x486   : > { %5103 = vmatmul.msk.bf16.gmra.mxu3 %vm852_vm0, %v7629_v38  ;;  %4490 = vmatmul.bf16.gmra.mxu0 %v7862_v0  ;;  %v8209_v38 = vpop.f32.mrf.mxu2  ;;  %v8218_v12 = vpop.f32.mrf.mxu1 }
 0x487   : > { %8782 = vst [vmem:[#allocation41_spill] sm:$0xff] %v8209_v38 }
 0x489   : > { %v8214_v19 = vpop.f32.mrf.mxu3 }
 0x48a   : > { %8783 = vst [vmem:[#allocation42_spill] sm:$0xff] %v8214_v19 }
 0x48b   : > { %5191 = vmatmul.msk.bf16.gmra.mxu2 %vm852_vm0, %v6768_v26 }
 0x48e   : > { %v8227_v20 = vpop.f32.mrf.mxu1 }
 0x491   : > { %4172 = vmatmul.bf16.gmra.mxu1 %v7991_v29  ;;  %v8222_v29 = vpop.f32.mrf.mxu2  ;;  %v8224_v56 = vpop.f32.mrf.mxu3 }
 0x492   : > { %8784 = vst [vmem:[#allocation43_spill] sm:$0xff] %v8222_v29 }
 0x493   : > { %8785 = vst [vmem:[#allocation44_spill] sm:$0xff] %v8224_v56 }
 0x496   : > { %5104 = vmatmul.msk.bf16.gmra.mxu3 %vm852_vm0, %v8778_v31  ;;  %4495 = vmatmul.bf16.gmra.mxu0 %v7974_v57  ;;  %v8240_v62 = vpop.f32.mrf.mxu1 }
 0x499   : > { %v8234_v8 = vpop.f32.mrf.mxu2  ;;  %v8236_v31 = vpop.f32.mrf.mxu3 }
 0x49a   : > { %8786 = vst [vmem:[#allocation45_spill] sm:$0xff] %v8234_v8 }
 0x49b   : > { %5192 = vmatmul.msk.bf16.gmra.mxu2 %vm852_vm0, %v6887_v13  ;;  %8787 = vst [vmem:[#allocation46_spill] sm:$0xff] %v8236_v31  ;;  %v8790_v31 = vld [vmem:[#allocation21_spill] sm:$0xff] }
 0x49e   : > { %v3994_v56 = vpop.f32.mrf.mxu1 }
 0x4a1   : > { %4177 = vmatmul.bf16.gmra.mxu1 %v7235_v37  ;;  %v8243_v37 = vpop.f32.mrf.mxu0  ;;  %v8245_v32 = vpop.f32.mrf.mxu2 }
 0x4a2   : > { %8788 = vst [vmem:[#allocation47_spill] sm:$0xff] %v8245_v32 }
 0x4a6   : > { %5105 = vmatmul.msk.bf16.gmra.mxu3 %vm852_vm0, %v6768_v26  ;;  %4500 = vmatmul.bf16.gmra.mxu0 %v8082_v6  ;;  %v8247_v26 = vpop.f32.mrf.mxu3  ;;  %v3996_v32 = vpop.f32.mrf.mxu1 }
 0x4a7   : > { %8789 = vst [vmem:[#allocation48_spill] sm:$0xff] %v8247_v26 }
 0x4a9   : > { %v8254_v8 = vpop.f32.mrf.mxu2  ;;  %v8256_v19 = vpop.f32.mrf.mxu0 }
 0x4aa   : > { %8791 = vst [vmem:[#allocation21_spill] sm:$0xff] %v8254_v8 }
 0x4ab   : > { %5193 = vmatmul.msk.bf16.gmra.mxu2 %vm852_vm0, %v6982_v27 }
 0x4b1   : > { %4182 = vmatmul.bf16.gmra.mxu1 %v7314_v36  ;;  %v8258_v36 = vpop.f32.mrf.mxu3  ;;  %v8267_v54 = vpop.f32.mrf.mxu0 }
 0x4b2   : > { %8792 = vst [vmem:[#allocation49_spill] sm:$0xff] %v8258_v36  ;;  %v8796_v36 = vld [vmem:[#allocation22_spill] sm:$0xff] }
 0x4b6   : > { %4505 = vmatmul.bf16.gmra.mxu0 %v8141_v45  ;;  %5106 = vmatmul.msk.bf16.gmra.mxu3 %vm852_vm0, %v6887_v13  ;;  %v3564_v29 = vpop.permute.xlu2 %3563  ;;  %v8793_v45 = vpack.c.b16 %v8148_v25, %v8146_v28  ;;  %v8265_v13 = vpop.f32.mrf.mxu2 }
 0x4b7   : > { %8794 = vst [vmem:[#allocation50_spill] sm:$0xff] %v8265_v13 }
 0x4b8   : > { %v3725_v26 = vsel %vm852_vm0, %v8793_v45, %v3564_v29 }
 0x4b9   : > { %v8271_v8 = vpop.f32.mrf.mxu3 }
 0x4ba   : > { %8795 = vst [vmem:[#allocation51_spill] sm:$0xff] %v8271_v8 }
 0x4bb   : > { %5194 = vmatmul.msk.bf16.gmra.mxu2 %vm852_vm0, %v8790_v31 }
 0x4c1   : > { %4187 = vmatmul.bf16.gmra.mxu1 %v7415_v34  ;;  %v3999_v34 = vpop.f32.mrf.mxu1  ;;  %v4066_v10 = vpop.f32.mrf.mxu3 }
 0x4c6   : > { %5107 = vmatmul.msk.bf16.gmra.mxu3 %vm852_vm0, %v6982_v27  ;;  %4510 = vmatmul.bf16.gmra.mxu0 %v3725_v26 }
 0x4c9   : > { %v4001_v28 = vpop.f32.mrf.mxu1 }
 0x4cb   : > { %5195 = vmatmul.msk.bf16.gmra.mxu2 %vm852_vm0, %v8796_v36 }
 0x4ce   : > { %v8275_v38 = vpop.f32.mrf.mxu2 }
 0x4cf   : > { %8797 = vst [vmem:[#allocation22_spill] sm:$0xff] %v8275_v38 }
 0x4d1   : > { %4192 = vmatmul.bf16.gmra.mxu1 %v7524_v40 }
 0x4d6   : > { %v3977_v25 = vpop.f32.mrf.mxu2  ;;  %5108 = vmatmul.msk.bf16.gmra.mxu3 %vm852_vm0, %v8790_v31  ;;  %v3995_v31 = vadd.f32 %v3994_v56, %v8182_v52  ;;  %v3997_v52 = vadd.f32 %v3996_v32, %v8194_v1 }
 0x4d7   : > { %v8280_v29 = vadd.f32 %v4066_v10, %v3977_v25 }
 0x4d9   : > { %8798 = vst [vmem:[#allocation52_spill] sm:$0xff] %v8280_v29  ;;  %v4069_v27 = vpop.f32.mrf.mxu3  ;;  %v8298_v29 = vld [vmem:[%s8800_s12] ss:$0 sm:$0xff] }
 0x4db   : > { %5196 = vmatmul.msk.bf16.gmra.mxu2 %vm852_vm0, %v7432_v50 }
 0x4de   : > { %v3980_v26 = vpop.f32.mrf.mxu2  ;;  %v4158_v45 = vpop.f32.mrf.mxu1 }
 0x4df   : > { %v8284_v8 = vadd.f32 %v4069_v27, %v3980_v26  ;;  %v4159_v25 = vadd.f32 %v4158_v45, %v3995_v31 }
 0x4e1   : > { %8799 = vst [vmem:[#allocation53_spill] sm:$0xff] %v8284_v8  ;;  %v4071_v13 = vpop.f32.mrf.mxu3  ;;  %4197 = vmatmul.bf16.gmra.mxu1 %v7601_v11 }
 0x4e6   : > { %v3982_v38 = vpop.f32.mrf.mxu2  ;;  %v4160_v40 = vpop.f32.mrf.mxu1  ;;  %5109 = vmatmul.msk.bf16.gmra.mxu3 %vm852_vm0, %v8796_v36 }
 0x4e7   : > { %v8289_v9 = vadd.f32 %v4071_v13, %v3982_v38  ;;  %v4161_v13 = vadd.f32 %v4160_v40, %v3997_v52  ;;  %v4000_v40 = vadd.f32 %v3999_v34, %v8205_v47  ;;  %v4002_v34 = vadd.f32 %v4001_v28, %v8218_v12 }
 0x4e8   : > { %v4005_v12 = vadd.f32 %v7889_v7, %v8227_v20  ;;  %v4007_v7 = vadd.f32 %v7948_v18, %v8240_v62  ;;  %v4010_v18 = vadd.f32 %v7995_v46, %v8002_v35  ;;  %v4012_v35 = vadd.f32 %v8000_v59, %v8006_v15 }
 0x4e9   : > { %v4247_v10 = vpop.f32.mrf.mxu3  ;;  %v4015_v59 = vadd.f32 %v8004_v44, %v8011_v17  ;;  %v8803_v17 = vld [vmem:[#allocation26_spill] sm:$0xff] }
 0x4ea   : > { %v4248_v8 = vadd.f32 %v4247_v10, %v4159_v25 }
 0x4eb   : > { %5197 = vmatmul.msk.bf16.gmra.mxu2 %vm852_vm0, %v7504_v51 }
 0x4ee   : > { %v4163_v27 = vpop.f32.mrf.mxu1  ;;  %v4525_v26 = vpop.f32.mrf.mxu2 }
 0x4ef   : > { %v4526_v11 = vadd.f32 %v4525_v26, %v8187_v39 }
 0x4f1   : > { %v4605_v38 = vadd.f32 %v4526_v11, %v4248_v8  ;;  %4202 = vmatmul.bf16.gmra.mxu1 %v7799_v61  ;;  %v4249_v36 = vpop.f32.mrf.mxu3 }
 0x4f2   : > { %v4250_v61 = vadd.f32 %v4249_v36, %v4161_v13 }
 0x4f3   : > { %v4641_v56 = vadd.f32 %v8298_v29, %v4605_v38  ;;  %v8316_v38 = vpop.f32.mrf.mxu0 }
 0x4f5   : > { %v4673_v45 = vmax.f32 %v4641_v56, 0.0 }
 0x4f6   : > { %v4165_v31 = vpop.f32.mrf.mxu1  ;;  %5110 = vmatmul.msk.bf16.gmra.mxu3 %vm852_vm0, %v7432_v50  ;;  %v4527_v39 = vpop.f32.mrf.mxu2  ;;  %v4164_v50 = vadd.f32 %v4163_v27, %v4000_v40 }
 0x4f7   : > { %4705 = vst.msk [vmem:[%s8307_s11] sm:$0xff] %vm852_vm0, %v4673_v45  ;;  %v4528_v8 = vadd.f32 %v4527_v39, %v8200_v23  ;;  %v4166_v27 = vadd.f32 %v4165_v31, %v4002_v34 }
 0x4f9   : > { %v4606_v32 = vadd.f32 %v4528_v8, %v4250_v61  ;;  %v4252_v1 = vpop.f32.mrf.mxu3 }
 0x4fa   : > { %v4253_v36 = vadd.f32 %v4252_v1, %v4164_v50 }
 0x4fb   : > { %v4642_v10 = vadd.f32 %v8298_v29, %v4606_v32  ;;  %5198 = vmatmul.msk.bf16.gmra.mxu2 %vm852_vm0, %v7282_v3  ;;  %v8329_v8 = vpop.f32.mrf.mxu0 }
 0x4fd   : > { %v4674_v25 = vmax.f32 %v4642_v10, 0.0 }
 0x4fe   : > { %v4168_v26 = vpop.f32.mrf.mxu1  ;;  %v4530_v11 = vpop.f32.mrf.mxu2 }
 0x4ff   : > { %4706 = vst.msk [vmem:[%s8307_s11 + $0x8] sm:$0xff] %vm852_vm0, %v4674_v25  ;;  %v4531_v23 = vadd.f32 %v4530_v11, %v8207_v2  ;;  %v4169_v31 = vadd.f32 %v4168_v26, %v4005_v12 }
 0x501   : > { %v4607_v52 = vadd.f32 %v4531_v23, %v4253_v36  ;;  %4207 = vmatmul.bf16.gmra.mxu1 %v7812_v5  ;;  %v4254_v47 = vpop.f32.mrf.mxu3 }
 0x502   : > { %v4255_v61 = vadd.f32 %v4254_v47, %v4166_v27 }
 0x503   : > { %v4643_v56 = vadd.f32 %v8298_v29, %v4607_v52  ;;  %v8342_v20 = vpop.f32.mrf.mxu0 }
 0x505   : > { %v4675_v13 = vmax.f32 %v4643_v56, 0.0  ;;  %v8801_v56 = vld [vmem:[#allocation23_spill] sm:$0xff] }
 0x506   : > { %v4170_v45 = vpop.f32.mrf.mxu1  ;;  %5111 = vmatmul.msk.bf16.gmra.mxu3 %vm852_vm0, %v7504_v51  ;;  %v4532_v39 = vpop.f32.mrf.mxu2 }
 0x507   : > { %4707 = vst.msk [vmem:[%s8307_s11 + $0x10] sm:$0xff] %vm852_vm0, %v4675_v13  ;;  %v4533_v2 = vadd.f32 %v4532_v39, %v8220_v4  ;;  %v4171_v11 = vadd.f32 %v4170_v45, %v4007_v7 }
 0x509   : > { %v4608_v5 = vadd.f32 %v4533_v2, %v4255_v61  ;;  %v4257_v32 = vpop.f32.mrf.mxu3 }
 0x50a   : > { %v4258_v4 = vadd.f32 %v4257_v32, %v4169_v31 }
 0x50b   : > { %v4644_v28 = vadd.f32 %v8298_v29, %v4608_v5  ;;  %5199 = vmatmul.msk.bf16.gmra.mxu2 %vm852_vm0, %v7646_v55  ;;  %v8355_v27 = vpop.f32.mrf.mxu0 }
 0x50d   : > { %v4676_v51 = vmax.f32 %v4644_v28, 0.0 }
 0x50e   : > { %v4173_v1 = vpop.f32.mrf.mxu1  ;;  %v4535_v40 = vpop.f32.mrf.mxu2 }
 0x50f   : > { %4708 = vst.msk [vmem:[%s8307_s11 + $0x18] sm:$0xff] %vm852_vm0, %v4676_v51  ;;  %v4536_v10 = vadd.f32 %v4535_v40, %v8232_v58  ;;  %v4174_v13 = vadd.f32 %v4173_v1, %v4010_v18 }
 0x511   : > { %v4609_v50 = vadd.f32 %v4536_v10, %v4258_v4  ;;  %4212 = vmatmul.bf16.gmra.mxu1 %v7667_v48  ;;  %v4259_v25 = vpop.f32.mrf.mxu3  ;;  %v8802_v4 = vld [vmem:[#allocation24_spill] sm:$0xff] }
 0x512   : > { %v4260_v58 = vadd.f32 %v4259_v25, %v4171_v11 }
 0x513   : > { %v4645_v26 = vadd.f32 %v8298_v29, %v4609_v50  ;;  %v8366_v51 = vpop.f32.mrf.mxu0 }
 0x515   : > { %v4677_v36 = vmax.f32 %v4645_v26, 0.0 }
 0x516   : > { %v4175_v23 = vpop.f32.mrf.mxu1  ;;  %5112 = vmatmul.msk.bf16.gmra.mxu3 %vm852_vm0, %v7282_v3  ;;  %v4537_v52 = vpop.f32.mrf.mxu2 }
 0x517   : > { %4709 = vst.msk [vmem:[%s8307_s11 + $0x20] sm:$0xff] %vm852_vm0, %v4677_v36  ;;  %v4538_v48 = vadd.f32 %v4537_v52, %v8243_v37  ;;  %v4176_v32 = vadd.f32 %v4175_v23, %v4012_v35  ;;  %v8804_v36 = vld [vmem:[#allocation25_spill] sm:$0xff] }
 0x518   : > { %v4017_v23 = vadd.f32 %v8804_v36, %v8803_v17 }
 0x519   : > { %v4610_v47 = vadd.f32 %v4538_v48, %v4260_v58  ;;  %v4262_v34 = vpop.f32.mrf.mxu3 }
 0x51a   : > { %v4263_v37 = vadd.f32 %v4262_v34, %v4174_v13  ;;  %v8805_v13 = vld [vmem:[#allocation28_spill] sm:$0xff] }
 0x51b   : > { %v4646_v62 = vadd.f32 %v8298_v29, %v4610_v47  ;;  %5200 = vmatmul.msk.bf16.gmra.mxu2 %vm852_vm0, %v8801_v56  ;;  %v8379_v26 = vpop.f32.mrf.mxu0 }
 0x51d   : > { %v4678_v3 = vmax.f32 %v4646_v62, 0.0 }
 0x51e   : > { %v4178_v45 = vpop.f32.mrf.mxu1  ;;  %v4540_v39 = vpop.f32.mrf.mxu2 }
 0x51f   : > { %4710 = vst.msk [vmem:[%s8307_s11 + $0x28] sm:$0xff] %vm852_vm0, %v4678_v3  ;;  %v4541_v61 = vadd.f32 %v4540_v39, %v8256_v19  ;;  %v4179_v10 = vadd.f32 %v4178_v45, %v4015_v59  ;;  %v8806_v3 = vld [vmem:[#allocation27_spill] sm:$0xff] }
 0x520   : > { %v4020_v45 = vadd.f32 %v8806_v3, %v8805_v13 }
 0x521   : > { %v4611_v2 = vadd.f32 %v4541_v61, %v4263_v37  ;;  %4217 = vmatmul.bf16.gmra.mxu1 %v7835_v43  ;;  %v4264_v46 = vpop.f32.mrf.mxu3  ;;  %v8807_v61 = vld [vmem:[#allocation19_spill] sm:$0xff] }
 0x522   : > { %v4265_v19 = vadd.f32 %v4264_v46, %v4176_v32 }
 0x523   : > { %v4647_v5 = vadd.f32 %v8298_v29, %v4611_v2  ;;  %v4471_v39 = vpop.f32.mrf.mxu0 }
 0x525   : > { %v4679_v12 = vmax.f32 %v4647_v5, 0.0 }
 0x526   : > { %v4180_v28 = vpop.f32.mrf.mxu1  ;;  %5113 = vmatmul.msk.bf16.gmra.mxu3 %vm852_vm0, %v7646_v55  ;;  %v4542_v31 = vpop.f32.mrf.mxu2 }
 0x527   : > { %4711 = vst.msk [vmem:[%s8307_s11 + $0x30] sm:$0xff] %vm852_vm0, %v4679_v12  ;;  %v4543_v43 = vadd.f32 %v4542_v31, %v8267_v54  ;;  %v4181_v58 = vadd.f32 %v4180_v28, %v4017_v23  ;;  %v8808_v28 = vld [vmem:[#allocation31_spill] sm:$0xff]  ;;  %v8809_v31 = vld [vmem:[#allocation29_spill] sm:$0xff] }
 0x529   : > { %v4612_v1 = vadd.f32 %v4543_v43, %v4265_v19  ;;  %v4267_v40 = vpop.f32.mrf.mxu3  ;;  %v4022_v19 = vadd.f32 %v8809_v31, %v8808_v28 }
 0x52a   : > { %v4268_v7 = vadd.f32 %v4267_v40, %v4179_v10 }
 0x52b   : > { %v4648_v15 = vadd.f32 %v8298_v29, %v4612_v1  ;;  %5201 = vmatmul.msk.bf16.gmra.mxu2 %vm852_vm0, %v8802_v4  ;;  %v4473_v1 = vpop.f32.mrf.mxu0 }
 0x52d   : > { %v4680_v55 = vmax.f32 %v4648_v15, 0.0 }
 0x52e   : > { %v4183_v50 = vpop.f32.mrf.mxu1  ;;  %v4545_v25 = vpop.f32.mrf.mxu2 }
 0x52f   : > { %4712 = vst.msk [vmem:[%s8307_s11 + $0x38] sm:$0xff] %vm852_vm0, %v4680_v55  ;;  %v4546_v54 = vadd.f32 %v4545_v25, %v8316_v38  ;;  %v4184_v2 = vadd.f32 %v4183_v50, %v4020_v45  ;;  %v8810_v25 = vld [vmem:[#allocation32_spill] sm:$0xff] }
 0x531   : > { %v4613_v11 = vadd.f32 %v4546_v54, %v4268_v7  ;;  %4222 = vmatmul.bf16.gmra.mxu1 %v7862_v0  ;;  %v4269_v44 = vpop.f32.mrf.mxu3  ;;  %v8811_v7 = vld [vmem:[#allocation30_spill] sm:$0xff] }
 0x532   : > { %v4270_v38 = vadd.f32 %v4269_v44, %v4181_v58  ;;  %v4025_v54 = vadd.f32 %v8811_v7, %v8810_v25 }
 0x533   : > { %v4649_v52 = vadd.f32 %v8298_v29, %v4613_v11  ;;  %v4476_v23 = vpop.f32.mrf.mxu0 }
 0x535   : > { %v4681_v48 = vmax.f32 %v4649_v52, 0.0 }
 0x536   : > { %v4185_v47 = vpop.f32.mrf.mxu1  ;;  %5114 = vmatmul.msk.bf16.gmra.mxu3 %vm852_vm0, %v8801_v56  ;;  %v4547_v34 = vpop.f32.mrf.mxu2 }
 0x537   : > { %4713 = vst.msk [vmem:[%s8307_s11 + $0x40] sm:$0xff] %vm852_vm0, %v4681_v48  ;;  %v4548_v18 = vadd.f32 %v4547_v34, %v8329_v8  ;;  %v4186_v40 = vadd.f32 %v4185_v47, %v4022_v19  ;;  %v8812_v47 = vld [vmem:[#allocation34_spill] sm:$0xff]  ;;  %v8813_v34 = vld [vmem:[#allocation33_spill] sm:$0xff] }
 0x539   : > { %v4614_v0 = vadd.f32 %v4548_v18, %v4270_v38  ;;  %v4272_v62 = vpop.f32.mrf.mxu3  ;;  %v4027_v38 = vadd.f32 %v8813_v34, %v8812_v47 }
 0x53a   : > { %v4273_v5 = vadd.f32 %v4272_v62, %v4184_v2  ;;  %v8814_v2 = vld [vmem:[#allocation36_spill] sm:$0xff] }
 0x53b   : > { %v4650_v37 = vadd.f32 %v8298_v29, %v4614_v0  ;;  %5202 = vmatmul.msk.bf16.gmra.mxu2 %vm852_vm0, %v8807_v61 }
 0x53d   : > { %v4682_v46 = vmax.f32 %v4650_v37, 0.0 }
 0x53e   : > { %v4188_v56 = vpop.f32.mrf.mxu1  ;;  %v4550_v35 = vpop.f32.mrf.mxu2 }
 0x53f   : > { %4714 = vst.msk [vmem:[%s8307_s11 + $0x48] sm:$0xff] %vm852_vm0, %v4682_v46  ;;  %v4551_v8 = vadd.f32 %v4550_v35, %v8342_v20  ;;  %v4189_v44 = vadd.f32 %v4188_v56, %v4025_v54  ;;  %v8815_v46 = vld [vmem:[#allocation35_spill] sm:$0xff] }
 0x540   : > { %v4030_v56 = vadd.f32 %v8815_v46, %v8814_v2 }
 0x541   : > { %v4615_v32 = vadd.f32 %v4551_v8, %v4273_v5  ;;  %4227 = vmatmul.bf16.gmra.mxu1 %v7974_v57  ;;  %v4274_v12 = vpop.f32.mrf.mxu3  ;;  %v8816_v5 = vpack.c.b16 %v8155_v49, %v8150_v22 }
 0x542   : > { %v4275_v20 = vadd.f32 %v4274_v12, %v4186_v40 }
 0x543   : > { %v4651_v43 = vadd.f32 %v8298_v29, %v4615_v32 }
 0x545   : > { %v4683_v59 = vmax.f32 %v4651_v43, 0.0  ;;  %v8817_v43 = vld [vmem:[#allocation37_spill] sm:$0xff] }
 0x546   : > { %v4190_v15 = vpop.f32.mrf.mxu1  ;;  %5115 = vmatmul.msk.bf16.gmra.mxu3 %vm852_vm0, %v8802_v4  ;;  %v4552_v10 = vpop.f32.mrf.mxu2  ;;  %v4032_v40 = vadd.f32 %v8817_v43, %v8111_v16 }
 0x547   : > { %4715 = vst.msk [vmem:[%s8307_s11 + $0x50] sm:$0xff] %vm852_vm0, %v4683_v59  ;;  %v4553_v57 = vadd.f32 %v4552_v10, %v8355_v27  ;;  %v4191_v18 = vadd.f32 %v4190_v15, %v4027_v38 }
 0x549   : > { %v4616_v55 = vadd.f32 %v4553_v57, %v4275_v20  ;;  %v4277_v50 = vpop.f32.mrf.mxu3 }
 0x54a   : > { %v4278_v52 = vadd.f32 %v4277_v50, %v4189_v44 }
 0x54b   : > { %v4652_v11 = vadd.f32 %v8298_v29, %v4616_v55  ;;  %5203 = vmatmul.msk.bf16.gmra.mxu2 %vm852_vm0, %v8114_v41 }
 0x54d   : > { %v4684_v17 = vmax.f32 %v4652_v11, 0.0 }
 0x54e   : > { %v4193_v36 = vpop.f32.mrf.mxu1  ;;  %v4555_v4 = vpop.f32.mrf.mxu2 }
 0x54f   : > { %4716 = vst.msk [vmem:[%s8307_s11 + $0x58] sm:$0xff] %vm852_vm0, %v4684_v17  ;;  %v4556_v27 = vadd.f32 %v4555_v4, %v8366_v51 }
 0x551   : > { %v4617_v58 = vadd.f32 %v4556_v27, %v4278_v52  ;;  %4232 = vmatmul.bf16.gmra.mxu1 %v8082_v6  ;;  %v4279_v48 = vpop.f32.mrf.mxu3  ;;  %v4478_v6 = vpop.f32.mrf.mxu0 }
 0x552   : > { %v4280_v51 = vadd.f32 %v4279_v48, %v4191_v18 }
 0x553   : > { %v4653_v41 = vadd.f32 %v8298_v29, %v4617_v58 }
 0x555   : > { %v4685_v0 = vmax.f32 %v4653_v41, 0.0 }
 0x556   : > { %v4195_v62 = vpop.f32.mrf.mxu1  ;;  %5116 = vmatmul.msk.bf16.gmra.mxu3 %vm852_vm0, %v8807_v61  ;;  %v4557_v13 = vpop.f32.mrf.mxu2  ;;  %v4194_v61 = vadd.f32 %v4193_v36, %v4030_v56 }
 0x557   : > { %4717 = vst.msk [vmem:[%s8307_s11 + $0x60] sm:$0xff] %vm852_vm0, %v4685_v0  ;;  %v4558_v3 = vadd.f32 %v4557_v13, %v8379_v26  ;;  %v4196_v22 = vadd.f32 %v4195_v62, %v4032_v40 }
 0x559   : > { %v4618_v45 = vadd.f32 %v4558_v3, %v4280_v51  ;;  %v4282_v37 = vpop.f32.mrf.mxu3  ;;  %v4481_v59 = vpop.f32.mrf.mxu0 }
 0x55a   : > { %v4283_v26 = vadd.f32 %v4282_v37, %v4194_v61 }
 0x55b   : > { %v4654_v35 = vadd.f32 %v8298_v29, %v4618_v45  ;;  %5204 = vmatmul.msk.bf16.gmra.mxu2 %vm852_vm0, %v8816_v5 }
 0x55d   : > { %v4686_v8 = vmax.f32 %v4654_v35, 0.0 }
 0x55e   : > { %v4198_v32 = vpop.f32.mrf.mxu1  ;;  %v4560_v12 = vpop.f32.mrf.mxu2 }
 0x55f   : > { %4718 = vst.msk [vmem:[%s8307_s11 + $0x68] sm:$0xff] %vm852_vm0, %v4686_v8  ;;  %v4561_v28 = vadd.f32 %v4560_v12, %v4471_v39  ;;  %v8818_v39 = vld [vmem:[#allocation38_spill] sm:$0xff] }
 0x560   : > { %v4035_v7 = vadd.f32 %v8818_v39, %v8135_v33 }
 0x561   : > { %v4619_v31 = vadd.f32 %v4561_v28, %v4283_v26  ;;  %v4284_v19 = vpop.f32.mrf.mxu3  ;;  %v4483_v16 = vpop.f32.mrf.mxu0 }
 0x562   : > { %v4285_v57 = vadd.f32 %v4284_v19, %v4196_v22  ;;  %v4199_v11 = vadd.f32 %v4198_v32, %v4035_v7 }
 0x563   : > { %v4655_v15 = vadd.f32 %v8298_v29, %v4619_v31  ;;  %v4045_v31 = vadd.f32 %v8178_v30, %v8185_v21 }
 0x565   : > { %v4687_v49 = vmax.f32 %v4655_v15, 0.0 }
 0x566   : > { %v4200_v10 = vpop.f32.mrf.mxu1  ;;  %v4562_v20 = vpop.f32.mrf.mxu2 }
 0x567   : > { %4719 = vst.msk [vmem:[%s8307_s11 + $0x70] sm:$0xff] %vm852_vm0, %v4687_v49  ;;  %v4563_v55 = vadd.f32 %v4562_v20, %v4473_v1  ;;  %v4037_v1 = vadd.f32 %v8143_v60, %v8160_v42  ;;  %v8819_v20 = vld [vmem:[#allocation39_spill] sm:$0xff] }
 0x569   : > { %v4620_v50 = vadd.f32 %v4563_v55, %v4285_v57  ;;  %v4287_v25 = vpop.f32.mrf.mxu3  ;;  %v4201_v33 = vadd.f32 %v4200_v10, %v4037_v1  ;;  %v4486_v41 = vpop.f32.mrf.mxu0  ;;  %v8820_v57 = vld [vmem:[#allocation20_spill] sm:$0xff] }
 0x56a   : > { %v4288_v4 = vadd.f32 %v4287_v25, %v4199_v11  ;;  %v4047_v55 = vadd.f32 %v8820_v57, %v8819_v20 }
 0x56b   : > { %v4656_v54 = vadd.f32 %v8298_v29, %v4620_v50 }
 0x56d   : > { %v4688_v44 = vmax.f32 %v4656_v54, 0.0 }
 0x56e   : > { %v4203_v17 = vpop.f32.mrf.mxu1  ;;  %v4565_v36 = vpop.f32.mrf.mxu2 }
 0x56f   : > { %4720 = vst.msk [vmem:[%s8307_s11 + $0x78] sm:$0xff] %vm852_vm0, %v4688_v44  ;;  %v4566_v52 = vadd.f32 %v4565_v36, %v4476_v23  ;;  %v4040_v23 = vadd.f32 %v8162_v63, %v8168_v53  ;;  %v8822_v36 = vld [vmem:[#allocation40_spill] sm:$0xff] }
 0x571   : > { %v4621_v27 = vadd.f32 %v4566_v52, %v4288_v4  ;;  %v4289_v58 = vpop.f32.mrf.mxu3  ;;  %v4204_v60 = vadd.f32 %v4203_v17, %v4040_v23  ;;  %v4488_v46 = vpop.f32.mrf.mxu0  ;;  %v8821_v17 = vld [vmem:[#allocation41_spill] sm:$0xff] }
 0x572   : > { %v4290_v18 = vadd.f32 %v4289_v58, %v4201_v33  ;;  %v4050_v4 = vadd.f32 %v8822_v36, %v8821_v17  ;;  %v8831_v36 = vld [vmem:[#allocation50_spill] sm:$0xff] }
 0x573   : > { %v4657_v48 = vadd.f32 %v8298_v29, %v4621_v27 }
 0x575   : > { %v4689_v47 = vmax.f32 %v4657_v48, 0.0 }
 0x576   : > { %v4205_v34 = vpop.f32.mrf.mxu1  ;;  %v4567_v38 = vpop.f32.mrf.mxu2 }
 0x577   : > { %4721 = vst.msk [vmem:[%s8307_s11 + $0x80] sm:$0xff] %vm852_vm0, %v4689_v47  ;;  %v4568_v0 = vadd.f32 %v4567_v38, %v4478_v6  ;;  %v4042_v6 = vadd.f32 %v8170_v14, %v8176_v24 }
 0x579   : > { %v4622_v62 = vadd.f32 %v4568_v0, %v4290_v18  ;;  %v4292_v13 = vpop.f32.mrf.mxu3  ;;  %v4206_v63 = vadd.f32 %v4205_v34, %v4042_v6  ;;  %v4491_v19 = vpop.f32.mrf.mxu0  ;;  %v8823_v18 = vld [vmem:[#allocation43_spill] sm:$0xff]  ;;  %v8824_v0 = vld [vmem:[#allocation42_spill] sm:$0xff] }
 0x57a   : > { %v4293_v37 = vadd.f32 %v4292_v13, %v4204_v60 }
 0x57b   : > { %v4658_v51 = vadd.f32 %v8298_v29, %v4622_v62  ;;  %v4052_v62 = vadd.f32 %v8824_v0, %v8823_v18  ;;  %v8833_v0 = vld [vmem:[#allocation22_spill] sm:$0xff] }
 0x57d   : > { %v4690_v42 = vmax.f32 %v4658_v51, 0.0 }
 0x57e   : > { %v4208_v3 = vpop.f32.mrf.mxu1  ;;  %v4570_v45 = vpop.f32.mrf.mxu2 }
 0x57f   : > { %4722 = vst.msk [vmem:[%s8307_s11 + $0x88] sm:$0xff] %vm852_vm0, %v4690_v42  ;;  %v4571_v2 = vadd.f32 %v4570_v45, %v4481_v59  ;;  %v4209_v14 = vadd.f32 %v4208_v3, %v4045_v31  ;;  %v8827_v31 = vld [vmem:[#allocation47_spill] sm:$0xff] }
 0x581   : > { %v4623_v56 = vadd.f32 %v4571_v2, %v4293_v37  ;;  %v4294_v35 = vpop.f32.mrf.mxu3  ;;  %v4493_v30 = vpop.f32.mrf.mxu0 }
 0x582   : > { %v4295_v32 = vadd.f32 %v4294_v35, %v4206_v63  ;;  %v8826_v35 = vld [vmem:[#allocation44_spill] sm:$0xff] }
 0x583   : > { %v4659_v5 = vadd.f32 %v8298_v29, %v4623_v56  ;;  %v8825_v56 = vld [vmem:[#allocation45_spill] sm:$0xff] }
 0x584   : > { %v4055_v6 = vadd.f32 %v8826_v35, %v8825_v56 }
 0x585   : > { %v4691_v53 = vmax.f32 %v4659_v5, 0.0 }
 0x586   : > { %v4210_v61 = vpop.f32.mrf.mxu1  ;;  %v4572_v8 = vpop.f32.mrf.mxu2 }
 0x587   : > { %4723 = vst.msk [vmem:[%s8307_s11 + $0x90] sm:$0xff] %vm852_vm0, %v4691_v53  ;;  %v4573_v12 = vadd.f32 %v4572_v8, %v4483_v16  ;;  %v4211_v21 = vadd.f32 %v4210_v61, %v4047_v55  ;;  %v8829_v55 = vld [vmem:[#allocation21_spill] sm:$0xff] }
 0x589   : > { %v4624_v26 = vadd.f32 %v4573_v12, %v4295_v32  ;;  %v4297_v28 = vpop.f32.mrf.mxu3  ;;  %v4496_v34 = vpop.f32.mrf.mxu0 }
 0x58a   : > { %v4298_v15 = vadd.f32 %v4297_v28, %v4209_v14 }
 0x58b   : > { %v4660_v43 = vadd.f32 %v8298_v29, %v4624_v26 }
 0x58d   : > { %v4692_v24 = vmax.f32 %v4660_v43, 0.0 }
 0x58e   : > { %v4213_v40 = vpop.f32.mrf.mxu1  ;;  %v4575_v59 = vpop.f32.mrf.mxu2 }
 0x58f   : > { %4724 = vst.msk [vmem:[%s8307_s11 + $0x98] sm:$0xff] %vm852_vm0, %v4692_v24  ;;  %v4576_v22 = vadd.f32 %v4575_v59, %v4486_v41  ;;  %v4214_v27 = vadd.f32 %v4213_v40, %v4050_v4  ;;  %v8832_v4 = vld [vmem:[#allocation49_spill] sm:$0xff] }
 0x591   : > { %v4625_v49 = vadd.f32 %v4576_v22, %v4298_v15  ;;  %v4299_v10 = vpop.f32.mrf.mxu3 }
 0x592   : > { %v4300_v54 = vadd.f32 %v4299_v10, %v4211_v21 }
 0x593   : > { %v4661_v50 = vadd.f32 %v8298_v29, %v4625_v49 }
 0x595   : > { %v4693_v25 = vmax.f32 %v4661_v50, 0.0  ;;  %v8830_v50 = vld [vmem:[#allocation48_spill] sm:$0xff] }
 0x596   : > { %v4215_v39 = vpop.f32.mrf.mxu1  ;;  %v4577_v7 = vpop.f32.mrf.mxu2 }
 0x597   : > { %4725 = vst.msk [vmem:[%s8307_s11 + $0xa0] sm:$0xff] %vm852_vm0, %v4693_v25  ;;  %v4578_v16 = vadd.f32 %v4577_v7, %v4488_v46  ;;  %v4216_v23 = vadd.f32 %v4215_v39, %v4052_v62  ;;  %v4498_v46 = vpop.f32.mrf.mxu0  ;;  %v8834_v62 = vld [vmem:[#allocation51_spill] sm:$0xff] }
 0x599   : > { %v4626_v11 = vadd.f32 %v4578_v16, %v4300_v54  ;;  %v4302_v44 = vpop.f32.mrf.mxu3 }
 0x59a   : > { %v4303_v33 = vadd.f32 %v4302_v44, %v4214_v27 }
 0x59b   : > { %v4662_v52 = vadd.f32 %v8298_v29, %v4626_v11 }
 0x59d   : > { %v4694_v58 = vmax.f32 %v4662_v52, 0.0  ;;  %v4062_v52 = vadd.f32 %v8832_v4, %v8831_v36 }
 0x59e   : > { %v4218_v1 = vpop.f32.mrf.mxu1  ;;  %v4580_v48 = vpop.f32.mrf.mxu2 }
 0x59f   : > { %4726 = vst.msk [vmem:[%s8307_s11 + $0xa8] sm:$0xff] %vm852_vm0, %v4694_v58  ;;  %v4581_v47 = vadd.f32 %v4580_v48, %v4491_v19  ;;  %v4219_v63 = vadd.f32 %v4218_v1, %v4055_v6  ;;  %v8828_v19 = vld [vmem:[#allocation46_spill] sm:$0xff]  ;;  %v4501_v24 = vpop.f32.mrf.mxu0  ;;  %v8835_v6 = vld [vmem:[#allocation52_spill] sm:$0xff] }
 0x5a0   : > { %v4057_v43 = vadd.f32 %v8828_v19, %v8827_v31  ;;  %v8836_v19 = vld [vmem:[#allocation53_spill] sm:$0xff] }
 0x5a1   : > { %v4627_v38 = vadd.f32 %v4581_v47, %v4303_v33  ;;  %v4304_v41 = vpop.f32.mrf.mxu3 }
 0x5a2   : > { %v4305_v3 = vadd.f32 %v4304_v41, %v4216_v23 }
 0x5a3   : > { %v4663_v13 = vadd.f32 %v8298_v29, %v4627_v38 }
 0x5a5   : > { %v4695_v51 = vmax.f32 %v4663_v13, 0.0  ;;  %v4065_v13 = vadd.f32 %v8834_v62, %v8833_v0 }
 0x5a6   : > { %v4220_v60 = vpop.f32.mrf.mxu1  ;;  %v4582_v42 = vpop.f32.mrf.mxu2 }
 0x5a7   : > { %4727 = vst.msk [vmem:[%s8307_s11 + $0xb0] sm:$0xff] %vm852_vm0, %v4695_v51  ;;  %v4583_v45 = vadd.f32 %v4582_v42, %v4493_v30  ;;  %v4221_v40 = vadd.f32 %v4220_v60, %v4057_v43  ;;  %v4060_v30 = vadd.f32 %v8830_v50, %v8829_v55  ;;  %v4503_v7 = vpop.f32.mrf.mxu0 }
 0x5a9   : > { %v4628_v37 = vadd.f32 %v4583_v45, %v4305_v3  ;;  %v4307_v2 = vpop.f32.mrf.mxu3 }
 0x5aa   : > { %v4308_v8 = vadd.f32 %v4307_v2, %v4219_v63 }
 0x5ab   : > { %v4664_v5 = vadd.f32 %v8298_v29, %v4628_v37 }
 0x5ad   : > { %v4696_v53 = vmax.f32 %v4664_v5, 0.0 }
 0x5ae   : > { %v4585_v61 = vpop.f32.mrf.mxu2  ;;  %v4223_v12 = vpop.f32.mrf.mxu1 }
 0x5af   : > { %4728 = vst.msk [vmem:[%s8307_s11 + $0xb8] sm:$0xff] %vm852_vm0, %v4696_v53  ;;  %v4586_v32 = vadd.f32 %v4585_v61, %v4496_v34  ;;  %v4224_v25 = vadd.f32 %v4223_v12, %v4060_v30  ;;  %v4506_v38 = vpop.f32.mrf.mxu0 }
 0x5b1   : > { %v4629_v26 = vadd.f32 %v4586_v32, %v4308_v8  ;;  %v4309_v28 = vpop.f32.mrf.mxu3 }
 0x5b2   : > { %v4310_v22 = vadd.f32 %v4309_v28, %v4221_v40 }
 0x5b3   : > { %v4665_v14 = vadd.f32 %v8298_v29, %v4629_v26 }
 0x5b5   : > { %v4697_v59 = vmax.f32 %v4665_v14, 0.0 }
 0x5b6   : > { %v4587_v15 = vpop.f32.mrf.mxu2  ;;  %v4225_v57 = vpop.f32.mrf.mxu1 }
 0x5b7   : > { %4729 = vst.msk [vmem:[%s8307_s11 + $0xc0] sm:$0xff] %vm852_vm0, %v4697_v59  ;;  %v4588_v49 = vadd.f32 %v4587_v15, %v4498_v46  ;;  %v4226_v1 = vadd.f32 %v4225_v57, %v4062_v52  ;;  %v4508_v56 = vpop.f32.mrf.mxu0 }
 0x5b9   : > { %v4630_v10 = vadd.f32 %v4588_v49, %v4310_v22  ;;  %v4312_v20 = vpop.f32.mrf.mxu3 }
 0x5ba   : > { %v4313_v16 = vadd.f32 %v4312_v20, %v4224_v25 }
 0x5bb   : > { %v4666_v21 = vadd.f32 %v8298_v29, %v4630_v10 }
 0x5bd   : > { %v4698_v39 = vmax.f32 %v4666_v21, 0.0 }
 0x5be   : > { %v4590_v54 = vpop.f32.mrf.mxu2  ;;  %v4228_v58 = vpop.f32.mrf.mxu1 }
 0x5bf   : > { %4730 = vst.msk [vmem:[%s8307_s11 + $0xc8] sm:$0xff] %vm852_vm0, %v4698_v39  ;;  %v4591_v11 = vadd.f32 %v4590_v54, %v4501_v24  ;;  %v4229_v51 = vadd.f32 %v4228_v58, %v4065_v13  ;;  %v4511_v31 = vpop.f32.mrf.mxu0 }
 0x5c1   : > { %v4631_v44 = vadd.f32 %v4591_v11, %v4313_v16  ;;  %v4314_v17 = vpop.f32.mrf.mxu3 }
 0x5c2   : > { %v4315_v47 = vadd.f32 %v4314_v17, %v4226_v1 }
 0x5c3   : > { %v4667_v27 = vadd.f32 %v8298_v29, %v4631_v44 }
 0x5c5   : > { %v4699_v48 = vmax.f32 %v4667_v27, 0.0 }
 0x5c6   : > { %v4592_v33 = vpop.f32.mrf.mxu2  ;;  %v4230_v42 = vpop.f32.mrf.mxu1 }
 0x5c7   : > { %4731 = vst.msk [vmem:[%s8307_s11 + $0xd0] sm:$0xff] %vm852_vm0, %v4699_v48  ;;  %v4593_v34 = vadd.f32 %v4592_v33, %v4503_v7  ;;  %v4231_v5 = vadd.f32 %v4230_v42, %v8835_v6  ;;  %v4513_v55 = vpop.f32.mrf.mxu0 }
 0x5c9   : > { %v4632_v41 = vadd.f32 %v4593_v34, %v4315_v47  ;;  %v4317_v18 = vpop.f32.mrf.mxu3 }
 0x5ca   : > { %v4318_v45 = vadd.f32 %v4317_v18, %v4229_v51 }
 0x5cb   : > { %v4668_v23 = vadd.f32 %v8298_v29, %v4632_v41 }
 0x5cd   : > { %v4700_v60 = vmax.f32 %v4668_v23, 0.0 }
 0x5ce   : > { %v4595_v3 = vpop.f32.mrf.mxu2  ;;  %v4233_v32 = vpop.f32.mrf.mxu1 }
 0x5cf   : > { %4732 = vst.msk [vmem:[%s8307_s11 + $0xd8] sm:$0xff] %vm852_vm0, %v4700_v60  ;;  %v4596_v37 = vadd.f32 %v4595_v3, %v4506_v38  ;;  %v4234_v43 = vadd.f32 %v4233_v32, %v8836_v19 }
 0x5d1   : > { %v4633_v2 = vadd.f32 %v4596_v37, %v4318_v45  ;;  %v4319_v46 = vpop.f32.mrf.mxu3 }
 0x5d2   : > { %v4320_v61 = vadd.f32 %v4319_v46, %v4231_v5 }
 0x5d3   : > { %v4669_v35 = vadd.f32 %v8298_v29, %v4633_v2 }
 0x5d5   : > { %v4701_v63 = vmax.f32 %v4669_v35, 0.0 }
 0x5d6   : > { %v4597_v53 = vpop.f32.mrf.mxu2  ;;  %v4235_v22 = vpop.f32.mrf.mxu1 }
 0x5d7   : > { %4733 = vst.msk [vmem:[%s8307_s11 + $0xe0] sm:$0xff] %vm852_vm0, %v4701_v63  ;;  %v4598_v8 = vadd.f32 %v4597_v53, %v4508_v56  ;;  %v4236_v20 = vadd.f32 %v4235_v22, %v8289_v9 }
 0x5d9   : > { %v4634_v12 = vadd.f32 %v4598_v8, %v4320_v61  ;;  %v4322_v26 = vpop.f32.mrf.mxu3 }
 0x5da   : > { %v4323_v40 = vadd.f32 %v4322_v26, %v4234_v43 }
 0x5db   : > { %v4670_v28 = vadd.f32 %v8298_v29, %v4634_v12 }
 0x5dd   : > { %v4702_v14 = vmax.f32 %v4670_v28, 0.0 }
 0x5de   : > { %v4600_v24 = vpop.f32.mrf.mxu2 }
 0x5df   : > { %4734 = vst.msk [vmem:[%s8307_s11 + $0xe8] sm:$0xff] %vm852_vm0, %v4702_v14  ;;  %v4601_v59 = vadd.f32 %v4600_v24, %v4511_v31 }
 0x5e1   : > { %v4635_v15 = vadd.f32 %v4601_v59, %v4323_v40  ;;  %v4324_v10 = vpop.f32.mrf.mxu3 }
 0x5e2   : > { %v4325_v30 = vadd.f32 %v4324_v10, %v4236_v20 }
 0x5e3   : > { %v4671_v49 = vadd.f32 %v8298_v29, %v4635_v15 }
 0x5e5   : > { %v4703_v57 = vmax.f32 %v4671_v49, 0.0 }
 0x5e6   : > { %v4602_v50 = vpop.f32.mrf.mxu2 }
 0x5e7   : > { %4735 = vst.msk [vmem:[%s8307_s11 + $0xf0] sm:$0xff] %vm852_vm0, %v4703_v57  ;;  %v4603_v21 = vadd.f32 %v4602_v50, %v4513_v55 }
 0x5e9   : > { %v4636_v25 = vadd.f32 %v4603_v21, %v4325_v30 }
 0x5eb   : > { %v4672_v39 = vadd.f32 %v8298_v29, %v4636_v25 }
 0x5ed   : > { %v4704_v9 = vmax.f32 %v4672_v39, 0.0 }
 0x5ef   : > { %4736 = vst.msk [vmem:[%s8307_s11 + $0xf8] sm:$0xff] %vm852_vm0, %v4704_v9 }
 0x5f0   : > { %5707 = shalt.err (!%p5704_p0)
}
 0x5f1   : > { %s5772_s8 = smov 128   ;;  %s5773_s7 = smov 8  }
 0x5f2   : > { %5285 = dma.vmem_to_hbm [thread:$0]  (%p5887_p9), %s4754_s25, 4096, %s4756_s18, %s4738_s23, %s5772_s8, %s5772_s8, %s5773_s7  }
 0x5f3 PF: > { %s8840_s12 = sld [smem:[#allocation13_spill]]  ;;  %p5298_p1 = pnand %p4916_p12, %p5894_p11 }
 0x5f5   : > { %p5299_p2 = pneg %p5298_p1 }
 0x5f9   : > { %s4770_s13 = sand.u32 1, %s8840_s12  }
 0x5fa   : > { %s4771_s21 = scalar_lea.sflag [#allocation5], %s4770_s13 }
 0x5fb   : > { %5741 = dma.done.wait (%p5299_p2), %s4771_s21, 4096  }
 0x5fc   : > { %5743 = vsyncadd (%p5299_p2), %s4771_s21, 4294963200  ;;  %s31_s20 = sadd.s32 1, %s5766_s20   ;;  %s8842_s22 = sld [smem:[#allocation14_spill]] }
 0x5fd   : > { %p28_p3 = scmp.ge.s32.totalorder %s31_s20, 4   ;;  %s8843_s17 = sld [smem:[#allocation17_spill]] }
 0x5fe   : > { %s8844_s14 = sld [smem:[#allocation15_spill]]  ;;  %s8845_s15 = smov %s5750_s16 }
 0x5ff   : > { %s8847_s18 = smov %s5762_s19 }
 0x600   :  { %30 = sbr.rel (!%p28_p3) target bundleno = 13 (0xd), region = 134 }
 0x602   : > { %s8846_s16 = smov %s8842_s22 }
 0x604   : > { %s8848_s19 = smov %s8844_s14 }
 0x605   :  { %4777 = vsyncpa [#allocation4], 1 }
 0x606   :  { %4779 = vsyncpa [#allocation4 + $0x1], 1 }
 0x607   :  { %4780 = vsyncpa [#allocation7], 1 }
 0x608   :  { %4782 = vsyncpa [#allocation7 + $0x1], 1 }
 0x609   :  { %4783 = vsyncpa [#allocation5], 1 }
 0x60a   :  { %4785 = vsyncpa [#allocation5 + $0x1], 1 }

</bundles_post_ra>
